<compile_context>
chip_gen: v7x
topology: tpu7x:2x2x1
jax: 0.10.0
libtpu: 0.0.40
codegen_flags: <defaults>
</compile_context>

<pallas_src>
import jax
import jax.numpy as jnp
import numpy as np
from jax.experimental import pallas as pl
from jax.experimental.pallas import tpu as pltpu


# ---------------------------------------------------------------------------
# Fused ASPP forward (single pallas_call)
# ---------------------------------------------------------------------------
def aspp_forward(x_nchw, params, rates=(6, 12, 18)):
    N, Cin, H, W = x_nchw.shape
    Cout = params["b_out"].shape[0]
    R = max(rates)
    Hp, Wp = H + 2 * R, W + 2 * R
    n_taps = 1 + 9 * len(rates)

    w_out = params["w_out"][:, :, 0, 0]                       # (Cout, 5*Cout)
    # module is only consistent when 5*Cout == 4*Cout + Cin  (i.e. Cin == Cout)
    assert w_out.shape[1] == 4 * Cout + Cin

    # --- fold the final 1x1 conv into every branch (the module is linear) ---
    Wo = [w_out[:, i * Cout:(i + 1) * Cout] for i in range(4)]
    Wo_pool = w_out[:, 4 * Cout:]                              # (Cout, Cin)

    w1 = params["w1"][:, :, 0, 0]                              # (Cout, Cin)
    tap_ws = [jnp.einsum("oj,jc->co", Wo[0], w1)]              # (Cin, Cout)
    tap_offs = [(R, R)]                                        # 1x1 branch tap
    for i, r in enumerate(rates):
        w3 = params[f"w3_{i}"]                                 # (Cout, Cin, 3, 3)
        e = jnp.einsum("oj,jckl->klco", Wo[i + 1], w3)         # (3, 3, Cin, Cout)
        for kh in range(3):
            for kw in range(3):
                tap_ws.append(e[kh, kw])
                tap_offs.append((R + (kh - 1) * r, R + (kw - 1) * r))

    w_taps = jnp.stack(tap_ws, axis=0).astype(jnp.bfloat16)    # (n_taps, Cin, Cout)
    w_pool = Wo_pool.T.astype(jnp.bfloat16)                    # (Cin, Cout)

    b_eff = params["b_out"]
    branch_biases = [params["b1"]] + [params[f"b3_{i}"] for i in range(len(rates))]
    for i in range(4):
        b_eff = b_eff + Wo[i] @ branch_biases[i]
    b_eff = b_eff.reshape(1, Cout).astype(jnp.float32)

    # --- input: NCHW -> NHWC (channels on lanes), bf16, zero-pad by R ---
    xp = jnp.pad(jnp.transpose(x_nchw, (0, 2, 3, 1)).astype(jnp.bfloat16),
                 ((0, 0), (R, R), (R, R), (0, 0)))             # (N, Hp, Wp, Cin)

    inv_hw = 1.0 / float(H * W)

    def kernel(xp_ref, wt_ref, wpool_ref, bias_ref, o_ref):
        acc = jnp.zeros((H * W, Cout), dtype=jnp.float32)
        center = None
        # unrolled straight-line accumulation over all folded taps
        for t, (ro, co) in enumerate(tap_offs):
            slab = xp_ref[0, ro:ro + H, co:co + W, :].reshape(H * W, Cin)
            if center is None and (ro, co) == (R, R):
                center = slab                                  # unshifted x tile
            acc = acc + jnp.dot(slab, wt_ref[t],
                                preferred_element_type=jnp.float32)
        # global-average-pool branch, folded through the final 1x1 conv.
        # (bilinear upsample of a 1x1 map with align_corners=True == broadcast)
        mean = jnp.sum(center.astype(jnp.float32), axis=0, keepdims=True) * inv_hw
        pooled = jnp.dot(mean.astype(jnp.bfloat16), wpool_ref[...],
                         preferred_element_type=jnp.float32)   # (1, Cout)
        o_ref[0] = (acc + pooled + bias_ref[...]).astype(o_ref.dtype)

    flops = 2 * N * H * W * n_taps * Cin * Cout + 2 * N * Cin * Cout
    bytes_accessed = int(xp.size * 2 + w_taps.size * 2 + w_pool.size * 2
                         + b_eff.size * 4 + N * H * W * Cout * 4)

    out_flat = pl.pallas_call(
        kernel,
        out_shape=jax.ShapeDtypeStruct((N, H * W, Cout), jnp.float32),
        grid_spec=pltpu.PrefetchScalarGridSpec(
            num_scalar_prefetch=0,
            grid=(N,),
            in_specs=[
                pl.BlockSpec((1, Hp, Wp, Cin), lambda n: (n, 0, 0, 0)),
                pl.BlockSpec((n_taps, Cin, Cout), lambda n: (0, 0, 0)),
                pl.BlockSpec((Cin, Cout), lambda n: (0, 0)),
                pl.BlockSpec((1, Cout), lambda n: (0, 0)),
            ],
            out_specs=pl.BlockSpec((1, H * W, Cout), lambda n: (n, 0, 0)),
        ),
        compiler_params=pltpu.CompilerParams(
            dimension_semantics=("parallel",)),
        cost_estimate=pl.CostEstimate(flops=flops, transcendentals=0,
                                      bytes_accessed=bytes_accessed),
    )(xp, w_taps, w_pool, b_eff)

    return out_flat.reshape(N, H, W, Cout).transpose(0, 3, 1, 2)   # NCHW


# ---------------------------------------------------------------------------
# Deterministic parameter init (PyTorch Conv2d-style uniform bounds)
# ---------------------------------------------------------------------------
def init_params(key, in_channels, out_channels, rates):
    def conv_init(key, cout, cin, kh, kw):
        kw_, kb_ = jax.random.split(key)
        bound = 1.0 / np.sqrt(cin * kh * kw)
        w = jax.random.uniform(kw_, (cout, cin, kh, kw), jnp.float32, -bound, bound)
        b = jax.random.uniform(kb_, (cout,), jnp.float32, -bound, bound)
        return w, b

    keys = jax.random.split(key, 5)
    p = {}
    p["w1"], p["b1"] = conv_init(keys[0], out_channels, in_channels, 1, 1)
    for i, _ in enumerate(rates):
        p[f"w3_{i}"], p[f"b3_{i}"] = conv_init(keys[1 + i], out_channels, in_channels, 3, 3)
    p["w_out"], p["b_out"] = conv_init(keys[4], out_channels, out_channels * 5, 1, 1)
    return p


# ---------------------------------------------------------------------------
# Pure-JAX f32 reference (mirrors the PyTorch forward) for a sanity check
# ---------------------------------------------------------------------------
def aspp_reference(x, params, rates=(6, 12, 18)):
    def conv(x, w, b, rate, k):
        pad = rate if k == 3 else 0
        y = jax.lax.conv_general_dilated(
            x, w, window_strides=(1, 1), padding=[(pad, pad), (pad, pad)],
            rhs_dilation=(rate, rate) if k == 3 else (1, 1),
            dimension_numbers=("NCHW", "OIHW", "NCHW"),
            precision=jax.lax.Precision.HIGHEST)
        return y + b[None, :, None, None]

    f1 = conv(x, params["w1"], params["b1"], 1, 1)
    f2 = conv(x, params["w3_0"], params["b3_0"], rates[0], 3)
    f3 = conv(x, params["w3_1"], params["b3_1"], rates[1], 3)
    f4 = conv(x, params["w3_2"], params["b3_2"], rates[2], 3)
    f5 = jnp.broadcast_to(jnp.mean(x, axis=(2, 3), keepdims=True), x.shape)
    cat = jnp.concatenate([f1, f2, f3, f4, f5], axis=1)
    return conv(cat, params["w_out"], params["b_out"], 1, 1)


# ---------------------------------------------------------------------------
if __name__ == "__main__":
    # Small shapes: batch=2, channels=32 (Cin == Cout required by the module),
    # spatial=16x16, dilation rates [6, 12, 18].
    N, C, H, W = 2, 32, 16, 16
    rates = (6, 12, 18)

    key = jax.random.PRNGKey(0)
    kx, kp = jax.random.split(key)
    x = jax.random.normal(kx, (N, C, H, W), dtype=jnp.float32)
    params = init_params(kp, in_channels=C, out_channels=C, rates=rates)

    out = aspp_forward(x, params, rates)
    out = jax.block_until_ready(out)

    assert out.shape == (N, C, H, W), out.shape
    assert bool(jnp.all(jnp.isfinite(out)))

    # bf16 MXU inputs + folded weights => loosened tolerance vs f32 HIGHEST ref.
    ref = jax.block_until_ready(aspp_reference(x, params, rates))
    np.testing.assert_allclose(np.asarray(out), np.asarray(ref), rtol=3e-2, atol=3e-2)

    print("KERNEL_OK")
</pallas_src>

<mosaic_0001>
module attributes {stable_mosaic.version = 11 : i64} {
  func.func @kernel(%arg0: i32, %arg1: memref<1x52x52x32xbf16, #tpu.memory_space<vmem>>, %arg2: memref<28x32x32xbf16, #tpu.memory_space<vmem>>, %arg3: memref<32x32xbf16, #tpu.memory_space<vmem>>, %arg4: memref<1x32xf32, #tpu.memory_space<vmem>>, %arg5: memref<1x256x32xf32, #tpu.memory_space<vmem>>) attributes {dimension_semantics = [#tpu.dimension_semantics<parallel>], iteration_bounds = array<i64: 2>, scalar_prefetch = 0 : i64, scratch_operands = 0 : i64, tpu.core_type = #tpu.core_type<tc>, window_params = [{transform_indices = @transform_0, window_bounds = array<i64: 1, 52, 52, 32>}, {pipeline_mode = #tpu.pipeline_mode<synchronous>, transform_indices = @transform_1, window_bounds = array<i64: 28, 32, 32>}, {pipeline_mode = #tpu.pipeline_mode<synchronous>, transform_indices = @transform_2, window_bounds = array<i64: 32, 32>}, {pipeline_mode = #tpu.pipeline_mode<synchronous>, transform_indices = @transform_3, window_bounds = array<i64: 1, 32>}, {transform_indices = @transform_4, window_bounds = array<i64: 1, 256, 32>}]} {
    %cst = arith.constant 0.000000e+00 : f32
    %0 = vector.broadcast %cst : f32 to vector<256x32xf32>
    %c0 = arith.constant 0 : index
    %c18 = arith.constant 18 : index
    %c18_0 = arith.constant 18 : index
    %c0_1 = arith.constant 0 : index
    %1 = vector.load %arg1[%c0, %c18, %c18_0, %c0_1] : memref<1x52x52x32xbf16, #tpu.memory_space<vmem>>, vector<1x16x16x32xbf16>
    %2 = vector.shape_cast %1 : vector<1x16x16x32xbf16> to vector<16x16x32xbf16>
    %3 = vector.shape_cast %2 : vector<16x16x32xbf16> to vector<256x32xbf16>
    %c0_2 = arith.constant 0 : index
    %c0_3 = arith.constant 0 : index
    %c0_4 = arith.constant 0 : index
    %4 = vector.load %arg2[%c0_2, %c0_3, %c0_4] : memref<28x32x32xbf16, #tpu.memory_space<vmem>>, vector<1x32x32xbf16>
    %5 = vector.shape_cast %4 : vector<1x32x32xbf16> to vector<32x32xbf16>
    %cst_5 = arith.constant dense<0.000000e+00> : vector<256x32xf32>
    %6 = tpu.matmul %3, %5, %cst_5 {dimension_numbers = #tpu.dot_dimension_numbers<[1], [0], [0], [1], [0, 0, 1, 1], [], []>} : vector<256x32xbf16>, vector<32x32xbf16>, vector<256x32xf32> -> vector<256x32xf32>
    %7 = arith.addf %0, %6 : vector<256x32xf32>
    %c0_6 = arith.constant 0 : index
    %c12 = arith.constant 12 : index
    %c12_7 = arith.constant 12 : index
    %c0_8 = arith.constant 0 : index
    %8 = vector.load %arg1[%c0_6, %c12, %c12_7, %c0_8] : memref<1x52x52x32xbf16, #tpu.memory_space<vmem>>, vector<1x16x16x32xbf16>
    %9 = vector.shape_cast %8 : vector<1x16x16x32xbf16> to vector<16x16x32xbf16>
    %10 = vector.shape_cast %9 : vector<16x16x32xbf16> to vector<256x32xbf16>
    %c1 = arith.constant 1 : index
    %c0_9 = arith.constant 0 : index
    %c0_10 = arith.constant 0 : index
    %11 = vector.load %arg2[%c1, %c0_9, %c0_10] : memref<28x32x32xbf16, #tpu.memory_space<vmem>>, vector<1x32x32xbf16>
    %12 = vector.shape_cast %11 : vector<1x32x32xbf16> to vector<32x32xbf16>
    %cst_11 = arith.constant dense<0.000000e+00> : vector<256x32xf32>
    %13 = tpu.matmul %10, %12, %cst_11 {dimension_numbers = #tpu.dot_dimension_numbers<[1], [0], [0], [1], [0, 0, 1, 1], [], []>} : vector<256x32xbf16>, vector<32x32xbf16>, vector<256x32xf32> -> vector<256x32xf32>
    %14 = arith.addf %7, %13 : vector<256x32xf32>
    %c0_12 = arith.constant 0 : index
    %c12_13 = arith.constant 12 : index
    %c18_14 = arith.constant 18 : index
    %c0_15 = arith.constant 0 : index
    %15 = vector.load %arg1[%c0_12, %c12_13, %c18_14, %c0_15] : memref<1x52x52x32xbf16, #tpu.memory_space<vmem>>, vector<1x16x16x32xbf16>
    %16 = vector.shape_cast %15 : vector<1x16x16x32xbf16> to vector<16x16x32xbf16>
    %17 = vector.shape_cast %16 : vector<16x16x32xbf16> to vector<256x32xbf16>
    %c2 = arith.constant 2 : index
    %c0_16 = arith.constant 0 : index
    %c0_17 = arith.constant 0 : index
    %18 = vector.load %arg2[%c2, %c0_16, %c0_17] : memref<28x32x32xbf16, #tpu.memory_space<vmem>>, vector<1x32x32xbf16>
    %19 = vector.shape_cast %18 : vector<1x32x32xbf16> to vector<32x32xbf16>
    %cst_18 = arith.constant dense<0.000000e+00> : vector<256x32xf32>
    %20 = tpu.matmul %17, %19, %cst_18 {dimension_numbers = #tpu.dot_dimension_numbers<[1], [0], [0], [1], [0, 0, 1, 1], [], []>} : vector<256x32xbf16>, vector<32x32xbf16>, vector<256x32xf32> -> vector<256x32xf32>
    %21 = arith.addf %14, %20 : vector<256x32xf32>
    %c0_19 = arith.constant 0 : index
    %c12_20 = arith.constant 12 : index
    %c24 = arith.constant 24 : index
    %c0_21 = arith.constant 0 : index
    %22 = vector.load %arg1[%c0_19, %c12_20, %c24, %c0_21] : memref<1x52x52x32xbf16, #tpu.memory_space<vmem>>, vector<1x16x16x32xbf16>
    %23 = vector.shape_cast %22 : vector<1x16x16x32xbf16> to vector<16x16x32xbf16>
    %24 = vector.shape_cast %23 : vector<16x16x32xbf16> to vector<256x32xbf16>
    %c3 = arith.constant 3 : index
    %c0_22 = arith.constant 0 : index
    %c0_23 = arith.constant 0 : index
    %25 = vector.load %arg2[%c3, %c0_22, %c0_23] : memref<28x32x32xbf16, #tpu.memory_space<vmem>>, vector<1x32x32xbf16>
    %26 = vector.shape_cast %25 : vector<1x32x32xbf16> to vector<32x32xbf16>
    %cst_24 = arith.constant dense<0.000000e+00> : vector<256x32xf32>
    %27 = tpu.matmul %24, %26, %cst_24 {dimension_numbers = #tpu.dot_dimension_numbers<[1], [0], [0], [1], [0, 0, 1, 1], [], []>} : vector<256x32xbf16>, vector<32x32xbf16>, vector<256x32xf32> -> vector<256x32xf32>
    %28 = arith.addf %21, %27 : vector<256x32xf32>
    %c0_25 = arith.constant 0 : index
    %c18_26 = arith.constant 18 : index
    %c12_27 = arith.constant 12 : index
    %c0_28 = arith.constant 0 : index
    %29 = vector.load %arg1[%c0_25, %c18_26, %c12_27, %c0_28] : memref<1x52x52x32xbf16, #tpu.memory_space<vmem>>, vector<1x16x16x32xbf16>
    %30 = vector.shape_cast %29 : vector<1x16x16x32xbf16> to vector<16x16x32xbf16>
    %31 = vector.shape_cast %30 : vector<16x16x32xbf16> to vector<256x32xbf16>
    %c4 = arith.constant 4 : index
    %c0_29 = arith.constant 0 : index
    %c0_30 = arith.constant 0 : index
    %32 = vector.load %arg2[%c4, %c0_29, %c0_30] : memref<28x32x32xbf16, #tpu.memory_space<vmem>>, vector<1x32x32xbf16>
    %33 = vector.shape_cast %32 : vector<1x32x32xbf16> to vector<32x32xbf16>
    %cst_31 = arith.constant dense<0.000000e+00> : vector<256x32xf32>
    %34 = tpu.matmul %31, %33, %cst_31 {dimension_numbers = #tpu.dot_dimension_numbers<[1], [0], [0], [1], [0, 0, 1, 1], [], []>} : vector<256x32xbf16>, vector<32x32xbf16>, vector<256x32xf32> -> vector<256x32xf32>
    %35 = arith.addf %28, %34 : vector<256x32xf32>
    %c0_32 = arith.constant 0 : index
    %c18_33 = arith.constant 18 : index
    %c18_34 = arith.constant 18 : index
    %c0_35 = arith.constant 0 : index
    %36 = vector.load %arg1[%c0_32, %c18_33, %c18_34, %c0_35] : memref<1x52x52x32xbf16, #tpu.memory_space<vmem>>, vector<1x16x16x32xbf16>
    %37 = vector.shape_cast %36 : vector<1x16x16x32xbf16> to vector<16x16x32xbf16>
    %38 = vector.shape_cast %37 : vector<16x16x32xbf16> to vector<256x32xbf16>
    %c5 = arith.constant 5 : index
    %c0_36 = arith.constant 0 : index
    %c0_37 = arith.constant 0 : index
    %39 = vector.load %arg2[%c5, %c0_36, %c0_37] : memref<28x32x32xbf16, #tpu.memory_space<vmem>>, vector<1x32x32xbf16>
    %40 = vector.shape_cast %39 : vector<1x32x32xbf16> to vector<32x32xbf16>
    %cst_38 = arith.constant dense<0.000000e+00> : vector<256x32xf32>
    %41 = tpu.matmul %38, %40, %cst_38 {dimension_numbers = #tpu.dot_dimension_numbers<[1], [0], [0], [1], [0, 0, 1, 1], [], []>} : vector<256x32xbf16>, vector<32x32xbf16>, vector<256x32xf32> -> vector<256x32xf32>
    %42 = arith.addf %35, %41 : vector<256x32xf32>
    %c0_39 = arith.constant 0 : index
    %c18_40 = arith.constant 18 : index
    %c24_41 = arith.constant 24 : index
    %c0_42 = arith.constant 0 : index
    %43 = vector.load %arg1[%c0_39, %c18_40, %c24_41, %c0_42] : memref<1x52x52x32xbf16, #tpu.memory_space<vmem>>, vector<1x16x16x32xbf16>
    %44 = vector.shape_cast %43 : vector<1x16x16x32xbf16> to vector<16x16x32xbf16>
    %45 = vector.shape_cast %44 : vector<16x16x32xbf16> to vector<256x32xbf16>
    %c6 = arith.constant 6 : index
    %c0_43 = arith.constant 0 : index
    %c0_44 = arith.constant 0 : index
    %46 = vector.load %arg2[%c6, %c0_43, %c0_44] : memref<28x32x32xbf16, #tpu.memory_space<vmem>>, vector<1x32x32xbf16>
    %47 = vector.shape_cast %46 : vector<1x32x32xbf16> to vector<32x32xbf16>
    %cst_45 = arith.constant dense<0.000000e+00> : vector<256x32xf32>
    %48 = tpu.matmul %45, %47, %cst_45 {dimension_numbers = #tpu.dot_dimension_numbers<[1], [0], [0], [1], [0, 0, 1, 1], [], []>} : vector<256x32xbf16>, vector<32x32xbf16>, vector<256x32xf32> -> vector<256x32xf32>
    %49 = arith.addf %42, %48 : vector<256x32xf32>
    %c0_46 = arith.constant 0 : index
    %c24_47 = arith.constant 24 : index
    %c12_48 = arith.constant 12 : index
    %c0_49 = arith.constant 0 : index
    %50 = vector.load %arg1[%c0_46, %c24_47, %c12_48, %c0_49] : memref<1x52x52x32xbf16, #tpu.memory_space<vmem>>, vector<1x16x16x32xbf16>
    %51 = vector.shape_cast %50 : vector<1x16x16x32xbf16> to vector<16x16x32xbf16>
    %52 = vector.shape_cast %51 : vector<16x16x32xbf16> to vector<256x32xbf16>
    %c7 = arith.constant 7 : index
    %c0_50 = arith.constant 0 : index
    %c0_51 = arith.constant 0 : index
    %53 = vector.load %arg2[%c7, %c0_50, %c0_51] : memref<28x32x32xbf16, #tpu.memory_space<vmem>>, vector<1x32x32xbf16>
    %54 = vector.shape_cast %53 : vector<1x32x32xbf16> to vector<32x32xbf16>
    %cst_52 = arith.constant dense<0.000000e+00> : vector<256x32xf32>
    %55 = tpu.matmul %52, %54, %cst_52 {dimension_numbers = #tpu.dot_dimension_numbers<[1], [0], [0], [1], [0, 0, 1, 1], [], []>} : vector<256x32xbf16>, vector<32x32xbf16>, vector<256x32xf32> -> vector<256x32xf32>
    %56 = arith.addf %49, %55 : vector<256x32xf32>
    %c0_53 = arith.constant 0 : index
    %c24_54 = arith.constant 24 : index
    %c18_55 = arith.constant 18 : index
    %c0_56 = arith.constant 0 : index
    %57 = vector.load %arg1[%c0_53, %c24_54, %c18_55, %c0_56] : memref<1x52x52x32xbf16, #tpu.memory_space<vmem>>, vector<1x16x16x32xbf16>
    %58 = vector.shape_cast %57 : vector<1x16x16x32xbf16> to vector<16x16x32xbf16>
    %59 = vector.shape_cast %58 : vector<16x16x32xbf16> to vector<256x32xbf16>
    %c8 = arith.constant 8 : index
    %c0_57 = arith.constant 0 : index
    %c0_58 = arith.constant 0 : index
    %60 = vector.load %arg2[%c8, %c0_57, %c0_58] : memref<28x32x32xbf16, #tpu.memory_space<vmem>>, vector<1x32x32xbf16>
    %61 = vector.shape_cast %60 : vector<1x32x32xbf16> to vector<32x32xbf16>
    %cst_59 = arith.constant dense<0.000000e+00> : vector<256x32xf32>
    %62 = tpu.matmul %59, %61, %cst_59 {dimension_numbers = #tpu.dot_dimension_numbers<[1], [0], [0], [1], [0, 0, 1, 1], [], []>} : vector<256x32xbf16>, vector<32x32xbf16>, vector<256x32xf32> -> vector<256x32xf32>
    %63 = arith.addf %56, %62 : vector<256x32xf32>
    %c0_60 = arith.constant 0 : index
    %c24_61 = arith.constant 24 : index
    %c24_62 = arith.constant 24 : index
    %c0_63 = arith.constant 0 : index
    %64 = vector.load %arg1[%c0_60, %c24_61, %c24_62, %c0_63] : memref<1x52x52x32xbf16, #tpu.memory_space<vmem>>, vector<1x16x16x32xbf16>
    %65 = vector.shape_cast %64 : vector<1x16x16x32xbf16> to vector<16x16x32xbf16>
    %66 = vector.shape_cast %65 : vector<16x16x32xbf16> to vector<256x32xbf16>
    %c9 = arith.constant 9 : index
    %c0_64 = arith.constant 0 : index
    %c0_65 = arith.constant 0 : index
    %67 = vector.load %arg2[%c9, %c0_64, %c0_65] : memref<28x32x32xbf16, #tpu.memory_space<vmem>>, vector<1x32x32xbf16>
    %68 = vector.shape_cast %67 : vector<1x32x32xbf16> to vector<32x32xbf16>
    %cst_66 = arith.constant dense<0.000000e+00> : vector<256x32xf32>
    %69 = tpu.matmul %66, %68, %cst_66 {dimension_numbers = #tpu.dot_dimension_numbers<[1], [0], [0], [1], [0, 0, 1, 1], [], []>} : vector<256x32xbf16>, vector<32x32xbf16>, vector<256x32xf32> -> vector<256x32xf32>
    %70 = arith.addf %63, %69 : vector<256x32xf32>
    %c0_67 = arith.constant 0 : index
    %c6_68 = arith.constant 6 : index
    %c6_69 = arith.constant 6 : index
    %c0_70 = arith.constant 0 : index
    %71 = vector.load %arg1[%c0_67, %c6_68, %c6_69, %c0_70] : memref<1x52x52x32xbf16, #tpu.memory_space<vmem>>, vector<1x16x16x32xbf16>
    %72 = vector.shape_cast %71 : vector<1x16x16x32xbf16> to vector<16x16x32xbf16>
    %73 = vector.shape_cast %72 : vector<16x16x32xbf16> to vector<256x32xbf16>
    %c10 = arith.constant 10 : index
    %c0_71 = arith.constant 0 : index
    %c0_72 = arith.constant 0 : index
    %74 = vector.load %arg2[%c10, %c0_71, %c0_72] : memref<28x32x32xbf16, #tpu.memory_space<vmem>>, vector<1x32x32xbf16>
    %75 = vector.shape_cast %74 : vector<1x32x32xbf16> to vector<32x32xbf16>
    %cst_73 = arith.constant dense<0.000000e+00> : vector<256x32xf32>
    %76 = tpu.matmul %73, %75, %cst_73 {dimension_numbers = #tpu.dot_dimension_numbers<[1], [0], [0], [1], [0, 0, 1, 1], [], []>} : vector<256x32xbf16>, vector<32x32xbf16>, vector<256x32xf32> -> vector<256x32xf32>
    %77 = arith.addf %70, %76 : vector<256x32xf32>
    %c0_74 = arith.constant 0 : index
    %c6_75 = arith.constant 6 : index
    %c18_76 = arith.constant 18 : index
    %c0_77 = arith.constant 0 : index
    %78 = vector.load %arg1[%c0_74, %c6_75, %c18_76, %c0_77] : memref<1x52x52x32xbf16, #tpu.memory_space<vmem>>, vector<1x16x16x32xbf16>
    %79 = vector.shape_cast %78 : vector<1x16x16x32xbf16> to vector<16x16x32xbf16>
    %80 = vector.shape_cast %79 : vector<16x16x32xbf16> to vector<256x32xbf16>
    %c11 = arith.constant 11 : index
    %c0_78 = arith.constant 0 : index
    %c0_79 = arith.constant 0 : index
    %81 = vector.load %arg2[%c11, %c0_78, %c0_79] : memref<28x32x32xbf16, #tpu.memory_space<vmem>>, vector<1x32x32xbf16>
    %82 = vector.shape_cast %81 : vector<1x32x32xbf16> to vector<32x32xbf16>
    %cst_80 = arith.constant dense<0.000000e+00> : vector<256x32xf32>
    %83 = tpu.matmul %80, %82, %cst_80 {dimension_numbers = #tpu.dot_dimension_numbers<[1], [0], [0], [1], [0, 0, 1, 1], [], []>} : vector<256x32xbf16>, vector<32x32xbf16>, vector<256x32xf32> -> vector<256x32xf32>
    %84 = arith.addf %77, %83 : vector<256x32xf32>
    %c0_81 = arith.constant 0 : index
    %c6_82 = arith.constant 6 : index
    %c30 = arith.constant 30 : index
    %c0_83 = arith.constant 0 : index
    %85 = vector.load %arg1[%c0_81, %c6_82, %c30, %c0_83] : memref<1x52x52x32xbf16, #tpu.memory_space<vmem>>, vector<1x16x16x32xbf16>
    %86 = vector.shape_cast %85 : vector<1x16x16x32xbf16> to vector<16x16x32xbf16>
    %87 = vector.shape_cast %86 : vector<16x16x32xbf16> to vector<256x32xbf16>
    %c12_84 = arith.constant 12 : index
    %c0_85 = arith.constant 0 : index
    %c0_86 = arith.constant 0 : index
    %88 = vector.load %arg2[%c12_84, %c0_85, %c0_86] : memref<28x32x32xbf16, #tpu.memory_space<vmem>>, vector<1x32x32xbf16>
    %89 = vector.shape_cast %88 : vector<1x32x32xbf16> to vector<32x32xbf16>
    %cst_87 = arith.constant dense<0.000000e+00> : vector<256x32xf32>
    %90 = tpu.matmul %87, %89, %cst_87 {dimension_numbers = #tpu.dot_dimension_numbers<[1], [0], [0], [1], [0, 0, 1, 1], [], []>} : vector<256x32xbf16>, vector<32x32xbf16>, vector<256x32xf32> -> vector<256x32xf32>
    %91 = arith.addf %84, %90 : vector<256x32xf32>
    %c0_88 = arith.constant 0 : index
    %c18_89 = arith.constant 18 : index
    %c6_90 = arith.constant 6 : index
    %c0_91 = arith.constant 0 : index
    %92 = vector.load %arg1[%c0_88, %c18_89, %c6_90, %c0_91] : memref<1x52x52x32xbf16, #tpu.memory_space<vmem>>, vector<1x16x16x32xbf16>
    %93 = vector.shape_cast %92 : vector<1x16x16x32xbf16> to vector<16x16x32xbf16>
    %94 = vector.shape_cast %93 : vector<16x16x32xbf16> to vector<256x32xbf16>
    %c13 = arith.constant 13 : index
    %c0_92 = arith.constant 0 : index
    %c0_93 = arith.constant 0 : index
    %95 = vector.load %arg2[%c13, %c0_92, %c0_93] : memref<28x32x32xbf16, #tpu.memory_space<vmem>>, vector<1x32x32xbf16>
    %96 = vector.shape_cast %95 : vector<1x32x32xbf16> to vector<32x32xbf16>
    %cst_94 = arith.constant dense<0.000000e+00> : vector<256x32xf32>
    %97 = tpu.matmul %94, %96, %cst_94 {dimension_numbers = #tpu.dot_dimension_numbers<[1], [0], [0], [1], [0, 0, 1, 1], [], []>} : vector<256x32xbf16>, vector<32x32xbf16>, vector<256x32xf32> -> vector<256x32xf32>
    %98 = arith.addf %91, %97 : vector<256x32xf32>
    %c0_95 = arith.constant 0 : index
    %c18_96 = arith.constant 18 : index
    %c18_97 = arith.constant 18 : index
    %c0_98 = arith.constant 0 : index
    %99 = vector.load %arg1[%c0_95, %c18_96, %c18_97, %c0_98] : memref<1x52x52x32xbf16, #tpu.memory_space<vmem>>, vector<1x16x16x32xbf16>
    %100 = vector.shape_cast %99 : vector<1x16x16x32xbf16> to vector<16x16x32xbf16>
    %101 = vector.shape_cast %100 : vector<16x16x32xbf16> to vector<256x32xbf16>
    %c14 = arith.constant 14 : index
    %c0_99 = arith.constant 0 : index
    %c0_100 = arith.constant 0 : index
    %102 = vector.load %arg2[%c14, %c0_99, %c0_100] : memref<28x32x32xbf16, #tpu.memory_space<vmem>>, vector<1x32x32xbf16>
    %103 = vector.shape_cast %102 : vector<1x32x32xbf16> to vector<32x32xbf16>
    %cst_101 = arith.constant dense<0.000000e+00> : vector<256x32xf32>
    %104 = tpu.matmul %101, %103, %cst_101 {dimension_numbers = #tpu.dot_dimension_numbers<[1], [0], [0], [1], [0, 0, 1, 1], [], []>} : vector<256x32xbf16>, vector<32x32xbf16>, vector<256x32xf32> -> vector<256x32xf32>
    %105 = arith.addf %98, %104 : vector<256x32xf32>
    %c0_102 = arith.constant 0 : index
    %c18_103 = arith.constant 18 : index
    %c30_104 = arith.constant 30 : index
    %c0_105 = arith.constant 0 : index
    %106 = vector.load %arg1[%c0_102, %c18_103, %c30_104, %c0_105] : memref<1x52x52x32xbf16, #tpu.memory_space<vmem>>, vector<1x16x16x32xbf16>
    %107 = vector.shape_cast %106 : vector<1x16x16x32xbf16> to vector<16x16x32xbf16>
    %108 = vector.shape_cast %107 : vector<16x16x32xbf16> to vector<256x32xbf16>
    %c15 = arith.constant 15 : index
    %c0_106 = arith.constant 0 : index
    %c0_107 = arith.constant 0 : index
    %109 = vector.load %arg2[%c15, %c0_106, %c0_107] : memref<28x32x32xbf16, #tpu.memory_space<vmem>>, vector<1x32x32xbf16>
    %110 = vector.shape_cast %109 : vector<1x32x32xbf16> to vector<32x32xbf16>
    %cst_108 = arith.constant dense<0.000000e+00> : vector<256x32xf32>
    %111 = tpu.matmul %108, %110, %cst_108 {dimension_numbers = #tpu.dot_dimension_numbers<[1], [0], [0], [1], [0, 0, 1, 1], [], []>} : vector<256x32xbf16>, vector<32x32xbf16>, vector<256x32xf32> -> vector<256x32xf32>
    %112 = arith.addf %105, %111 : vector<256x32xf32>
    %c0_109 = arith.constant 0 : index
    %c30_110 = arith.constant 30 : index
    %c6_111 = arith.constant 6 : index
    %c0_112 = arith.constant 0 : index
    %113 = vector.load %arg1[%c0_109, %c30_110, %c6_111, %c0_112] : memref<1x52x52x32xbf16, #tpu.memory_space<vmem>>, vector<1x16x16x32xbf16>
    %114 = vector.shape_cast %113 : vector<1x16x16x32xbf16> to vector<16x16x32xbf16>
    %115 = vector.shape_cast %114 : vector<16x16x32xbf16> to vector<256x32xbf16>
    %c16 = arith.constant 16 : index
    %c0_113 = arith.constant 0 : index
    %c0_114 = arith.constant 0 : index
    %116 = vector.load %arg2[%c16, %c0_113, %c0_114] : memref<28x32x32xbf16, #tpu.memory_space<vmem>>, vector<1x32x32xbf16>
    %117 = vector.shape_cast %116 : vector<1x32x32xbf16> to vector<32x32xbf16>
    %cst_115 = arith.constant dense<0.000000e+00> : vector<256x32xf32>
    %118 = tpu.matmul %115, %117, %cst_115 {dimension_numbers = #tpu.dot_dimension_numbers<[1], [0], [0], [1], [0, 0, 1, 1], [], []>} : vector<256x32xbf16>, vector<32x32xbf16>, vector<256x32xf32> -> vector<256x32xf32>
    %119 = arith.addf %112, %118 : vector<256x32xf32>
    %c0_116 = arith.constant 0 : index
    %c30_117 = arith.constant 30 : index
    %c18_118 = arith.constant 18 : index
    %c0_119 = arith.constant 0 : index
    %120 = vector.load %arg1[%c0_116, %c30_117, %c18_118, %c0_119] : memref<1x52x52x32xbf16, #tpu.memory_space<vmem>>, vector<1x16x16x32xbf16>
    %121 = vector.shape_cast %120 : vector<1x16x16x32xbf16> to vector<16x16x32xbf16>
    %122 = vector.shape_cast %121 : vector<16x16x32xbf16> to vector<256x32xbf16>
    %c17 = arith.constant 17 : index
    %c0_120 = arith.constant 0 : index
    %c0_121 = arith.constant 0 : index
    %123 = vector.load %arg2[%c17, %c0_120, %c0_121] : memref<28x32x32xbf16, #tpu.memory_space<vmem>>, vector<1x32x32xbf16>
    %124 = vector.shape_cast %123 : vector<1x32x32xbf16> to vector<32x32xbf16>
    %cst_122 = arith.constant dense<0.000000e+00> : vector<256x32xf32>
    %125 = tpu.matmul %122, %124, %cst_122 {dimension_numbers = #tpu.dot_dimension_numbers<[1], [0], [0], [1], [0, 0, 1, 1], [], []>} : vector<256x32xbf16>, vector<32x32xbf16>, vector<256x32xf32> -> vector<256x32xf32>
    %126 = arith.addf %119, %125 : vector<256x32xf32>
    %c0_123 = arith.constant 0 : index
    %c30_124 = arith.constant 30 : index
    %c30_125 = arith.constant 30 : index
    %c0_126 = arith.constant 0 : index
    %127 = vector.load %arg1[%c0_123, %c30_124, %c30_125, %c0_126] : memref<1x52x52x32xbf16, #tpu.memory_space<vmem>>, vector<1x16x16x32xbf16>
    %128 = vector.shape_cast %127 : vector<1x16x16x32xbf16> to vector<16x16x32xbf16>
    %129 = vector.shape_cast %128 : vector<16x16x32xbf16> to vector<256x32xbf16>
    %c18_127 = arith.constant 18 : index
    %c0_128 = arith.constant 0 : index
    %c0_129 = arith.constant 0 : index
    %130 = vector.load %arg2[%c18_127, %c0_128, %c0_129] : memref<28x32x32xbf16, #tpu.memory_space<vmem>>, vector<1x32x32xbf16>
    %131 = vector.shape_cast %130 : vector<1x32x32xbf16> to vector<32x32xbf16>
    %cst_130 = arith.constant dense<0.000000e+00> : vector<256x32xf32>
    %132 = tpu.matmul %129, %131, %cst_130 {dimension_numbers = #tpu.dot_dimension_numbers<[1], [0], [0], [1], [0, 0, 1, 1], [], []>} : vector<256x32xbf16>, vector<32x32xbf16>, vector<256x32xf32> -> vector<256x32xf32>
    %133 = arith.addf %126, %132 : vector<256x32xf32>
    %c0_131 = arith.constant 0 : index
    %c0_132 = arith.constant 0 : index
    %c0_133 = arith.constant 0 : index
    %c0_134 = arith.constant 0 : index
    %134 = vector.load %arg1[%c0_131, %c0_132, %c0_133, %c0_134] : memref<1x52x52x32xbf16, #tpu.memory_space<vmem>>, vector<1x16x16x32xbf16>
    %135 = vector.shape_cast %134 : vector<1x16x16x32xbf16> to vector<16x16x32xbf16>
    %136 = vector.shape_cast %135 : vector<16x16x32xbf16> to vector<256x32xbf16>
    %c19 = arith.constant 19 : index
    %c0_135 = arith.constant 0 : index
    %c0_136 = arith.constant 0 : index
    %137 = vector.load %arg2[%c19, %c0_135, %c0_136] : memref<28x32x32xbf16, #tpu.memory_space<vmem>>, vector<1x32x32xbf16>
    %138 = vector.shape_cast %137 : vector<1x32x32xbf16> to vector<32x32xbf16>
    %cst_137 = arith.constant dense<0.000000e+00> : vector<256x32xf32>
    %139 = tpu.matmul %136, %138, %cst_137 {dimension_numbers = #tpu.dot_dimension_numbers<[1], [0], [0], [1], [0, 0, 1, 1], [], []>} : vector<256x32xbf16>, vector<32x32xbf16>, vector<256x32xf32> -> vector<256x32xf32>
    %140 = arith.addf %133, %139 : vector<256x32xf32>
    %c0_138 = arith.constant 0 : index
    %c0_139 = arith.constant 0 : index
    %c18_140 = arith.constant 18 : index
    %c0_141 = arith.constant 0 : index
    %141 = vector.load %arg1[%c0_138, %c0_139, %c18_140, %c0_141] : memref<1x52x52x32xbf16, #tpu.memory_space<vmem>>, vector<1x16x16x32xbf16>
    %142 = vector.shape_cast %141 : vector<1x16x16x32xbf16> to vector<16x16x32xbf16>
    %143 = vector.shape_cast %142 : vector<16x16x32xbf16> to vector<256x32xbf16>
    %c20 = arith.constant 20 : index
    %c0_142 = arith.constant 0 : index
    %c0_143 = arith.constant 0 : index
    %144 = vector.load %arg2[%c20, %c0_142, %c0_143] : memref<28x32x32xbf16, #tpu.memory_space<vmem>>, vector<1x32x32xbf16>
    %145 = vector.shape_cast %144 : vector<1x32x32xbf16> to vector<32x32xbf16>
    %cst_144 = arith.constant dense<0.000000e+00> : vector<256x32xf32>
    %146 = tpu.matmul %143, %145, %cst_144 {dimension_numbers = #tpu.dot_dimension_numbers<[1], [0], [0], [1], [0, 0, 1, 1], [], []>} : vector<256x32xbf16>, vector<32x32xbf16>, vector<256x32xf32> -> vector<256x32xf32>
    %147 = arith.addf %140, %146 : vector<256x32xf32>
    %c0_145 = arith.constant 0 : index
    %c0_146 = arith.constant 0 : index
    %c36 = arith.constant 36 : index
    %c0_147 = arith.constant 0 : index
    %148 = vector.load %arg1[%c0_145, %c0_146, %c36, %c0_147] : memref<1x52x52x32xbf16, #tpu.memory_space<vmem>>, vector<1x16x16x32xbf16>
    %149 = vector.shape_cast %148 : vector<1x16x16x32xbf16> to vector<16x16x32xbf16>
    %150 = vector.shape_cast %149 : vector<16x16x32xbf16> to vector<256x32xbf16>
    %c21 = arith.constant 21 : index
    %c0_148 = arith.constant 0 : index
    %c0_149 = arith.constant 0 : index
    %151 = vector.load %arg2[%c21, %c0_148, %c0_149] : memref<28x32x32xbf16, #tpu.memory_space<vmem>>, vector<1x32x32xbf16>
    %152 = vector.shape_cast %151 : vector<1x32x32xbf16> to vector<32x32xbf16>
    %cst_150 = arith.constant dense<0.000000e+00> : vector<256x32xf32>
    %153 = tpu.matmul %150, %152, %cst_150 {dimension_numbers = #tpu.dot_dimension_numbers<[1], [0], [0], [1], [0, 0, 1, 1], [], []>} : vector<256x32xbf16>, vector<32x32xbf16>, vector<256x32xf32> -> vector<256x32xf32>
    %154 = arith.addf %147, %153 : vector<256x32xf32>
    %c0_151 = arith.constant 0 : index
    %c18_152 = arith.constant 18 : index
    %c0_153 = arith.constant 0 : index
    %c0_154 = arith.constant 0 : index
    %155 = vector.load %arg1[%c0_151, %c18_152, %c0_153, %c0_154] : memref<1x52x52x32xbf16, #tpu.memory_space<vmem>>, vector<1x16x16x32xbf16>
    %156 = vector.shape_cast %155 : vector<1x16x16x32xbf16> to vector<16x16x32xbf16>
    %157 = vector.shape_cast %156 : vector<16x16x32xbf16> to vector<256x32xbf16>
    %c22 = arith.constant 22 : index
    %c0_155 = arith.constant 0 : index
    %c0_156 = arith.constant 0 : index
    %158 = vector.load %arg2[%c22, %c0_155, %c0_156] : memref<28x32x32xbf16, #tpu.memory_space<vmem>>, vector<1x32x32xbf16>
    %159 = vector.shape_cast %158 : vector<1x32x32xbf16> to vector<32x32xbf16>
    %cst_157 = arith.constant dense<0.000000e+00> : vector<256x32xf32>
    %160 = tpu.matmul %157, %159, %cst_157 {dimension_numbers = #tpu.dot_dimension_numbers<[1], [0], [0], [1], [0, 0, 1, 1], [], []>} : vector<256x32xbf16>, vector<32x32xbf16>, vector<256x32xf32> -> vector<256x32xf32>
    %161 = arith.addf %154, %160 : vector<256x32xf32>
    %c0_158 = arith.constant 0 : index
    %c18_159 = arith.constant 18 : index
    %c18_160 = arith.constant 18 : index
    %c0_161 = arith.constant 0 : index
    %162 = vector.load %arg1[%c0_158, %c18_159, %c18_160, %c0_161] : memref<1x52x52x32xbf16, #tpu.memory_space<vmem>>, vector<1x16x16x32xbf16>
    %163 = vector.shape_cast %162 : vector<1x16x16x32xbf16> to vector<16x16x32xbf16>
    %164 = vector.shape_cast %163 : vector<16x16x32xbf16> to vector<256x32xbf16>
    %c23 = arith.constant 23 : index
    %c0_162 = arith.constant 0 : index
    %c0_163 = arith.constant 0 : index
    %165 = vector.load %arg2[%c23, %c0_162, %c0_163] : memref<28x32x32xbf16, #tpu.memory_space<vmem>>, vector<1x32x32xbf16>
    %166 = vector.shape_cast %165 : vector<1x32x32xbf16> to vector<32x32xbf16>
    %cst_164 = arith.constant dense<0.000000e+00> : vector<256x32xf32>
    %167 = tpu.matmul %164, %166, %cst_164 {dimension_numbers = #tpu.dot_dimension_numbers<[1], [0], [0], [1], [0, 0, 1, 1], [], []>} : vector<256x32xbf16>, vector<32x32xbf16>, vector<256x32xf32> -> vector<256x32xf32>
    %168 = arith.addf %161, %167 : vector<256x32xf32>
    %c0_165 = arith.constant 0 : index
    %c18_166 = arith.constant 18 : index
    %c36_167 = arith.constant 36 : index
    %c0_168 = arith.constant 0 : index
    %169 = vector.load %arg1[%c0_165, %c18_166, %c36_167, %c0_168] : memref<1x52x52x32xbf16, #tpu.memory_space<vmem>>, vector<1x16x16x32xbf16>
    %170 = vector.shape_cast %169 : vector<1x16x16x32xbf16> to vector<16x16x32xbf16>
    %171 = vector.shape_cast %170 : vector<16x16x32xbf16> to vector<256x32xbf16>
    %c24_169 = arith.constant 24 : index
    %c0_170 = arith.constant 0 : index
    %c0_171 = arith.constant 0 : index
    %172 = vector.load %arg2[%c24_169, %c0_170, %c0_171] : memref<28x32x32xbf16, #tpu.memory_space<vmem>>, vector<1x32x32xbf16>
    %173 = vector.shape_cast %172 : vector<1x32x32xbf16> to vector<32x32xbf16>
    %cst_172 = arith.constant dense<0.000000e+00> : vector<256x32xf32>
    %174 = tpu.matmul %171, %173, %cst_172 {dimension_numbers = #tpu.dot_dimension_numbers<[1], [0], [0], [1], [0, 0, 1, 1], [], []>} : vector<256x32xbf16>, vector<32x32xbf16>, vector<256x32xf32> -> vector<256x32xf32>
    %175 = arith.addf %168, %174 : vector<256x32xf32>
    %c0_173 = arith.constant 0 : index
    %c36_174 = arith.constant 36 : index
    %c0_175 = arith.constant 0 : index
    %c0_176 = arith.constant 0 : index
    %176 = vector.load %arg1[%c0_173, %c36_174, %c0_175, %c0_176] : memref<1x52x52x32xbf16, #tpu.memory_space<vmem>>, vector<1x16x16x32xbf16>
    %177 = vector.shape_cast %176 : vector<1x16x16x32xbf16> to vector<16x16x32xbf16>
    %178 = vector.shape_cast %177 : vector<16x16x32xbf16> to vector<256x32xbf16>
    %c25 = arith.constant 25 : index
    %c0_177 = arith.constant 0 : index
    %c0_178 = arith.constant 0 : index
    %179 = vector.load %arg2[%c25, %c0_177, %c0_178] : memref<28x32x32xbf16, #tpu.memory_space<vmem>>, vector<1x32x32xbf16>
    %180 = vector.shape_cast %179 : vector<1x32x32xbf16> to vector<32x32xbf16>
    %cst_179 = arith.constant dense<0.000000e+00> : vector<256x32xf32>
    %181 = tpu.matmul %178, %180, %cst_179 {dimension_numbers = #tpu.dot_dimension_numbers<[1], [0], [0], [1], [0, 0, 1, 1], [], []>} : vector<256x32xbf16>, vector<32x32xbf16>, vector<256x32xf32> -> vector<256x32xf32>
    %182 = arith.addf %175, %181 : vector<256x32xf32>
    %c0_180 = arith.constant 0 : index
    %c36_181 = arith.constant 36 : index
    %c18_182 = arith.constant 18 : index
    %c0_183 = arith.constant 0 : index
    %183 = vector.load %arg1[%c0_180, %c36_181, %c18_182, %c0_183] : memref<1x52x52x32xbf16, #tpu.memory_space<vmem>>, vector<1x16x16x32xbf16>
    %184 = vector.shape_cast %183 : vector<1x16x16x32xbf16> to vector<16x16x32xbf16>
    %185 = vector.shape_cast %184 : vector<16x16x32xbf16> to vector<256x32xbf16>
    %c26 = arith.constant 26 : index
    %c0_184 = arith.constant 0 : index
    %c0_185 = arith.constant 0 : index
    %186 = vector.load %arg2[%c26, %c0_184, %c0_185] : memref<28x32x32xbf16, #tpu.memory_space<vmem>>, vector<1x32x32xbf16>
    %187 = vector.shape_cast %186 : vector<1x32x32xbf16> to vector<32x32xbf16>
    %cst_186 = arith.constant dense<0.000000e+00> : vector<256x32xf32>
    %188 = tpu.matmul %185, %187, %cst_186 {dimension_numbers = #tpu.dot_dimension_numbers<[1], [0], [0], [1], [0, 0, 1, 1], [], []>} : vector<256x32xbf16>, vector<32x32xbf16>, vector<256x32xf32> -> vector<256x32xf32>
    %189 = arith.addf %182, %188 : vector<256x32xf32>
    %c0_187 = arith.constant 0 : index
    %c36_188 = arith.constant 36 : index
    %c36_189 = arith.constant 36 : index
    %c0_190 = arith.constant 0 : index
    %190 = vector.load %arg1[%c0_187, %c36_188, %c36_189, %c0_190] : memref<1x52x52x32xbf16, #tpu.memory_space<vmem>>, vector<1x16x16x32xbf16>
    %191 = vector.shape_cast %190 : vector<1x16x16x32xbf16> to vector<16x16x32xbf16>
    %192 = vector.shape_cast %191 : vector<16x16x32xbf16> to vector<256x32xbf16>
    %c27 = arith.constant 27 : index
    %c0_191 = arith.constant 0 : index
    %c0_192 = arith.constant 0 : index
    %193 = vector.load %arg2[%c27, %c0_191, %c0_192] : memref<28x32x32xbf16, #tpu.memory_space<vmem>>, vector<1x32x32xbf16>
    %194 = vector.shape_cast %193 : vector<1x32x32xbf16> to vector<32x32xbf16>
    %cst_193 = arith.constant dense<0.000000e+00> : vector<256x32xf32>
    %195 = tpu.matmul %192, %194, %cst_193 {dimension_numbers = #tpu.dot_dimension_numbers<[1], [0], [0], [1], [0, 0, 1, 1], [], []>} : vector<256x32xbf16>, vector<32x32xbf16>, vector<256x32xf32> -> vector<256x32xf32>
    %196 = arith.addf %189, %195 : vector<256x32xf32>
    %197 = arith.extf %3 : vector<256x32xbf16> to vector<256x32xf32>
    %cst_194 = arith.constant dense<0.000000e+00> : vector<32xf32>
    %198 = vector.multi_reduction <add>, %197, %cst_194 [0] : vector<256x32xf32> to vector<32xf32>
    %199 = vector.shape_cast %198 : vector<32xf32> to vector<1x32xf32>
    %cst_195 = arith.constant 3.906250e-03 : f32
    %200 = vector.broadcast %cst_195 : f32 to vector<1x32xf32>
    %201 = arith.mulf %199, %200 : vector<1x32xf32>
    %202 = arith.truncf %201 : vector<1x32xf32> to vector<1x32xbf16>
    %c0_196 = arith.constant 0 : index
    %c0_197 = arith.constant 0 : index
    %203 = vector.load %arg3[%c0_196, %c0_197] : memref<32x32xbf16, #tpu.memory_space<vmem>>, vector<32x32xbf16>
    %cst_198 = arith.constant dense<0.000000e+00> : vector<1x32xf32>
    %204 = tpu.matmul %202, %203, %cst_198 {dimension_numbers = #tpu.dot_dimension_numbers<[1], [0], [0], [1], [0, 0, 1, 1], [], []>} : vector<1x32xbf16>, vector<32x32xbf16>, vector<1x32xf32> -> vector<1x32xf32>
    %205 = vector.broadcast %204 : vector<1x32xf32> to vector<256x32xf32>
    %206 = arith.addf %196, %205 : vector<256x32xf32>
    %c0_199 = arith.constant 0 : index
    %c0_200 = arith.constant 0 : index
    %207 = vector.load %arg4[%c0_199, %c0_200] : memref<1x32xf32, #tpu.memory_space<vmem>>, vector<1x32xf32>
    %208 = vector.broadcast %207 : vector<1x32xf32> to vector<256x32xf32>
    %209 = arith.addf %206, %208 : vector<256x32xf32>
    %c0_201 = arith.constant 0 : index
    %c0_202 = arith.constant 0 : index
    %c0_203 = arith.constant 0 : index
    %210 = vector.load %arg5[%c0_201, %c0_202, %c0_203] : memref<1x256x32xf32, #tpu.memory_space<vmem>>, vector<1x256x32xf32>
    %211 = vector.shape_cast %210 : vector<1x256x32xf32> to vector<256x32xf32>
    %212 = vector.shape_cast %209 : vector<256x32xf32> to vector<1x256x32xf32>
    tpu.vector_store %arg5[%c0_201, %c0_202, %c0_203], %212 {strides = array<i32>} : memref<1x256x32xf32, #tpu.memory_space<vmem>>, vector<1x256x32xf32>,
    return
  }
  func.func @transform_0(%arg0: i32) -> (i32, i32, i32, i32) {
    %c0_i32 = arith.constant 0 : i32
    %c0_i32_0 = arith.constant 0 : i32
    %c0_i32_1 = arith.constant 0 : i32
    %c0_i32_2 = arith.constant 0 : i32
    return %arg0, %c0_i32, %c0_i32_0, %c0_i32_1 : i32, i32, i32, i32
  }
  func.func @transform_1(%arg0: i32) -> (i32, i32, i32) {
    %c0_i32 = arith.constant 0 : i32
    %c0_i32_0 = arith.constant 0 : i32
    %c0_i32_1 = arith.constant 0 : i32
    %c0_i32_2 = arith.constant 0 : i32
    return %c0_i32, %c0_i32_0, %c0_i32_1 : i32, i32, i32
  }
  func.func @transform_2(%arg0: i32) -> (i32, i32) {
    %c0_i32 = arith.constant 0 : i32
    %c0_i32_0 = arith.constant 0 : i32
    %c0_i32_1 = arith.constant 0 : i32
    return %c0_i32, %c0_i32_0 : i32, i32
  }
  func.func @transform_3(%arg0: i32) -> (i32, i32) {
    %c0_i32 = arith.constant 0 : i32
    %c0_i32_0 = arith.constant 0 : i32
    %c0_i32_1 = arith.constant 0 : i32
    return %c0_i32, %c0_i32_0 : i32, i32
  }
  func.func @transform_4(%arg0: i32) -> (i32, i32, i32) {
    %c0_i32 = arith.constant 0 : i32
    %c0_i32_0 = arith.constant 0 : i32
    %c0_i32_1 = arith.constant 0 : i32
    return %arg0, %c0_i32, %c0_i32_0 : i32, i32, i32
  }
}

</mosaic_0001>

<bundles_post_ra>
// kernel: tpu_custom_call.1
= control target key start
LH: loop header
LB: loop body
LE: loop exit
PB: predicated region body
PF: predicated region fallthrough
CT: control target
= control target key end

     0   :  { %s17888_s15 = smov 0   ;;  %s21838_s0 = inlined_call_operand.vmem [shape: bf16[2,52,52,32], index: 0, kind: input, shape index: {}]   ;;  %s21839_s1 = inlined_call_operand.vmem [shape: bf16[28,32,32], index: 1, kind: input, shape index: {}]   ;;  %s21840_s2 = inlined_call_operand.vmem [shape: bf16[32,32], index: 2, kind: input, shape index: {}]   ;;  %s21841_s3 = inlined_call_operand.vmem [shape: f32[1,32], index: 3, kind: input, shape index: {}]   ;;  %s21842_s4 = inlined_call_operand.vmem [shape: f32[2,256,32], index: 4, kind: output, shape index: {}]  }
   0x1 LB: > { %s13026_s16 = sadd.s32 4294967295, %s17859_s15   ;;  %p13030_p0 = scmp.ge.s32.totalorder %s17859_s15, 1  ;;  %s17859_s15 = sphi %s17888_s15, %s14_s15  }
   0x2   : > { %p162_p1 = scmp.lt.s32.totalorder %s17859_s15, 3 }
   0x4   : > { %p163_p2 = pnand %p13030_p0, %p162_p1 }
   0x6   : > { %166 = sbr.rel (%p163_p2) target bundleno = 1181 (0x49d), region = 36 }
   0xd   : > { %v17683_v0 = vld [vmem:[%s21839_s1 + $0x10] sm:$0xff]   ;;  %p188_p3 = scmp.lt.s32.totalorder %s13026_s16, 1  ;;  %v17684_v1 = vld [vmem:[%s21839_s1 + $0xe0] sm:$0xff]   ;;  %vm544_vm0 = vcmask 1041408   ;;  %v17685_v2 = vld [vmem:[%s21839_s1 + $0x18] sm:$0xff]   ;;  %vm545_vm1 = vcmask 1045508  }
   0xe   : > { %15792 = vmatprep.subr.bf16.mxu1 %v17683_v0  ;;  %16296 = vmatprep.subr.bf16.mxu0 %v17684_v1  ;;  %v17686_v3 = vld [vmem:[%s21839_s1 + $0xe8] sm:$0xff]   ;;  %v17914_v4 = vld [vmem:[%s21839_s1] sm:$0xff]   ;;  %v17919_v5 = vld [vmem:[%s21839_s1 + $0xf0] sm:$0xff]   ;;  %vm296_vm3 = vcmask 1042432   ;;  %vm297_vm4 = vcmask 1046532   ;;  %vm724_vm6 = vcmask 261120  }
   0xf   : > { %s21995_s16 = smov (!%p188_p3, %s13026_s16), 1  ;;  %15793 = vmatpush3.bf16.msra.mxu1 %v17683_v0  ;;  %16297 = vmatpush3.bf16.msra.mxu0 %v17684_v1  ;;  %vm17927_vm2 = vmor %vm544_vm0, %vm545_vm1  ;;  %v17690_v52 = vld [vmem:[%s21839_s1 + $0x8] sm:$0xff]   ;;  %vm4581_vm7 = vcmask 1040384   ;;  %vm4582_vm8 = vcmask 1044484   ;;  %vm17862_vm10 = vmmov 0  }
  0x10   : > { %15794 = vmatprep.subr.bf16.mxu1 %v17685_v2  ;;  %s17672_s25 = smul.u32 1456, %s21995_s16  ;;  %16298 = vmatprep.subr.bf16.mxu0 %v17686_v3  ;;  %vm17938_vm5 = vmor %vm296_vm3, %vm297_vm4 }
  0x11   : > { %vm18290_vm9 = vmor %vm4581_vm7, %vm4582_vm8 }
  0x12   : > { %s17924_s6 = scalar_lea.vmem %s21838_s0, %s17672_s25 }
  0x13   : > { %15795 = vmatpush3.bf16.msra.mxu1 %v17685_v2  ;;  %v13098_v7 = vld [vmem:[%s17924_s6 + $0x154] sm:$0xc]  ;;  %v13099_v8 = vld [vmem:[%s17924_s6 + $0x158] sm:$0xf]  ;;  %v13100_v9 = vld [vmem:[%s17924_s6 + $0x15c] sm:$0x3]  ;;  %16299 = vmatpush3.bf16.msra.mxu0 %v17686_v3 }
  0x14   : > { %v13146_v10 = vrot.slane %v13098_v7, 10  ;;  %v549_v11 = vrot.slane %v13099_v8, 6  ;;  %v552_v12 = vrot.slane %v13100_v9, 6  ;;  %15828 = vmatprep.subr.bf16.mxu1 %v17914_v4  ;;  %v13034_v13 = vld [vmem:[%s17924_s6 + $0x200] sm:$0xe]  ;;  %16332 = vmatprep.subr.bf16.mxu0 %v17919_v5  ;;  %v17691_v8 = vld [vmem:[%s21839_s1 + $0xf8] sm:$0xff]  }
  0x15   : > { %v13035_v14 = vld [vmem:[%s17924_s6 + $0x204] sm:$0xf]  ;;  %v13036_v15 = vld [vmem:[%s17924_s6 + $0x208] sm:$0x1]  ;;  %v13082_v17 = vrot.slane %v13034_v13, 9 }
  0x16   : > { %v550_v18 = vsel %vm17927_vm2, %v13146_v10, %v549_v11  ;;  %v551_v19 = vrot.slane %v549_v11, 4  ;;  %v301_v20 = vrot.slane %v13035_v14, 5  ;;  %v304_v21 = vrot.slane %v13036_v15, 5  ;;  %v13101_v22 = vld [vmem:[%s17924_s6 + $0x170] sm:$0xc]  ;;  %v17993_v9 = vld [vmem:[%s21839_s1 + $0x20] sm:$0xff]  }
  0x17   : > { %v13102_v23 = vld [vmem:[%s17924_s6 + $0x174] sm:$0xf]  ;;  %v13103_v24 = vld [vmem:[%s17924_s6 + $0x178] sm:$0x3]  ;;  %v13147_v25 = vrot.slane %v13101_v22, 10 }
  0x18   : > { %v553_v26 = vsel %vm17927_vm2, %v551_v19, %v552_v12  ;;  %v302_v27 = vsel %vm17938_vm5, %v13082_v17, %v301_v20  ;;  %v303_v28 = vrot.slane %v301_v20, 4  ;;  %v556_v29 = vrot.slane %v13102_v23, 6  ;;  %v13037_v30 = vld [vmem:[%s17924_s6 + $0x21c] sm:$0xe]  ;;  %v13038_v31 = vld [vmem:[%s17924_s6 + $0x220] sm:$0xf] }
  0x19   : > { %v13166_v32 = vcombine.low %v550_v18, %v553_v26  ;;  %v12702_v33 = vunpack.c.l.bf16 %v302_v27  ;;  %v559_v34 = vrot.slane %v13103_v24, 6  ;;  %v13039_v35 = vld [vmem:[%s17924_s6 + $0x224] sm:$0x1]  ;;  %v13083_v36 = vrot.slane %v13037_v30, 9  ;;  %v13104_v41 = vld [vmem:[%s17924_s6 + $0x18c] sm:$0xc] }
  0x1a   : > { %v305_v37 = vsel %vm17938_vm5, %v303_v28, %v304_v21  ;;  %v557_v38 = vsel %vm17927_vm2, %v13147_v25, %v556_v29  ;;  %v558_v39 = vrot.slane %v556_v29, 4  ;;  %v308_v40 = vrot.slane %v13038_v31, 5  ;;  %v13105_v46 = vld [vmem:[%s17924_s6 + $0x190] sm:$0xf]  ;;  %v13106_v47 = vld [vmem:[%s17924_s6 + $0x194] sm:$0x3] }
  0x1b   : > { %15796 = vmatprep.mubr.msk.bf16.mxu1 %vm724_vm6, %v13166_v32  ;;  %v17961_v42 = vcombine.low %v302_v27, %v305_v37  ;;  %v12703_v43 = vunpack.c.l.bf16 %v305_v37  ;;  %v12734_v44 = vsel %vm724_vm6, %v12702_v33, 0.0  ;;  %v311_v45 = vrot.slane %v13039_v35, 5  ;;  %v13040_v51 = vld [vmem:[%s17924_s6 + $0x238] sm:$0xe]  ;;  %v13041_v57 = vld [vmem:[%s17924_s6 + $0x23c] sm:$0xf] }
  0x1c   : > { %v560_v48 = vsel %vm17927_vm2, %v558_v39, %v559_v34  ;;  %v309_v49 = vsel %vm17938_vm5, %v13083_v36, %v308_v40  ;;  %v310_v50 = vrot.slane %v308_v40, 4  ;;  %v13148_v56 = vrot.slane %v13104_v41, 10  ;;  %v13042_v58 = vld [vmem:[%s17924_s6 + $0x240] sm:$0x1]  ;;  %v13107_v63 = vld [vmem:[%s17924_s6 + $0x1a8] sm:$0xc] }
  0x1d   : > { %21890 = vst [vmem:[#allocation2_spill] sm:$0xff] %v17961_v42  ;;  %16300 = vmatprep.mubr.msk.bf16.mxu0 %vm724_vm6, %v17961_v42  ;;  %v12735_v53 = vsel %vm724_vm6, %v12703_v43, 0.0  ;;  %v13167_v54 = vcombine.low %v557_v38, %v560_v48  ;;  %v12704_v55 = vunpack.c.l.bf16 %v309_v49  ;;  %v563_v61 = vrot.slane %v13105_v46, 6  ;;  %v13108_v0 = vld [vmem:[%s17924_s6 + $0x1ac] sm:$0xf] }
  0x1e   : > { %v12736_v59 = vadd.f32 %v12735_v53, %v12734_v44  ;;  %v312_v60 = vsel %vm17938_vm5, %v310_v50, %v311_v45  ;;  %v566_v62 = vrot.slane %v13106_v47, 6  ;;  %v13084_v7 = vrot.slane %v13040_v51, 9  ;;  %v13109_v14 = vld [vmem:[%s17924_s6 + $0x1b0] sm:$0x3]  ;;  %v13043_v15 = vld [vmem:[%s17924_s6 + $0x254] sm:$0xe] }
  0x1f   : > { %15797 = vmatmul.mubr.msk.bf16.vlgmr.msra.gmra.mrb[0].mxu1 %vm724_vm6, %v13167_v54  ;;  %v17984_v1 = vcombine.low %v309_v49, %v312_v60  ;;  %v12705_v2 = vunpack.c.l.bf16 %v312_v60  ;;  %v12737_v3 = vsel %vm724_vm6, %v12704_v55, 0.0  ;;  %v564_v11 = vsel %vm17927_vm2, %v13148_v56, %v563_v61  ;;  %v13044_v21 = vld [vmem:[%s17924_s6 + $0x258] sm:$0xf]  ;;  %v13045_v25 = vld [vmem:[%s17924_s6 + $0x25c] sm:$0x1] }
  0x20   : > { %15829 = vmatpush3.bf16.msra.mxu1 %v17914_v4  ;;  %v12738_v10 = vadd.f32 %v12737_v3, %v12736_v59  ;;  %v565_v12 = vrot.slane %v563_v61, 4  ;;  %v315_v13 = vrot.slane %v13041_v57, 5  ;;  %v318_v18 = vrot.slane %v13042_v58, 5  ;;  %v13110_v34 = vld [vmem:[%s17924_s6 + $0x1c4] sm:$0xc] }
  0x21   : > { %21891 = vst [vmem:[#allocation3_spill] sm:$0xff] %v17984_v1  ;;  %16301 = vmatmul.mubr.msk.bf16.vlgmr.msra.gmra.mrb[0].mxu0 %vm724_vm6, %v17984_v1  ;;  %v12739_v17 = vsel %vm724_vm6, %v12705_v2, 0.0  ;;  %v13149_v19 = vrot.slane %v13107_v63, 10  ;;  %v570_v20 = vrot.slane %v13108_v0, 6  ;;  %15830 = vmatprep.subr.bf16.mxu1 %v17690_v52  ;;  %v573_v31 = vrot.slane %v13109_v14, 6 }
  0x22   : > { %v12740_v4 = vadd.f32 %v12739_v17, %v12738_v10  ;;  %16333 = vmatpush3.bf16.msra.mxu0 %v17919_v5  ;;  %v567_v22 = vsel %vm17927_vm2, %v565_v12, %v566_v62  ;;  %v316_v23 = vsel %vm17938_vm5, %v13084_v7, %v315_v13  ;;  %v317_v24 = vrot.slane %v315_v13, 4  ;;  %v18015_v5 = vld [vmem:[%s21839_s1 + $0x100] sm:$0xff]   ;;  %v13111_v39 = vld [vmem:[%s17924_s6 + $0x1c8] sm:$0xf]  ;;  %v13112_v40 = vld [vmem:[%s17924_s6 + $0x1cc] sm:$0x3] }
  0x23   : > { %v13168_v26 = vcombine.low %v564_v11, %v567_v22  ;;  %v12706_v27 = vunpack.c.l.bf16 %v316_v23  ;;  %v571_v28 = vsel %vm17927_vm2, %v13149_v19, %v570_v20  ;;  %v572_v29 = vrot.slane %v570_v20, 4  ;;  %16334 = vmatprep.subr.bf16.mxu0 %v17691_v8  ;;  %v13046_v46 = vld [vmem:[%s17924_s6 + $0x270] sm:$0xe]  ;;  %v13047_v51 = vld [vmem:[%s17924_s6 + $0x274] sm:$0xf] }
  0x24   : > { %v319_v30 = vsel %vm17938_vm5, %v317_v24, %v318_v18  ;;  %v13085_v32 = vrot.slane %v13043_v15, 9  ;;  %v322_v33 = vrot.slane %v13044_v21, 5  ;;  %15831 = vmatpush3.bf16.msra.mxu1 %v17690_v52  ;;  %v325_v38 = vrot.slane %v13045_v25, 5  ;;  %v13048_v52 = vld [vmem:[%s17924_s6 + $0x278] sm:$0x1] }
  0x25   : > { %15800 = vmatprep.mubr.msk.bf16.mxu1 %vm724_vm6, %v13168_v26  ;;  %v18021_v35 = vcombine.low %v316_v23, %v319_v30  ;;  %v12707_v36 = vunpack.c.l.bf16 %v319_v30  ;;  %v12741_v37 = vsel %vm724_vm6, %v12706_v27, 0.0  ;;  %15864 = vmatprep.subr.bf16.mxu1 %v17993_v9  ;;  %v574_v43 = vsel %vm17927_vm2, %v572_v29, %v573_v31  ;;  %v13113_v57 = vld [vmem:[%s17924_s6 + $0x1e0] sm:$0xc]  ;;  %v13114_v58 = vld [vmem:[%s17924_s6 + $0x1e4] sm:$0xf] }
  0x26   : > { %v12742_v41 = vadd.f32 %v12741_v37, %v12740_v4  ;;  %v323_v44 = vsel %vm17938_vm5, %v13085_v32, %v322_v33  ;;  %v324_v45 = vrot.slane %v322_v33, 4  ;;  %16335 = vmatpush3.bf16.msra.mxu0 %v17691_v8  ;;  %v13169_v48 = vcombine.low %v571_v28, %v574_v43  ;;  %v13115_v7 = vld [vmem:[%s17924_s6 + $0x1e8] sm:$0x3]  ;;  %v13049_v8 = vld [vmem:[%s17924_s6 + $0x28c] sm:$0xe] }
  0x27   : > { %21892 = vst [vmem:[#allocation4_spill] sm:$0xff] %v18021_v35  ;;  %16304 = vmatprep.mubr.msk.bf16.mxu0 %vm724_vm6, %v18021_v35  ;;  %v12743_v47 = vsel %vm724_vm6, %v12707_v36, 0.0  ;;  %v12708_v49 = vunpack.c.l.bf16 %v323_v44  ;;  %v13150_v50 = vrot.slane %v13110_v34, 10  ;;  %16368 = vmatprep.subr.bf16.mxu0 %v18015_v5  ;;  %v577_v55 = vrot.slane %v13111_v39, 6  ;;  %v13050_v14 = vld [vmem:[%s17924_s6 + $0x290] sm:$0xf] }
  0x28   : > { %v12744_v53 = vadd.f32 %v12743_v47, %v12742_v41  ;;  %v326_v54 = vsel %vm17938_vm5, %v324_v45, %v325_v38  ;;  %v580_v56 = vrot.slane %v13112_v40, 6  ;;  %15801 = vmatmul.mubr.msk.bf16.gmra.mrb[4].mxu1 %vm724_vm6, %v13169_v48  ;;  %v13086_v62 = vrot.slane %v13046_v46, 9  ;;  %v13051_v20 = vld [vmem:[%s17924_s6 + $0x294] sm:$0x1]  ;;  %v13116_v24 = vld [vmem:[%s17924_s6 + $0x1fc] sm:$0xc] }
  0x29   : > { %v18043_v59 = vcombine.low %v323_v44, %v326_v54  ;;  %v12709_v60 = vunpack.c.l.bf16 %v326_v54  ;;  %v12745_v61 = vsel %vm724_vm6, %v12708_v49, 0.0  ;;  %v578_v0 = vsel %vm17927_vm2, %v13150_v50, %v577_v55  ;;  %v13117_v29 = vld [vmem:[%s17924_s6 + $0x200] sm:$0xf]  ;;  %v13118_v34 = vld [vmem:[%s17924_s6 + $0x204] sm:$0x3] }
  0x2a   : > { %v12746_v63 = vadd.f32 %v12745_v61, %v12744_v53  ;;  %v579_v2 = vrot.slane %v577_v55, 4  ;;  %v329_v3 = vrot.slane %v13047_v51, 5  ;;  %v332_v11 = vrot.slane %v13048_v52, 5  ;;  %v13052_v40 = vld [vmem:[%s17924_s6 + $0x2a8] sm:$0xe] }
  0x2b   : > { %21893 = vst [vmem:[#allocation5_spill] sm:$0xff] %v18043_v59  ;;  %16305 = vmatmul.mubr.msk.bf16.gmra.mrb[4].mxu0 %vm724_vm6, %v18043_v59  ;;  %v12747_v10 = vsel %vm724_vm6, %v12709_v60, 0.0  ;;  %v13151_v12 = vrot.slane %v13113_v57, 10  ;;  %v584_v13 = vrot.slane %v13114_v58, 6  ;;  %v587_v26 = vrot.slane %v13115_v7, 6 }
  0x2c   : > { %v12748_v15 = vadd.f32 %v12747_v10, %v12746_v63  ;;  %v581_v17 = vsel %vm17927_vm2, %v579_v2, %v580_v56  ;;  %v330_v18 = vsel %vm17938_vm5, %v13086_v62, %v329_v3  ;;  %v331_v19 = vrot.slane %v329_v3, 4  ;;  %v13053_v46 = vld [vmem:[%s17924_s6 + $0x2ac] sm:$0xf]  ;;  %v13054_v47 = vld [vmem:[%s17924_s6 + $0x2b0] sm:$0x1] }
  0x2d   : > { %v13170_v21 = vcombine.low %v578_v0, %v581_v17  ;;  %v12710_v4 = vunpack.c.l.bf16 %v330_v18  ;;  %v585_v22 = vsel %vm17927_vm2, %v13151_v12, %v584_v13  ;;  %v586_v23 = vrot.slane %v584_v13, 4  ;;  %v13119_v52 = vld [vmem:[%s17924_s6 + $0x218] sm:$0xc]  ;;  %v13120_v53 = vld [vmem:[%s17924_s6 + $0x21c] sm:$0xf] }
  0x2e   : > { %v333_v25 = vsel %vm17938_vm5, %v331_v19, %v332_v11  ;;  %v13087_v27 = vrot.slane %v13049_v8, 9  ;;  %v336_v28 = vrot.slane %v13050_v14, 5  ;;  %v339_v33 = vrot.slane %v13051_v20, 5  ;;  %v13121_v58 = vld [vmem:[%s17924_s6 + $0x220] sm:$0x3] }
  0x2f   : > { %15804 = vmatprep.mubr.msk.bf16.mxu1 %vm724_vm6, %v13170_v21  ;;  %v18066_v30 = vcombine.low %v330_v18, %v333_v25  ;;  %v12711_v31 = vunpack.c.l.bf16 %v333_v25  ;;  %v12749_v32 = vsel %vm724_vm6, %v12710_v4, 0.0  ;;  %v588_v37 = vsel %vm17927_vm2, %v586_v23, %v587_v26  ;;  %v13055_v60 = vld [vmem:[%s17924_s6 + $0x2c4] sm:$0xe]  ;;  %v13056_v2 = vld [vmem:[%s17924_s6 + $0x2c8] sm:$0xf] }
  0x30   : > { %v12750_v36 = vadd.f32 %v12749_v32, %v12748_v15  ;;  %v337_v38 = vsel %vm17938_vm5, %v13087_v27, %v336_v28  ;;  %v338_v39 = vrot.slane %v336_v28, 4  ;;  %v13171_v43 = vcombine.low %v585_v22, %v588_v37  ;;  %v13057_v15 = vld [vmem:[%s17924_s6 + $0x2cc] sm:$0x1]  ;;  %v13058_v37 = vld [vmem:[%s17924_s6 + $0x2e0] sm:$0xe] }
  0x31   : > { %21894 = vst [vmem:[#allocation6_spill] sm:$0xff] %v18066_v30  ;;  %16308 = vmatprep.mubr.msk.bf16.mxu0 %vm724_vm6, %v18066_v30  ;;  %v12751_v41 = vsel %vm724_vm6, %v12711_v31, 0.0  ;;  %v12712_v44 = vunpack.c.l.bf16 %v337_v38  ;;  %v13152_v45 = vrot.slane %v13116_v24, 10  ;;  %v591_v50 = vrot.slane %v13117_v29, 6  ;;  %v13122_v24 = vld [vmem:[%s17924_s6 + $0x234] sm:$0xc] }
  0x32   : > { %v12752_v48 = vadd.f32 %v12751_v41, %v12750_v36  ;;  %v340_v49 = vsel %vm17938_vm5, %v338_v39, %v339_v33  ;;  %v594_v51 = vrot.slane %v13118_v34, 6  ;;  %15805 = vmatmul.mubr.msk.bf16.gmra.mrb[8].mxu1 %vm724_vm6, %v13171_v43  ;;  %v13088_v57 = vrot.slane %v13052_v40, 9  ;;  %v13123_v29 = vld [vmem:[%s17924_s6 + $0x238] sm:$0xf]  ;;  %v13124_v31 = vld [vmem:[%s17924_s6 + $0x23c] sm:$0x3] }
  0x33   : > { %v18085_v54 = vcombine.low %v337_v38, %v340_v49  ;;  %v12713_v55 = vunpack.c.l.bf16 %v340_v49  ;;  %v12753_v56 = vsel %vm724_vm6, %v12712_v44, 0.0  ;;  %v592_v62 = vsel %vm17927_vm2, %v13152_v45, %v591_v50  ;;  %v13059_v43 = vld [vmem:[%s17924_s6 + $0x2e4] sm:$0xf]  ;;  %v13060_v44 = vld [vmem:[%s17924_s6 + $0x2e8] sm:$0x1] }
  0x34   : > { %v12754_v61 = vadd.f32 %v12753_v56, %v12752_v48  ;;  %v593_v63 = vrot.slane %v591_v50, 4  ;;  %v343_v0 = vrot.slane %v13053_v46, 5  ;;  %v346_v7 = vrot.slane %v13054_v47, 5  ;;  %v13125_v49 = vld [vmem:[%s17924_s6 + $0x250] sm:$0xc] }
  0x35   : > { %21895 = vst [vmem:[#allocation7_spill] sm:$0xff] %v18085_v54  ;;  %16309 = vmatmul.mubr.msk.bf16.gmra.mrb[8].mxu0 %vm724_vm6, %v18085_v54  ;;  %v12755_v3 = vsel %vm724_vm6, %v12713_v55, 0.0  ;;  %v13153_v8 = vrot.slane %v13119_v52, 10  ;;  %v598_v10 = vrot.slane %v13120_v53, 6  ;;  %v601_v4 = vrot.slane %v13121_v58, 6 }
  0x36   : > { %v12756_v11 = vadd.f32 %v12755_v3, %v12754_v61  ;;  %v595_v12 = vsel %vm17927_vm2, %v593_v63, %v594_v51  ;;  %v344_v13 = vsel %vm17938_vm5, %v13088_v57, %v343_v0  ;;  %v345_v14 = vrot.slane %v343_v0, 4  ;;  %v13126_v50 = vld [vmem:[%s17924_s6 + $0x254] sm:$0xf]  ;;  %v13127_v61 = vld [vmem:[%s17924_s6 + $0x258] sm:$0x3] }
  0x37   : > { %v13172_v17 = vcombine.low %v592_v62, %v595_v12  ;;  %v12714_v18 = vunpack.c.l.bf16 %v344_v13  ;;  %v599_v19 = vsel %vm17927_vm2, %v13153_v8, %v598_v10  ;;  %v600_v20 = vrot.slane %v598_v10, 4  ;;  %v13061_v62 = vld [vmem:[%s17924_s6 + $0x2fc] sm:$0xe] }
  0x38   : > { %v347_v21 = vsel %vm17938_vm5, %v345_v14, %v346_v7  ;;  %v13089_v22 = vrot.slane %v13055_v60, 9  ;;  %v350_v23 = vrot.slane %v13056_v2, 5  ;;  %v353_v28 = vrot.slane %v13057_v15, 5  ;;  %v13062_v7 = vld [vmem:[%s17924_s6 + $0x300] sm:$0xf] }
  0x39   : > { %15808 = vmatprep.mubr.msk.bf16.mxu1 %vm724_vm6, %v13172_v17  ;;  %v18107_v25 = vcombine.low %v344_v13, %v347_v21  ;;  %v12715_v26 = vunpack.c.l.bf16 %v347_v21  ;;  %v12757_v27 = vsel %vm724_vm6, %v12714_v18, 0.0  ;;  %v602_v33 = vsel %vm17927_vm2, %v600_v20, %v601_v4  ;;  %v13063_v13 = vld [vmem:[%s17924_s6 + $0x304] sm:$0x1] }
  0x3a   : > { %v12758_v32 = vadd.f32 %v12757_v27, %v12756_v11  ;;  %v351_v34 = vsel %vm17938_vm5, %v13089_v22, %v350_v23  ;;  %v352_v36 = vrot.slane %v350_v23, 4  ;;  %v13173_v39 = vcombine.low %v599_v19, %v602_v33  ;;  %v13128_v22 = vld [vmem:[%s17924_s6 + $0x26c] sm:$0xc] }
  0x3b   : > { %21896 = vst [vmem:[#allocation8_spill] sm:$0xff] %v18107_v25  ;;  %16312 = vmatprep.mubr.msk.bf16.mxu0 %vm724_vm6, %v18107_v25  ;;  %v12759_v38 = vsel %vm724_vm6, %v12715_v26, 0.0  ;;  %v12716_v40 = vunpack.c.l.bf16 %v351_v34  ;;  %v13154_v41 = vrot.slane %v13122_v24, 10  ;;  %v605_v47 = vrot.slane %v13123_v29, 6  ;;  %v13130_v29 = vld [vmem:[%s17924_s6 + $0x274] sm:$0x3] }
  0x3c   : > { %v12760_v45 = vadd.f32 %v12759_v38, %v12758_v32  ;;  %v354_v46 = vsel %vm17938_vm5, %v352_v36, %v353_v28  ;;  %v608_v48 = vrot.slane %v13124_v31, 6  ;;  %15809 = vmatmul.mubr.msk.bf16.gmra.mrb[12].mxu1 %vm724_vm6, %v13173_v39  ;;  %v13090_v55 = vrot.slane %v13058_v37, 9  ;;  %v13129_v28 = vld [vmem:[%s17924_s6 + $0x270] sm:$0xf]  ;;  %v13064_v36 = vld [vmem:[%s17924_s6 + $0x318] sm:$0xe] }
  0x3d   : > { %v18127_v51 = vcombine.low %v351_v34, %v354_v46  ;;  %v12717_v52 = vunpack.c.l.bf16 %v354_v46  ;;  %v12761_v53 = vsel %vm724_vm6, %v12716_v40, 0.0  ;;  %v606_v57 = vsel %vm17927_vm2, %v13154_v41, %v605_v47  ;;  %v13065_v41 = vld [vmem:[%s17924_s6 + $0x31c] sm:$0xf] }
  0x3e   : > { %v12762_v56 = vadd.f32 %v12761_v53, %v12760_v45  ;;  %v607_v58 = vrot.slane %v605_v47, 4  ;;  %v357_v60 = vrot.slane %v13059_v43, 5  ;;  %v360_v0 = vrot.slane %v13060_v44, 5  ;;  %v13066_v43 = vld [vmem:[%s17924_s6 + $0x320] sm:$0x1] }
  0x3f   : > { %21897 = vst [vmem:[#allocation9_spill] sm:$0xff] %v18127_v51  ;;  %16313 = vmatmul.mubr.msk.bf16.gmra.mrb[12].mxu0 %vm724_vm6, %v18127_v51  ;;  %v12763_v63 = vsel %vm724_vm6, %v12717_v52, 0.0  ;;  %v13155_v2 = vrot.slane %v13125_v49, 10  ;;  %v612_v3 = vrot.slane %v13126_v50, 6  ;;  %v615_v20 = vrot.slane %v13127_v61, 6 }
  0x40   : > { %v12764_v8 = vadd.f32 %v12763_v63, %v12762_v56  ;;  %v609_v10 = vsel %vm17927_vm2, %v607_v58, %v608_v48  ;;  %v358_v11 = vsel %vm17938_vm5, %v13090_v55, %v357_v60  ;;  %v359_v12 = vrot.slane %v357_v60, 4  ;;  %v13131_v48 = vld [vmem:[%s17924_s6 + $0x288] sm:$0xc]  ;;  %v13132_v49 = vld [vmem:[%s17924_s6 + $0x28c] sm:$0xf] }
  0x41   : > { %v13174_v14 = vcombine.low %v606_v57, %v609_v10  ;;  %v12718_v15 = vunpack.c.l.bf16 %v358_v11  ;;  %v613_v17 = vsel %vm17927_vm2, %v13155_v2, %v612_v3  ;;  %v614_v18 = vrot.slane %v612_v3, 4  ;;  %v13133_v56 = vld [vmem:[%s17924_s6 + $0x290] sm:$0x3]  ;;  %v13068_v63 = vld [vmem:[%s17924_s6 + $0x338] sm:$0xf] }
  0x42   : > { %v361_v19 = vsel %vm17938_vm5, %v359_v12, %v360_v0  ;;  %v13091_v21 = vrot.slane %v13061_v62, 9  ;;  %v364_v4 = vrot.slane %v13062_v7, 5  ;;  %v367_v27 = vrot.slane %v13063_v13, 5  ;;  %v13067_v62 = vld [vmem:[%s17924_s6 + $0x334] sm:$0xe] }
  0x43   : > { %15812 = vmatprep.mubr.msk.bf16.mxu1 %vm724_vm6, %v13174_v14  ;;  %v18149_v23 = vcombine.low %v358_v11, %v361_v19  ;;  %v12719_v24 = vunpack.c.l.bf16 %v361_v19  ;;  %v12765_v26 = vsel %vm724_vm6, %v12718_v15, 0.0  ;;  %v616_v32 = vsel %vm17927_vm2, %v614_v18, %v615_v20  ;;  %v13134_v19 = vld [vmem:[%s17924_s6 + $0x2a4] sm:$0xc] }
  0x44   : > { %v12766_v31 = vadd.f32 %v12765_v26, %v12764_v8  ;;  %v365_v33 = vsel %vm17938_vm5, %v13091_v21, %v364_v4  ;;  %v366_v34 = vrot.slane %v364_v4, 4  ;;  %v13175_v38 = vcombine.low %v613_v17, %v616_v32  ;;  %v13069_v8 = vld [vmem:[%s17924_s6 + $0x33c] sm:$0x1]  ;;  %v13070_v32 = vld [vmem:[%s17924_s6 + $0x350] sm:$0xe] }
  0x45   : > { %21898 = vst [vmem:[#allocation10_spill] sm:$0xff] %v18149_v23  ;;  %16316 = vmatprep.mubr.msk.bf16.mxu0 %vm724_vm6, %v18149_v23  ;;  %v12767_v37 = vsel %vm724_vm6, %v12719_v24, 0.0  ;;  %v12720_v39 = vunpack.c.l.bf16 %v365_v33  ;;  %v13156_v40 = vrot.slane %v13128_v22, 10  ;;  %v619_v46 = vrot.slane %v13129_v28, 6  ;;  %v13135_v24 = vld [vmem:[%s17924_s6 + $0x2a8] sm:$0xf] }
  0x46   : > { %v12768_v44 = vadd.f32 %v12767_v37, %v12766_v31  ;;  %v368_v45 = vsel %vm17938_vm5, %v366_v34, %v367_v27  ;;  %v622_v47 = vrot.slane %v13130_v29, 6  ;;  %15813 = vmatmul.mubr.msk.bf16.gmra.mrb[16].mxu1 %vm724_vm6, %v13175_v38  ;;  %v13092_v55 = vrot.slane %v13064_v36, 9  ;;  %v13136_v31 = vld [vmem:[%s17924_s6 + $0x2ac] sm:$0x3]  ;;  %v13071_v38 = vld [vmem:[%s17924_s6 + $0x354] sm:$0xf] }
  0x47   : > { %v18169_v50 = vcombine.low %v365_v33, %v368_v45  ;;  %v12721_v52 = vunpack.c.l.bf16 %v368_v45  ;;  %v12769_v53 = vsel %vm724_vm6, %v12720_v39, 0.0  ;;  %v620_v58 = vsel %vm17927_vm2, %v13156_v40, %v619_v46 }
  0x48   : > { %v12770_v57 = vadd.f32 %v12769_v53, %v12768_v44  ;;  %v621_v60 = vrot.slane %v619_v46, 4  ;;  %v371_v61 = vrot.slane %v13065_v41, 5  ;;  %v374_v2 = vrot.slane %v13066_v43, 5  ;;  %v13072_v44 = vld [vmem:[%s17924_s6 + $0x358] sm:$0x1] }
  0x49   : > { %21899 = vst [vmem:[#allocation11_spill] sm:$0xff] %v18169_v50  ;;  %16317 = vmatmul.mubr.msk.bf16.gmra.mrb[16].mxu0 %vm724_vm6, %v18169_v50  ;;  %v12771_v0 = vsel %vm724_vm6, %v12721_v52, 0.0  ;;  %v13157_v3 = vrot.slane %v13131_v48, 10  ;;  %v626_v7 = vrot.slane %v13132_v49, 6  ;;  %v629_v21 = vrot.slane %v13133_v56, 6 }
  0x4a   : > { %v12772_v10 = vadd.f32 %v12771_v0, %v12770_v57  ;;  %v623_v11 = vsel %vm17927_vm2, %v621_v60, %v622_v47  ;;  %v372_v12 = vsel %vm17938_vm5, %v13092_v55, %v371_v61  ;;  %v373_v13 = vrot.slane %v371_v61, 4  ;;  %v13137_v49 = vld [vmem:[%s17924_s6 + $0x2c0] sm:$0xc]  ;;  %v13138_v52 = vld [vmem:[%s17924_s6 + $0x2c4] sm:$0xf] }
  0x4b   : > { %v13176_v14 = vcombine.low %v620_v58, %v623_v11  ;;  %v12722_v15 = vunpack.c.l.bf16 %v372_v12  ;;  %v627_v17 = vsel %vm17927_vm2, %v13157_v3, %v626_v7  ;;  %v628_v18 = vrot.slane %v626_v7, 4  ;;  %v13073_v0 = vld [vmem:[%s17924_s6 + $0x36c] sm:$0xe] }
  0x4c   : > { %v375_v20 = vsel %vm17938_vm5, %v373_v13, %v374_v2  ;;  %v13093_v4 = vrot.slane %v13067_v62, 9  ;;  %v378_v22 = vrot.slane %v13068_v63, 5  ;;  %v381_v29 = vrot.slane %v13069_v8, 5  ;;  %v13139_v63 = vld [vmem:[%s17924_s6 + $0x2c8] sm:$0x3] }
  0x4d   : > { %15816 = vmatprep.mubr.msk.bf16.mxu1 %vm724_vm6, %v13176_v14  ;;  %v18192_v26 = vcombine.low %v372_v12, %v375_v20  ;;  %v12723_v27 = vunpack.c.l.bf16 %v375_v20  ;;  %v12773_v28 = vsel %vm724_vm6, %v12722_v15, 0.0  ;;  %v630_v34 = vsel %vm17927_vm2, %v628_v18, %v629_v21  ;;  %v13075_v15 = vld [vmem:[%s17924_s6 + $0x374] sm:$0x1]  ;;  %v13140_v21 = vld [vmem:[%s17924_s6 + $0x2dc] sm:$0xc] }
  0x4e   : > { %v12774_v33 = vadd.f32 %v12773_v28, %v12772_v10  ;;  %v379_v36 = vsel %vm17938_vm5, %v13093_v4, %v378_v22  ;;  %v380_v37 = vrot.slane %v378_v22, 4  ;;  %v13177_v40 = vcombine.low %v627_v17, %v630_v34  ;;  %v13074_v10 = vld [vmem:[%s17924_s6 + $0x370] sm:$0xf]  ;;  %v13141_v28 = vld [vmem:[%s17924_s6 + $0x2e0] sm:$0xf] }
  0x4f   : > { %21900 = vst [vmem:[#allocation12_spill] sm:$0xff] %v18192_v26  ;;  %16320 = vmatprep.mubr.msk.bf16.mxu0 %vm724_vm6, %v18192_v26  ;;  %v12775_v39 = vsel %vm724_vm6, %v12723_v27, 0.0  ;;  %v12724_v41 = vunpack.c.l.bf16 %v379_v36  ;;  %v13158_v43 = vrot.slane %v13134_v19, 10  ;;  %v633_v47 = vrot.slane %v13135_v24, 6  ;;  %v13142_v34 = vld [vmem:[%s17924_s6 + $0x2e4] sm:$0x3] }
  0x50   : > { %v12776_v45 = vadd.f32 %v12775_v39, %v12774_v33  ;;  %v382_v46 = vsel %vm17938_vm5, %v380_v37, %v381_v29  ;;  %v636_v48 = vrot.slane %v13136_v31, 6  ;;  %15817 = vmatmul.mubr.msk.bf16.gmra.mrb[20].mxu1 %vm724_vm6, %v13177_v40  ;;  %v13094_v57 = vrot.slane %v13070_v32, 9 }
  0x51   : > { %v18211_v53 = vcombine.low %v379_v36, %v382_v46  ;;  %v12725_v55 = vunpack.c.l.bf16 %v382_v46  ;;  %v12777_v56 = vsel %vm724_vm6, %v12724_v41, 0.0  ;;  %v634_v60 = vsel %vm17927_vm2, %v13158_v43, %v633_v47  ;;  %v13076_v36 = vld [vmem:[%s17924_s6 + $0x388] sm:$0xe]  ;;  %v13077_v41 = vld [vmem:[%s17924_s6 + $0x38c] sm:$0xf] }
  0x52   : > { %v12778_v58 = vadd.f32 %v12777_v56, %v12776_v45  ;;  %v635_v61 = vrot.slane %v633_v47, 4  ;;  %v385_v62 = vrot.slane %v13071_v38, 5  ;;  %v388_v3 = vrot.slane %v13072_v44, 5  ;;  %v13078_v43 = vld [vmem:[%s17924_s6 + $0x390] sm:$0x1] }
  0x53   : > { %21901 = vst [vmem:[#allocation13_spill] sm:$0xff] %v18211_v53  ;;  %16321 = vmatmul.mubr.msk.bf16.gmra.mrb[20].mxu0 %vm724_vm6, %v18211_v53  ;;  %v12779_v2 = vsel %vm724_vm6, %v12725_v55, 0.0  ;;  %v13159_v7 = vrot.slane %v13137_v49, 10  ;;  %v640_v8 = vrot.slane %v13138_v52, 6  ;;  %v643_v22 = vrot.slane %v13139_v63, 6 }
  0x54   : > { %v12780_v11 = vadd.f32 %v12779_v2, %v12778_v58  ;;  %v637_v12 = vsel %vm17927_vm2, %v635_v61, %v636_v48  ;;  %v386_v13 = vsel %vm17938_vm5, %v13094_v57, %v385_v62  ;;  %v387_v14 = vrot.slane %v385_v62, 4  ;;  %v13143_v48 = vld [vmem:[%s17924_s6 + $0x2f8] sm:$0xc]  ;;  %v13144_v57 = vld [vmem:[%s17924_s6 + $0x2fc] sm:$0xf] }
  0x55   : > { %v13178_v17 = vcombine.low %v634_v60, %v637_v12  ;;  %v12726_v18 = vunpack.c.l.bf16 %v386_v13  ;;  %v641_v19 = vsel %vm17927_vm2, %v13159_v7, %v640_v8  ;;  %v642_v20 = vrot.slane %v640_v8, 4  ;;  %v13145_v63 = vld [vmem:[%s17924_s6 + $0x300] sm:$0x3]  ;;  %v13079_v8 = vld [vmem:[%s17924_s6 + $0x3a4] sm:$0xe] }
  0x56   : > { %v389_v4 = vsel %vm17938_vm5, %v387_v14, %v388_v3  ;;  %v13095_v24 = vrot.slane %v13073_v0, 9  ;;  %v392_v27 = vrot.slane %v13074_v10, 5  ;;  %v395_v33 = vrot.slane %v13075_v15, 5  ;;  %v13080_v10 = vld [vmem:[%s17924_s6 + $0x3a8] sm:$0xf] }
  0x57   : > { %15820 = vmatprep.mubr.msk.bf16.mxu1 %vm724_vm6, %v13178_v17  ;;  %v18234_v29 = vcombine.low %v386_v13, %v389_v4  ;;  %v12727_v31 = vunpack.c.l.bf16 %v389_v4  ;;  %v12781_v32 = vsel %vm724_vm6, %v12726_v18, 0.0  ;;  %v644_v38 = vsel %vm17927_vm2, %v642_v20, %v643_v22  ;;  %v13081_v15 = vld [vmem:[%s17924_s6 + $0x3ac] sm:$0x1] }
  0x58   : > { %v12782_v37 = vadd.f32 %v12781_v32, %v12780_v11  ;;  %v393_v39 = vsel %vm17938_vm5, %v13095_v24, %v392_v27  ;;  %v394_v40 = vrot.slane %v392_v27, 4  ;;  %v13179_v45 = vcombine.low %v641_v19, %v644_v38 }
  0x59   : > { %21902 = vst [vmem:[#allocation14_spill] sm:$0xff] %v18234_v29  ;;  %16324 = vmatprep.mubr.msk.bf16.mxu0 %vm724_vm6, %v18234_v29  ;;  %v12783_v44 = vsel %vm724_vm6, %v12727_v31, 0.0  ;;  %v12728_v46 = vunpack.c.l.bf16 %v393_v39  ;;  %v13160_v47 = vrot.slane %v13140_v21, 10  ;;  %v647_v55 = vrot.slane %v13141_v28, 6 }
  0x5a   : > { %v12784_v49 = vadd.f32 %v12783_v44, %v12782_v37  ;;  %v396_v52 = vsel %vm17938_vm5, %v394_v40, %v395_v33  ;;  %v650_v56 = vrot.slane %v13142_v34, 6  ;;  %15821 = vmatmul.mubr.msk.bf16.gmra.mrb[24].mxu1 %vm724_vm6, %v13179_v45  ;;  %v13096_v62 = vrot.slane %v13076_v36, 9  ;;  %v14256_v33 = vld [vmem:[%s17924_s6 + $0x204] sm:$0x8]  ;;  %v14258_v40 = vld [vmem:[%s17924_s6 + $0x20c] sm:$0x7] }
  0x5b   : > { %v18253_v58 = vcombine.low %v393_v39, %v396_v52  ;;  %v12729_v60 = vunpack.c.l.bf16 %v396_v52  ;;  %v12785_v61 = vsel %vm724_vm6, %v12728_v46, 0.0  ;;  %v648_v2 = vsel %vm17927_vm2, %v13160_v47, %v647_v55  ;;  %v14257_v39 = vld [vmem:[%s17924_s6 + $0x208] sm:$0xf]  ;;  %v14259_v46 = vld [vmem:[%s17924_s6 + $0x220] sm:$0x8] }
  0x5c   : > { %v12786_v0 = vadd.f32 %v12785_v61, %v12784_v49  ;;  %v649_v3 = vrot.slane %v647_v55, 4  ;;  %v399_v7 = vrot.slane %v13077_v41, 5  ;;  %v402_v12 = vrot.slane %v13078_v43, 5 }
  0x5d   : > { %21903 = vst [vmem:[#allocation15_spill] sm:$0xff] %v18253_v58  ;;  %16325 = vmatmul.mubr.msk.bf16.gmra.mrb[24].mxu0 %vm724_vm6, %v18253_v58  ;;  %v12787_v11 = vsel %vm724_vm6, %v12729_v60, 0.0  ;;  %v13161_v13 = vrot.slane %v13143_v48, 10  ;;  %v654_v14 = vrot.slane %v13144_v57, 6  ;;  %v657_v28 = vrot.slane %v13145_v63, 6 }
  0x5e   : > { %v12788_v17 = vadd.f32 %v12787_v11, %v12786_v0  ;;  %v651_v18 = vsel %vm17927_vm2, %v649_v3, %v650_v56  ;;  %v400_v19 = vsel %vm17938_vm5, %v13096_v62, %v399_v7  ;;  %v401_v20 = vrot.slane %v399_v7, 4  ;;  %v14260_v56 = vld [vmem:[%s17924_s6 + $0x224] sm:$0xf]  ;;  %v14261_v57 = vld [vmem:[%s17924_s6 + $0x228] sm:$0x7] }
  0x5f   : > { %v13180_v21 = vcombine.low %v648_v2, %v651_v18  ;;  %v12730_v4 = vunpack.c.l.bf16 %v400_v19  ;;  %v655_v22 = vsel %vm17927_vm2, %v13161_v13, %v654_v14  ;;  %v656_v24 = vrot.slane %v654_v14, 4  ;;  %v14262_v0 = vld [vmem:[%s17924_s6 + $0x23c] sm:$0x8]  ;;  %v14263_v2 = vld [vmem:[%s17924_s6 + $0x240] sm:$0xf] }
  0x60   : > { %v403_v27 = vsel %vm17938_vm5, %v401_v20, %v402_v12  ;;  %v13097_v31 = vrot.slane %v13079_v8, 9  ;;  %v406_v32 = vrot.slane %v13080_v10, 5  ;;  %v409_v38 = vrot.slane %v13081_v15, 5  ;;  %v14264_v15 = vld [vmem:[%s17924_s6 + $0x244] sm:$0x7] }
  0x61   : > { %15824 = vmatprep.mubr.msk.bf16.mxu1 %vm724_vm6, %v13180_v21  ;;  %v18275_v34 = vcombine.low %v400_v19, %v403_v27  ;;  %v12731_v36 = vunpack.c.l.bf16 %v403_v27  ;;  %v12789_v37 = vsel %vm724_vm6, %v12730_v4, 0.0  ;;  %v658_v43 = vsel %vm17927_vm2, %v656_v24, %v657_v28  ;;  %v14266_v21 = vld [vmem:[%s17924_s6 + $0x25c] sm:$0xf]  ;;  %v14265_v28 = vld [vmem:[%s17924_s6 + $0x258] sm:$0x8] }
  0x62   : > { %v12790_v41 = vadd.f32 %v12789_v37, %v12788_v17  ;;  %v407_v44 = vsel %vm17938_vm5, %v13097_v31, %v406_v32  ;;  %v408_v45 = vrot.slane %v406_v32, 4  ;;  %v13181_v48 = vcombine.low %v655_v22, %v658_v43  ;;  %v14267_v37 = vld [vmem:[%s17924_s6 + $0x260] sm:$0x7]  ;;  %v14270_v43 = vld [vmem:[%s17924_s6 + $0x27c] sm:$0x7] }
  0x63   : > { %21904 = vst [vmem:[#allocation16_spill] sm:$0xff] %v18275_v34  ;;  %16328 = vmatprep.mubr.msk.bf16.mxu0 %vm724_vm6, %v18275_v34  ;;  %v12791_v47 = vsel %vm724_vm6, %v12731_v36, 0.0  ;;  %v12732_v49 = vunpack.c.l.bf16 %v407_v44  ;;  %v14304_v55 = vrot.slane %v14256_v33, 11  ;;  %v6852_v62 = vrot.slane %v14257_v39, 7 }
  0x64   : > { %v12792_v60 = vadd.f32 %v12791_v47, %v12790_v41  ;;  %v410_v61 = vsel %vm17938_vm5, %v408_v45, %v409_v38  ;;  %v6855_v63 = vrot.slane %v14258_v40, 7  ;;  %15825 = vmatmul.mubr.msk.bf16.gmra.mrb[28].mxu1 %vm724_vm6, %v13181_v48  ;;  %v14305_v10 = vrot.slane %v14259_v46, 11  ;;  %v14268_v38 = vld [vmem:[%s17924_s6 + $0x274] sm:$0x8]  ;;  %v14269_v41 = vld [vmem:[%s17924_s6 + $0x278] sm:$0xf] }
  0x65   : > { %v18301_v3 = vcombine.low %v407_v44, %v410_v61  ;;  %v12733_v7 = vunpack.c.l.bf16 %v410_v61  ;;  %v12793_v8 = vsel %vm724_vm6, %v12732_v49, 0.0  ;;  %15832 = vmatprep.mubr.msk.bf16.mxu1 %vm724_vm6, %v17961_v42  ;;  %v6853_v12 = vsel %vm18290_vm9, %v14304_v55, %v6852_v62  ;;  %v17694_v46 = vld [vmem:[%s21839_s1 + $0x28] sm:$0xff]   ;;  %v14272_v61 = vld [vmem:[%s17924_s6 + $0x294] sm:$0xf] }
  0x66   : > { %v12794_v11 = vadd.f32 %v12793_v8, %v12792_v60  ;;  %v6854_v13 = vrot.slane %v6852_v62, 4  ;;  %v6859_v14 = vrot.slane %v14260_v56, 7  ;;  %v6862_v18 = vrot.slane %v14261_v57, 7  ;;  %v17695_v62 = vld [vmem:[%s21839_s1 + $0x108] sm:$0xff]  }
  0x67   : > { %21907 = vst [vmem:[#allocation17_spill] sm:$0xff] %v18301_v3  ;;  %16329 = vmatmul.mubr.msk.bf16.gmra.mrb[28].mxu0 %vm724_vm6, %v18301_v3  ;;  %v12795_v17 = vsel %vm724_vm6, %v12733_v7, 0.0  ;;  %v14306_v19 = vrot.slane %v14262_v0, 11  ;;  %v6866_v20 = vrot.slane %v14263_v2, 7  ;;  %v6869_v36 = vrot.slane %v14264_v15, 7  ;;  %v18348_v2 = vld [vmem:[%s21839_s1 + $0x30] sm:$0xff]  }
  0x68   : > { %v18313_v4 = vadd.f32 %v12795_v17, %v12794_v11  ;;  %v6856_v22 = vsel %vm18290_vm9, %v6854_v13, %v6855_v63  ;;  %v6860_v24 = vsel %vm18290_vm9, %v14305_v10, %v6859_v14  ;;  %v6861_v27 = vrot.slane %v6859_v14, 4  ;;  %v14275_v63 = vld [vmem:[%s17924_s6 + $0x2b0] sm:$0xf]  ;;  %v14273_v13 = vld [vmem:[%s17924_s6 + $0x298] sm:$0x7] }
  0x69   : > { %v14324_v31 = vcombine.low %v6853_v12, %v6856_v22  ;;  %v6867_v32 = vsel %vm18290_vm9, %v14306_v19, %v6866_v20  ;;  %v6868_v33 = vrot.slane %v6866_v20, 4  ;;  %v6873_v40 = vrot.slane %v14266_v21, 7  ;;  %v14271_v12 = vld [vmem:[%s17924_s6 + $0x290] sm:$0x8]  ;;  %v14274_v15 = vld [vmem:[%s17924_s6 + $0x2ac] sm:$0x8] }
  0x6a   : > { %21908 = vst [vmem:[#allocation18_spill] sm:$0xff] %v18313_v4  ;;  %v6863_v39 = vsel %vm18290_vm9, %v6861_v27, %v6862_v18  ;;  %v14307_v48 = vrot.slane %v14265_v28, 11  ;;  %v6876_v55 = vrot.slane %v14267_v37, 7  ;;  %v14308_v56 = vrot.slane %v14268_v38, 11  ;;  %v14276_v17 = vld [vmem:[%s17924_s6 + $0x2b4] sm:$0x7] }
  0x6b   : > { %16336 = vmatprep.mubr.msk.bf16.mxu0 %vm724_vm6, %v14324_v31  ;;  %v14325_v44 = vcombine.low %v6860_v24, %v6863_v39  ;;  %v6870_v45 = vsel %vm18290_vm9, %v6868_v33, %v6869_v36  ;;  %v6875_v49 = vrot.slane %v6873_v40, 4  ;;  %v6880_v57 = vrot.slane %v14269_v41, 7  ;;  %v14278_v31 = vld [vmem:[%s17924_s6 + $0x2cc] sm:$0xf]  ;;  %v14279_v41 = vld [vmem:[%s17924_s6 + $0x2d0] sm:$0x7] }
  0x6c   : > { %v14326_v47 = vcombine.low %v6867_v32, %v6870_v45  ;;  %15833 = vmatmul.mubr.msk.bf16.vlgmr.msra.gmra.mrb[0].mxu1 %vm724_vm6, %v17984_v1  ;;  %v6883_v60 = vrot.slane %v14270_v43, 7  ;;  %v6887_v8 = vrot.slane %v14272_v61, 7  ;;  %v6894_v14 = vrot.slane %v14275_v63, 7  ;;  %v14281_v32 = vld [vmem:[%s17924_s6 + $0x2e8] sm:$0xf] }
  0x6d   : > { %15865 = vmatpush3.bf16.msra.mxu1 %v17993_v9  ;;  %15836 = vmatprep.mubr.msk.bf16.mxu1 %vm724_vm6, %v18021_v35  ;;  %v6882_v0 = vrot.slane %v6880_v57, 4  ;;  %v6874_v9 = vsel %vm18290_vm9, %v14307_v48, %v6873_v40  ;;  %v6877_v7 = vsel %vm18290_vm9, %v6875_v49, %v6876_v55  ;;  %v6881_v10 = vsel %vm18290_vm9, %v14308_v56, %v6880_v57  ;;  %v14277_v40 = vld [vmem:[%s17924_s6 + $0x2c8] sm:$0x8]  ;;  %v14282_v45 = vld [vmem:[%s17924_s6 + $0x2ec] sm:$0x7] }
  0x6e   : > { %15866 = vmatprep.subr.bf16.mxu1 %v17694_v46  ;;  %v14327_v18 = vcombine.low %v6874_v9, %v6877_v7  ;;  %v14309_v20 = vrot.slane %v14271_v12, 11  ;;  %v6889_v21 = vrot.slane %v6887_v8, 4  ;;  %v6890_v22 = vrot.slane %v14273_v13, 7  ;;  %v14284_v61 = vld [vmem:[%s17924_s6 + $0x304] sm:$0xf] }
  0x6f   : > { %16337 = vmatmul.mubr.msk.bf16.vlgmr.msra.gmra.mrb[0].mxu0 %vm724_vm6, %v14325_v44  ;;  %v6884_v11 = vsel %vm18290_vm9, %v6882_v0, %v6883_v60  ;;  %v14310_v24 = vrot.slane %v14274_v15, 11  ;;  %v6896_v27 = vrot.slane %v6894_v14, 4  ;;  %v6897_v28 = vrot.slane %v14276_v17, 7  ;;  %v14280_v44 = vld [vmem:[%s17924_s6 + $0x2e4] sm:$0x8] }
  0x70   : > { %16369 = vmatpush3.bf16.msra.mxu0 %v18015_v5  ;;  %16340 = vmatprep.mubr.msk.bf16.mxu0 %vm724_vm6, %v14326_v47  ;;  %v18365_v5 = vld [vmem:[%s21839_s1 + $0x110] sm:$0xff]   ;;  %v14328_v19 = vcombine.low %v6881_v10, %v6884_v11  ;;  %v6888_v33 = vsel %vm18290_vm9, %v14309_v20, %v6887_v8  ;;  %v6891_v36 = vsel %vm18290_vm9, %v6889_v21, %v6890_v22  ;;  %v6901_v37 = vrot.slane %v14278_v31, 7  ;;  %v14283_v10 = vld [vmem:[%s17924_s6 + $0x300] sm:$0x8]  ;;  %v14285_v11 = vld [vmem:[%s17924_s6 + $0x308] sm:$0x7] }
  0x71   : > { %16370 = vmatprep.subr.bf16.mxu0 %v17695_v62  ;;  %15867 = vmatpush3.bf16.msra.mxu1 %v17694_v46  ;;  %v6895_v38 = vsel %vm18290_vm9, %v14310_v24, %v6894_v14  ;;  %v6898_v39 = vsel %vm18290_vm9, %v6896_v27, %v6897_v28  ;;  %v6908_v43 = vrot.slane %v14281_v32, 7  ;;  %v14329_v46 = vcombine.low %v6888_v33, %v6891_v36  ;;  %v14286_v13 = vld [vmem:[%s17924_s6 + $0x31c] sm:$0x8]  ;;  %v14288_v14 = vld [vmem:[%s17924_s6 + $0x324] sm:$0x7] }
  0x72   : > { %15900 = vmatprep.subr.bf16.mxu1 %v18348_v2  ;;  %v14330_v47 = vcombine.low %v6895_v38, %v6898_v39  ;;  %v14311_v48 = vrot.slane %v14277_v40, 11  ;;  %v6903_v49 = vrot.slane %v6901_v37, 4  ;;  %v6904_v55 = vrot.slane %v14279_v41, 7  ;;  %v14290_v27 = vld [vmem:[%s17924_s6 + $0x33c] sm:$0xf] }
  0x73   : > { %v14312_v56 = vrot.slane %v14280_v44, 11  ;;  %v6910_v57 = vrot.slane %v6908_v43, 4  ;;  %v6911_v60 = vrot.slane %v14282_v45, 7  ;;  %v6915_v9 = vrot.slane %v14284_v61, 7  ;;  %v14293_v28 = vld [vmem:[%s17924_s6 + $0x358] sm:$0xf] }
  0x74   : > { %16371 = vmatpush3.bf16.msra.mxu0 %v17695_v62  ;;  %15837 = vmatmul.mubr.msk.bf16.gmra.mrb[4].mxu1 %vm724_vm6, %v18043_v59  ;;  %v14287_v62 = vld [vmem:[%s17924_s6 + $0x320] sm:$0xf]  ;;  %v6902_v63 = vsel %vm18290_vm9, %v14311_v48, %v6901_v37  ;;  %v6905_v0 = vsel %vm18290_vm9, %v6903_v49, %v6904_v55  ;;  %v6918_v20 = vrot.slane %v14285_v11, 7  ;;  %v14314_v21 = vrot.slane %v14286_v13, 11  ;;  %v14289_v38 = vld [vmem:[%s17924_s6 + $0x338] sm:$0x8] }
  0x75   : > { %16404 = vmatprep.subr.bf16.mxu0 %v18365_v5  ;;  %15840 = vmatprep.mubr.msk.bf16.mxu1 %vm724_vm6, %v18066_v30  ;;  %v6909_v7 = vsel %vm18290_vm9, %v14312_v56, %v6908_v43  ;;  %v6912_v8 = vsel %vm18290_vm9, %v6910_v57, %v6911_v60  ;;  %v6922_v12 = vrot.slane %v14287_v62, 7  ;;  %v14331_v15 = vcombine.low %v6902_v63, %v6905_v0  ;;  %v14291_v39 = vld [vmem:[%s17924_s6 + $0x340] sm:$0x7]  ;;  %v14292_v41 = vld [vmem:[%s17924_s6 + $0x354] sm:$0x8] }
  0x76   : > { %v14332_v17 = vcombine.low %v6909_v7, %v6912_v8  ;;  %v6925_v24 = vrot.slane %v14288_v14, 7  ;;  %v6929_v33 = vrot.slane %v14290_v27, 7  ;;  %v6936_v40 = vrot.slane %v14293_v28, 7  ;;  %v14294_v43 = vld [vmem:[%s17924_s6 + $0x35c] sm:$0x7] }
  0x77   : > { %16341 = vmatmul.mubr.msk.bf16.gmra.mrb[4].mxu0 %vm724_vm6, %v14327_v18  ;;  %v14313_v18 = vrot.slane %v14283_v10, 11  ;;  %v6924_v22 = vrot.slane %v6922_v12, 4  ;;  %v6923_v36 = vsel %vm18290_vm9, %v14314_v21, %v6922_v12  ;;  %v14296_v45 = vld [vmem:[%s17924_s6 + $0x374] sm:$0xf]  ;;  %v6932_v49 = vrot.slane %v14291_v39, 7 }
  0x78   : > { %16344 = vmatprep.mubr.msk.bf16.mxu0 %vm724_vm6, %v14328_v19  ;;  %v6917_v19 = vrot.slane %v6915_v9, 4  ;;  %v6931_v48 = vrot.slane %v6929_v33, 4  ;;  %v14316_v55 = vrot.slane %v14292_v41, 11  ;;  %v6938_v56 = vrot.slane %v6936_v40, 4  ;;  %v14299_v60 = vld [vmem:[%s17924_s6 + $0x390] sm:$0xf] }
  0x79   : > { %v6916_v31 = vsel %vm18290_vm9, %v14313_v18, %v6915_v9  ;;  %v6926_v37 = vsel %vm18290_vm9, %v6924_v22, %v6925_v24  ;;  %v6939_v57 = vrot.slane %v14294_v43, 7  ;;  %v6943_v61 = vrot.slane %v14296_v45, 7  ;;  %v14295_v0 = vld [vmem:[%s17924_s6 + $0x370] sm:$0x8]  ;;  %v14297_v9 = vld [vmem:[%s17924_s6 + $0x378] sm:$0x7] }
  0x7a   : > { %v6919_v32 = vsel %vm18290_vm9, %v6917_v19, %v6918_v20  ;;  %v6933_v63 = vsel %vm18290_vm9, %v6931_v48, %v6932_v49  ;;  %v6937_v7 = vsel %vm18290_vm9, %v14316_v55, %v6936_v40  ;;  %v6950_v10 = vrot.slane %v14299_v60, 7  ;;  %v14298_v11 = vld [vmem:[%s17924_s6 + $0x38c] sm:$0x8]  ;;  %v14300_v12 = vld [vmem:[%s17924_s6 + $0x394] sm:$0x7] }
  0x7b   : > { %v14333_v44 = vcombine.low %v6916_v31, %v6919_v32  ;;  %v6940_v8 = vsel %vm18290_vm9, %v6938_v56, %v6939_v57  ;;  %v14302_v13 = vld [vmem:[%s17924_s6 + $0x3ac] sm:$0xf]  ;;  %v6946_v18 = vrot.slane %v14297_v9, 7  ;;  %v18453_v20 = vld [vmem:[%s17924_s6 + $0x15c] sm:$0xf]  ;;  %v14318_v21 = vrot.slane %v14298_v11, 11 }
  0x7c   : > { %15841 = vmatmul.mubr.msk.bf16.gmra.mrb[8].mxu1 %vm724_vm6, %v18085_v54  ;;  %v14336_v19 = vcombine.low %v6937_v7, %v6940_v8  ;;  %v6952_v22 = vrot.slane %v6950_v10, 4  ;;  %v6953_v24 = vrot.slane %v14300_v12, 7  ;;  %v6957_v27 = vrot.slane %v14302_v13, 7  ;;  %v14359_v28 = vld [vmem:[%s17924_s6 + $0x34c] sm:$0xf] }
  0x7d   : > { %15844 = vmatprep.mubr.msk.bf16.mxu1 %vm724_vm6, %v18107_v25  ;;  %v13236_v39 = vld [vmem:[%s17924_s6 + $0x160] sm:$0x1]  ;;  %v6951_v40 = vsel %vm18290_vm9, %v14318_v21, %v6950_v10  ;;  %v14358_v43 = vld [vmem:[%s17924_s6 + $0x348] sm:$0x8]  ;;  %v14360_v48 = vld [vmem:[%s17924_s6 + $0x350] sm:$0x7] }
  0x7e   : > { %v6954_v41 = vsel %vm18290_vm9, %v6952_v22, %v6953_v24  ;;  %v18478_v49 = vld [vmem:[%s17924_s6 + $0x178] sm:$0xf]  ;;  %v1304_v60 = vrot.slane %v13236_v39, 5  ;;  %v7370_v7 = vrot.slane %v14360_v48, 7  ;;  %v13237_v8 = vld [vmem:[%s17924_s6 + $0x174] sm:$0xe] }
  0x7f   : > { %16345 = vmatmul.mubr.msk.bf16.gmra.mrb[8].mxu0 %vm724_vm6, %v14329_v46  ;;  %v14334_v46 = vcombine.low %v6923_v36, %v6926_v37  ;;  %v1301_v36 = vrot.slane %v18453_v20, 5  ;;  %v14303_v37 = vld [vmem:[%s17924_s6 + $0x3b0] sm:$0x7]  ;;  %v1308_v10 = vrot.slane %v18478_v49, 5  ;;  %v13239_v12 = vld [vmem:[%s17924_s6 + $0x17c] sm:$0x1] }
  0x80   : > { %16348 = vmatprep.mubr.msk.bf16.mxu0 %vm724_vm6, %v14330_v47  ;;  %v14315_v47 = vrot.slane %v14289_v38, 11  ;;  %v13234_v38 = vld [vmem:[%s17924_s6 + $0x158] sm:$0xe]  ;;  %v6960_v55 = vrot.slane %v14303_v37, 7  ;;  %v14363_v21 = vld [vmem:[%s17924_s6 + $0x36c] sm:$0x7] }
  0x81   : > { %v13282_v56 = vrot.slane %v13234_v38, 9  ;;  %v1303_v57 = vrot.slane %v1301_v36, 4  ;;  %v14364_v37 = vld [vmem:[%s17924_s6 + $0x380] sm:$0x8]  ;;  %v19093_v54 = vld [vmem:[%s17924_s6 + $0x218] sm:$0xc] }
  0x82   : > { %v6930_v62 = vsel %vm18290_vm9, %v14315_v47, %v6929_v33  ;;  %v14301_v33 = vld [vmem:[%s17924_s6 + $0x3a8] sm:$0x8]  ;;  %v6959_v47 = vrot.slane %v6957_v27, 4  ;;  %v19096_v30 = vld [vmem:[%s17924_s6 + $0x374] sm:$0xf] }
  0x83   : > { %v14335_v14 = vcombine.low %v6930_v62, %v6933_v63  ;;  %v14338_v62 = vcombine.low %v6951_v40, %v6954_v41  ;;  %v14406_v63 = vrot.slane %v14358_v43, 11  ;;  %v19125_v25 = vld [vmem:[%s17924_s6 + $0x238] sm:$0xf]  ;;  %v19157_v35 = vld [vmem:[%s17924_s6 + $0x38c] sm:$0x8] }
  0x84   : > { %15845 = vmatmul.mubr.msk.bf16.gmra.mrb[12].mxu1 %vm724_vm6, %v18127_v51  ;;  %v19078_v51 = vld [vmem:[%s17924_s6 + $0x21c] sm:$0xf]  ;;  %21921 = vst [vmem:[#allocation22_spill] sm:$0xff] %v19157_v35  ;;  %v19202_v1 = vld [vmem:[%s17924_s6 + $0x258] sm:$0x3] }
  0x85   : > { %15848 = vmatprep.mubr.msk.bf16.mxu1 %vm724_vm6, %v18149_v23  ;;  %v19075_v23 = vld [vmem:[%s17924_s6 + $0x35c] sm:$0x7] }
  0x87   : > { %16349 = vmatmul.mubr.msk.bf16.gmra.mrb[12].mxu0 %vm724_vm6, %v14331_v15  ;;  %v14317_v15 = vrot.slane %v14295_v0, 11  ;;  %v18482_v0 = vld [vmem:[%s17924_s6 + $0x194] sm:$0xf] }
  0x88   : > { %16352 = vmatprep.mubr.msk.bf16.mxu0 %vm724_vm6, %v14332_v17  ;;  %v6945_v17 = vrot.slane %v6943_v61, 4  ;;  %v1315_v22 = vrot.slane %v18482_v0, 5 }
  0x89   : > { %v6944_v31 = vsel %vm18290_vm9, %v14317_v15, %v6943_v61  ;;  %v14362_v61 = vld [vmem:[%s17924_s6 + $0x368] sm:$0xf]  ;;  %v6961_v15 = vsel %vm18290_vm9, %v6959_v47, %v6960_v55 }
  0x8a   : > { %v6947_v32 = vsel %vm18290_vm9, %v6945_v17, %v6946_v18  ;;  %v7374_v13 = vrot.slane %v14362_v61, 7  ;;  %v1302_v17 = vsel %vm17938_vm5, %v13282_v56, %v1301_v36  ;;  %v1305_v18 = vsel %vm17938_vm5, %v1303_v57, %v1304_v60  ;;  %v18517_v56 = vld [vmem:[%s17924_s6 + $0x3a0] sm:$0xf] }
  0x8b   : > { %v14337_v45 = vcombine.low %v6944_v31, %v6947_v32  ;;  %v13242_v31 = vld [vmem:[%s17924_s6 + $0x198] sm:$0x1]  ;;  %v1311_v36 = vrot.slane %v13239_v12, 5  ;;  %v13302_v40 = vcombine.low %v1302_v17, %v1305_v18  ;;  %v1317_v48 = vrot.slane %v1315_v22, 4  ;;  %v13245_v12 = vld [vmem:[%s17924_s6 + $0x1b4] sm:$0x1] }
  0x8c   : > { %15849 = vmatmul.mubr.msk.bf16.gmra.mrb[16].mxu1 %vm724_vm6, %v18169_v50  ;;  %v7376_v43 = vrot.slane %v7374_v13, 4  ;;  %v1318_v55 = vrot.slane %v13242_v31, 5  ;;  %v14408_v61 = vrot.slane %v14364_v37, 11  ;;  %v1325_v37 = vrot.slane %v13245_v12, 5  ;;  %v18572_v12 = vld [vmem:[%s17924_s6 + $0x204] sm:$0xf] }
  0x8d   : > { %15852 = vmatprep.mubr.msk.bf16.mxu1 %vm724_vm6, %v18192_v26 }
  0x8f   : > { %16353 = vmatmul.mubr.msk.bf16.gmra.mrb[16].mxu0 %vm724_vm6, %v14333_v44  ;;  %v7367_v44 = vrot.slane %v14359_v28, 7  ;;  %v13240_v28 = vld [vmem:[%s17924_s6 + $0x190] sm:$0xe] }
  0x90   : > { %16356 = vmatprep.mubr.msk.bf16.mxu0 %vm724_vm6, %v14334_v46  ;;  %v14319_v46 = vrot.slane %v14301_v33, 11  ;;  %v1310_v33 = vrot.slane %v1308_v10, 4  ;;  %v13284_v47 = vrot.slane %v13240_v28, 9 }
  0x91   : > { %v7369_v9 = vrot.slane %v7367_v44, 4  ;;  %v7368_v24 = vsel %vm18290_vm9, %v14406_v63, %v7367_v44  ;;  %v7377_v44 = vrot.slane %v14363_v21, 7  ;;  %v14367_v21 = vld [vmem:[%s17924_s6 + $0x39c] sm:$0x8] }
  0x92   : > { %v6958_v11 = vsel %vm18290_vm9, %v14319_v46, %v6957_v27  ;;  %v13283_v27 = vrot.slane %v13237_v8, 9  ;;  %v18514_v46 = vld [vmem:[%s17924_s6 + $0x1b0] sm:$0xf]  ;;  %v1312_v63 = vsel %vm17938_vm5, %v1310_v33, %v1311_v36  ;;  %v13243_v8 = vld [vmem:[%s17924_s6 + $0x1ac] sm:$0xe]  ;;  %v1316_v18 = vsel %vm17938_vm5, %v13284_v47, %v1315_v22 }
  0x93   : > { %v7371_v32 = vsel %vm18290_vm9, %v7369_v9, %v7370_v7  ;;  %v14339_v39 = vcombine.low %v6958_v11, %v6961_v15  ;;  %v1322_v11 = vrot.slane %v18514_v46, 5  ;;  %v18536_v15 = vld [vmem:[%s17924_s6 + $0x3bc] sm:$0xf]  ;;  %v7378_v17 = vsel %vm18290_vm9, %v7376_v43, %v7377_v44  ;;  %v13248_v33 = vld [vmem:[%s17924_s6 + $0x1d0] sm:$0x1] }
  0x94   : > { %15853 = vmatmul.mubr.msk.bf16.gmra.mrb[20].mxu1 %vm724_vm6, %v18211_v53  ;;  %v14426_v57 = vcombine.low %v7368_v24, %v7371_v32  ;;  %v1309_v60 = vsel %vm17938_vm5, %v13283_v27, %v1308_v10  ;;  %v13285_v31 = vrot.slane %v13243_v8, 9  ;;  %v13246_v32 = vld [vmem:[%s17924_s6 + $0x1c8] sm:$0xe]  ;;  %v14372_v47 = vld [vmem:[%s17924_s6 + $0x3c0] sm:$0x7] }
  0x95   : > { %15856 = vmatprep.mubr.msk.bf16.mxu1 %vm724_vm6, %v18234_v29  ;;  %v13303_v27 = vcombine.low %v1309_v60, %v1312_v63  ;;  %v1324_v36 = vrot.slane %v1322_v11, 4  ;;  %v1332_v60 = vrot.slane %v13248_v33, 5  ;;  %v18566_v63 = vld [vmem:[%s17924_s6 + $0x3d8] sm:$0xf] }
  0x97   : > { %16357 = vmatmul.mubr.msk.bf16.gmra.mrb[20].mxu0 %vm724_vm6, %v14335_v14  ;;  %v14365_v14 = vld [vmem:[%s17924_s6 + $0x384] sm:$0xf] }
  0x98   : > { %16360 = vmatprep.mubr.msk.bf16.mxu0 %vm724_vm6, %v14336_v19  ;;  %v14361_v19 = vld [vmem:[%s17924_s6 + $0x364] sm:$0x8]  ;;  %v7381_v38 = vrot.slane %v14365_v14, 7  ;;  %v7388_v14 = vrot.slane %v18517_v56, 7  ;;  %v13286_v56 = vrot.slane %v13246_v32, 9 }
  0x99   : > { %v14407_v41 = vrot.slane %v14361_v19, 11  ;;  %v1319_v19 = vsel %vm17938_vm5, %v1317_v48, %v1318_v55  ;;  %v18562_v48 = vld [vmem:[%s17924_s6 + $0x1e8] sm:$0xf] }
  0x9a   : > { %v7383_v9 = vrot.slane %v7381_v38, 4  ;;  %v7382_v28 = vsel %vm18290_vm9, %v14408_v61, %v7381_v38  ;;  %v13304_v38 = vcombine.low %v1316_v18, %v1319_v19  ;;  %v7390_v44 = vrot.slane %v7388_v14, 4  ;;  %v13249_v61 = vld [vmem:[%s17924_s6 + $0x1e4] sm:$0xe] }
  0x9b   : > { %v7375_v10 = vsel %vm18290_vm9, %v14407_v41, %v7374_v13  ;;  %v14369_v13 = vld [vmem:[%s17924_s6 + $0x3a4] sm:$0x7]  ;;  %v17698_v41 = vld [vmem:[%s21839_s1 + $0x38] sm:$0xff]   ;;  %v7398_v18 = vrot.slane %v14372_v47, 7  ;;  %v1336_v19 = vrot.slane %v18562_v48, 5 }
  0x9c   : > { %15857 = vmatmul.mubr.msk.bf16.gmra.mrb[24].mxu1 %vm724_vm6, %v18253_v58  ;;  %v14427_v43 = vcombine.low %v7375_v10, %v7378_v17  ;;  %v7391_v55 = vrot.slane %v14369_v13, 7  ;;  %v13251_v10 = vld [vmem:[%s17924_s6 + $0x1ec] sm:$0x1] }
  0x9d   : > { %15860 = vmatprep.mubr.msk.bf16.mxu1 %vm724_vm6, %v18275_v34  ;;  %v1338_v47 = vrot.slane %v1336_v19, 4 }
  0x9e   : > { %v7392_v32 = vsel %vm18290_vm9, %v7390_v44, %v7391_v55  ;;  %v1339_v55 = vrot.slane %v13251_v10, 5 }
  0x9f   : > { %16361 = vmatmul.mubr.msk.bf16.gmra.mrb[24].mxu0 %vm724_vm6, %v14337_v45  ;;  %v14366_v45 = vld [vmem:[%s17924_s6 + $0x388] sm:$0x7] }
  0xa0   : > { %16364 = vmatprep.mubr.msk.bf16.mxu0 %vm724_vm6, %v14338_v62  ;;  %v18522_v62 = vld [vmem:[%s17924_s6 + $0x1cc] sm:$0xf]  ;;  %v7384_v7 = vrot.slane %v14366_v45, 7  ;;  %v14409_v45 = vrot.slane %v14367_v21, 11  ;;  %v14373_v21 = vld [vmem:[%s17924_s6 + $0x3d4] sm:$0x8] }
  0xa1   : > { %v1329_v24 = vrot.slane %v18522_v62, 5 }
  0xa2   : > { %v7385_v22 = vsel %vm18290_vm9, %v7383_v9, %v7384_v7  ;;  %v1323_v7 = vsel %vm17938_vm5, %v13285_v31, %v1322_v11  ;;  %v17699_v11 = vld [vmem:[%s21839_s1 + $0x118] sm:$0xff]   ;;  %v7389_v13 = vsel %vm18290_vm9, %v14409_v45, %v7388_v14  ;;  %v14377_v31 = vld [vmem:[%s17924_s6 + $0x3f4] sm:$0xf]  ;;  %v13254_v14 = vld [vmem:[%s17924_s6 + $0x208] sm:$0x1] }
  0xa3   : > { %v14428_v9 = vcombine.low %v7382_v28, %v7385_v22  ;;  %v7402_v28 = vrot.slane %v18566_v63, 7  ;;  %v1330_v33 = vsel %vm17938_vm5, %v13286_v56, %v1329_v24  ;;  %v13252_v22 = vld [vmem:[%s17924_s6 + $0x200] sm:$0xe]  ;;  %v14378_v45 = vld [vmem:[%s17924_s6 + $0x3f8] sm:$0x7]  ;;  %v7409_v56 = vrot.slane %v14377_v31, 7 }
  0xa4   : > { %15861 = vmatmul.mubr.msk.bf16.gmra.mrb[28].mxu1 %vm724_vm6, %v18301_v3  ;;  %v1346_v10 = vrot.slane %v13254_v14, 5  ;;  %v13255_v31 = vld [vmem:[%s17924_s6 + $0x21c] sm:$0xe]  ;;  %v18696_v3 = vld [vmem:[%s17924_s6 + $0x290] sm:$0xf] }
  0xa5   : > { %15868 = vmatprep.mubr.msk.bf16.mxu1 %vm724_vm6, %v13302_v40  ;;  %v7395_v40 = vrot.slane %v18536_v15, 7  ;;  %v1326_v15 = vsel %vm17938_vm5, %v1324_v36, %v1325_v37  ;;  %v1343_v36 = vrot.slane %v18572_v12, 5  ;;  %v18602_v37 = vld [vmem:[%s21839_s1 + $0x40] sm:$0xff]   ;;  %v7404_v63 = vrot.slane %v7402_v28, 4 }
  0xa7   : > { %16365 = vmatmul.mubr.msk.bf16.gmra.mrb[28].mxu0 %vm724_vm6, %v14339_v39  ;;  %v14370_v39 = vld [vmem:[%s17924_s6 + $0x3b8] sm:$0x8]  ;;  %v7397_v17 = vrot.slane %v7395_v40, 4 }
  0xa8   : > { %16372 = vmatprep.mubr.msk.bf16.mxu0 %vm724_vm6, %v14426_v57  ;;  %v1331_v57 = vrot.slane %v1329_v24, 4  ;;  %v14410_v8 = vrot.slane %v14370_v39, 11  ;;  %v13305_v39 = vcombine.low %v1323_v7, %v1326_v15  ;;  %v13288_v7 = vrot.slane %v13252_v22, 9 }
  0xa9   : > { %v7399_v44 = vsel %vm18290_vm9, %v7397_v17, %v7398_v18 }
  0xaa   : > { %v7396_v24 = vsel %vm18290_vm9, %v14410_v8, %v7395_v40  ;;  %v14429_v40 = vcombine.low %v7389_v13, %v7392_v32  ;;  %v1345_v8 = vrot.slane %v1343_v36, 4  ;;  %v18625_v13 = vld [vmem:[%s17924_s6 + $0x23c] sm:$0xf]  ;;  %v1344_v14 = vsel %vm17938_vm5, %v13288_v7, %v1343_v36 }
  0xab   : > { %v14430_v15 = vcombine.low %v7396_v24, %v7399_v44  ;;  %v14379_v24 = vld [vmem:[%s17924_s6 + $0x40c] sm:$0x8] }
  0xac   : > { %15869 = vmatmul.mubr.msk.bf16.vlgmr.msra.gmra.mrb[0].mxu1 %vm724_vm6, %v13303_v27  ;;  %v14375_v27 = vld [vmem:[%s17924_s6 + $0x3dc] sm:$0x7] }
  0xad   : > { %15901 = vmatpush3.bf16.msra.mxu1 %v18348_v2  ;;  %15872 = vmatprep.mubr.msk.bf16.mxu1 %vm724_vm6, %v13304_v38  ;;  %v1333_v2 = vsel %vm17938_vm5, %v1331_v57, %v1332_v60  ;;  %v14376_v38 = vld [vmem:[%s17924_s6 + $0x3f0] sm:$0x8]  ;;  %v18613_v57 = vld [vmem:[%s17924_s6 + $0x220] sm:$0xf] }
  0xae   : > { %15902 = vmatprep.subr.bf16.mxu1 %v17698_v41  ;;  %v13306_v60 = vcombine.low %v1330_v33, %v1333_v2  ;;  %v14412_v18 = vrot.slane %v14376_v38, 11  ;;  %v1350_v32 = vrot.slane %v18613_v57, 5  ;;  %v14380_v33 = vld [vmem:[%s17924_s6 + $0x410] sm:$0xf]  ;;  %v14383_v2 = vld [vmem:[%s17924_s6 + $0x42c] sm:$0xf] }
  0xaf   : > { %16373 = vmatmul.mubr.msk.bf16.vlgmr.msra.gmra.mrb[0].mxu0 %vm724_vm6, %v14427_v43  ;;  %v13287_v43 = vrot.slane %v13249_v61, 9  ;;  %v14411_v61 = vrot.slane %v14373_v21, 11  ;;  %v7411_v21 = vrot.slane %v7409_v56, 4  ;;  %v7416_v44 = vrot.slane %v14380_v33, 7 }
  0xb0   : > { %16405 = vmatpush3.bf16.msra.mxu0 %v18365_v5  ;;  %16376 = vmatprep.mubr.msk.bf16.mxu0 %vm724_vm6, %v14428_v9  ;;  %v18618_v5 = vld [vmem:[%s21839_s1 + $0x120] sm:$0xff]   ;;  %v7405_v9 = vrot.slane %v14375_v27, 7  ;;  %v7412_v27 = vrot.slane %v14378_v45, 7  ;;  %v7410_v38 = vsel %vm18290_vm9, %v14412_v18, %v7409_v56  ;;  %v13289_v45 = vrot.slane %v13255_v31, 9  ;;  %v18658_v31 = vld [vmem:[%s17924_s6 + $0x258] sm:$0xf] }
  0xb1   : > { %16406 = vmatprep.subr.bf16.mxu0 %v17699_v11  ;;  %15903 = vmatpush3.bf16.msra.mxu1 %v17698_v41  ;;  %v1337_v17 = vsel %vm17938_vm5, %v13287_v43, %v1336_v19  ;;  %v1340_v41 = vsel %vm17938_vm5, %v1338_v47, %v1339_v55  ;;  %v7403_v19 = vsel %vm18290_vm9, %v14411_v61, %v7402_v28  ;;  %v1357_v43 = vrot.slane %v18625_v13, 5  ;;  %v13258_v47 = vld [vmem:[%s17924_s6 + $0x238] sm:$0xe]  ;;  %v13260_v55 = vld [vmem:[%s17924_s6 + $0x240] sm:$0x1] }
  0xb2   : > { %15936 = vmatprep.subr.bf16.mxu1 %v18602_v37  ;;  %v7406_v22 = vsel %vm18290_vm9, %v7404_v63, %v7405_v9  ;;  %v13307_v28 = vcombine.low %v1337_v17, %v1340_v41  ;;  %v7413_v36 = vsel %vm18290_vm9, %v7411_v21, %v7412_v27  ;;  %v14381_v61 = vld [vmem:[%s17924_s6 + $0x414] sm:$0x7]  ;;  %v7423_v63 = vrot.slane %v14383_v2, 7 }
  0xb3   : > { %v14431_v9 = vcombine.low %v7403_v19, %v7406_v22  ;;  %v13290_v56 = vrot.slane %v13258_v47, 9  ;;  %v1359_v17 = vrot.slane %v1357_v43, 4  ;;  %v1360_v18 = vrot.slane %v13260_v55, 5  ;;  %v13261_v19 = vld [vmem:[%s17924_s6 + $0x254] sm:$0xe] }
  0xb4   : > { %16407 = vmatpush3.bf16.msra.mxu0 %v17699_v11  ;;  %15873 = vmatmul.mubr.msk.bf16.gmra.mrb[4].mxu1 %vm724_vm6, %v13305_v39  ;;  %v13257_v11 = vld [vmem:[%s17924_s6 + $0x224] sm:$0x1]  ;;  %v1347_v39 = vsel %vm17938_vm5, %v1345_v8, %v1346_v10  ;;  %v14382_v8 = vld [vmem:[%s17924_s6 + $0x428] sm:$0x8]  ;;  %v14384_v10 = vld [vmem:[%s17924_s6 + $0x430] sm:$0x7]  ;;  %v14432_v41 = vcombine.low %v7410_v38, %v7413_v36  ;;  %v1351_v21 = vsel %vm17938_vm5, %v13289_v45, %v1350_v32 }
  0xb5   : > { %16440 = vmatprep.subr.bf16.mxu0 %v18618_v5  ;;  %15876 = vmatprep.mubr.msk.bf16.mxu1 %vm724_vm6, %v13306_v60  ;;  %v1353_v60 = vrot.slane %v13257_v11, 5  ;;  %v13308_v7 = vcombine.low %v1344_v14, %v1347_v39  ;;  %v7418_v27 = vrot.slane %v7416_v44, 4  ;;  %v7419_v33 = vrot.slane %v14381_v61, 7  ;;  %v18664_v11 = vld [vmem:[%s17924_s6 + $0x274] sm:$0xf] }
  0xb6   : > { %v14414_v22 = vrot.slane %v14382_v8, 11  ;;  %v7425_v14 = vrot.slane %v7423_v63, 4  ;;  %v7426_v39 = vrot.slane %v14384_v10, 7  ;;  %v1364_v38 = vrot.slane %v18658_v31, 5  ;;  %v14389_v45 = vld [vmem:[%s17924_s6 + $0x464] sm:$0xf] }
  0xb7   : > { %16377 = vmatmul.mubr.msk.bf16.gmra.mrb[4].mxu0 %vm724_vm6, %v14429_v40  ;;  %v1352_v40 = vrot.slane %v1350_v32, 4  ;;  %v13263_v32 = vld [vmem:[%s17924_s6 + $0x25c] sm:$0x1]  ;;  %v1361_v47 = vsel %vm17938_vm5, %v1359_v17, %v1360_v18  ;;  %v14385_v55 = vld [vmem:[%s17924_s6 + $0x444] sm:$0x8]  ;;  %v13291_v17 = vrot.slane %v13261_v19, 9 }
  0xb8   : > { %16380 = vmatprep.mubr.msk.bf16.mxu0 %vm724_vm6, %v14430_v15  ;;  %v14413_v15 = vrot.slane %v14379_v24, 11  ;;  %v14386_v24 = vld [vmem:[%s17924_s6 + $0x448] sm:$0xf]  ;;  %v14387_v36 = vld [vmem:[%s17924_s6 + $0x44c] sm:$0x7]  ;;  %v7424_v10 = vsel %vm18290_vm9, %v14414_v22, %v7423_v63  ;;  %v14415_v22 = vrot.slane %v14385_v55, 11 }
  0xb9   : > { %v1354_v2 = vsel %vm17938_vm5, %v1352_v40, %v1353_v60  ;;  %v1371_v40 = vrot.slane %v18664_v11, 5  ;;  %v13266_v8 = vld [vmem:[%s17924_s6 + $0x278] sm:$0x1]  ;;  %v14388_v18 = vld [vmem:[%s17924_s6 + $0x460] sm:$0x8]  ;;  %v1365_v55 = vsel %vm17938_vm5, %v13291_v17, %v1364_v38 }
  0xba   : > { %v13309_v60 = vcombine.low %v1351_v21, %v1354_v2  ;;  %v7417_v61 = vsel %vm18290_vm9, %v14413_v15, %v7416_v44  ;;  %v7437_v21 = vrot.slane %v14389_v45, 7  ;;  %v1366_v44 = vrot.slane %v1364_v38, 4 }
  0xbb   : > { %v1367_v15 = vrot.slane %v13263_v32, 5  ;;  %v1374_v4 = vrot.slane %v13266_v8, 5  ;;  %v14416_v45 = vrot.slane %v14388_v18, 11 }
  0xbc   : > { %15877 = vmatmul.mubr.msk.bf16.gmra.mrb[8].mxu1 %vm724_vm6, %v13307_v28  ;;  %v1358_v28 = vsel %vm17938_vm5, %v13290_v56, %v1357_v43  ;;  %v13264_v43 = vld [vmem:[%s17924_s6 + $0x270] sm:$0xe]  ;;  %v7427_v56 = vsel %vm18290_vm9, %v7425_v14, %v7426_v39  ;;  %v7433_v14 = vrot.slane %v14387_v36, 7  ;;  %v18699_v39 = vld [vmem:[%s17924_s6 + $0x2ac] sm:$0xf]  ;;  %v7439_v32 = vrot.slane %v7437_v21, 4 }
  0xbd   : > { %15880 = vmatprep.mubr.msk.bf16.mxu1 %vm724_vm6, %v13308_v7  ;;  %v7430_v7 = vrot.slane %v14386_v24, 7  ;;  %v13310_v2 = vcombine.low %v1358_v28, %v1361_v47  ;;  %v1373_v24 = vrot.slane %v1371_v40, 4  ;;  %v14434_v63 = vcombine.low %v7424_v10, %v7427_v56  ;;  %v13267_v47 = vld [vmem:[%s17924_s6 + $0x28c] sm:$0xe]  ;;  %v14391_v56 = vld [vmem:[%s17924_s6 + $0x47c] sm:$0x8] }
  0xbe   : > { %v1368_v36 = vsel %vm17938_vm5, %v1366_v44, %v1367_v15  ;;  %v1385_v18 = vrot.slane %v18699_v39, 5  ;;  %v13272_v44 = vld [vmem:[%s17924_s6 + $0x2b0] sm:$0x1] }
  0xbf   : > { %16381 = vmatmul.mubr.msk.bf16.gmra.mrb[8].mxu0 %vm724_vm6, %v14431_v9  ;;  %v7420_v9 = vsel %vm18290_vm9, %v7418_v27, %v7419_v33  ;;  %v13292_v33 = vrot.slane %v13264_v43, 9  ;;  %v7432_v19 = vrot.slane %v7430_v7, 4  ;;  %v1378_v43 = vrot.slane %v18696_v3, 5 }
  0xc0   : > { %16384 = vmatprep.mubr.msk.bf16.mxu0 %vm724_vm6, %v14432_v41  ;;  %v14390_v41 = vld [vmem:[%s17924_s6 + $0x468] sm:$0x7]  ;;  %v14433_v27 = vcombine.low %v7417_v61, %v7420_v9  ;;  %v13269_v61 = vld [vmem:[%s17924_s6 + $0x294] sm:$0x1]  ;;  %v14392_v9 = vld [vmem:[%s17924_s6 + $0x480] sm:$0xf]  ;;  %v1375_v10 = vsel %vm17938_vm5, %v1373_v24, %v1374_v4  ;;  %v7431_v38 = vsel %vm18290_vm9, %v14415_v22, %v7430_v7  ;;  %v7438_v4 = vsel %vm18290_vm9, %v14416_v45, %v7437_v21 }
  0xc1   : > { %v7440_v28 = vrot.slane %v14390_v41, 7  ;;  %v1372_v8 = vsel %vm17938_vm5, %v13292_v33, %v1371_v40  ;;  %v7434_v17 = vsel %vm18290_vm9, %v7432_v19, %v7433_v14  ;;  %v7444_v41 = vrot.slane %v14392_v9, 7  ;;  %v14394_v33 = vld [vmem:[%s17924_s6 + $0x498] sm:$0x8]  ;;  %v14396_v19 = vld [vmem:[%s17924_s6 + $0x4a0] sm:$0x7] }
  0xc2   : > { %v13311_v40 = vcombine.low %v1365_v55, %v1368_v36  ;;  %v13293_v7 = vrot.slane %v13267_v47, 9  ;;  %v1380_v22 = vrot.slane %v1378_v43, 4  ;;  %v1381_v34 = vrot.slane %v13269_v61, 5  ;;  %v18734_v36 = vld [vmem:[%s17924_s6 + $0x2c8] sm:$0xf] }
  0xc3   : > { %v7441_v15 = vsel %vm18290_vm9, %v7439_v32, %v7440_v28  ;;  %v14435_v14 = vcombine.low %v7431_v38, %v7434_v17  ;;  %v1387_v58 = vrot.slane %v1385_v18, 4  ;;  %v1388_v55 = vrot.slane %v13272_v44, 5  ;;  %v13273_v17 = vld [vmem:[%s17924_s6 + $0x2c4] sm:$0xe]  ;;  %v14401_v44 = vld [vmem:[%s17924_s6 + $0x4d4] sm:$0xf] }
  0xc4   : > { %15881 = vmatmul.mubr.msk.bf16.gmra.mrb[12].mxu1 %vm724_vm6, %v13309_v60  ;;  %v14395_v60 = vld [vmem:[%s17924_s6 + $0x49c] sm:$0xf]  ;;  %v14436_v21 = vcombine.low %v7438_v4, %v7441_v15  ;;  %v14417_v45 = vrot.slane %v14391_v56, 11  ;;  %v7446_v32 = vrot.slane %v7444_v41, 4  ;;  %v14418_v47 = vrot.slane %v14394_v33, 11 }
  0xc5   : > { %15884 = vmatprep.mubr.msk.bf16.mxu1 %vm724_vm6, %v13310_v2  ;;  %v13270_v2 = vld [vmem:[%s17924_s6 + $0x2a8] sm:$0xe]  ;;  %v7451_v24 = vrot.slane %v14395_v60, 7  ;;  %v18737_v60 = vld [vmem:[%s17924_s6 + $0x2e4] sm:$0xf]  ;;  %v1379_v38 = vsel %vm17938_vm5, %v13293_v7, %v1378_v43  ;;  %v1382_v56 = vsel %vm17938_vm5, %v1380_v22, %v1381_v34  ;;  %v1389_v4 = vsel %vm17938_vm5, %v1387_v58, %v1388_v55 }
  0xc6   : > { %v13294_v9 = vrot.slane %v13270_v2, 9  ;;  %v1392_v2 = vrot.slane %v18734_v36, 5  ;;  %v13275_v15 = vld [vmem:[%s17924_s6 + $0x2cc] sm:$0x1]  ;;  %v14397_v43 = vld [vmem:[%s17924_s6 + $0x4b4] sm:$0x8]  ;;  %v7445_v34 = vsel %vm18290_vm9, %v14417_v45, %v7444_v41 }
  0xc7   : > { %16385 = vmatmul.mubr.msk.bf16.gmra.mrb[12].mxu0 %vm724_vm6, %v14433_v27  ;;  %v14393_v27 = vld [vmem:[%s17924_s6 + $0x484] sm:$0x7]  ;;  %v7453_v61 = vrot.slane %v7451_v24, 4  ;;  %v13276_v7 = vld [vmem:[%s17924_s6 + $0x2e0] sm:$0xe]  ;;  %v7452_v58 = vsel %vm18290_vm9, %v14418_v47, %v7451_v24  ;;  %v7465_v55 = vrot.slane %v14401_v44, 7 }
  0xc8   : > { %16388 = vmatprep.mubr.msk.bf16.mxu0 %vm724_vm6, %v14434_v63  ;;  %v13312_v63 = vcombine.low %v1372_v8, %v1375_v10  ;;  %v7447_v28 = vrot.slane %v14393_v27, 7  ;;  %v7454_v8 = vrot.slane %v14396_v19, 7  ;;  %v14398_v10 = vld [vmem:[%s17924_s6 + $0x4b8] sm:$0xf]  ;;  %v1399_v27 = vrot.slane %v18737_v60, 5 }
  0xc9   : > { %v13278_v22 = vld [vmem:[%s17924_s6 + $0x2e8] sm:$0x1]  ;;  %v13295_v29 = vrot.slane %v13273_v17, 9  ;;  %v1394_v41 = vrot.slane %v1392_v2, 4  ;;  %v1395_v45 = vrot.slane %v13275_v15, 5  ;;  %v14419_v47 = vrot.slane %v14397_v43, 11 }
  0xca   : > { %v7448_v33 = vsel %vm18290_vm9, %v7446_v32, %v7447_v28  ;;  %v7455_v19 = vsel %vm18290_vm9, %v7453_v61, %v7454_v8  ;;  %v14402_v32 = vld [vmem:[%s17924_s6 + $0x4d8] sm:$0x7]  ;;  %v1401_v53 = vrot.slane %v1399_v27, 4  ;;  %v7467_v44 = vrot.slane %v7465_v55, 4  ;;  %v13279_v43 = vld [vmem:[%s17924_s6 + $0x2fc] sm:$0xe] }
  0xcb   : > { %v14437_v28 = vcombine.low %v7445_v34, %v7448_v33  ;;  %v14438_v24 = vcombine.low %v7452_v58, %v7455_v19  ;;  %v1393_v15 = vsel %vm17938_vm5, %v13295_v29, %v1392_v2  ;;  %v1396_v34 = vsel %vm17938_vm5, %v1394_v41, %v1395_v45  ;;  %v13281_v58 = vld [vmem:[%s17924_s6 + $0x304] sm:$0x1]  ;;  %v14403_v19 = vld [vmem:[%s17924_s6 + $0x4ec] sm:$0x8]  ;;  %v14460_v41 = vld [vmem:[%s17924_s6 + $0x350] sm:$0xe] }
  0xcc   : > { %15885 = vmatmul.mubr.msk.bf16.gmra.mrb[16].mxu1 %vm724_vm6, %v13311_v40  ;;  %v1386_v40 = vsel %vm17938_vm5, %v13294_v9, %v1385_v18  ;;  %v13313_v18 = vcombine.low %v1379_v38, %v1382_v56  ;;  %v14400_v9 = vld [vmem:[%s17924_s6 + $0x4d0] sm:$0x8]  ;;  %v1402_v38 = vrot.slane %v13278_v22, 5  ;;  %v18772_v56 = vld [vmem:[%s17924_s6 + $0x300] sm:$0xf] }
  0xcd   : > { %15888 = vmatprep.mubr.msk.bf16.mxu1 %vm724_vm6, %v13312_v63  ;;  %v7458_v63 = vrot.slane %v14398_v10, 7  ;;  %v13296_v10 = vrot.slane %v13276_v7, 9  ;;  %v14420_v17 = vrot.slane %v14400_v9, 11  ;;  %v1406_v33 = vrot.slane %v18772_v56, 5  ;;  %v14461_v7 = vld [vmem:[%s17924_s6 + $0x354] sm:$0xf] }
  0xce   : > { %v13315_v9 = vcombine.low %v1393_v15, %v1396_v34  ;;  %v7881_v45 = vrot.slane %v14461_v7, 5  ;;  %v13336_v7 = vld [vmem:[%s17924_s6 + $0x160] sm:$0xf] }
  0xcf   : > { %16389 = vmatmul.mubr.msk.bf16.gmra.mrb[16].mxu0 %vm724_vm6, %v14435_v14  ;;  %v14399_v14 = vld [vmem:[%s17924_s6 + $0x4bc] sm:$0x7]  ;;  %v7460_v61 = vrot.slane %v7458_v63, 4  ;;  %v1400_v22 = vsel %vm17938_vm5, %v13296_v10, %v1399_v27  ;;  %v7459_v29 = vsel %vm18290_vm9, %v14419_v47, %v7458_v63  ;;  %v14405_v27 = vld [vmem:[%s17924_s6 + $0x4f4] sm:$0x7]  ;;  %v1408_v10 = vrot.slane %v1406_v33, 4 }
  0xd0   : > { %16392 = vmatprep.mubr.msk.bf16.mxu0 %vm724_vm6, %v14436_v21  ;;  %v13314_v21 = vcombine.low %v1386_v40, %v1389_v4  ;;  %v7461_v8 = vrot.slane %v14399_v14, 7  ;;  %v7468_v40 = vrot.slane %v14402_v32, 7  ;;  %v14404_v4 = vld [vmem:[%s17924_s6 + $0x4f0] sm:$0xf]  ;;  %v1409_v63 = vrot.slane %v13281_v58, 5 }
  0xd1   : > { %v7472_v14 = vrot.slane %v14404_v4, 7  ;;  %v14421_v47 = vrot.slane %v14403_v19, 11  ;;  %v7475_v4 = vrot.slane %v14405_v27, 7  ;;  %v14463_v19 = vld [vmem:[%s17924_s6 + $0x36c] sm:$0xe] }
  0xd2   : > { %v7462_v2 = vsel %vm18290_vm9, %v7460_v61, %v7461_v8  ;;  %v1410_v34 = vsel %vm17938_vm5, %v1408_v10, %v1409_v63  ;;  %v14468_v27 = vld [vmem:[%s17924_s6 + $0x390] sm:$0x1] }
  0xd3   : > { %v7474_v8 = vrot.slane %v7472_v14, 4 }
  0xd4   : > { %15889 = vmatmul.mubr.msk.bf16.gmra.mrb[20].mxu1 %vm724_vm6, %v13313_v18  ;;  %v1403_v18 = vsel %vm17938_vm5, %v1401_v53, %v1402_v38  ;;  %v7469_v53 = vsel %vm18290_vm9, %v7467_v44, %v7468_v40  ;;  %v14462_v38 = vld [vmem:[%s17924_s6 + $0x358] sm:$0x1]  ;;  %v7883_v44 = vrot.slane %v7881_v45, 4 }
  0xd5   : > { %15892 = vmatprep.mubr.msk.bf16.mxu1 %vm724_vm6, %v13314_v21  ;;  %v7466_v21 = vsel %vm18290_vm9, %v14420_v17, %v7465_v55  ;;  %v13316_v32 = vcombine.low %v1400_v22, %v1403_v18  ;;  %v14508_v55 = vrot.slane %v14460_v41, 9  ;;  %v14464_v17 = vld [vmem:[%s17924_s6 + $0x370] sm:$0xf]  ;;  %v7884_v40 = vrot.slane %v14462_v38, 5 }
  0xd6   : > { %v14440_v61 = vcombine.low %v7466_v21, %v7469_v53  ;;  %v7473_v22 = vsel %vm18290_vm9, %v14421_v47, %v7472_v14  ;;  %v7476_v18 = vsel %vm18290_vm9, %v7474_v8, %v7475_v4  ;;  %v7888_v58 = vrot.slane %v14464_v17, 5  ;;  %v14466_v14 = vld [vmem:[%s17924_s6 + $0x388] sm:$0xe]  ;;  %v13338_v8 = vld [vmem:[%s17924_s6 + $0x198] sm:$0xf] }
  0xd7   : > { %16393 = vmatmul.mubr.msk.bf16.gmra.mrb[20].mxu0 %vm724_vm6, %v14437_v28  ;;  %v13297_v28 = vrot.slane %v13279_v43, 9  ;;  %v14467_v43 = vld [vmem:[%s17924_s6 + $0x38c] sm:$0xf]  ;;  %v13356_v53 = vcombine.low %v18453_v20, %v13336_v7  ;;  %v14441_v41 = vcombine.low %v7473_v22, %v7476_v18  ;;  %v14470_v47 = vld [vmem:[%s17924_s6 + $0x3a8] sm:$0xf]  ;;  %v13358_v22 = vcombine.low %v18482_v0, %v13338_v8 }
  0xd8   : > { %16396 = vmatprep.mubr.msk.bf16.mxu0 %vm724_vm6, %v14438_v24  ;;  %v14439_v24 = vcombine.low %v7459_v29, %v7462_v2  ;;  %v7885_v2 = vsel %vm17938_vm5, %v7883_v44, %v7884_v40  ;;  %v7895_v21 = vrot.slane %v14467_v43, 5  ;;  %v7890_v10 = vrot.slane %v7888_v58, 4  ;;  %v13337_v20 = vld [vmem:[%s17924_s6 + $0x17c] sm:$0xf]  ;;  %v14471_v43 = vld [vmem:[%s17924_s6 + $0x3ac] sm:$0x1] }
  0xd9   : > { %v1407_v15 = vsel %vm17938_vm5, %v13297_v28, %v1406_v33  ;;  %v7882_v33 = vsel %vm17938_vm5, %v14508_v55, %v7881_v45  ;;  %v14509_v28 = vrot.slane %v14463_v19, 9  ;;  %v14510_v45 = vrot.slane %v14466_v14, 9  ;;  %v14472_v18 = vld [vmem:[%s17924_s6 + $0x3c0] sm:$0xe] }
  0xda   : > { %v13317_v29 = vcombine.low %v1407_v15, %v1410_v34  ;;  %v7897_v38 = vrot.slane %v7895_v21, 4  ;;  %v7902_v17 = vrot.slane %v14470_v47, 5  ;;  %v13357_v44 = vcombine.low %v18478_v49, %v13337_v20  ;;  %v14469_v34 = vld [vmem:[%s17924_s6 + $0x3a4] sm:$0xe]  ;;  %v17711_v49 = vld [vmem:[%s21839_s1 + $0x48] sm:$0xff]  }
  0xdb   : > { %v7889_v4 = vsel %vm17938_vm5, %v14509_v28, %v7888_v58  ;;  %v7896_v40 = vsel %vm17938_vm5, %v14510_v45, %v7895_v21  ;;  %v14474_v58 = vld [vmem:[%s17924_s6 + $0x3c8] sm:$0x1]  ;;  %v14476_v21 = vld [vmem:[%s17924_s6 + $0x3e0] sm:$0xf]  ;;  %v13340_v28 = vld [vmem:[%s17924_s6 + $0x1d0] sm:$0xf] }
  0xdc   : > { %15893 = vmatmul.mubr.msk.bf16.gmra.mrb[24].mxu1 %vm724_vm6, %v13315_v9  ;;  %v14465_v9 = vld [vmem:[%s17924_s6 + $0x374] sm:$0x1]  ;;  %v7904_v19 = vrot.slane %v7902_v17, 4  ;;  %v7912_v0 = vrot.slane %v14474_v58, 5  ;;  %v18908_v58 = vld [vmem:[%s17924_s6 + $0x430] sm:$0xe] }
  0xdd   : > { %15896 = vmatprep.mubr.msk.bf16.mxu1 %vm724_vm6, %v13316_v32  ;;  %v14528_v32 = vcombine.low %v7882_v33, %v7885_v2  ;;  %v7891_v63 = vrot.slane %v14465_v9, 5  ;;  %v14511_v2 = vrot.slane %v14469_v34, 9  ;;  %v7905_v9 = vrot.slane %v14471_v43, 5 }
  0xdf   : > { %16397 = vmatmul.mubr.msk.bf16.gmra.mrb[24].mxu0 %vm724_vm6, %v14439_v24  ;;  %v7898_v24 = vrot.slane %v14468_v27, 5  ;;  %v7892_v55 = vsel %vm17938_vm5, %v7890_v10, %v7891_v63  ;;  %v17713_v27 = vld [vmem:[%s21839_s1 + $0x128] sm:$0xff]   ;;  %v7916_v10 = vrot.slane %v14476_v21, 5  ;;  %v18868_v63 = vld [vmem:[%s21839_s1 + $0x50] sm:$0xff]   ;;  %v7906_v45 = vsel %vm17938_vm5, %v7904_v19, %v7905_v9 }
  0xe0   : > { %16400 = vmatprep.mubr.msk.bf16.mxu0 %vm724_vm6, %v14440_v61  ;;  %v14473_v61 = vld [vmem:[%s17924_s6 + $0x3c4] sm:$0xf]  ;;  %21909 = vst [vmem:[#allocation19_spill] sm:$0xff] %v18868_v63  ;;  %v18919_v19 = vld [vmem:[%s17924_s6 + $0x44c] sm:$0xe] }
  0xe1   : > { %v7899_v15 = vsel %vm17938_vm5, %v7897_v38, %v7898_v24  ;;  %v7909_v7 = vrot.slane %v14473_v61, 5  ;;  %v14475_v38 = vld [vmem:[%s17924_s6 + $0x3dc] sm:$0xe]  ;;  %v14477_v24 = vld [vmem:[%s17924_s6 + $0x3e4] sm:$0x1] }
  0xe2   : > { %v14530_v33 = vcombine.low %v7896_v40, %v7899_v15  ;;  %v14478_v61 = vld [vmem:[%s17924_s6 + $0x3f8] sm:$0xe]  ;;  %v18899_v40 = vld [vmem:[%s17924_s6 + $0x414] sm:$0xe]  ;;  %v14513_v43 = vrot.slane %v14475_v38, 9 }
  0xe3   : > { %v7911_v14 = vrot.slane %v7909_v7, 4  ;;  %v18902_v15 = vld [vmem:[%s17924_s6 + $0x434] sm:$0xf]  ;;  %v14514_v9 = vrot.slane %v14478_v61, 9  ;;  %v18942_v38 = vld [vmem:[%s17924_s6 + $0x468] sm:$0xe] }
  0xe4   : > { %15897 = vmatmul.mubr.msk.bf16.gmra.mrb[28].mxu1 %vm724_vm6, %v13317_v29  ;;  %v14529_v29 = vcombine.low %v7889_v4, %v7892_v55  ;;  %v18886_v4 = vld [vmem:[%s17924_s6 + $0x418] sm:$0xf]  ;;  %v18891_v55 = vld [vmem:[%s21839_s1 + $0x130] sm:$0xff]  }
  0xe5   : > { %15904 = vmatprep.mubr.msk.bf16.mxu1 %vm724_vm6, %v13356_v53  ;;  %v14512_v53 = vrot.slane %v14472_v18, 9  ;;  %21910 = vst [vmem:[#allocation20_spill] sm:$0xff] %v18891_v55  ;;  %v18905_v18 = vld [vmem:[%s17924_s6 + $0x41c] sm:$0x1] }
  0xe7   : > { %16401 = vmatmul.mubr.msk.bf16.gmra.mrb[28].mxu0 %vm724_vm6, %v14441_v41  ;;  %v13339_v41 = vld [vmem:[%s17924_s6 + $0x1b4] sm:$0xf]  ;;  %v7910_v20 = vsel %vm17938_vm5, %v14512_v53, %v7909_v7  ;;  %v7918_v7 = vrot.slane %v7916_v10, 4 }
  0xe8   : > { %16408 = vmatprep.mubr.msk.bf16.mxu0 %vm724_vm6, %v14528_v32  ;;  %v18861_v32 = vld [vmem:[%s17924_s6 + $0x3fc] sm:$0xf]  ;;  %v13359_v47 = vcombine.low %v18514_v46, %v13339_v41  ;;  %v13360_v46 = vcombine.low %v18522_v62, %v13340_v28  ;;  %v18911_v62 = vld [vmem:[%s17924_s6 + $0x450] sm:$0xf] }
  0xe9   : > { %v7923_v8 = vrot.slane %v18861_v32, 5  ;;  %v21855_v41 = vrot.slane %v18911_v62, 5  ;;  %v7917_v32 = vsel %vm17938_vm5, %v14513_v43, %v7916_v10  ;;  %v14516_v10 = vrot.slane %v18908_v58, 9  ;;  %v18970_v43 = vld [vmem:[%s17924_s6 + $0x4a0] sm:$0xe] }
  0xea   : > { %v21932_v35 = vrot.slane %v18970_v43, 9 }
  0xeb   : > { %v7925_v21 = vrot.slane %v7923_v8, 4 }
  0xec   : > { %15905 = vmatmul.mubr.msk.bf16.vlgmr.msra.gmra.mrb[0].mxu1 %vm724_vm6, %v13357_v44  ;;  %v14480_v44 = vld [vmem:[%s17924_s6 + $0x400] sm:$0x1] }
  0xed   : > { %15937 = vmatpush3.bf16.msra.mxu1 %v18602_v37  ;;  %15908 = vmatprep.mubr.msk.bf16.mxu1 %vm724_vm6, %v13358_v22  ;;  %v7903_v37 = vsel %vm17938_vm5, %v14511_v2, %v7902_v17  ;;  %v18895_v17 = vld [vmem:[%s17924_s6 + $0x1ec] sm:$0xf]  ;;  %v7919_v22 = vrot.slane %v14477_v24, 5  ;;  %v18916_v2 = vld [vmem:[%s17924_s6 + $0x438] sm:$0x1]  ;;  %v7926_v53 = vrot.slane %v14480_v44, 5 }
  0xee   : > { %15938 = vmatprep.subr.bf16.mxu1 %v17711_v49  ;;  %v14531_v34 = vcombine.low %v7903_v37, %v7906_v45  ;;  %v14515_v37 = vrot.slane %v18899_v40, 9  ;;  %v18939_v45 = vld [vmem:[%s17924_s6 + $0x454] sm:$0x1]  ;;  %v18961_v44 = vld [vmem:[%s17924_s6 + $0x488] sm:$0xf] }
  0xef   : > { %16409 = vmatmul.mubr.msk.bf16.vlgmr.msra.gmra.mrb[0].mxu0 %vm724_vm6, %v14529_v29  ;;  %v7920_v28 = vsel %vm17938_vm5, %v7918_v7, %v7919_v22  ;;  %v7927_v61 = vsel %vm17938_vm5, %v7925_v21, %v7926_v53  ;;  %v18964_v40 = vld [vmem:[%s17924_s6 + $0x48c] sm:$0x1]  ;;  %v18973_v7 = vld [vmem:[%s17924_s6 + $0x4a4] sm:$0xf]  ;;  %v7947_v58 = vrot.slane %v18939_v45, 5  ;;  %v21856_v21 = vrot.slane %v18961_v44, 5 }
  0xf0   : > { %16441 = vmatpush3.bf16.msra.mxu0 %v18618_v5  ;;  %16412 = vmatprep.mubr.msk.bf16.mxu0 %vm724_vm6, %v14530_v33  ;;  %v7913_v5 = vsel %vm17938_vm5, %v7911_v14, %v7912_v0  ;;  %v7930_v33 = vrot.slane %v18886_v4, 5  ;;  %v18924_v14 = vld [vmem:[%s17924_s6 + $0x46c] sm:$0xf]  ;;  %v7937_v0 = vrot.slane %v18902_v15, 5  ;;  %v14533_v22 = vcombine.low %v7917_v32, %v7920_v28  ;;  %v18987_v53 = vld [vmem:[%s17924_s6 + $0x4dc] sm:$0xf] }
  0xf1   : > { %16442 = vmatprep.subr.bf16.mxu0 %v17713_v27  ;;  %15939 = vmatpush3.bf16.msra.mxu1 %v17711_v49  ;;  %v14532_v29 = vcombine.low %v7910_v20, %v7913_v5  ;;  %v13342_v49 = vld [vmem:[%s17924_s6 + $0x208] sm:$0xf]  ;;  %v18949_v20 = vld [vmem:[%s17924_s6 + $0x470] sm:$0x1]  ;;  %v7924_v5 = vsel %vm17938_vm5, %v14514_v9, %v7923_v8  ;;  %v13344_v32 = vld [vmem:[%s17924_s6 + $0x240] sm:$0xf] }
  0xf2   : > { %15972 = vmatprep.subr.bf16.mxu1 %v18868_v63  ;;  %v7932_v24 = vrot.slane %v7930_v33, 4  ;;  %v13362_v15 = vcombine.low %v18572_v12, %v13342_v49  ;;  %v7939_v8 = vrot.slane %v7937_v0, 4  ;;  %v18982_v12 = vld [vmem:[%s17924_s6 + $0x4c0] sm:$0xf]  ;;  %v14534_v49 = vcombine.low %v7924_v5, %v7927_v61  ;;  %v19010_v4 = vld [vmem:[%s17924_s6 + $0x4d8] sm:$0xe] }
  0xf3   : > { %v21857_v45 = vrot.slane %v18973_v7, 5  ;;  %v7931_v5 = vsel %vm17938_vm5, %v14515_v37, %v7930_v33  ;;  %v21866_v37 = vrot.slane %v18982_v12, 5  ;;  %v19028_v33 = vld [vmem:[%s17924_s6 + $0x4e0] sm:$0x1]  ;;  %v21911_v50 = vrot.slane %v18987_v53, 5 }
  0xf4   : > { %16443 = vmatpush3.bf16.msra.mxu0 %v17713_v27  ;;  %15909 = vmatmul.mubr.msk.bf16.gmra.mrb[4].mxu1 %vm724_vm6, %v13359_v47  ;;  %v13361_v27 = vcombine.low %v18562_v48, %v18895_v17  ;;  %v7933_v48 = vrot.slane %v18905_v18, 5  ;;  %v7940_v47 = vrot.slane %v18916_v2, 5  ;;  %v18958_v17 = vld [vmem:[%s17924_s6 + $0x484] sm:$0xe]  ;;  %v18979_v2 = vld [vmem:[%s17924_s6 + $0x4a8] sm:$0x1] }
  0xf5   : > { %16476 = vmatprep.subr.bf16.mxu0 %v18891_v55  ;;  %15912 = vmatprep.mubr.msk.bf16.mxu1 %vm724_vm6, %v13360_v46  ;;  %v21854_v46 = vrot.slane %v18924_v14, 5  ;;  %v13343_v18 = vld [vmem:[%s17924_s6 + $0x224] sm:$0xf]  ;;  %v19060_v26 = vrot.slane %v21866_v37, 4  ;;  %v21912_v37 = vrot.slane %v18911_v62, 5 }
  0xf6   : > { %v7934_v61 = vsel %vm17938_vm5, %v7932_v24, %v7933_v48  ;;  %v19018_v48 = vld [vmem:[%s17924_s6 + $0x4f8] sm:$0xf]  ;;  %v13363_v9 = vcombine.low %v18613_v57, %v13343_v18  ;;  %v19039_v57 = vrot.slane %v21857_v45, 4  ;;  %v13345_v18 = vld [vmem:[%s17924_s6 + $0x25c] sm:$0xf] }
  0xf7   : > { %16413 = vmatmul.mubr.msk.bf16.gmra.mrb[4].mxu0 %vm724_vm6, %v14531_v34  ;;  %v7946_v34 = vrot.slane %v21855_v41, 4  ;;  %v18993_v28 = vrot.slane %v21854_v46, 4  ;;  %v19007_v46 = vld [vmem:[%s17924_s6 + $0x4c4] sm:$0x1]  ;;  %v7938_v41 = vsel %vm17938_vm5, %v14516_v10, %v7937_v0  ;;  %v14535_v24 = vcombine.low %v7931_v5, %v7934_v61  ;;  %v19055_v45 = vld [vmem:[%s17924_s6 + $0x358] sm:$0xf] }
  0xf8   : > { %16416 = vmatprep.mubr.msk.bf16.mxu0 %vm724_vm6, %v14532_v29  ;;  %v18997_v29 = vld [vmem:[%s17924_s6 + $0x4bc] sm:$0xe]  ;;  %v13364_v0 = vcombine.low %v18625_v13, %v13344_v32  ;;  %v19064_v5 = vrot.slane %v21911_v50, 4  ;;  %v19068_v32 = vld [vmem:[%s17924_s6 + $0x204] sm:$0x3]  ;;  %v21913_v50 = vrot.slane %v18919_v19, 9 }
  0xf9   : > { %v7948_v61 = vsel %vm17938_vm5, %v7946_v34, %v7947_v58  ;;  %v21914_v62 = vrot.slane %v19018_v48, 5  ;;  %v19118_v58 = vld [vmem:[%s17924_s6 + $0x370] sm:$0x8]  ;;  %v21918_v34 = vrot.slane %v18942_v38, 9  ;;  %v19150_v38 = vld [vmem:[%s17924_s6 + $0x234] sm:$0xc] }
  0xfa   : > { %v7945_v13 = vsel %vm17938_vm5, %v21913_v50, %v21912_v37  ;;  %v19107_v37 = vld [vmem:[%s17924_s6 + $0x220] sm:$0x3]  ;;  %v19175_v55 = vld [vmem:[%s17924_s6 + $0x394] sm:$0x7] }
  0xfb   : > { %v19101_v19 = vrot.slane %v21914_v62, 4  ;;  %v19128_v62 = vld [vmem:[%s17924_s6 + $0x390] sm:$0xf]  ;;  %21924 = vst [vmem:[#allocation23_spill] sm:$0xff] %v19175_v55 }
  0xfc   : > { %15913 = vmatmul.mubr.msk.bf16.gmra.mrb[8].mxu1 %vm724_vm6, %v13361_v27  ;;  %v19031_v27 = vld [vmem:[%s17924_s6 + $0x200] sm:$0xf]  ;;  %21916 = vst [vmem:[#allocation21_spill] sm:$0xff] %v19128_v62 }
  0xfd   : > { %15916 = vmatprep.mubr.msk.bf16.mxu1 %vm724_vm6, %v13362_v15  ;;  %v19046_v15 = vld [vmem:[%s17924_s6 + $0x4fc] sm:$0x1]  ;;  %v21915_v50 = vrot.slane %v19031_v27, 6 }
  0xff   : > { %16417 = vmatmul.mubr.msk.bf16.gmra.mrb[8].mxu0 %vm724_vm6, %v14533_v22  ;;  %v19024_v22 = vrot.slane %v21856_v21, 4  ;;  %v19043_v21 = vld [vmem:[%s17924_s6 + $0x4f4] sm:$0xe] }
 0x100   : > { %16420 = vmatprep.mubr.msk.bf16.mxu0 %vm724_vm6, %v14534_v49  ;;  %v7941_v49 = vsel %vm17938_vm5, %v7939_v8, %v7940_v47  ;;  %v19052_v8 = vld [vmem:[%s17924_s6 + $0x1fc] sm:$0xc]  ;;  %v19072_v47 = vld [vmem:[%s17924_s6 + $0x354] sm:$0x8] }
 0x101   : > { %v14536_v10 = vcombine.low %v7938_v41, %v7941_v49  ;;  %v13346_v41 = vld [vmem:[%s17924_s6 + $0x278] sm:$0xf]  ;;  %v21917_v49 = vrot.slane %v18924_v14, 5 }
 0x102   : > { %v19147_v14 = vld [vmem:[%s17924_s6 + $0x378] sm:$0x7] }
 0x103   : > { %v7952_v59 = vsel %vm17938_vm5, %v21918_v34, %v21917_v49  ;;  %v14537_v49 = vcombine.low %v7945_v13, %v7948_v61  ;;  %v19154_v34 = vld [vmem:[%s17924_s6 + $0x23c] sm:$0x3] }
 0x104   : > { %15917 = vmatmul.mubr.msk.bf16.gmra.mrb[12].mxu1 %vm724_vm6, %v13363_v9 }
 0x105   : > { %15920 = vmatprep.mubr.msk.bf16.mxu1 %vm724_vm6, %v13364_v0  ;;  %v19112_v0 = vrot.slane %v21915_v50, 4  ;;  %v13347_v50 = vld [vmem:[%s17924_s6 + $0x294] sm:$0xf] }
 0x107   : > { %16421 = vmatmul.mubr.msk.bf16.gmra.mrb[12].mxu0 %vm724_vm6, %v14535_v24  ;;  %v13365_v24 = vcombine.low %v18658_v31, %v13345_v18  ;;  %v21920_v18 = vrot.slane %v19055_v45, 7 }
 0x108   : > { %16424 = vmatprep.mubr.msk.bf16.mxu0 %vm724_vm6, %v14536_v10  ;;  %v21919_v10 = vrot.slane %v18949_v20, 5  ;;  %v13366_v20 = vcombine.low %v18664_v11, %v13346_v41  ;;  %v21923_v11 = vrot.slane %v19096_v30, 7  ;;  %v21926_v41 = vrot.slane %v18958_v17, 9  ;;  %v13348_v17 = vld [vmem:[%s17924_s6 + $0x2b0] sm:$0xf] }
 0x109   : > { %v19143_v9 = vrot.slane %v21920_v18, 4 }
 0x10a   : > { %v7955_v31 = vsel %vm17938_vm5, %v18993_v28, %v21919_v10  ;;  %v19160_v28 = vld [vmem:[%s17924_s6 + $0x254] sm:$0xf]  ;;  %v21922_v10 = vrot.slane %v19078_v51, 6  ;;  %v19171_v61 = vrot.slane %v21923_v11, 4  ;;  %v21925_v11 = vrot.slane %v18961_v44, 5 }
 0x10b   : > { %v14538_v13 = vcombine.low %v7952_v59, %v7955_v31  ;;  %v19199_v59 = vld [vmem:[%s17924_s6 + $0x250] sm:$0xc]  ;;  %v21928_v44 = vrot.slane %v19125_v25, 6  ;;  %v13367_v31 = vcombine.low %v18696_v3, %v13347_v50  ;;  %v21934_v43 = vrot.slane %v19160_v28, 6 }
 0x10c   : > { %v19164_v18 = vrot.slane %v21922_v10, 4  ;;  %v19178_v10 = vld [vmem:[%s17924_s6 + $0x3ac] sm:$0xf]  ;;  %15921 = vmatmul.mubr.msk.bf16.gmra.mrb[16].mxu1 %vm724_vm6, %v13365_v24  ;;  %v7959_v63 = vsel %vm17938_vm5, %v21926_v41, %v21925_v11  ;;  %v21927_v24 = vrot.slane %v18964_v40, 5  ;;  %v21929_v40 = vrot.slane %v19128_v62, 7 }
 0x10d   : > { %15924 = vmatprep.mubr.msk.bf16.mxu1 %vm724_vm6, %v13366_v20  ;;  %v19205_v20 = vld [vmem:[%s17924_s6 + $0x3a8] sm:$0x8]  ;;  %v19211_v41 = vrot.slane %v21928_v44, 4  ;;  %v21936_v55 = vrot.slane %v19178_v10, 7 }
 0x10e   : > { %v7962_v42 = vsel %vm17938_vm5, %v19024_v22, %v21927_v24  ;;  %v19215_v11 = vrot.slane %v21929_v40, 4  ;;  %v21933_v40 = vrot.slane %v18979_v2, 5  ;;  %v19236_v24 = vld [vmem:[%s17924_s6 + $0x26c] sm:$0xc] }
 0x10f   : > { %16425 = vmatmul.mubr.msk.bf16.gmra.mrb[16].mxu0 %vm724_vm6, %v14537_v49  ;;  %v21931_v49 = vrot.slane %v18973_v7, 5  ;;  %v19244_v7 = vrot.slane %v21934_v43, 4  ;;  %v14539_v50 = vcombine.low %v7959_v63, %v7962_v42  ;;  %v19257_v62 = vrot.slane %v21936_v55, 4  ;;  %v13349_v2 = vld [vmem:[%s17924_s6 + $0x2cc] sm:$0xf] }
 0x110   : > { %21930 = vst [vmem:[#allocation24_spill] sm:$0xff] %v19215_v11  ;;  %16428 = vmatprep.mubr.msk.bf16.mxu0 %vm724_vm6, %v14538_v13  ;;  %v7969_v22 = vsel %vm17938_vm5, %v19039_v57, %v21933_v40  ;;  %v19233_v11 = vld [vmem:[%s17924_s6 + $0x3b0] sm:$0x7]  ;;  %v13368_v57 = vcombine.low %v18699_v39, %v13348_v17  ;;  %v19253_v40 = vld [vmem:[%s17924_s6 + $0x3c4] sm:$0x8]  ;;  %v13442_v43 = vrot.slane %v19236_v24, 10  ;;  %v13369_v63 = vcombine.low %v18734_v36, %v13349_v2 }
 0x111   : > { %v7966_v44 = vsel %vm17938_vm5, %v21932_v35, %v21931_v49  ;;  %v19239_v13 = vld [vmem:[%s17924_s6 + $0x270] sm:$0xf]  ;;  %21935 = vst [vmem:[#allocation25_spill] sm:$0xff] %v19244_v7  ;;  %v19250_v49 = vld [vmem:[%s17924_s6 + $0x274] sm:$0x3]  ;;  %v8419_v3 = vrot.slane %v19233_v11, 7 }
 0x112   : > { %v2181_v7 = vrot.slane %v19239_v13, 6  ;;  %v14540_v35 = vcombine.low %v7966_v44, %v7969_v22  ;;  %v13350_v42 = vld [vmem:[%s17924_s6 + $0x2e8] sm:$0xf]  ;;  %v2184_v39 = vrot.slane %v19250_v49, 6  ;;  %v21937_v55 = vrot.slane %v18982_v12, 5 }
 0x113   : > { %v21938_v17 = vrot.slane %v18997_v29, 9  ;;  %v21939_v22 = vrot.slane %v19007_v46, 5  ;;  %v21942_v29 = vrot.slane %v19028_v33, 5  ;;  %v13370_v46 = vcombine.low %v18737_v60, %v13350_v42  ;;  %v19301_v36 = vld [vmem:[%s17924_s6 + $0x28c] sm:$0xf] }
 0x114   : > { %15925 = vmatmul.mubr.msk.bf16.gmra.mrb[20].mxu1 %vm724_vm6, %v13367_v31  ;;  %v21943_v33 = vrot.slane %v19031_v27, 6  ;;  %v21944_v60 = vrot.slane %v19052_v8, 10  ;;  %v21945_v2 = vrot.slane %v19068_v32, 6  ;;  %v21946_v8 = vrot.slane %v19018_v48, 5  ;;  %v19515_v24 = vld [vmem:[%s17924_s6 + $0x41c] sm:$0xf] }
 0x115   : > { %15928 = vmatprep.mubr.msk.bf16.mxu1 %vm724_vm6, %v13368_v57  ;;  %v7973_v31 = vsel %vm17938_vm5, %v21938_v17, %v21937_v55  ;;  %v7976_v44 = vsel %vm17938_vm5, %v19060_v26, %v21939_v22  ;;  %v21940_v57 = vrot.slane %v18987_v53, 5  ;;  %v19295_v55 = vld [vmem:[%s17924_s6 + $0x3c8] sm:$0xf]  ;;  %v19298_v17 = vld [vmem:[%s17924_s6 + $0x3cc] sm:$0x7]  ;;  %v21948_v22 = vrot.slane %v19046_v15, 5 }
 0x116   : > { %v14541_v26 = vcombine.low %v7973_v31, %v7976_v44  ;;  %v2157_v42 = vsel %vm17927_vm2, %v19112_v0, %v21945_v2  ;;  %v8423_v27 = vrot.slane %v19295_v55, 7  ;;  %v21947_v31 = vrot.slane %v19043_v21, 9 }
 0x117   : > { %16429 = vmatmul.mubr.msk.bf16.gmra.mrb[20].mxu0 %vm724_vm6, %v14539_v50  ;;  %v21941_v50 = vrot.slane %v19010_v4, 9  ;;  %v13351_v4 = vld [vmem:[%s17924_s6 + $0x304] sm:$0xf]  ;;  %v7990_v0 = vsel %vm17938_vm5, %v19101_v19, %v21948_v22  ;;  %v8426_v44 = vrot.slane %v19298_v17, 7  ;;  %v21949_v48 = vrot.slane %v19055_v45, 7 }
 0x118   : > { %16432 = vmatprep.mubr.msk.bf16.mxu0 %vm724_vm6, %v14540_v35  ;;  %v7983_v35 = vsel %vm17938_vm5, %v19064_v5, %v21942_v29  ;;  %v2154_v5 = vsel %vm17927_vm2, %v21944_v60, %v21943_v33  ;;  %v7987_v32 = vsel %vm17938_vm5, %v21947_v31, %v21946_v8  ;;  %v21950_v21 = vrot.slane %v19072_v47, 11  ;;  %v19350_v29 = vld [vmem:[%s17924_s6 + $0x3e4] sm:$0xf]  ;;  %v19359_v45 = vld [vmem:[%s17924_s6 + $0x3e0] sm:$0x8] }
 0x119   : > { %v7980_v12 = vsel %vm17938_vm5, %v21941_v50, %v21940_v57  ;;  %v2188_v57 = vrot.slane %v19301_v36, 6  ;;  %v13371_v50 = vcombine.low %v18772_v56, %v13351_v4  ;;  %v21951_v15 = vrot.slane %v19075_v23, 7  ;;  %v19356_v56 = vld [vmem:[%s17924_s6 + $0x290] sm:$0x3] }
 0x11a   : > { %v14542_v53 = vcombine.low %v7980_v12, %v7983_v35  ;;  %v8396_v12 = vsel %vm18290_vm9, %v21950_v21, %v21949_v48  ;;  %v13458_v35 = vcombine.low %v2154_v5, %v2157_v42  ;;  %v21952_v23 = vrot.slane %v19078_v51, 6  ;;  %v19377_v5 = vld [vmem:[%s17924_s6 + $0x2a4] sm:$0xc]  ;;  %v21965_v48 = vld [vmem:[#allocation23_spill] sm:$0xff]  ;;  %v21967_v21 = vld [vmem:[#allocation24_spill] sm:$0xff] }
 0x11b   : > { %v8399_v19 = vsel %vm18290_vm9, %v19143_v9, %v21951_v15  ;;  %v21953_v9 = vrot.slane %v19093_v54, 10  ;;  %v21954_v33 = vrot.slane %v19107_v37, 6  ;;  %v21955_v2 = vrot.slane %v19125_v25, 6  ;;  %v19421_v15 = vld [vmem:[%s17924_s6 + $0x2ac] sm:$0x3] }
 0x11c   : > { %15929 = vmatmul.mubr.msk.bf16.gmra.mrb[24].mxu1 %vm724_vm6, %v13369_v63  ;;  %v19320_v63 = vrot.slane %v2181_v7, 4  ;;  %v14630_v47 = vcombine.low %v8396_v12, %v8399_v19  ;;  %v21956_v51 = vrot.slane %v19150_v38, 10  ;;  %v21957_v42 = vrot.slane %v19154_v34, 6  ;;  %v19424_v19 = vld [vmem:[%s17924_s6 + $0x3fc] sm:$0x8] }
 0x11d   : > { %15932 = vmatprep.mubr.msk.bf16.mxu1 %vm724_vm6, %v13370_v46  ;;  %v14543_v46 = vcombine.low %v7987_v32, %v7990_v0  ;;  %v2161_v4 = vsel %vm17927_vm2, %v21953_v9, %v21952_v23  ;;  %v2164_v60 = vsel %vm17927_vm2, %v19164_v18, %v21954_v33  ;;  %v8425_v18 = vrot.slane %v8423_v27, 4  ;;  %v21961_v32 = vld [vmem:[#allocation21_spill] sm:$0xff]  ;;  %v21963_v0 = vld [vmem:[#allocation22_spill] sm:$0xff] }
 0x11e   : > { %v2168_v54 = vsel %vm17927_vm2, %v21956_v51, %v21955_v2  ;;  %v2171_v37 = vsel %vm17927_vm2, %v19211_v41, %v21957_v42  ;;  %v8430_v8 = vrot.slane %v19350_v29, 7  ;;  %v21958_v25 = vrot.slane %v19096_v30, 7  ;;  %v19437_v42 = vld [vmem:[%s17924_s6 + $0x400] sm:$0xf] }
 0x11f   : > { %16433 = vmatmul.mubr.msk.bf16.gmra.mrb[24].mxu0 %vm724_vm6, %v14541_v26  ;;  %v19353_v26 = vld [vmem:[%s17924_s6 + $0x288] sm:$0xc]  ;;  %v21959_v38 = vrot.slane %v19118_v58, 11  ;;  %v21960_v34 = vrot.slane %v19147_v14, 7  ;;  %v21962_v22 = vrot.slane %v21961_v32, 7  ;;  %v21966_v58 = vrot.slane %v21965_v48, 7 }
 0x120   : > { %16436 = vmatprep.mubr.msk.bf16.mxu0 %vm724_vm6, %v14542_v53  ;;  %v19362_v53 = vld [vmem:[%s17924_s6 + $0x3e8] sm:$0x7]  ;;  %v14615_v23 = vrot.slane %v19359_v45, 11  ;;  %v13459_v9 = vcombine.low %v2161_v4, %v2164_v60  ;;  %v13460_v33 = vcombine.low %v2168_v54, %v2171_v37  ;;  %v13444_v51 = vrot.slane %v19377_v5, 10 }
 0x121   : > { %v8403_v31 = vsel %vm18290_vm9, %v21959_v38, %v21958_v25  ;;  %v8406_v41 = vsel %vm18290_vm9, %v19171_v61, %v21960_v34  ;;  %v8413_v12 = vsel %vm18290_vm9, %v21967_v21, %v21966_v58  ;;  %v19418_v14 = vld [vmem:[%s17924_s6 + $0x2a8] sm:$0xf]  ;;  %v13443_v61 = vrot.slane %v19353_v26, 10  ;;  %v17722_v25 = vld [vmem:[%s21839_s1 + $0x58] sm:$0xff]   ;;  %v19467_v58 = vld [vmem:[%s17924_s6 + $0x404] sm:$0x7] }
 0x122   : > { %v8433_v2 = vrot.slane %v19362_v53, 7  ;;  %v2195_v4 = vrot.slane %v19418_v14, 6  ;;  %v2198_v60 = vrot.slane %v19421_v15, 6  ;;  %v14616_v54 = vrot.slane %v19424_v19, 11  ;;  %v19489_v21 = vld [vmem:[%s17924_s6 + $0x2c8] sm:$0x3] }
 0x123   : > { %v14631_v37 = vcombine.low %v8403_v31, %v8406_v41  ;;  %v21968_v34 = vrot.slane %v19160_v28, 6  ;;  %v21969_v32 = vrot.slane %v19199_v59, 10  ;;  %v17723_v28 = vld [vmem:[%s21839_s1 + $0x138] sm:$0xff]   ;;  %v21972_v59 = vrot.slane %v19202_v1, 6  ;;  %v21974_v14 = vld [vmem:[#allocation19_spill] sm:$0xff]  ;;  %v21976_v15 = vld [vmem:[#allocation20_spill] sm:$0xff] }
 0x124   : > { %15933 = vmatmul.mubr.msk.bf16.gmra.mrb[28].mxu1 %vm724_vm6, %v13371_v50  ;;  %v21964_v50 = vrot.slane %v21963_v0, 11  ;;  %v21970_v0 = vrot.slane %v19178_v10, 7  ;;  %v21973_v31 = vld [vmem:[#allocation25_spill] sm:$0xff]  ;;  %v19482_v10 = vsel %vm18290_vm9, %v19257_v62, %v8419_v3  ;;  %v2182_v62 = vsel %vm17927_vm2, %v13442_v43, %v2181_v7  ;;  %v19623_v19 = vld [vmem:[%s17924_s6 + $0x470] sm:$0xf] }
 0x125   : > { %15940 = vmatprep.mubr.msk.bf16.mxu1 %vm724_vm6, %v13458_v35  ;;  %v19430_v35 = vrot.slane %v2188_v57, 4  ;;  %v2178_v41 = vsel %vm17927_vm2, %v21973_v31, %v21972_v59  ;;  %v2185_v11 = vsel %vm17927_vm2, %v19320_v63, %v2184_v39  ;;  %v19505_v3 = vld [vmem:[%s17924_s6 + $0x418] sm:$0x8]  ;;  %v21975_v49 = vrot.slane %v19253_v40, 11  ;;  %v19527_v39 = vld [vmem:[%s17924_s6 + $0x420] sm:$0x7] }
 0x126   : > { %v8410_v30 = vsel %vm18290_vm9, %v21964_v50, %v21962_v22  ;;  %v2175_v22 = vsel %vm17927_vm2, %v21969_v32, %v21968_v34  ;;  %v21971_v50 = vrot.slane %v19205_v20, 11  ;;  %v8437_v20 = vrot.slane %v19437_v42, 7  ;;  %v19530_v63 = vld [vmem:[%s17924_s6 + $0x2dc] sm:$0xc]  ;;  %v19543_v42 = vld [vmem:[%s17924_s6 + $0x438] sm:$0xf] }
 0x127   : > { %16437 = vmatmul.mubr.msk.bf16.gmra.mrb[28].mxu0 %vm724_vm6, %v14543_v46  ;;  %v2191_v46 = vrot.slane %v19356_v56, 6  ;;  %v19447_v56 = vrot.slane %v8430_v8, 4  ;;  %v14632_v38 = vcombine.low %v8410_v30, %v8413_v12  ;;  %v19486_v30 = vld [vmem:[%s17924_s6 + $0x2c0] sm:$0xc]  ;;  %v13461_v13 = vcombine.low %v2175_v22, %v2178_v41  ;;  %v19572_v31 = vld [vmem:[%s17924_s6 + $0x434] sm:$0x8] }
 0x128   : > { %16444 = vmatprep.mubr.msk.bf16.mxu0 %vm724_vm6, %v14630_v47  ;;  %v19440_v47 = vld [vmem:[%s17924_s6 + $0x2c4] sm:$0xf]  ;;  %v19464_v48 = vsel %vm18290_vm9, %v21971_v50, %v21970_v0  ;;  %v8424_v43 = vsel %vm18290_vm9, %v21975_v49, %v8423_v27  ;;  %v8427_v55 = vsel %vm18290_vm9, %v8425_v18, %v8426_v44  ;;  %v2197_v40 = vrot.slane %v2195_v4, 4  ;;  %v19540_v27 = vld [vmem:[%s17924_s6 + $0x2e0] sm:$0xf] }
 0x129   : > { %v2202_v1 = vrot.slane %v19440_v47, 6  ;;  %v19510_v12 = vld [vmem:[%s21839_s1 + $0x60] sm:$0xff]   ;;  %v14633_v7 = vcombine.low %v19464_v48, %v19482_v10  ;;  %v13445_v34 = vrot.slane %v19486_v30, 10  ;;  %v2205_v17 = vrot.slane %v19489_v21, 6  ;;  %v19575_v41 = vld [vmem:[%s17924_s6 + $0x43c] sm:$0x7] }
 0x12a   : > { %v19552_v44 = vld [vmem:[%s21839_s1 + $0x140] sm:$0xff]   ;;  %v14617_v18 = vrot.slane %v19505_v3, 11  ;;  %v8444_v32 = vrot.slane %v19515_v24, 7  ;;  %v8447_v22 = vrot.slane %v19527_v39, 7  ;;  %v13446_v50 = vrot.slane %v19530_v63, 10 }
 0x12b   : > { %v19558_v0 = vld [vmem:[%s17924_s6 + $0x2e4] sm:$0x3]  ;;  %v2189_v48 = vsel %vm17927_vm2, %v13443_v61, %v2188_v57  ;;  %v2209_v59 = vrot.slane %v19540_v27, 6  ;;  %v8451_v10 = vrot.slane %v19543_v42, 7  ;;  %v14634_v36 = vcombine.low %v8424_v43, %v8427_v55  ;;  %v19586_v61 = vld [vmem:[%s17924_s6 + $0x2f8] sm:$0xc] }
 0x12c   : > { %15941 = vmatmul.mubr.msk.bf16.vlgmr.msra.gmra.mrb[0].mxu1 %vm724_vm6, %v13459_v9  ;;  %v13462_v9 = vcombine.low %v2182_v62, %v2185_v11  ;;  %v2196_v57 = vsel %vm17927_vm2, %v13444_v51, %v2195_v4  ;;  %v2199_v26 = vsel %vm17927_vm2, %v2197_v40, %v2198_v60  ;;  %v8431_v51 = vsel %vm18290_vm9, %v14615_v23, %v8430_v8  ;;  %v19613_v60 = vld [vmem:[%s17924_s6 + $0x454] sm:$0xf]  ;;  %v19620_v23 = vld [vmem:[%s17924_s6 + $0x318] sm:$0xf]  ;;  %v14589_v62 = vld [vmem:[%s17924_s6 + $0x450] sm:$0x8] }
 0x12d   : > { %15973 = vmatpush3.bf16.msra.mxu1 %v21974_v14  ;;  %15944 = vmatprep.mubr.msk.bf16.mxu1 %vm724_vm6, %v13460_v33  ;;  %v8440_v33 = vrot.slane %v19467_v58, 7  ;;  %v2192_v58 = vsel %vm17927_vm2, %v19430_v35, %v2191_v46  ;;  %v19589_v35 = vld [vmem:[%s17924_s6 + $0x2fc] sm:$0xf]  ;;  %v19592_v46 = vld [vmem:[%s17924_s6 + $0x300] sm:$0x3]  ;;  %v8438_v4 = vsel %vm18290_vm9, %v14616_v54, %v8437_v20  ;;  %v13464_v29 = vcombine.low %v2196_v57, %v2199_v26 }
 0x12e   : > { %15974 = vmatprep.subr.bf16.mxu1 %v17722_v25  ;;  %v13463_v5 = vcombine.low %v2189_v48, %v2192_v58  ;;  %v8446_v8 = vrot.slane %v8444_v32, 4  ;;  %v2212_v53 = vrot.slane %v19558_v0, 6  ;;  %v8453_v54 = vrot.slane %v8451_v10, 4  ;;  %v14591_v24 = vld [vmem:[%s17924_s6 + $0x458] sm:$0x7] }
 0x12f   : > { %16445 = vmatmul.mubr.msk.bf16.vlgmr.msra.gmra.mrb[0].mxu0 %vm724_vm6, %v14631_v37  ;;  %v8439_v37 = vrot.slane %v8437_v20, 4  ;;  %v13447_v20 = vrot.slane %v19586_v61, 10  ;;  %v2216_v30 = vrot.slane %v19589_v35, 6  ;;  %v2219_v21 = vrot.slane %v19592_v46, 6  ;;  %v13422_v39 = vld [vmem:[%s17924_s6 + $0x31c] sm:$0x3] }
 0x130   : > { %16477 = vmatpush3.bf16.msra.mxu0 %v21976_v15  ;;  %16448 = vmatprep.mubr.msk.bf16.mxu0 %vm724_vm6, %v14632_v38  ;;  %v2204_v38 = vrot.slane %v2202_v1, 4  ;;  %v8458_v11 = vrot.slane %v19613_v60, 7  ;;  %v2203_v3 = vsel %vm17927_vm2, %v13445_v34, %v2202_v1  ;;  %v8465_v49 = vrot.slane %v19623_v19, 7  ;;  %v14592_v63 = vld [vmem:[%s17924_s6 + $0x46c] sm:$0x8] }
 0x131   : > { %16478 = vmatprep.subr.bf16.mxu0 %v17723_v28  ;;  %15975 = vmatpush3.bf16.msra.mxu1 %v17722_v25  ;;  %v8434_v25 = vsel %vm18290_vm9, %v19447_v56, %v8433_v2  ;;  %v8441_v45 = vsel %vm18290_vm9, %v8439_v37, %v8440_v33  ;;  %v2211_v2 = vrot.slane %v2209_v59, 4  ;;  %v14618_v56 = vrot.slane %v19572_v31, 11  ;;  %v19648_v15 = vld [vmem:[%s17924_s6 + $0x334] sm:$0xf]  ;;  %v19652_v47 = vld [vmem:[%s17924_s6 + $0x330] sm:$0xc] }
 0x132   : > { %16008 = vmatprep.subr.bf16.mxu1 %v19510_v12  ;;  %v2206_v14 = vsel %vm17927_vm2, %v2204_v38, %v2205_v17  ;;  %v14635_v43 = vcombine.low %v8431_v51, %v8434_v25  ;;  %v14594_v55 = vld [vmem:[%s17924_s6 + $0x474] sm:$0x7]  ;;  %v8445_v40 = vsel %vm18290_vm9, %v14617_v18, %v8444_v32  ;;  %v2210_v33 = vsel %vm17927_vm2, %v13446_v50, %v2209_v59  ;;  %v13425_v50 = vld [vmem:[%s17924_s6 + $0x338] sm:$0x3]  ;;  %v19675_v31 = vld [vmem:[%s17924_s6 + $0x48c] sm:$0xf] }
 0x133   : > { %v13465_v1 = vcombine.low %v2203_v3, %v2206_v14  ;;  %v8448_v27 = vsel %vm18290_vm9, %v8446_v8, %v8447_v22  ;;  %v2213_v37 = vsel %vm17927_vm2, %v2211_v2, %v2212_v53  ;;  %v14619_v34 = vrot.slane %v14589_v62, 11  ;;  %v13428_v53 = vld [vmem:[%s17924_s6 + $0x354] sm:$0x3]  ;;  %v14600_v62 = vld [vmem:[%s17924_s6 + $0x4ac] sm:$0x7] }
 0x134   : > { %16479 = vmatpush3.bf16.msra.mxu0 %v17723_v28  ;;  %15945 = vmatmul.mubr.msk.bf16.gmra.mrb[4].mxu1 %vm724_vm6, %v13461_v13  ;;  %v8454_v28 = vrot.slane %v19575_v41, 7  ;;  %v13420_v13 = vld [vmem:[%s17924_s6 + $0x314] sm:$0xc]  ;;  %v2230_v38 = vrot.slane %v19648_v15, 6  ;;  %v2218_v17 = vrot.slane %v2216_v30, 4  ;;  %v8460_v18 = vrot.slane %v8458_v11, 4 }
 0x135   : > { %16512 = vmatprep.subr.bf16.mxu0 %v19552_v44  ;;  %15948 = vmatprep.mubr.msk.bf16.mxu1 %vm724_vm6, %v13462_v9  ;;  %v14636_v9 = vcombine.low %v8438_v4, %v8441_v45  ;;  %v8461_v32 = vrot.slane %v14591_v24, 7  ;;  %v13448_v0 = vrot.slane %v13420_v13, 10  ;;  %v8452_v22 = vsel %vm18290_vm9, %v14618_v56, %v8451_v10  ;;  %v19678_v41 = vld [vmem:[%s17924_s6 + $0x350] sm:$0xf]  ;;  %v19708_v14 = vld [vmem:[%s17924_s6 + $0x36c] sm:$0xf] }
 0x136   : > { %v8455_v48 = vsel %vm18290_vm9, %v8453_v54, %v8454_v28  ;;  %v2226_v58 = vrot.slane %v13422_v39, 6  ;;  %v14620_v59 = vrot.slane %v14592_v63, 11  ;;  %v8467_v57 = vrot.slane %v8465_v49, 4  ;;  %v14597_v4 = vld [vmem:[%s17924_s6 + $0x490] sm:$0x7] }
 0x137   : > { %16449 = vmatmul.mubr.msk.bf16.gmra.mrb[4].mxu0 %vm724_vm6, %v14633_v7  ;;  %v2223_v7 = vrot.slane %v19620_v23, 6  ;;  %v8468_v26 = vrot.slane %v14594_v55, 7  ;;  %v13449_v42 = vrot.slane %v19652_v47, 10  ;;  %v14637_v61 = vcombine.low %v8445_v40, %v8448_v27  ;;  %v14599_v23 = vld [vmem:[%s17924_s6 + $0x4a8] sm:$0xf] }
 0x138   : > { %16452 = vmatprep.mubr.msk.bf16.mxu0 %vm724_vm6, %v14634_v36  ;;  %v13466_v10 = vcombine.low %v2210_v33, %v2213_v37  ;;  %v2232_v35 = vrot.slane %v2230_v38, 4  ;;  %v2233_v46 = vrot.slane %v13425_v50, 6  ;;  %v2217_v51 = vsel %vm17927_vm2, %v13447_v20, %v2216_v30  ;;  %v14598_v28 = vld [vmem:[%s17924_s6 + $0x4a4] sm:$0x8]  ;;  %v13433_v33 = vld [vmem:[%s17924_s6 + $0x388] sm:$0xf] }
 0x139   : > { %v2225_v36 = vrot.slane %v2223_v7, 4  ;;  %v2220_v25 = vsel %vm17927_vm2, %v2218_v17, %v2219_v21  ;;  %v8472_v60 = vrot.slane %v19675_v31, 7  ;;  %v2237_v45 = vrot.slane %v19678_v41, 6  ;;  %v14601_v17 = vld [vmem:[%s17924_s6 + $0x4c0] sm:$0x8] }
 0x13a   : > { %v14638_v8 = vcombine.low %v8452_v22, %v8455_v48  ;;  %v2224_v19 = vsel %vm17927_vm2, %v13448_v0, %v2223_v7  ;;  %v13467_v56 = vcombine.low %v2217_v51, %v2220_v25  ;;  %v8459_v54 = vsel %vm18290_vm9, %v14619_v34, %v8458_v11  ;;  %v13431_v34 = vld [vmem:[%s17924_s6 + $0x370] sm:$0x3]  ;;  %v14603_v0 = vld [vmem:[%s17924_s6 + $0x4c8] sm:$0x7]  ;;  %v13432_v50 = vld [vmem:[%s17924_s6 + $0x384] sm:$0xc] }
 0x13b   : > { %v2227_v2 = vsel %vm17927_vm2, %v2225_v36, %v2226_v58  ;;  %v8462_v20 = vsel %vm18290_vm9, %v8460_v18, %v8461_v32  ;;  %v8466_v30 = vsel %vm18290_vm9, %v14620_v59, %v8465_v49  ;;  %v8479_v3 = vrot.slane %v14599_v23, 7  ;;  %v13434_v22 = vld [vmem:[%s17924_s6 + $0x38c] sm:$0x3]  ;;  %v14606_v51 = vld [vmem:[%s17924_s6 + $0x4e4] sm:$0x7] }
 0x13c   : > { %15949 = vmatmul.mubr.msk.bf16.gmra.mrb[8].mxu1 %vm724_vm6, %v13463_v5  ;;  %v14595_v5 = vld [vmem:[%s17924_s6 + $0x488] sm:$0x8]  ;;  %v13468_v24 = vcombine.low %v2224_v19, %v2227_v2  ;;  %v8469_v11 = vsel %vm18290_vm9, %v8467_v57, %v8468_v26  ;;  %v8475_v13 = vrot.slane %v14597_v4, 7  ;;  %v8474_v49 = vrot.slane %v8472_v60, 4  ;;  %v13436_v23 = vld [vmem:[%s17924_s6 + $0x3a4] sm:$0xf] }
 0x13d   : > { %15952 = vmatprep.mubr.msk.bf16.mxu1 %vm724_vm6, %v13464_v29  ;;  %v13426_v29 = vld [vmem:[%s17924_s6 + $0x34c] sm:$0xc]  ;;  %v14621_v21 = vrot.slane %v14595_v5, 11  ;;  %v2239_v39 = vrot.slane %v2237_v45, 4  ;;  %v2240_v63 = vrot.slane %v13428_v53, 6  ;;  %v14622_v15 = vrot.slane %v14598_v28, 11 }
 0x13e   : > { %v13450_v7 = vrot.slane %v13426_v29, 10  ;;  %v2234_v55 = vsel %vm17927_vm2, %v2232_v35, %v2233_v46  ;;  %v8482_v47 = vrot.slane %v14600_v62, 7  ;;  %v2244_v40 = vrot.slane %v19708_v14, 6  ;;  %v14608_v28 = vld [vmem:[%s17924_s6 + $0x4fc] sm:$0xf] }
 0x13f   : > { %16453 = vmatmul.mubr.msk.bf16.gmra.mrb[8].mxu0 %vm724_vm6, %v14635_v43  ;;  %v19714_v43 = vld [vmem:[%s17924_s6 + $0x4c4] sm:$0xf]  ;;  %v14639_v27 = vcombine.low %v8459_v54, %v8462_v20  ;;  %v8481_v37 = vrot.slane %v8479_v3, 4  ;;  %v14640_v32 = vcombine.low %v8466_v30, %v8469_v11  ;;  %v8473_v58 = vsel %vm18290_vm9, %v14621_v21, %v8472_v60  ;;  %v13435_v14 = vld [vmem:[%s17924_s6 + $0x3a0] sm:$0xc] }
 0x140   : > { %16456 = vmatprep.mubr.msk.bf16.mxu0 %vm724_vm6, %v14636_v9  ;;  %v2231_v9 = vsel %vm17927_vm2, %v13449_v42, %v2230_v38  ;;  %v8486_v18 = vrot.slane %v19714_v43, 7  ;;  %v14605_v38 = vld [vmem:[%s17924_s6 + $0x4e0] sm:$0xf]  ;;  %v8476_v59 = vsel %vm18290_vm9, %v8474_v49, %v8475_v13  ;;  %v2238_v31 = vsel %vm17927_vm2, %v13450_v7, %v2237_v45  ;;  %v14604_v42 = vld [vmem:[%s17924_s6 + $0x4dc] sm:$0x8] }
 0x141   : > { %v13469_v48 = vcombine.low %v2231_v9, %v2234_v55  ;;  %v2251_v41 = vrot.slane %v13433_v33, 6  ;;  %v2241_v36 = vsel %vm17927_vm2, %v2239_v39, %v2240_v63  ;;  %v8480_v57 = vsel %vm18290_vm9, %v14622_v15, %v8479_v3  ;;  %v14607_v7 = vld [vmem:[%s17924_s6 + $0x4f8] sm:$0x8]  ;;  %v14609_v15 = vld [vmem:[%s17924_s6 + $0x500] sm:$0x7] }
 0x142   : > { %v2246_v35 = vrot.slane %v2244_v40, 4  ;;  %v2247_v46 = vrot.slane %v13431_v34, 6  ;;  %v14623_v5 = vrot.slane %v14601_v17, 11  ;;  %v8488_v25 = vrot.slane %v8486_v18, 4 }
 0x143   : > { %v8489_v4 = vrot.slane %v14603_v0, 7  ;;  %v13452_v60 = vrot.slane %v13432_v50, 10  ;;  %v2254_v29 = vrot.slane %v13434_v22, 6  ;;  %v13470_v45 = vcombine.low %v2238_v31, %v2241_v36  ;;  %v17728_v31 = vld [vmem:[%s17924_s6 + $0x38] sm:$0xff]   ;;  %v17737_v36 = vld [vmem:[%s21839_s1 + $0x148] sm:$0xff]  }
 0x144   : > { %15953 = vmatmul.mubr.msk.bf16.gmra.mrb[12].mxu1 %vm724_vm6, %v13465_v1  ;;  %v13429_v1 = vld [vmem:[%s17924_s6 + $0x368] sm:$0xc]  ;;  %v14624_v53 = vrot.slane %v14604_v42, 11  ;;  %v14641_v19 = vcombine.low %v8473_v58, %v8476_v59  ;;  %v2248_v30 = vsel %vm17927_vm2, %v2246_v35, %v2247_v46  ;;  %v2258_v21 = vrot.slane %v13436_v23, 6  ;;  %v17726_v58 = vld [vmem:[%s17924_s6 + $0x1c] sm:$0xff]   ;;  %v17729_v42 = vld [vmem:[%s17924_s6 + $0x54] sm:$0xff]  }
 0x145   : > { %15956 = vmatprep.mubr.msk.bf16.mxu1 %vm724_vm6, %v13466_v10  ;;  %v13451_v26 = vrot.slane %v13429_v1, 10  ;;  %v8483_v10 = vsel %vm18290_vm9, %v8481_v37, %v8482_v47  ;;  %v2252_v62 = vsel %vm17927_vm2, %v13452_v60, %v2251_v41  ;;  %v8487_v11 = vsel %vm18290_vm9, %v14623_v5, %v8486_v18  ;;  %v17734_v59 = vld [vmem:[%s21839_s1 + $0x68] sm:$0xff]   ;;  %v21984_v60 = vld [vmem:[#allocation9_spill] sm:$0xff]  ;;  %v21987_v23 = vld [vmem:[#allocation12_spill] sm:$0xff] }
 0x146   : > { %v14642_v54 = vcombine.low %v8480_v57, %v8483_v10  ;;  %v8490_v13 = vsel %vm18290_vm9, %v8488_v25, %v8489_v4  ;;  %v8500_v43 = vrot.slane %v14608_v28, 7  ;;  %v13453_v55 = vrot.slane %v13435_v14, 10  ;;  %v21979_v57 = vld [vmem:[#allocation4_spill] sm:$0xff]  ;;  %v21980_v10 = vld [vmem:[#allocation5_spill] sm:$0xff]  ;;  %v17732_v46 = vld [vmem:[%s17924_s6 + $0xa8] sm:$0xff]  }
 0x147   : > { %16457 = vmatmul.mubr.msk.bf16.gmra.mrb[12].mxu0 %vm724_vm6, %v14637_v61  ;;  %v8493_v61 = vrot.slane %v14605_v38, 7  ;;  %v2245_v20 = vsel %vm17927_vm2, %v13451_v26, %v2244_v40  ;;  %v2260_v47 = vrot.slane %v2258_v21, 4  ;;  %v14643_v40 = vcombine.low %v8487_v11, %v8490_v13  ;;  %v17725_v38 = vld [vmem:[%s17924_s6] sm:$0xff]   ;;  %v19809_v26 = vld [vmem:[%s21839_s1 + $0x70] sm:$0xff]   ;;  %v21982_v5 = vld [vmem:[#allocation7_spill] sm:$0xff] }
 0x148   : > { %16460 = vmatprep.mubr.msk.bf16.mxu0 %vm724_vm6, %v14638_v8  ;;  %v2253_v8 = vrot.slane %v2251_v41, 4  ;;  %v13471_v49 = vcombine.low %v2245_v20, %v2248_v30  ;;  %v14625_v33 = vrot.slane %v14607_v7, 11  ;;  %v8502_v37 = vrot.slane %v8500_v43, 4  ;;  %v21978_v41 = vld [vmem:[#allocation3_spill] sm:$0xff]  ;;  %v17735_v4 = vld [vmem:[%s17924_s6 + $0xe0] sm:$0xff]  }
 0x149   : > { %v8495_v2 = vrot.slane %v8493_v61, 4  ;;  %v8494_v39 = vsel %vm18290_vm9, %v14624_v53, %v8493_v61  ;;  %v8503_v34 = vrot.slane %v14609_v15, 7  ;;  %v2259_v17 = vsel %vm17927_vm2, %v13453_v55, %v2258_v21  ;;  %v17730_v61 = vld [vmem:[%s17924_s6 + $0x70] sm:$0xff]   ;;  %v17733_v25 = vld [vmem:[%s17924_s6 + $0xc4] sm:$0xff]   ;;  %v9182_v28 = vld [vmem:[%s17924_s6 + $0xc] sm:$0xf] }
 0x14a   : > { %v2255_v3 = vsel %vm17927_vm2, %v2253_v8, %v2254_v29  ;;  %v17731_v35 = vld [vmem:[%s17924_s6 + $0x8c] sm:$0xff]   ;;  %v21985_v29 = vld [vmem:[#allocation10_spill] sm:$0xff]  ;;  %v17738_v8 = vld [vmem:[%s17924_s6 + $0x118] sm:$0xff]   ;;  %v9279_v30 = vrot.slane %v9182_v28, 5 }
 0x14b   : > { %v13472_v9 = vcombine.low %v2252_v62, %v2255_v3  ;;  %v8504_v0 = vsel %vm18290_vm9, %v8502_v37, %v8503_v34  ;;  %v21986_v53 = vld [vmem:[#allocation11_spill] sm:$0xff]  ;;  %v9183_v21 = vld [vmem:[%s17924_s6 + $0x10] sm:$0x1]  ;;  %v9188_v11 = vld [vmem:[%s17924_s6 + $0x44] sm:$0xf] }
 0x14c   : > { %15957 = vmatmul.mubr.msk.bf16.gmra.mrb[16].mxu1 %vm724_vm6, %v13467_v56  ;;  %v8496_v56 = vrot.slane %v14606_v51, 7  ;;  %v21983_v51 = vld [vmem:[#allocation8_spill] sm:$0xff]  ;;  %v9181_v20 = vld [vmem:[%s17924_s6 + $0x8] sm:$0xe]  ;;  %v9281_v7 = vrot.slane %v9279_v30, 4  ;;  %v9293_v55 = vrot.slane %v9188_v11, 5 }
 0x14d   : > { %15960 = vmatprep.mubr.msk.bf16.mxu1 %vm724_vm6, %v13468_v24  ;;  %v13437_v24 = vld [vmem:[%s17924_s6 + $0x3a8] sm:$0x3]  ;;  %v17741_v62 = vld [vmem:[%s17924_s6 + $0x16c] sm:$0xff]   ;;  %v14702_v14 = vrot.slane %v9181_v20, 9  ;;  %v17837_v37 = vld [vmem:[%s17924_s6 + $0x204] sm:$0xf] }
 0x14e   : > { %v8497_v63 = vsel %vm18290_vm9, %v8495_v2, %v8496_v56  ;;  %v2261_v1 = vrot.slane %v13437_v24, 6  ;;  %v17740_v2 = vld [vmem:[%s17924_s6 + $0x150] sm:$0xff]   ;;  %v21988_v56 = vld [vmem:[#allocation13_spill] sm:$0xff]  ;;  %v17742_v3 = vld [vmem:[%s17924_s6 + $0x188] sm:$0xff]  }
 0x14f   : > { %16461 = vmatmul.mubr.msk.bf16.gmra.mrb[16].mxu0 %vm724_vm6, %v14639_v27  ;;  %v14644_v27 = vcombine.low %v8494_v39, %v8497_v63  ;;  %v9185_v24 = vld [vmem:[%s17924_s6 + $0x28] sm:$0xf]  ;;  %v9184_v63 = vld [vmem:[%s17924_s6 + $0x24] sm:$0xe]  ;;  %v9186_v15 = vld [vmem:[%s17924_s6 + $0x2c] sm:$0x1] }
 0x150   : > { %16464 = vmatprep.mubr.msk.bf16.mxu0 %vm724_vm6, %v14640_v32  ;;  %v2262_v18 = vsel %vm17927_vm2, %v2260_v47, %v2261_v1  ;;  %v8501_v32 = vsel %vm18290_vm9, %v14625_v33, %v8500_v43  ;;  %v21990_v13 = vld [vmem:[#allocation15_spill] sm:$0xff]  ;;  %v9282_v43 = vrot.slane %v9183_v21, 5  ;;  %v9187_v47 = vld [vmem:[%s17924_s6 + $0x40] sm:$0xe] }
 0x151   : > { %v13473_v50 = vcombine.low %v2259_v17, %v2262_v18  ;;  %v14645_v22 = vcombine.low %v8501_v32, %v8504_v0  ;;  %v13514_v39 = vld [vmem:[%s17924_s6 + $0x208] sm:$0xf]  ;;  %v14703_v17 = vrot.slane %v9184_v63, 9  ;;  %v9289_v18 = vrot.slane %v9186_v15, 5  ;;  %v9191_v32 = vld [vmem:[%s17924_s6 + $0x60] sm:$0xf] }
 0x152   : > { %v9189_v1 = vld [vmem:[%s17924_s6 + $0x48] sm:$0x1]  ;;  %v9283_v33 = vsel %vm17938_vm5, %v9281_v7, %v9282_v43  ;;  %v13534_v34 = vcombine.low %v17837_v37, %v13514_v39  ;;  %v17754_v43 = vld [vmem:[%s21839_s1 + $0x78] sm:$0xff]  }
 0x153   : > { %v17743_v0 = vld [vmem:[%s17924_s6 + $0x1a4] sm:$0xff]   ;;  %v13517_v15 = vld [vmem:[%s17924_s6 + $0x25c] sm:$0xf] }
 0x154   : > { %15961 = vmatmul.mubr.msk.bf16.gmra.mrb[20].mxu1 %vm724_vm6, %v13469_v48  ;;  %v21977_v48 = vld [vmem:[#allocation2_spill] sm:$0xff] }
 0x155   : > { %15964 = vmatprep.mubr.msk.bf16.mxu1 %vm724_vm6, %v13470_v45  ;;  %v17736_v45 = vld [vmem:[%s17924_s6 + $0xfc] sm:$0xff]  }
 0x157   : > { %16465 = vmatmul.mubr.msk.bf16.gmra.mrb[20].mxu0 %vm724_vm6, %v14641_v19  ;;  %v17739_v19 = vld [vmem:[%s17924_s6 + $0x134] sm:$0xff]  }
 0x158   : > { %16468 = vmatprep.mubr.msk.bf16.mxu0 %vm724_vm6, %v14642_v54  ;;  %v21989_v54 = vld [vmem:[#allocation14_spill] sm:$0xff] }
 0x15c   : > { %15965 = vmatmul.mubr.msk.bf16.gmra.mrb[24].mxu1 %vm724_vm6, %v13471_v49  ;;  %v21991_v49 = vld [vmem:[#allocation16_spill] sm:$0xff] }
 0x15d   : > { %15968 = vmatprep.mubr.msk.bf16.mxu1 %vm724_vm6, %v13472_v9  ;;  %v9286_v9 = vrot.slane %v9185_v24, 5  ;;  %v17839_v24 = vld [vmem:[%s17924_s6 + $0x23c] sm:$0xf] }
 0x15f   : > { %16469 = vmatmul.mubr.msk.bf16.gmra.mrb[24].mxu0 %vm724_vm6, %v14643_v40  ;;  %v9280_v40 = vsel %vm17938_vm5, %v14702_v14, %v9279_v30 }
 0x160   : > { %16472 = vmatprep.mubr.msk.bf16.mxu0 %vm724_vm6, %v14644_v27  ;;  %v13515_v27 = vld [vmem:[%s17924_s6 + $0x224] sm:$0xf] }
 0x164   : > { %15969 = vmatmul.mubr.msk.bf16.gmra.mrb[28].mxu1 %vm724_vm6, %v13473_v50  ;;  %v9288_v50 = vrot.slane %v9286_v9, 4 }
 0x165   : > { %15976 = vmatprep.mubr.msk.bf16.mxu1 %vm724_vm6, %v21977_v48 }
 0x167   : > { %16473 = vmatmul.mubr.msk.bf16.gmra.mrb[28].mxu0 %vm724_vm6, %v14645_v22  ;;  %v14704_v22 = vrot.slane %v9187_v47, 9  ;;  %v17756_v47 = vld [vmem:[%s21839_s1 + $0x158] sm:$0xff]  }
 0x168   : > { %16480 = vmatprep.mubr.msk.bf16.mxu0 %vm724_vm6, %v17725_v38  ;;  %v9295_v38 = vrot.slane %v9293_v55, 4 }
 0x169   : > { %v9294_v28 = vsel %vm17938_vm5, %v14704_v22, %v9293_v55  ;;  %v19942_v22 = vld [vmem:[%s21839_s1 + $0x160] sm:$0xff]  }
 0x16c   : > { %15977 = vmatmul.mubr.msk.bf16.vlgmr.msra.gmra.mrb[0].mxu1 %vm724_vm6, %v21978_v41 }
 0x16d   : > { %16009 = vmatpush3.bf16.msra.mxu1 %v19510_v12  ;;  %15980 = vmatprep.mubr.msk.bf16.mxu1 %vm724_vm6, %v21979_v57  ;;  %v19816_v12 = vld [vmem:[%s21839_s1 + $0x150] sm:$0xff]  }
 0x16e   : > { %16010 = vmatprep.subr.bf16.mxu1 %v17734_v59 }
 0x16f   : > { %16481 = vmatmul.mubr.msk.bf16.vlgmr.msra.gmra.mrb[0].mxu0 %vm724_vm6, %v17726_v58  ;;  %v9296_v58 = vrot.slane %v9189_v1, 5  ;;  %v9200_v1 = vld [vmem:[%s17924_s6 + $0xb4] sm:$0xf] }
 0x170   : > { %16513 = vmatpush3.bf16.msra.mxu0 %v19552_v44  ;;  %16484 = vmatprep.mubr.msk.bf16.mxu0 %vm724_vm6, %v17728_v31  ;;  %v21981_v44 = vld [vmem:[#allocation6_spill] sm:$0xff]  ;;  %v9190_v31 = vld [vmem:[%s17924_s6 + $0x5c] sm:$0xe] }
 0x171   : > { %16514 = vmatprep.subr.bf16.mxu0 %v17737_v36  ;;  %16011 = vmatpush3.bf16.msra.mxu1 %v17734_v59  ;;  %v14722_v59 = vcombine.low %v9280_v40, %v9283_v33  ;;  %v9297_v20 = vsel %vm17938_vm5, %v9295_v38, %v9296_v58  ;;  %v14705_v30 = vrot.slane %v9190_v31, 9  ;;  %v13518_v40 = vld [vmem:[%s17924_s6 + $0x278] sm:$0xf]  ;;  %v19924_v33 = vld [vmem:[%s21839_s1 + $0x80] sm:$0xff]   ;;  %v17841_v38 = vld [vmem:[%s17924_s6 + $0x274] sm:$0xf] }
 0x172   : > { %16044 = vmatprep.subr.bf16.mxu1 %v19809_v26  ;;  %v14724_v63 = vcombine.low %v9294_v28, %v9297_v20  ;;  %v13538_v58 = vcombine.low %v17841_v38, %v13518_v40  ;;  %v9201_v31 = vld [vmem:[%s17924_s6 + $0xb8] sm:$0x1]  ;;  %v9206_v28 = vld [vmem:[%s17924_s6 + $0xec] sm:$0xf]  ;;  %v13520_v20 = vld [vmem:[%s17924_s6 + $0x2b0] sm:$0xf] }
 0x174   : > { %16515 = vmatpush3.bf16.msra.mxu0 %v17737_v36  ;;  %15981 = vmatmul.mubr.msk.bf16.gmra.mrb[4].mxu1 %vm724_vm6, %v21980_v10  ;;  %v9192_v36 = vld [vmem:[%s17924_s6 + $0x64] sm:$0x1] }
 0x175   : > { %16548 = vmatprep.subr.bf16.mxu0 %v19816_v12  ;;  %15984 = vmatprep.mubr.msk.bf16.mxu1 %vm724_vm6, %v21981_v44 }
 0x177   : > { %16485 = vmatmul.mubr.msk.bf16.gmra.mrb[4].mxu0 %vm724_vm6, %v17729_v42  ;;  %v21992_v42 = vld [vmem:[#allocation17_spill] sm:$0xff] }
 0x178   : > { %16488 = vmatprep.mubr.msk.bf16.mxu0 %vm724_vm6, %v17730_v61  ;;  %v9300_v61 = vrot.slane %v9191_v32, 5 }
 0x17a   : > { %v9302_v21 = vrot.slane %v9300_v61, 4 }
 0x17c   : > { %15985 = vmatmul.mubr.msk.bf16.gmra.mrb[8].mxu1 %vm724_vm6, %v21982_v5 }
 0x17d   : > { %15988 = vmatprep.mubr.msk.bf16.mxu1 %vm724_vm6, %v21983_v51 }
 0x17f   : > { %16489 = vmatmul.mubr.msk.bf16.gmra.mrb[8].mxu0 %vm724_vm6, %v17731_v35  ;;  %v9193_v35 = vld [vmem:[%s17924_s6 + $0x78] sm:$0xe] }
 0x180   : > { %16492 = vmatprep.mubr.msk.bf16.mxu0 %vm724_vm6, %v17732_v46  ;;  %v9194_v46 = vld [vmem:[%s17924_s6 + $0x7c] sm:$0xf] }
 0x181   : > { %v9307_v14 = vrot.slane %v9194_v46, 5 }
 0x183   : > { %v9309_v55 = vrot.slane %v9307_v14, 4 }
 0x184   : > { %15989 = vmatmul.mubr.msk.bf16.gmra.mrb[12].mxu1 %vm724_vm6, %v21984_v60 }
 0x185   : > { %15992 = vmatprep.mubr.msk.bf16.mxu1 %vm724_vm6, %v21985_v29 }
 0x187   : > { %16493 = vmatmul.mubr.msk.bf16.gmra.mrb[12].mxu0 %vm724_vm6, %v17733_v25  ;;  %v17838_v25 = vld [vmem:[%s17924_s6 + $0x220] sm:$0xf] }
 0x188   : > { %16496 = vmatprep.mubr.msk.bf16.mxu0 %vm724_vm6, %v17735_v4  ;;  %v13535_v4 = vcombine.low %v17838_v25, %v13515_v27 }
 0x18c   : > { %15993 = vmatmul.mubr.msk.bf16.gmra.mrb[16].mxu1 %vm724_vm6, %v21986_v53 }
 0x18d   : > { %15996 = vmatprep.mubr.msk.bf16.mxu1 %vm724_vm6, %v21987_v23 }
 0x18f   : > { %16497 = vmatmul.mubr.msk.bf16.gmra.mrb[16].mxu0 %vm724_vm6, %v17736_v45  ;;  %v9287_v45 = vsel %vm17938_vm5, %v14703_v17, %v9286_v9  ;;  %v9197_v9 = vld [vmem:[%s17924_s6 + $0x98] sm:$0xf] }
 0x190   : > { %16500 = vmatprep.mubr.msk.bf16.mxu0 %vm724_vm6, %v17738_v8  ;;  %v13516_v8 = vld [vmem:[%s17924_s6 + $0x240] sm:$0xf]  ;;  %v9314_v37 = vrot.slane %v9197_v9, 5  ;;  %v9205_v9 = vld [vmem:[%s17924_s6 + $0xe8] sm:$0xe] }
 0x191   : > { %v13536_v11 = vcombine.low %v17839_v24, %v13516_v8  ;;  %v9324_v8 = vrot.slane %v9201_v31, 5 }
 0x192   : > { %v9316_v46 = vrot.slane %v9314_v37, 4 }
 0x194   : > { %15997 = vmatmul.mubr.msk.bf16.gmra.mrb[20].mxu1 %vm724_vm6, %v21988_v56 }
 0x195   : > { %16000 = vmatprep.mubr.msk.bf16.mxu1 %vm724_vm6, %v21989_v54 }
 0x197   : > { %16501 = vmatmul.mubr.msk.bf16.gmra.mrb[20].mxu0 %vm724_vm6, %v17739_v19  ;;  %v9195_v19 = vld [vmem:[%s17924_s6 + $0x80] sm:$0x1] }
 0x198   : > { %16504 = vmatprep.mubr.msk.bf16.mxu0 %vm724_vm6, %v17740_v2  ;;  %v9290_v2 = vsel %vm17938_vm5, %v9288_v50, %v9289_v18  ;;  %v9310_v7 = vrot.slane %v9195_v19, 5  ;;  %v9321_v50 = vrot.slane %v9200_v1, 5  ;;  %v9203_v19 = vld [vmem:[%s17924_s6 + $0xd0] sm:$0xf] }
 0x199   : > { %v14723_v39 = vcombine.low %v9287_v45, %v9290_v2  ;;  %v13519_v2 = vld [vmem:[%s17924_s6 + $0x294] sm:$0xf] }
 0x19a   : > { %v9311_v32 = vsel %vm17938_vm5, %v9309_v55, %v9310_v7  ;;  %v9323_v45 = vrot.slane %v9321_v50, 4  ;;  %v9202_v7 = vld [vmem:[%s17924_s6 + $0xcc] sm:$0xe]  ;;  %v9207_v55 = vld [vmem:[%s17924_s6 + $0xf0] sm:$0x1] }
 0x19b   : > { %v14709_v40 = vrot.slane %v9202_v7, 9  ;;  %v9218_v7 = vld [vmem:[%s17924_s6 + $0x15c] sm:$0xf] }
 0x19c   : > { %16001 = vmatmul.mubr.msk.bf16.gmra.mrb[24].mxu1 %vm724_vm6, %v21990_v13 }
 0x19d   : > { %16004 = vmatprep.mubr.msk.bf16.mxu1 %vm724_vm6, %v21991_v49 }
 0x19f   : > { %16505 = vmatmul.mubr.msk.bf16.gmra.mrb[24].mxu0 %vm724_vm6, %v17741_v62  ;;  %v9303_v62 = vrot.slane %v9192_v36, 5 }
 0x1a0   : > { %16508 = vmatprep.mubr.msk.bf16.mxu0 %vm724_vm6, %v17742_v3  ;;  %v14706_v3 = vrot.slane %v9193_v35, 9 }
 0x1a1   : > { %v9304_v27 = vsel %vm17938_vm5, %v9302_v21, %v9303_v62  ;;  %v9328_v62 = vrot.slane %v9203_v19, 5  ;;  %v9213_v19 = vld [vmem:[%s17924_s6 + $0x128] sm:$0x1] }
 0x1a2   : > { %v9308_v18 = vsel %vm17938_vm5, %v14706_v3, %v9307_v14  ;;  %v17842_v3 = vld [vmem:[%s17924_s6 + $0x290] sm:$0xf] }
 0x1a3   : > { %v13539_v14 = vcombine.low %v17842_v3, %v13519_v2 }
 0x1a4   : > { %16005 = vmatmul.mubr.msk.bf16.gmra.mrb[28].mxu1 %vm724_vm6, %v21992_v42 }
 0x1a5   : > { %16012 = vmatprep.mubr.msk.bf16.mxu1 %vm724_vm6, %v13534_v34  ;;  %v17840_v34 = vld [vmem:[%s17924_s6 + $0x258] sm:$0xf] }
 0x1a6   : > { %v13537_v17 = vcombine.low %v17840_v34, %v13517_v15 }
 0x1a7   : > { %16509 = vmatmul.mubr.msk.bf16.gmra.mrb[28].mxu0 %vm724_vm6, %v17743_v0  ;;  %v9198_v0 = vld [vmem:[%s17924_s6 + $0x9c] sm:$0x1] }
 0x1a8   : > { %16516 = vmatprep.mubr.msk.bf16.mxu0 %vm724_vm6, %v14722_v59  ;;  %v9199_v59 = vld [vmem:[%s17924_s6 + $0xb0] sm:$0xe]  ;;  %v9317_v25 = vrot.slane %v9198_v0, 5  ;;  %v13522_v0 = vld [vmem:[%s17924_s6 + $0x2e8] sm:$0xf] }
 0x1aa   : > { %v9318_v21 = vsel %vm17938_vm5, %v9316_v46, %v9317_v25  ;;  %v9210_v46 = vld [vmem:[%s17924_s6 + $0x10c] sm:$0x1] }
 0x1ac   : > { %16013 = vmatmul.mubr.msk.bf16.vlgmr.msra.gmra.mrb[0].mxu1 %vm724_vm6, %v13535_v4  ;;  %v14708_v4 = vrot.slane %v9199_v59, 9  ;;  %v17844_v59 = vld [vmem:[%s17924_s6 + $0x2c8] sm:$0xf] }
 0x1ad   : > { %16045 = vmatpush3.bf16.msra.mxu1 %v19809_v26  ;;  %16016 = vmatprep.mubr.msk.bf16.mxu1 %vm724_vm6, %v13536_v11  ;;  %v9301_v26 = vsel %vm17938_vm5, %v14705_v30, %v9300_v61  ;;  %v14726_v61 = vcombine.low %v9308_v18, %v9311_v32  ;;  %v9325_v11 = vsel %vm17938_vm5, %v9323_v45, %v9324_v8  ;;  %v9209_v18 = vld [vmem:[%s17924_s6 + $0x108] sm:$0xf]  ;;  %v13521_v32 = vld [vmem:[%s17924_s6 + $0x2cc] sm:$0xf]  ;;  %v9211_v8 = vld [vmem:[%s17924_s6 + $0x120] sm:$0xe] }
 0x1ae   : > { %16046 = vmatprep.subr.bf16.mxu1 %v17754_v43  ;;  %v14725_v36 = vcombine.low %v9301_v26, %v9304_v27  ;;  %v9322_v24 = vsel %vm17938_vm5, %v14708_v4, %v9321_v50  ;;  %v9330_v26 = vrot.slane %v9328_v62, 4  ;;  %v9329_v50 = vsel %vm17938_vm5, %v14709_v40, %v9328_v62  ;;  %v17845_v4 = vld [vmem:[%s17924_s6 + $0x2e4] sm:$0xf]  ;;  %v9214_v40 = vld [vmem:[%s17924_s6 + $0x13c] sm:$0xe] }
 0x1af   : > { %16517 = vmatmul.mubr.msk.bf16.vlgmr.msra.gmra.mrb[0].mxu0 %vm724_vm6, %v14723_v39  ;;  %v9335_v39 = vrot.slane %v9206_v28, 5  ;;  %v14728_v1 = vcombine.low %v9322_v24, %v9325_v11  ;;  %v13541_v31 = vcombine.low %v17844_v59, %v13521_v32  ;;  %v13542_v45 = vcombine.low %v17845_v4, %v13522_v0  ;;  %v9215_v24 = vld [vmem:[%s17924_s6 + $0x140] sm:$0xf]  ;;  %v13523_v11 = vld [vmem:[%s17924_s6 + $0x304] sm:$0xf] }
 0x1b0   : > { %16549 = vmatpush3.bf16.msra.mxu0 %v19816_v12  ;;  %16520 = vmatprep.mubr.msk.bf16.mxu0 %vm724_vm6, %v14724_v63  ;;  %v9196_v12 = vld [vmem:[%s17924_s6 + $0x94] sm:$0xe]  ;;  %v17843_v63 = vld [vmem:[%s17924_s6 + $0x2ac] sm:$0xf]  ;;  %v14712_v62 = vrot.slane %v9211_v8, 9 }
 0x1b1   : > { %16550 = vmatprep.subr.bf16.mxu0 %v17756_v47  ;;  %16047 = vmatpush3.bf16.msra.mxu1 %v17754_v43  ;;  %v14707_v35 = vrot.slane %v9196_v12, 9  ;;  %v9204_v43 = vld [vmem:[%s17924_s6 + $0xd4] sm:$0x1]  ;;  %v13540_v15 = vcombine.low %v17843_v63, %v13520_v20  ;;  %v9337_v34 = vrot.slane %v9335_v39, 4  ;;  %v9212_v12 = vld [vmem:[%s17924_s6 + $0x124] sm:$0xf] }
 0x1b2   : > { %16080 = vmatprep.subr.bf16.mxu1 %v19924_v33  ;;  %v9331_v27 = vrot.slane %v9204_v43, 5  ;;  %v9349_v25 = vrot.slane %v9212_v12, 5  ;;  %v13524_v43 = vld [vmem:[%s17924_s6 + $0x320] sm:$0xf]  ;;  %v9221_v12 = vld [vmem:[%s17924_s6 + $0x178] sm:$0xf] }
 0x1b3   : > { %v9315_v30 = vsel %vm17938_vm5, %v14707_v35, %v9314_v37  ;;  %v14710_v37 = vrot.slane %v9205_v9, 9  ;;  %v9208_v35 = vld [vmem:[%s17924_s6 + $0x104] sm:$0xe]  ;;  %v17846_v9 = vld [vmem:[%s17924_s6 + $0x300] sm:$0xf] }
 0x1b4   : > { %16551 = vmatpush3.bf16.msra.mxu0 %v17756_v47  ;;  %16017 = vmatmul.mubr.msk.bf16.gmra.mrb[4].mxu1 %vm724_vm6, %v13537_v17  ;;  %v14727_v47 = vcombine.low %v9315_v30, %v9318_v21  ;;  %v9338_v17 = vrot.slane %v9207_v55, 5  ;;  %v9332_v38 = vsel %vm17938_vm5, %v9330_v26, %v9331_v27  ;;  %v14711_v20 = vrot.slane %v9208_v35, 9  ;;  %v9216_v26 = vld [vmem:[%s17924_s6 + $0x144] sm:$0x1]  ;;  %v13525_v59 = vld [vmem:[%s17924_s6 + $0x33c] sm:$0xf] }
 0x1b5   : > { %16584 = vmatprep.subr.bf16.mxu0 %v19942_v22  ;;  %16020 = vmatprep.mubr.msk.bf16.mxu1 %vm724_vm6, %v13538_v58  ;;  %v9342_v58 = vrot.slane %v9209_v18, 5  ;;  %v14729_v2 = vcombine.low %v9329_v50, %v9332_v38  ;;  %v9345_v21 = vrot.slane %v9210_v46, 5  ;;  %v9351_v3 = vrot.slane %v9349_v25, 4  ;;  %v9219_v18 = vld [vmem:[%s17924_s6 + $0x160] sm:$0x1] }
 0x1b6   : > { %v13543_v55 = vcombine.low %v17846_v9, %v13523_v11  ;;  %v9363_v27 = vrot.slane %v9218_v7, 5  ;;  %v14713_v50 = vrot.slane %v9214_v40, 9  ;;  %v9220_v35 = vld [vmem:[%s17924_s6 + $0x174] sm:$0xe]  ;;  %v9370_v46 = vrot.slane %v9221_v12, 5 }
 0x1b7   : > { %16521 = vmatmul.mubr.msk.bf16.gmra.mrb[4].mxu0 %vm724_vm6, %v14725_v36  ;;  %v9336_v36 = vsel %vm17938_vm5, %v14710_v37, %v9335_v39  ;;  %v9344_v30 = vrot.slane %v9342_v58, 4  ;;  %v9343_v39 = vsel %vm17938_vm5, %v14711_v20, %v9342_v58  ;;  %v17847_v37 = vld [vmem:[%s17924_s6 + $0x31c] sm:$0xf]  ;;  %v9359_v58 = vrot.slane %v9216_v26, 5  ;;  %v13526_v4 = vld [vmem:[%s17924_s6 + $0x358] sm:$0xf] }
 0x1b8   : > { %16524 = vmatprep.mubr.msk.bf16.mxu0 %vm724_vm6, %v14726_v61  ;;  %v9339_v61 = vsel %vm17938_vm5, %v9337_v34, %v9338_v17  ;;  %v13544_v34 = vcombine.low %v17847_v37, %v13524_v43  ;;  %v9217_v17 = vld [vmem:[%s17924_s6 + $0x158] sm:$0xe]  ;;  %v9223_v7 = vld [vmem:[%s17924_s6 + $0x190] sm:$0xe]  ;;  %v9225_v43 = vld [vmem:[%s17924_s6 + $0x198] sm:$0x1] }
 0x1b9   : > { %v14730_v28 = vcombine.low %v9336_v36, %v9339_v61  ;;  %v9346_v63 = vsel %vm17938_vm5, %v9344_v30, %v9345_v21  ;;  %v9365_v36 = vrot.slane %v9363_v27, 4  ;;  %v9366_v61 = vrot.slane %v9219_v18, 5  ;;  %v17848_v8 = vld [vmem:[%s17924_s6 + $0x338] sm:$0xf]  ;;  %v13527_v9 = vld [vmem:[%s17924_s6 + $0x374] sm:$0xf] }
 0x1ba   : > { %v14731_v32 = vcombine.low %v9343_v39, %v9346_v63  ;;  %v14715_v21 = vrot.slane %v9220_v35, 9  ;;  %v9227_v63 = vld [vmem:[%s17924_s6 + $0x1b0] sm:$0xf]  ;;  %v9380_v26 = vrot.slane %v9225_v43, 5  ;;  %v9228_v18 = vld [vmem:[%s17924_s6 + $0x1b4] sm:$0x1] }
 0x1bb   : > { %v9367_v30 = vsel %vm17938_vm5, %v9365_v36, %v9366_v61  ;;  %v13568_v12 = vld [vmem:[%s17924_s6 + $0x2a4] sm:$0xc]  ;;  %v17851_v35 = vld [vmem:[%s17924_s6 + $0x38c] sm:$0xf] }
 0x1bc   : > { %16021 = vmatmul.mubr.msk.bf16.gmra.mrb[8].mxu1 %vm724_vm6, %v13539_v14  ;;  %v9352_v14 = vrot.slane %v9213_v19, 5  ;;  %v13545_v19 = vcombine.low %v17848_v8, %v13525_v59  ;;  %v9371_v37 = vsel %vm17938_vm5, %v14715_v21, %v9370_v46  ;;  %v9695_v59 = vld [vmem:[%s17924_s6 + $0x10] sm:$0xc] }
 0x1bd   : > { %16024 = vmatprep.mubr.msk.bf16.mxu1 %vm724_vm6, %v13540_v15  ;;  %v9356_v15 = vrot.slane %v9215_v24, 5  ;;  %v9372_v24 = vrot.slane %v9370_v46, 4 }
 0x1bf   : > { %16525 = vmatmul.mubr.msk.bf16.gmra.mrb[8].mxu0 %vm724_vm6, %v14727_v47  ;;  %v9350_v47 = vsel %vm17938_vm5, %v14712_v62, %v9349_v25  ;;  %v9358_v38 = vrot.slane %v9356_v15, 4  ;;  %v9224_v25 = vld [vmem:[%s17924_s6 + $0x194] sm:$0xf] }
 0x1c0   : > { %16528 = vmatprep.mubr.msk.bf16.mxu0 %vm724_vm6, %v14728_v1  ;;  %v9353_v1 = vsel %vm17938_vm5, %v9351_v3, %v9352_v14  ;;  %v9377_v62 = vrot.slane %v9224_v25, 5  ;;  %v17849_v3 = vld [vmem:[%s17924_s6 + $0x354] sm:$0xf] }
 0x1c1   : > { %v14732_v0 = vcombine.low %v9350_v47, %v9353_v1  ;;  %v13546_v14 = vcombine.low %v17849_v3, %v13526_v4  ;;  %v13569_v47 = vld [vmem:[%s17924_s6 + $0x2a8] sm:$0xf]  ;;  %v14716_v1 = vrot.slane %v9223_v7, 9  ;;  %v14756_v3 = vrot.slane %v9695_v59, 10 }
 0x1c2   : > { %v9379_v40 = vrot.slane %v9377_v62, 4  ;;  %v13573_v7 = vld [vmem:[%s17924_s6 + $0x2c8] sm:$0x3] }
 0x1c3   : > { %v9378_v25 = vsel %vm17938_vm5, %v14716_v1, %v9377_v62  ;;  %v17852_v59 = vld [vmem:[%s17924_s6 + $0x3a8] sm:$0xf] }
 0x1c4   : > { %16025 = vmatmul.mubr.msk.bf16.gmra.mrb[12].mxu1 %vm724_vm6, %v13541_v31  ;;  %v14714_v31 = vrot.slane %v9217_v17, 9  ;;  %v9226_v17 = vld [vmem:[%s17924_s6 + $0x1ac] sm:$0xe]  ;;  %v9381_v4 = vsel %vm17938_vm5, %v9379_v40, %v9380_v26  ;;  %v13574_v40 = vld [vmem:[%s17924_s6 + $0x2dc] sm:$0xc] }
 0x1c5   : > { %16028 = vmatprep.mubr.msk.bf16.mxu1 %vm724_vm6, %v13542_v45  ;;  %v9222_v45 = vld [vmem:[%s17924_s6 + $0x17c] sm:$0x1]  ;;  %v14717_v8 = vrot.slane %v9226_v17, 9  ;;  %v14736_v62 = vcombine.low %v9378_v25, %v9381_v4  ;;  %v13576_v26 = vld [vmem:[%s17924_s6 + $0x2e4] sm:$0x3] }
 0x1c6   : > { %v9364_v20 = vsel %vm17938_vm5, %v14714_v31, %v9363_v27  ;;  %v9373_v11 = vrot.slane %v9222_v45, 5  ;;  %v9696_v27 = vld [vmem:[%s17924_s6 + $0x14] sm:$0xf]  ;;  %v9697_v31 = vld [vmem:[%s17924_s6 + $0x18] sm:$0x3] }
 0x1c7   : > { %16529 = vmatmul.mubr.msk.bf16.gmra.mrb[12].mxu0 %vm724_vm6, %v14729_v2  ;;  %v9357_v2 = vsel %vm17938_vm5, %v14713_v50, %v9356_v15  ;;  %v14734_v15 = vcombine.low %v9364_v20, %v9367_v30  ;;  %v3216_v50 = vrot.slane %v13569_v47, 6  ;;  %v9793_v36 = vrot.slane %v9696_v27, 6  ;;  %v13572_v45 = vld [vmem:[%s17924_s6 + $0x2c4] sm:$0xf]  ;;  %v13575_v20 = vld [vmem:[%s17924_s6 + $0x2e0] sm:$0xf] }
 0x1c8   : > { %16532 = vmatprep.mubr.msk.bf16.mxu0 %vm724_vm6, %v14730_v28  ;;  %v9360_v28 = vsel %vm17938_vm5, %v9358_v38, %v9359_v58  ;;  %v17850_v38 = vld [vmem:[%s17924_s6 + $0x370] sm:$0xf]  ;;  %v3223_v43 = vrot.slane %v13572_v45, 6  ;;  %v9698_v17 = vld [vmem:[%s17924_s6 + $0x2c] sm:$0xc] }
 0x1c9   : > { %v14733_v39 = vcombine.low %v9357_v2, %v9360_v28  ;;  %v13547_v58 = vcombine.low %v17850_v38, %v13527_v9  ;;  %v9387_v2 = vrot.slane %v9228_v18, 5  ;;  %v13616_v28 = vrot.slane %v13568_v12, 10  ;;  %v13529_v9 = vld [vmem:[%s17924_s6 + $0x3ac] sm:$0xf]  ;;  %v9701_v38 = vld [vmem:[%s17924_s6 + $0x48] sm:$0xc] }
 0x1ca   : > { %v3218_v30 = vrot.slane %v3216_v50, 4  ;;  %v9703_v25 = vld [vmem:[%s17924_s6 + $0x50] sm:$0x3] }
 0x1cb   : > { %v3217_v1 = vsel %vm17927_vm2, %v13616_v28, %v3216_v50  ;;  %v9700_v50 = vld [vmem:[%s17924_s6 + $0x34] sm:$0x3] }
 0x1cc   : > { %16029 = vmatmul.mubr.msk.bf16.gmra.mrb[16].mxu1 %vm724_vm6, %v13543_v55  ;;  %v13528_v55 = vld [vmem:[%s17924_s6 + $0x390] sm:$0xf] }
 0x1cd   : > { %16032 = vmatprep.mubr.msk.bf16.mxu1 %vm724_vm6, %v13544_v34  ;;  %v9374_v34 = vsel %vm17938_vm5, %v9372_v24, %v9373_v11  ;;  %v13548_v46 = vcombine.low %v17851_v35, %v13528_v55  ;;  %v13571_v24 = vld [vmem:[%s17924_s6 + $0x2c0] sm:$0xc]  ;;  %v9795_v11 = vrot.slane %v9793_v36, 4 }
 0x1ce   : > { %v14735_v61 = vcombine.low %v9371_v37, %v9374_v34  ;;  %v13617_v37 = vrot.slane %v13571_v24, 10  ;;  %v3226_v34 = vrot.slane %v13573_v7, 6 }
 0x1cf   : > { %16533 = vmatmul.mubr.msk.bf16.gmra.mrb[16].mxu0 %vm724_vm6, %v14731_v32  ;;  %v9384_v32 = vrot.slane %v9227_v63, 5  ;;  %v3230_v63 = vrot.slane %v13575_v20, 6  ;;  %v9803_v20 = vrot.slane %v9700_v50, 6 }
 0x1d0   : > { %16536 = vmatprep.mubr.msk.bf16.mxu0 %vm724_vm6, %v14732_v0  ;;  %v13570_v0 = vld [vmem:[%s17924_s6 + $0x2ac] sm:$0x3] }
 0x1d1   : > { %v3219_v21 = vrot.slane %v13570_v0, 6  ;;  %v9385_v55 = vsel %vm17938_vm5, %v14717_v8, %v9384_v32  ;;  %v3225_v0 = vrot.slane %v3223_v43, 4  ;;  %v3232_v35 = vrot.slane %v3230_v63, 4  ;;  %v13578_v8 = vld [vmem:[%s17924_s6 + $0x2fc] sm:$0xf] }
 0x1d3   : > { %v3220_v27 = vsel %vm17927_vm2, %v3218_v30, %v3219_v21  ;;  %v9705_v30 = vld [vmem:[%s17924_s6 + $0x68] sm:$0xf]  ;;  %v13581_v21 = vld [vmem:[%s17924_s6 + $0x318] sm:$0xf] }
 0x1d4   : > { %16033 = vmatmul.mubr.msk.bf16.gmra.mrb[20].mxu1 %vm724_vm6, %v13545_v19  ;;  %v9386_v19 = vrot.slane %v9384_v32, 4  ;;  %v9794_v32 = vsel %vm17927_vm2, %v14756_v3, %v9793_v36  ;;  %v13636_v45 = vcombine.low %v3217_v1, %v3220_v27  ;;  %v14757_v36 = vrot.slane %v9698_v17, 10 }
 0x1d5   : > { %16036 = vmatprep.mubr.msk.bf16.mxu1 %vm724_vm6, %v13546_v14  ;;  %v9796_v14 = vrot.slane %v9697_v31, 6  ;;  %v13549_v31 = vcombine.low %v17852_v59, %v13529_v9  ;;  %v3227_v3 = vsel %vm17927_vm2, %v3225_v0, %v3226_v34  ;;  %v3237_v9 = vrot.slane %v13578_v8, 6  ;;  %v13582_v34 = vld [vmem:[%s17924_s6 + $0x31c] sm:$0x3] }
 0x1d6   : > { %v9388_v47 = vsel %vm17938_vm5, %v9386_v19, %v9387_v2  ;;  %v3224_v2 = vsel %vm17927_vm2, %v13617_v37, %v3223_v43  ;;  %v9814_v1 = vrot.slane %v9705_v30, 6  ;;  %v13580_v37 = vld [vmem:[%s17924_s6 + $0x314] sm:$0xc] }
 0x1d7   : > { %16537 = vmatmul.mubr.msk.bf16.gmra.mrb[20].mxu0 %vm724_vm6, %v14733_v39  ;;  %v9699_v39 = vld [vmem:[%s17924_s6 + $0x30] sm:$0xf]  ;;  %v9797_v12 = vsel %vm17927_vm2, %v9795_v11, %v9796_v14  ;;  %v14737_v4 = vcombine.low %v9385_v55, %v9388_v47  ;;  %v14758_v14 = vrot.slane %v9701_v38, 10  ;;  %v9708_v11 = vld [vmem:[%s17924_s6 + $0x84] sm:$0xf]  ;;  %v3239_v59 = vrot.slane %v3237_v9, 4 }
 0x1d8   : > { %16540 = vmatprep.mubr.msk.bf16.mxu0 %vm724_vm6, %v14734_v15  ;;  %v20069_v15 = vld [vmem:[%s17924_s6 + $0x4c] sm:$0xf]  ;;  %v9800_v18 = vrot.slane %v9699_v39, 6  ;;  %v14776_v19 = vcombine.low %v9794_v32, %v9797_v12  ;;  %v13577_v39 = vld [vmem:[%s17924_s6 + $0x2f8] sm:$0xc]  ;;  %v9821_v17 = vrot.slane %v9708_v11, 6 }
 0x1d9   : > { %v9704_v55 = vld [vmem:[%s17924_s6 + $0x64] sm:$0xc]  ;;  %v9706_v47 = vld [vmem:[%s17924_s6 + $0x6c] sm:$0x3]  ;;  %v13619_v50 = vrot.slane %v13577_v39, 10 }
 0x1da   : > { %v9802_v28 = vrot.slane %v9800_v18, 4  ;;  %v9707_v38 = vld [vmem:[%s17924_s6 + $0x80] sm:$0xc] }
 0x1db   : > { %v14760_v8 = vrot.slane %v9707_v38, 10 }
 0x1dc   : > { %16037 = vmatmul.mubr.msk.bf16.gmra.mrb[24].mxu1 %vm724_vm6, %v13547_v58  ;;  %v9807_v58 = vrot.slane %v20069_v15, 6  ;;  %v13579_v15 = vld [vmem:[%s17924_s6 + $0x300] sm:$0x3]  ;;  %v9804_v27 = vsel %vm17927_vm2, %v9802_v28, %v9803_v20  ;;  %v13583_v28 = vld [vmem:[%s17924_s6 + $0x330] sm:$0xc]  ;;  %v17765_v20 = vld [vmem:[%s21839_s1 + $0x88] sm:$0xff]  }
 0x1dd   : > { %16040 = vmatprep.mubr.msk.bf16.mxu1 %vm724_vm6, %v13548_v46  ;;  %v3233_v46 = vrot.slane %v13576_v26, 6  ;;  %v13637_v26 = vcombine.low %v3224_v2, %v3227_v3 }
 0x1de   : > { %v9809_v24 = vrot.slane %v9807_v58, 4  ;;  %v9808_v12 = vsel %vm17927_vm2, %v14758_v14, %v9807_v58  ;;  %v3247_v58 = vrot.slane %v13582_v34, 6  ;;  %v20137_v14 = vld [vmem:[%s17924_s6 + $0x350] sm:$0xf] }
 0x1df   : > { %16541 = vmatmul.mubr.msk.bf16.gmra.mrb[24].mxu0 %vm724_vm6, %v14735_v61  ;;  %v13618_v61 = vrot.slane %v13574_v40, 10  ;;  %v3234_v43 = vsel %vm17927_vm2, %v3232_v35, %v3233_v46  ;;  %v3244_v40 = vrot.slane %v13581_v21, 6  ;;  %v9817_v35 = vrot.slane %v9706_v47, 6  ;;  %v20128_v46 = vld [vmem:[%s17924_s6 + $0x334] sm:$0xf] }
 0x1e0   : > { %16544 = vmatprep.mubr.msk.bf16.mxu0 %vm724_vm6, %v14736_v62  ;;  %v9810_v62 = vrot.slane %v9703_v25, 6  ;;  %v9816_v25 = vrot.slane %v9814_v1, 4  ;;  %v13585_v21 = vld [vmem:[%s17924_s6 + $0x338] sm:$0x3]  ;;  %v3251_v3 = vrot.slane %v20128_v46, 6 }
 0x1e1   : > { %v3231_v7 = vsel %vm17927_vm2, %v13618_v61, %v3230_v63  ;;  %v9801_v63 = vsel %vm17927_vm2, %v14757_v36, %v9800_v18  ;;  %v9709_v18 = vld [vmem:[%s17924_s6 + $0x88] sm:$0x3]  ;;  %v14759_v61 = vrot.slane %v9704_v55, 10  ;;  %v13621_v55 = vrot.slane %v13583_v28, 10  ;;  %v9710_v47 = vld [vmem:[%s17924_s6 + $0x9c] sm:$0xc] }
 0x1e2   : > { %v13638_v32 = vcombine.low %v3231_v7, %v3234_v43  ;;  %v9811_v0 = vsel %vm17927_vm2, %v9809_v24, %v9810_v62  ;;  %v14777_v36 = vcombine.low %v9801_v63, %v9804_v27  ;;  %v9824_v2 = vrot.slane %v9709_v18, 6  ;;  %v9711_v7 = vld [vmem:[%s17924_s6 + $0xa0] sm:$0xf]  ;;  %v17766_v43 = vld [vmem:[%s21839_s1 + $0x168] sm:$0xff]   ;;  %v9712_v27 = vld [vmem:[%s17924_s6 + $0xa4] sm:$0x3] }
 0x1e3   : > { %v14778_v30 = vcombine.low %v9808_v12, %v9811_v0  ;;  %v3238_v24 = vsel %vm17927_vm2, %v13619_v50, %v3237_v9  ;;  %v9815_v11 = vsel %vm17927_vm2, %v14759_v61, %v9814_v1  ;;  %v9818_v39 = vsel %vm17927_vm2, %v9816_v25, %v9817_v35  ;;  %v9714_v1 = vld [vmem:[%s17924_s6 + $0xbc] sm:$0xf]  ;;  %v13588_v12 = vld [vmem:[%s17924_s6 + $0x354] sm:$0x3]  ;;  %v9713_v50 = vld [vmem:[%s17924_s6 + $0xb8] sm:$0xc] }
 0x1e4   : > { %16041 = vmatmul.mubr.msk.bf16.gmra.mrb[28].mxu1 %vm724_vm6, %v13549_v31  ;;  %v3240_v31 = vrot.slane %v13579_v15, 6  ;;  %v3254_v63 = vrot.slane %v13585_v21, 6  ;;  %v3253_v34 = vrot.slane %v3251_v3, 4  ;;  %v9835_v38 = vrot.slane %v9714_v1, 6  ;;  %v20180_v18 = vld [vmem:[%s21839_s1 + $0x170] sm:$0xff]  }
 0x1e5   : > { %16048 = vmatprep.mubr.msk.bf16.mxu1 %vm724_vm6, %v13636_v45  ;;  %v3246_v45 = vrot.slane %v3244_v40, 4  ;;  %v14761_v61 = vrot.slane %v9710_v47, 10  ;;  %v9715_v35 = vld [vmem:[%s17924_s6 + $0xc0] sm:$0x3]  ;;  %v13590_v46 = vld [vmem:[%s17924_s6 + $0x36c] sm:$0xf] }
 0x1e6   : > { %v3241_v62 = vsel %vm17927_vm2, %v3239_v59, %v3240_v31  ;;  %v14779_v59 = vcombine.low %v9815_v11, %v9818_v39  ;;  %v9831_v25 = vrot.slane %v9712_v27, 6  ;;  %v14762_v28 = vrot.slane %v9713_v50, 10  ;;  %v9716_v11 = vld [vmem:[%s17924_s6 + $0xd4] sm:$0xc]  ;;  %v13592_v27 = vld [vmem:[%s17924_s6 + $0x384] sm:$0xc] }
 0x1e7   : > { %16545 = vmatmul.mubr.msk.bf16.gmra.mrb[28].mxu0 %vm724_vm6, %v14737_v4  ;;  %v13620_v4 = vrot.slane %v13580_v37, 10  ;;  %v3248_v9 = vsel %vm17927_vm2, %v3246_v45, %v3247_v58  ;;  %v20170_v37 = vld [vmem:[%s21839_s1 + $0x90] sm:$0xff]   ;;  %v13639_v0 = vcombine.low %v3238_v24, %v3241_v62  ;;  %v3261_v58 = vrot.slane %v13588_v12, 6 }
 0x1e8   : > { %16552 = vmatprep.mubr.msk.bf16.mxu0 %vm724_vm6, %v14776_v19  ;;  %v9823_v19 = vrot.slane %v9821_v17, 4  ;;  %v9837_v21 = vrot.slane %v9835_v38, 4  ;;  %v13591_v24 = vld [vmem:[%s17924_s6 + $0x370] sm:$0x3]  ;;  %v3265_v62 = vrot.slane %v13590_v46, 6 }
 0x1e9   : > { %v3245_v15 = vsel %vm17927_vm2, %v13620_v4, %v3244_v40  ;;  %v3258_v40 = vrot.slane %v20137_v14, 6  ;;  %v9838_v14 = vrot.slane %v9715_v35, 6  ;;  %v9720_v39 = vld [vmem:[%s17924_s6 + $0xf4] sm:$0xf]  ;;  %v9719_v12 = vld [vmem:[%s17924_s6 + $0xf0] sm:$0xc] }
 0x1ea   : > { %v13640_v31 = vcombine.low %v3245_v15, %v3248_v9  ;;  %v13624_v35 = vrot.slane %v13592_v27, 10 }
 0x1eb   : > { %v3260_v45 = vrot.slane %v3258_v40, 4 }
 0x1ec   : > { %16049 = vmatmul.mubr.msk.bf16.vlgmr.msra.gmra.mrb[0].mxu1 %vm724_vm6, %v13637_v26  ;;  %v9825_v26 = vsel %vm17927_vm2, %v9823_v19, %v9824_v2  ;;  %v3255_v19 = vsel %vm17927_vm2, %v3253_v34, %v3254_v63  ;;  %v3268_v63 = vrot.slane %v13591_v24, 6  ;;  %v13594_v34 = vld [vmem:[%s17924_s6 + $0x38c] sm:$0x3]  ;;  %v13597_v24 = vld [vmem:[%s17924_s6 + $0x3a8] sm:$0x3] }
 0x1ed   : > { %16081 = vmatpush3.bf16.msra.mxu1 %v19924_v33  ;;  %16052 = vmatprep.mubr.msk.bf16.mxu1 %vm724_vm6, %v13638_v32  ;;  %v9822_v33 = vsel %vm17927_vm2, %v14760_v8, %v9821_v17  ;;  %v9828_v17 = vrot.slane %v9711_v7, 6  ;;  %v13586_v32 = vld [vmem:[%s17924_s6 + $0x34c] sm:$0xc]  ;;  %v3252_v8 = vsel %vm17927_vm2, %v13621_v55, %v3251_v3  ;;  %v3262_v9 = vsel %vm17927_vm2, %v3260_v45, %v3261_v58  ;;  %v9718_v55 = vld [vmem:[%s17924_s6 + $0xdc] sm:$0x3] }
 0x1ee   : > { %16082 = vmatprep.subr.bf16.mxu1 %v17765_v20  ;;  %v13622_v4 = vrot.slane %v13586_v32, 10  ;;  %v14763_v32 = vrot.slane %v9716_v11, 10  ;;  %v14764_v58 = vrot.slane %v9719_v12, 10  ;;  %v3282_v27 = vrot.slane %v13597_v24, 6 }
 0x1ef   : > { %16553 = vmatmul.mubr.msk.bf16.vlgmr.msra.gmra.mrb[0].mxu0 %vm724_vm6, %v14777_v36  ;;  %v9717_v36 = vld [vmem:[%s17924_s6 + $0xd8] sm:$0xf]  ;;  %v9830_v2 = vrot.slane %v9828_v17, 4  ;;  %v9829_v3 = vsel %vm17927_vm2, %v14761_v61, %v9828_v17  ;;  %v3267_v17 = vrot.slane %v3265_v62, 4  ;;  %v13596_v61 = vld [vmem:[%s17924_s6 + $0x3a4] sm:$0xf] }
 0x1f0   : > { %16585 = vmatpush3.bf16.msra.mxu0 %v19942_v22  ;;  %16556 = vmatprep.mubr.msk.bf16.mxu0 %vm724_vm6, %v14778_v30  ;;  %v14780_v22 = vcombine.low %v9822_v33, %v9825_v26  ;;  %v13589_v30 = vld [vmem:[%s17924_s6 + $0x368] sm:$0xc]  ;;  %v9842_v7 = vrot.slane %v9717_v36, 6  ;;  %v3259_v15 = vsel %vm17927_vm2, %v13622_v4, %v3258_v40  ;;  %v9836_v33 = vsel %vm17927_vm2, %v14762_v28, %v9835_v38  ;;  %v9723_v36 = vld [vmem:[%s17924_s6 + $0x110] sm:$0xf] }
 0x1f1   : > { %16586 = vmatprep.subr.bf16.mxu0 %v17766_v43  ;;  %16083 = vmatpush3.bf16.msra.mxu1 %v17765_v20  ;;  %v13593_v20 = vld [vmem:[%s17924_s6 + $0x388] sm:$0xf]  ;;  %v9832_v1 = vsel %vm17927_vm2, %v9830_v2, %v9831_v25  ;;  %v13623_v26 = vrot.slane %v13589_v30, 10  ;;  %v9839_v40 = vsel %vm17927_vm2, %v9837_v21, %v9838_v14  ;;  %v13642_v50 = vcombine.low %v3259_v15, %v3262_v9  ;;  %v13595_v30 = vld [vmem:[%s17924_s6 + $0x3a0] sm:$0xc] }
 0x1f2   : > { %16116 = vmatprep.subr.bf16.mxu1 %v20170_v37  ;;  %v3272_v47 = vrot.slane %v13593_v20, 6  ;;  %v14781_v38 = vcombine.low %v9829_v3, %v9832_v1  ;;  %v3275_v25 = vrot.slane %v13594_v34, 6  ;;  %v14782_v4 = vcombine.low %v9836_v33, %v9839_v40  ;;  %v13598_v33 = vld [vmem:[%s17924_s6 + $0x3bc] sm:$0xc]  ;;  %v9725_v34 = vld [vmem:[%s17924_s6 + $0x128] sm:$0xc] }
 0x1f3   : > { %v3266_v45 = vsel %vm17927_vm2, %v13623_v26, %v3265_v62  ;;  %v3279_v20 = vrot.slane %v13596_v61, 6  ;;  %v9843_v21 = vsel %vm17927_vm2, %v14763_v32, %v9842_v7  ;;  %v9726_v62 = vld [vmem:[%s17924_s6 + $0x12c] sm:$0xf]  ;;  %v9856_v15 = vrot.slane %v9723_v36, 6  ;;  %v13600_v26 = vld [vmem:[%s17924_s6 + $0x3c4] sm:$0x3] }
 0x1f4   : > { %16587 = vmatpush3.bf16.msra.mxu0 %v17766_v43  ;;  %16053 = vmatmul.mubr.msk.bf16.gmra.mrb[4].mxu1 %vm724_vm6, %v13639_v0  ;;  %v13641_v43 = vcombine.low %v3252_v8, %v3255_v19  ;;  %v9849_v0 = vrot.slane %v9720_v39, 6  ;;  %v3274_v46 = vrot.slane %v3272_v47, 4  ;;  %v13599_v8 = vld [vmem:[%s17924_s6 + $0x3c0] sm:$0xf]  ;;  %v3269_v19 = vsel %vm17927_vm2, %v3267_v17, %v3268_v63  ;;  %v9722_v39 = vld [vmem:[%s17924_s6 + $0x10c] sm:$0xc] }
 0x1f5   : > { %16620 = vmatprep.subr.bf16.mxu0 %v20180_v18  ;;  %16056 = vmatprep.mubr.msk.bf16.mxu1 %vm724_vm6, %v13640_v31  ;;  %v9845_v31 = vrot.slane %v9718_v55, 6  ;;  %v3273_v3 = vsel %vm17927_vm2, %v13624_v35, %v3272_v47  ;;  %v3286_v9 = vrot.slane %v13599_v8, 6  ;;  %v13625_v1 = vrot.slane %v13595_v30, 10  ;;  %v13603_v30 = vld [vmem:[%s17924_s6 + $0x3e0] sm:$0x3] }
 0x1f6   : > { %v9851_v2 = vrot.slane %v9849_v0, 4  ;;  %v3276_v11 = vsel %vm17927_vm2, %v3274_v46, %v3275_v25  ;;  %v9850_v55 = vsel %vm17927_vm2, %v14764_v58, %v9849_v0  ;;  %v3281_v63 = vrot.slane %v3279_v20, 4 }
 0x1f7   : > { %16557 = vmatmul.mubr.msk.bf16.gmra.mrb[4].mxu0 %vm724_vm6, %v14779_v59  ;;  %v9844_v59 = vrot.slane %v9842_v7, 4  ;;  %v13643_v7 = vcombine.low %v3266_v45, %v3269_v19  ;;  %v9863_v40 = vrot.slane %v9726_v62, 6  ;;  %v13644_v32 = vcombine.low %v3273_v3, %v3276_v11  ;;  %v13605_v45 = vld [vmem:[%s17924_s6 + $0x3f8] sm:$0xf]  ;;  %v9728_v62 = vld [vmem:[%s17924_s6 + $0x144] sm:$0xc] }
 0x1f8   : > { %16560 = vmatprep.mubr.msk.bf16.mxu0 %vm724_vm6, %v14780_v22  ;;  %v9721_v22 = vld [vmem:[%s17924_s6 + $0xf8] sm:$0x3]  ;;  %v14765_v12 = vrot.slane %v9722_v39, 10  ;;  %v9858_v0 = vrot.slane %v9856_v15, 4  ;;  %v3288_v61 = vrot.slane %v3286_v9, 4  ;;  %v3280_v46 = vsel %vm17927_vm2, %v13625_v1, %v3279_v20 }
 0x1f9   : > { %v9852_v28 = vrot.slane %v9721_v22, 6  ;;  %v9846_v14 = vsel %vm17927_vm2, %v9844_v59, %v9845_v31  ;;  %v9727_v59 = vld [vmem:[%s17924_s6 + $0x130] sm:$0x3]  ;;  %v13602_v31 = vld [vmem:[%s17924_s6 + $0x3dc] sm:$0xf]  ;;  %v13626_v22 = vrot.slane %v13598_v33, 10  ;;  %v3283_v58 = vsel %vm17927_vm2, %v3281_v63, %v3282_v27 }
 0x1fa   : > { %v14783_v17 = vcombine.low %v9843_v21, %v9846_v14  ;;  %v14766_v25 = vrot.slane %v9725_v34, 10  ;;  %v9865_v36 = vrot.slane %v9863_v40, 4  ;;  %v9866_v8 = vrot.slane %v9727_v59, 6  ;;  %v9732_v20 = vld [vmem:[%s17924_s6 + $0x164] sm:$0xf] }
 0x1fb   : > { %v9853_v47 = vsel %vm17927_vm2, %v9851_v2, %v9852_v28  ;;  %v3293_v19 = vrot.slane %v13602_v31, 6  ;;  %v9729_v2 = vld [vmem:[%s17924_s6 + $0x148] sm:$0xf]  ;;  %v9857_v28 = vsel %vm17927_vm2, %v14765_v12, %v9856_v15  ;;  %v3287_v14 = vsel %vm17927_vm2, %v13626_v22, %v3286_v9  ;;  %v9731_v34 = vld [vmem:[%s17924_s6 + $0x160] sm:$0xc] }
 0x1fc   : > { %16057 = vmatmul.mubr.msk.bf16.gmra.mrb[8].mxu1 %vm724_vm6, %v13641_v43  ;;  %v9724_v43 = vld [vmem:[%s17924_s6 + $0x114] sm:$0x3]  ;;  %v14784_v35 = vcombine.low %v9850_v55, %v9853_v47  ;;  %v3300_v3 = vrot.slane %v13605_v45, 6  ;;  %v13645_v11 = vcombine.low %v3280_v46, %v3283_v58  ;;  %v9864_v39 = vsel %vm17927_vm2, %v14766_v25, %v9863_v40  ;;  %v13606_v55 = vld [vmem:[%s17924_s6 + $0x3fc] sm:$0x3] }
 0x1fd   : > { %16060 = vmatprep.mubr.msk.bf16.mxu1 %vm724_vm6, %v13642_v50  ;;  %v9859_v50 = vrot.slane %v9724_v43, 6  ;;  %v9870_v15 = vrot.slane %v9729_v2, 6  ;;  %v9867_v9 = vsel %vm17927_vm2, %v9865_v36, %v9866_v8  ;;  %v3295_v1 = vrot.slane %v3293_v19, 4  ;;  %v13608_v59 = vld [vmem:[%s17924_s6 + $0x414] sm:$0xf] }
 0x1fe   : > { %v3296_v33 = vrot.slane %v13603_v30, 6  ;;  %v9877_v47 = vrot.slane %v9732_v20, 6  ;;  %v3302_v12 = vrot.slane %v3300_v3, 4  ;;  %v14786_v31 = vcombine.low %v9864_v39, %v9867_v9  ;;  %v9735_v45 = vld [vmem:[%s17924_s6 + $0x180] sm:$0xf] }
 0x1ff   : > { %16561 = vmatmul.mubr.msk.bf16.gmra.mrb[8].mxu0 %vm724_vm6, %v14781_v38  ;;  %v3289_v38 = vrot.slane %v13600_v26, 6  ;;  %v9860_v21 = vsel %vm17927_vm2, %v9858_v0, %v9859_v50  ;;  %v9730_v26 = vld [vmem:[%s17924_s6 + $0x14c] sm:$0x3]  ;;  %v3303_v50 = vrot.slane %v13606_v55, 6  ;;  %v9872_v22 = vrot.slane %v9870_v15, 4 }
 0x200   : > { %16564 = vmatprep.mubr.msk.bf16.mxu0 %vm724_vm6, %v14782_v4  ;;  %v13601_v4 = vld [vmem:[%s17924_s6 + $0x3d8] sm:$0xc]  ;;  %v14785_v63 = vcombine.low %v9857_v28, %v9860_v21  ;;  %v14768_v46 = vrot.slane %v9731_v34, 10  ;;  %v9879_v25 = vrot.slane %v9877_v47, 4  ;;  %v13607_v58 = vld [vmem:[%s17924_s6 + $0x410] sm:$0xc] }
 0x201   : > { %v3290_v24 = vsel %vm17927_vm2, %v3288_v61, %v3289_v38  ;;  %v13627_v43 = vrot.slane %v13601_v4, 10  ;;  %v9873_v61 = vrot.slane %v9730_v26, 6  ;;  %v13611_v38 = vld [vmem:[%s17924_s6 + $0x430] sm:$0xf]  ;;  %v3307_v36 = vrot.slane %v13608_v59, 6 }
 0x202   : > { %v13646_v27 = vcombine.low %v3287_v14, %v3290_v24  ;;  %v9738_v8 = vld [vmem:[%s17924_s6 + $0x19c] sm:$0xf]  ;;  %v3304_v2 = vsel %vm17927_vm2, %v3302_v12, %v3303_v50  ;;  %v13609_v28 = vld [vmem:[%s17924_s6 + $0x418] sm:$0x3]  ;;  %v3314_v30 = vrot.slane %v13611_v38, 6  ;;  %v9884_v24 = vrot.slane %v9735_v45, 6 }
 0x203   : > { %v3294_v0 = vsel %vm17927_vm2, %v13627_v43, %v3293_v19  ;;  %v9874_v14 = vsel %vm17927_vm2, %v9872_v22, %v9873_v61  ;;  %v13629_v43 = vrot.slane %v13607_v58, 10  ;;  %v9736_v55 = vld [vmem:[%s17924_s6 + $0x184] sm:$0x3]  ;;  %v9891_v9 = vrot.slane %v9738_v8, 6  ;;  %v9737_v26 = vld [vmem:[%s17924_s6 + $0x198] sm:$0xc] }
 0x204   : > { %16061 = vmatmul.mubr.msk.bf16.gmra.mrb[12].mxu1 %vm724_vm6, %v13643_v7  ;;  %v13604_v7 = vld [vmem:[%s17924_s6 + $0x3f4] sm:$0xc]  ;;  %v9886_v50 = vrot.slane %v9884_v24, 4  ;;  %v9887_v59 = vrot.slane %v9736_v55, 6  ;;  %v9741_v38 = vld [vmem:[%s17924_s6 + $0x1b8] sm:$0xf] }
 0x205   : > { %16064 = vmatprep.mubr.msk.bf16.mxu1 %vm724_vm6, %v13644_v32  ;;  %v14767_v32 = vrot.slane %v9728_v62, 10  ;;  %v13628_v40 = vrot.slane %v13604_v7, 10  ;;  %v13610_v62 = vld [vmem:[%s17924_s6 + $0x42c] sm:$0xc]  ;;  %v9734_v7 = vld [vmem:[%s17924_s6 + $0x17c] sm:$0xc] }
 0x206   : > { %v13630_v34 = vrot.slane %v13610_v62, 10  ;;  %v14769_v12 = vrot.slane %v9734_v7, 10  ;;  %v9893_v22 = vrot.slane %v9891_v9, 4  ;;  %v13613_v58 = vld [vmem:[%s17924_s6 + $0x448] sm:$0xc] }
 0x207   : > { %16565 = vmatmul.mubr.msk.bf16.gmra.mrb[12].mxu0 %vm724_vm6, %v14783_v17  ;;  %v9733_v17 = vld [vmem:[%s17924_s6 + $0x168] sm:$0x3]  ;;  %v3301_v19 = vsel %vm17927_vm2, %v13628_v40, %v3300_v3  ;;  %v9871_v21 = vsel %vm17927_vm2, %v14767_v32, %v9870_v15  ;;  %v9878_v3 = vsel %vm17927_vm2, %v14768_v46, %v9877_v47  ;;  %v3309_v15 = vrot.slane %v3307_v36, 4  ;;  %v13614_v40 = vld [vmem:[%s17924_s6 + $0x44c] sm:$0xf] }
 0x208   : > { %16568 = vmatprep.mubr.msk.bf16.mxu0 %vm724_vm6, %v14784_v35  ;;  %v3297_v35 = vsel %vm17927_vm2, %v3295_v1, %v3296_v33  ;;  %v9880_v4 = vrot.slane %v9733_v17, 6  ;;  %v13648_v1 = vcombine.low %v3301_v19, %v3304_v2  ;;  %v3310_v33 = vrot.slane %v13609_v28, 6  ;;  %v13615_v8 = vld [vmem:[%s17924_s6 + $0x450] sm:$0x3] }
 0x209   : > { %v13647_v20 = vcombine.low %v3294_v0, %v3297_v35  ;;  %v3316_v17 = vrot.slane %v3314_v30, 4  ;;  %v14770_v0 = vrot.slane %v9737_v26, 10  ;;  %v3308_v35 = vsel %vm17927_vm2, %v13629_v43, %v3307_v36  ;;  %v20346_v26 = vld [vmem:[%s17924_s6 + $0x2c8] sm:$0xf] }
 0x20a   : > { %v9881_v39 = vsel %vm17927_vm2, %v9879_v25, %v9880_v4  ;;  %v3311_v46 = vsel %vm17927_vm2, %v3309_v15, %v3310_v33  ;;  %v3321_v25 = vrot.slane %v13614_v40, 6  ;;  %v3315_v4 = vsel %vm17927_vm2, %v13630_v34, %v3314_v30 }
 0x20b   : > { %v14788_v47 = vcombine.low %v9878_v3, %v9881_v39  ;;  %v9885_v36 = vsel %vm17927_vm2, %v14769_v12, %v9884_v24  ;;  %v9888_v2 = vsel %vm17927_vm2, %v9886_v50, %v9887_v59  ;;  %v9898_v28 = vrot.slane %v9741_v38, 6  ;;  %v9742_v3 = vld [vmem:[%s17924_s6 + $0x1bc] sm:$0x3]  ;;  %v13673_v59 = vld [vmem:[%s17924_s6 + $0x2c4] sm:$0xe] }
 0x20c   : > { %16065 = vmatmul.mubr.msk.bf16.gmra.mrb[16].mxu1 %vm724_vm6, %v13645_v11  ;;  %v13612_v11 = vld [vmem:[%s17924_s6 + $0x434] sm:$0x3]  ;;  %v13649_v30 = vcombine.low %v3308_v35, %v3311_v46  ;;  %v13631_v43 = vrot.slane %v13613_v58, 10  ;;  %v3323_v24 = vrot.slane %v3321_v25, 4  ;;  %v3324_v7 = vrot.slane %v13615_v8, 6 }
 0x20d   : > { %16068 = vmatprep.mubr.msk.bf16.mxu1 %vm724_vm6, %v13646_v27  ;;  %v14787_v27 = vcombine.low %v9871_v21, %v9874_v14  ;;  %v3317_v32 = vrot.slane %v13612_v11, 6  ;;  %v13672_v21 = vld [vmem:[%s17924_s6 + $0x2b0] sm:$0x1]  ;;  %v9892_v14 = vsel %vm17927_vm2, %v14770_v0, %v9891_v9  ;;  %v9740_v11 = vld [vmem:[%s17924_s6 + $0x1b4] sm:$0xc]  ;;  %v14789_v55 = vcombine.low %v9885_v36, %v9888_v2 }
 0x20e   : > { %v3733_v33 = vrot.slane %v13672_v21, 5  ;;  %v14771_v9 = vrot.slane %v9740_v11, 10  ;;  %v9901_v34 = vrot.slane %v9742_v3, 6  ;;  %v3325_v40 = vsel %vm17927_vm2, %v3323_v24, %v3324_v7  ;;  %v13675_v0 = vld [vmem:[%s17924_s6 + $0x2cc] sm:$0x1] }
 0x20f   : > { %16569 = vmatmul.mubr.msk.bf16.gmra.mrb[16].mxu0 %vm724_vm6, %v14785_v63  ;;  %v9739_v63 = vld [vmem:[%s17924_s6 + $0x1a0] sm:$0x3]  ;;  %v3318_v45 = vsel %vm17927_vm2, %v3316_v17, %v3317_v32  ;;  %v20349_v17 = vld [vmem:[%s17924_s6 + $0x2e4] sm:$0xf]  ;;  %v3322_v32 = vsel %vm17927_vm2, %v13631_v43, %v3321_v25  ;;  %v13678_v46 = vld [vmem:[%s17924_s6 + $0x2e8] sm:$0x1] }
 0x210   : > { %16572 = vmatprep.mubr.msk.bf16.mxu0 %vm724_vm6, %v14786_v31  ;;  %v20315_v31 = vld [vmem:[%s17924_s6 + $0x2ac] sm:$0xf]  ;;  %v9894_v61 = vrot.slane %v9739_v63, 6  ;;  %v13650_v39 = vcombine.low %v3315_v4, %v3318_v45  ;;  %v13676_v35 = vld [vmem:[%s17924_s6 + $0x2e0] sm:$0xe]  ;;  %v13651_v25 = vcombine.low %v3322_v32, %v3325_v40  ;;  %v13719_v45 = vrot.slane %v13673_v59, 9 }
 0x211   : > { %v3730_v19 = vrot.slane %v20315_v31, 5  ;;  %v3740_v8 = vrot.slane %v13675_v0, 5  ;;  %v13720_v36 = vrot.slane %v13676_v35, 9  ;;  %v20374_v21 = vld [vmem:[%s17924_s6 + $0x300] sm:$0xf]  ;;  %v17771_v59 = vld [vmem:[%s17924_s6 + $0x230] sm:$0xff]  }
 0x212   : > { %v9895_v62 = vsel %vm17927_vm2, %v9893_v22, %v9894_v61  ;;  %v3744_v22 = vrot.slane %v20349_v17, 5  ;;  %v9899_v61 = vsel %vm17927_vm2, %v14771_v9, %v9898_v28  ;;  %v3751_v11 = vrot.slane %v20374_v21, 5  ;;  %v13679_v43 = vld [vmem:[%s17924_s6 + $0x2fc] sm:$0xe]  ;;  %v13681_v24 = vld [vmem:[%s17924_s6 + $0x304] sm:$0x1] }
 0x213   : > { %v3732_v15 = vrot.slane %v3730_v19, 4  ;;  %v14790_v63 = vcombine.low %v9892_v14, %v9895_v62  ;;  %v13721_v9 = vrot.slane %v13679_v43, 9  ;;  %v20407_v0 = vld [vmem:[%s17924_s6 + $0x354] sm:$0xf]  ;;  %v20444_v43 = vld [vmem:[%s17924_s6 + $0x370] sm:$0xf] }
 0x214   : > { %16069 = vmatmul.mubr.msk.bf16.gmra.mrb[20].mxu1 %vm724_vm6, %v13647_v20  ;;  %v13670_v20 = vld [vmem:[%s17924_s6 + $0x2a8] sm:$0xe]  ;;  %v3746_v2 = vrot.slane %v3744_v22, 4  ;;  %v3745_v3 = vsel %vm17938_vm5, %v13720_v36, %v3744_v22  ;;  %v17780_v22 = vld [vmem:[%s21839_s1 + $0x178] sm:$0xff]  }
 0x215   : > { %16072 = vmatprep.mubr.msk.bf16.mxu1 %vm724_vm6, %v13648_v1  ;;  %v13718_v1 = vrot.slane %v13670_v20, 9  ;;  %v3734_v50 = vsel %vm17938_vm5, %v3732_v15, %v3733_v33  ;;  %v3747_v20 = vrot.slane %v13678_v46, 5  ;;  %v17769_v33 = vld [vmem:[%s17924_s6 + $0x214] sm:$0xff]  }
 0x217   : > { %16573 = vmatmul.mubr.msk.bf16.gmra.mrb[20].mxu0 %vm724_vm6, %v14787_v27  ;;  %v9900_v27 = vrot.slane %v9898_v28, 4  ;;  %v3731_v12 = vsel %vm17938_vm5, %v13718_v1, %v3730_v19  ;;  %v17768_v28 = vld [vmem:[%s17924_s6 + $0x1f8] sm:$0xff]   ;;  %v13684_v1 = vld [vmem:[%s17924_s6 + $0x320] sm:$0x1] }
 0x218   : > { %16576 = vmatprep.mubr.msk.bf16.mxu0 %vm724_vm6, %v14788_v47  ;;  %v3737_v47 = vrot.slane %v20346_v26, 5  ;;  %v13738_v4 = vcombine.low %v3731_v12, %v3734_v50  ;;  %v20400_v12 = vld [vmem:[%s17924_s6 + $0x338] sm:$0xf] }
 0x219   : > { %v9902_v38 = vsel %vm17927_vm2, %v9900_v27, %v9901_v34  ;;  %v3753_v27 = vrot.slane %v3751_v11, 4  ;;  %v3754_v34 = vrot.slane %v13681_v24, 5  ;;  %v17777_v50 = vld [vmem:[%s21839_s1 + $0x98] sm:$0xff]   ;;  %v3765_v35 = vrot.slane %v20400_v12, 5  ;;  %v17773_v24 = vld [vmem:[%s17924_s6 + $0x268] sm:$0xff]  }
 0x21a   : > { %v3739_v58 = vrot.slane %v3737_v47, 4  ;;  %v14791_v19 = vcombine.low %v9899_v61, %v9902_v38  ;;  %v3738_v14 = vsel %vm17938_vm5, %v13719_v45, %v3737_v47  ;;  %v3761_v47 = vrot.slane %v13684_v1, 5 }
 0x21b   : > { %v3752_v61 = vsel %vm17938_vm5, %v13721_v9, %v3751_v11  ;;  %v3755_v38 = vsel %vm17938_vm5, %v3753_v27, %v3754_v34  ;;  %v3772_v45 = vrot.slane %v20407_v0, 5  ;;  %v13691_v9 = vld [vmem:[%s17924_s6 + $0x36c] sm:$0xe]  ;;  %v13693_v27 = vld [vmem:[%s17924_s6 + $0x374] sm:$0x1] }
 0x21c   : > { %16073 = vmatmul.mubr.msk.bf16.gmra.mrb[24].mxu1 %vm724_vm6, %v13649_v30  ;;  %v20378_v30 = vld [vmem:[%s17924_s6 + $0x31c] sm:$0xf]  ;;  %v3741_v62 = vsel %vm17938_vm5, %v3739_v58, %v3740_v8  ;;  %v20431_v58 = vld [vmem:[%s21839_s1 + $0xa0] sm:$0xff]   ;;  %v13688_v8 = vld [vmem:[%s17924_s6 + $0x350] sm:$0xe]  ;;  %v13741_v36 = vcombine.low %v3752_v61, %v3755_v38  ;;  %v3782_v61 = vrot.slane %v13693_v27, 5 }
 0x21d   : > { %16076 = vmatprep.mubr.msk.bf16.mxu1 %vm724_vm6, %v13650_v39  ;;  %v3748_v39 = vsel %vm17938_vm5, %v3746_v2, %v3747_v20  ;;  %v3758_v7 = vrot.slane %v20378_v30, 5  ;;  %v13739_v15 = vcombine.low %v3738_v14, %v3741_v62  ;;  %v20440_v2 = vld [vmem:[%s21839_s1 + $0x180] sm:$0xff]   ;;  %v3767_v14 = vrot.slane %v3765_v35, 4 }
 0x21e   : > { %v13724_v11 = vrot.slane %v13688_v8, 9  ;;  %v17774_v38 = vld [vmem:[%s17924_s6 + $0x284] sm:$0xff]  }
 0x21f   : > { %16577 = vmatmul.mubr.msk.bf16.gmra.mrb[24].mxu0 %vm724_vm6, %v14789_v55  ;;  %v13682_v55 = vld [vmem:[%s17924_s6 + $0x318] sm:$0xe]  ;;  %v3760_v40 = vrot.slane %v3758_v7, 4 }
 0x220   : > { %16580 = vmatprep.mubr.msk.bf16.mxu0 %vm724_vm6, %v14790_v63  ;;  %v13740_v63 = vcombine.low %v3745_v3, %v3748_v39  ;;  %v13722_v32 = vrot.slane %v13682_v55, 9  ;;  %v3774_v3 = vrot.slane %v3772_v45, 4 }
 0x222   : > { %v3759_v46 = vsel %vm17938_vm5, %v13722_v32, %v3758_v7  ;;  %v20449_v7 = vld [vmem:[%s17924_s6 + $0x38c] sm:$0xf]  ;;  %v13694_v32 = vld [vmem:[%s17924_s6 + $0x388] sm:$0xe] }
 0x223   : > { %v3786_v34 = vrot.slane %v20449_v7, 5 }
 0x224   : > { %16077 = vmatmul.mubr.msk.bf16.gmra.mrb[28].mxu1 %vm724_vm6, %v13651_v25  ;;  %v3762_v25 = vsel %vm17938_vm5, %v3760_v40, %v3761_v47  ;;  %v13696_v40 = vld [vmem:[%s17924_s6 + $0x390] sm:$0x1] }
 0x225   : > { %16084 = vmatprep.mubr.msk.bf16.mxu1 %vm724_vm6, %v13738_v4  ;;  %v13687_v4 = vld [vmem:[%s17924_s6 + $0x33c] sm:$0x1]  ;;  %v13742_v20 = vcombine.low %v3759_v46, %v3762_v25  ;;  %v3788_v46 = vrot.slane %v3786_v34, 4  ;;  %v3789_v25 = vrot.slane %v13696_v40, 5 }
 0x226   : > { %v3768_v62 = vrot.slane %v13687_v4, 5  ;;  %v17775_v4 = vld [vmem:[%s17924_s6 + $0x2a0] sm:$0xff]   ;;  %v20502_v40 = vld [vmem:[%s17924_s6 + $0x3fc] sm:$0xf] }
 0x227   : > { %16581 = vmatmul.mubr.msk.bf16.gmra.mrb[28].mxu0 %vm724_vm6, %v14791_v19  ;;  %v13690_v19 = vld [vmem:[%s17924_s6 + $0x358] sm:$0x1] }
 0x228   : > { %16588 = vmatprep.mubr.msk.bf16.mxu0 %vm724_vm6, %v17768_v28  ;;  %v3775_v39 = vrot.slane %v13690_v19, 5  ;;  %v3769_v1 = vsel %vm17938_vm5, %v3767_v14, %v3768_v62  ;;  %v13697_v14 = vld [vmem:[%s17924_s6 + $0x3a4] sm:$0xe]  ;;  %v13699_v62 = vld [vmem:[%s17924_s6 + $0x3ac] sm:$0x1] }
 0x22c   : > { %16085 = vmatmul.mubr.msk.bf16.vlgmr.msra.gmra.mrb[0].mxu1 %vm724_vm6, %v13739_v15  ;;  %v3779_v15 = vrot.slane %v20444_v43, 5 }
 0x22d   : > { %16117 = vmatpush3.bf16.msra.mxu1 %v20170_v37  ;;  %16088 = vmatprep.mubr.msk.bf16.mxu1 %vm724_vm6, %v13740_v63  ;;  %v13685_v37 = vld [vmem:[%s17924_s6 + $0x334] sm:$0xe]  ;;  %v3776_v63 = vsel %vm17938_vm5, %v3774_v3, %v3775_v39  ;;  %v13702_v3 = vld [vmem:[%s17924_s6 + $0x3c8] sm:$0x1] }
 0x22e   : > { %16118 = vmatprep.subr.bf16.mxu1 %v17777_v50  ;;  %v13723_v28 = vrot.slane %v13685_v37, 9  ;;  %v20472_v37 = vld [vmem:[%s17924_s6 + $0x3a8] sm:$0xf]  ;;  %v3803_v27 = vrot.slane %v13702_v3, 5  ;;  %v20524_v3 = vld [vmem:[%s17924_s6 + $0x418] sm:$0xf] }
 0x22f   : > { %16589 = vmatmul.mubr.msk.bf16.vlgmr.msra.gmra.mrb[0].mxu0 %vm724_vm6, %v17769_v33  ;;  %v3773_v33 = vsel %vm17938_vm5, %v13724_v11, %v3772_v45  ;;  %v20476_v45 = vld [vmem:[%s17924_s6 + $0x3c4] sm:$0xf]  ;;  %v13700_v11 = vld [vmem:[%s17924_s6 + $0x3c0] sm:$0xe] }
 0x230   : > { %16621 = vmatpush3.bf16.msra.mxu0 %v20180_v18  ;;  %16592 = vmatprep.mubr.msk.bf16.mxu0 %vm724_vm6, %v17771_v59  ;;  %v17772_v18 = vld [vmem:[%s17924_s6 + $0x24c] sm:$0xff]   ;;  %v3766_v55 = vsel %vm17938_vm5, %v13723_v28, %v3765_v35  ;;  %v13725_v59 = vrot.slane %v13691_v9, 9  ;;  %v13726_v35 = vrot.slane %v13694_v32, 9  ;;  %v3790_v28 = vsel %vm17938_vm5, %v3788_v46, %v3789_v25  ;;  %v17778_v32 = vld [vmem:[%s17924_s6 + $0x2d8] sm:$0xff]  }
 0x231   : > { %16622 = vmatprep.subr.bf16.mxu0 %v17780_v22  ;;  %16119 = vmatpush3.bf16.msra.mxu1 %v17777_v50  ;;  %v13743_v47 = vcombine.low %v3766_v55, %v3769_v1  ;;  %v13744_v50 = vcombine.low %v3773_v33, %v3776_v63  ;;  %v13727_v55 = vrot.slane %v13697_v14, 9  ;;  %v17776_v33 = vld [vmem:[%s17924_s6 + $0x2bc] sm:$0xff]   ;;  %v13728_v63 = vrot.slane %v13700_v11, 9  ;;  %v13706_v25 = vld [vmem:[%s17924_s6 + $0x3f8] sm:$0xe] }
 0x232   : > { %16152 = vmatprep.subr.bf16.mxu1 %v20431_v58  ;;  %v3780_v8 = vsel %vm17938_vm5, %v13725_v59, %v3779_v15  ;;  %v3814_v46 = vrot.slane %v20502_v40, 5  ;;  %v17779_v14 = vld [vmem:[%s17924_s6 + $0x2f4] sm:$0xff]  }
 0x234   : > { %16623 = vmatpush3.bf16.msra.mxu0 %v17780_v22  ;;  %16089 = vmatmul.mubr.msk.bf16.gmra.mrb[4].mxu1 %vm724_vm6, %v13741_v36  ;;  %v3781_v22 = vrot.slane %v3779_v15, 4  ;;  %v3793_v36 = vrot.slane %v20472_v37, 5  ;;  %v3796_v15 = vrot.slane %v13699_v62, 5  ;;  %v13730_v62 = vrot.slane %v13706_v25, 9 }
 0x235   : > { %16656 = vmatprep.subr.bf16.mxu0 %v20440_v2  ;;  %16092 = vmatprep.mubr.msk.bf16.mxu1 %vm724_vm6, %v13742_v20  ;;  %v3787_v20 = vsel %vm17938_vm5, %v13726_v35, %v3786_v34  ;;  %v20498_v34 = vld [vmem:[%s17924_s6 + $0x3e0] sm:$0xf]  ;;  %v13705_v35 = vld [vmem:[%s17924_s6 + $0x3e4] sm:$0x1] }
 0x236   : > { %v3783_v19 = vsel %vm17938_vm5, %v3781_v22, %v3782_v61  ;;  %v3795_v1 = vrot.slane %v3793_v36, 4  ;;  %v3807_v59 = vrot.slane %v20498_v34, 5 }
 0x237   : > { %16593 = vmatmul.mubr.msk.bf16.gmra.mrb[4].mxu0 %vm724_vm6, %v17772_v18  ;;  %v3800_v18 = vrot.slane %v20476_v45, 5  ;;  %v13745_v39 = vcombine.low %v3780_v8, %v3783_v19 }
 0x238   : > { %16596 = vmatprep.mubr.msk.bf16.mxu0 %vm724_vm6, %v17773_v24  ;;  %v13746_v24 = vcombine.low %v3787_v20, %v3790_v28  ;;  %v3809_v20 = vrot.slane %v3807_v59, 4  ;;  %v3810_v28 = vrot.slane %v13705_v35, 5 }
 0x239   : > { %v3802_v9 = vrot.slane %v3800_v18, 4  ;;  %v3801_v22 = vsel %vm17938_vm5, %v13728_v63, %v3800_v18  ;;  %v3816_v18 = vrot.slane %v3814_v46, 4 }
 0x23b   : > { %v3804_v61 = vsel %vm17938_vm5, %v3802_v9, %v3803_v27  ;;  %v13709_v9 = vld [vmem:[%s17924_s6 + $0x414] sm:$0xe]  ;;  %v13711_v27 = vld [vmem:[%s17924_s6 + $0x41c] sm:$0x1] }
 0x23c   : > { %16093 = vmatmul.mubr.msk.bf16.gmra.mrb[8].mxu1 %vm724_vm6, %v13743_v47  ;;  %v3794_v47 = vsel %vm17938_vm5, %v13727_v55, %v3793_v36  ;;  %v13748_v19 = vcombine.low %v3801_v22, %v3804_v61  ;;  %v13731_v61 = vrot.slane %v13709_v9, 9  ;;  %v3824_v35 = vrot.slane %v13711_v27, 5  ;;  %v17784_v9 = vld [vmem:[%s17924_s6 + $0x364] sm:$0xff]  }
 0x23d   : > { %16096 = vmatprep.mubr.msk.bf16.mxu1 %vm724_vm6, %v13744_v50  ;;  %v3797_v50 = vsel %vm17938_vm5, %v3795_v1, %v3796_v15  ;;  %v3811_v1 = vsel %vm17938_vm5, %v3809_v20, %v3810_v28  ;;  %v3821_v15 = vrot.slane %v20524_v3, 5  ;;  %v17785_v27 = vld [vmem:[%s17924_s6 + $0x380] sm:$0xff]  }
 0x23e   : > { %v13747_v8 = vcombine.low %v3794_v47, %v3797_v50  ;;  %v13712_v47 = vld [vmem:[%s17924_s6 + $0x430] sm:$0xe]  ;;  %v13714_v50 = vld [vmem:[%s17924_s6 + $0x438] sm:$0x1] }
 0x23f   : > { %16597 = vmatmul.mubr.msk.bf16.gmra.mrb[8].mxu0 %vm724_vm6, %v17774_v38  ;;  %v13703_v38 = vld [vmem:[%s17924_s6 + $0x3dc] sm:$0xe]  ;;  %v13732_v25 = vrot.slane %v13712_v47, 9  ;;  %v3822_v20 = vsel %vm17938_vm5, %v13731_v61, %v3821_v15 }
 0x240   : > { %16600 = vmatprep.mubr.msk.bf16.mxu0 %vm724_vm6, %v17775_v4  ;;  %v13708_v4 = vld [vmem:[%s17924_s6 + $0x400] sm:$0x1]  ;;  %v13729_v36 = vrot.slane %v13703_v38, 9  ;;  %v3823_v38 = vrot.slane %v3821_v15, 4 }
 0x241   : > { %v3817_v11 = vrot.slane %v13708_v4, 5  ;;  %v17786_v61 = vld [vmem:[%s17924_s6 + $0x39c] sm:$0xff]  }
 0x242   : > { %v3808_v55 = vsel %vm17938_vm5, %v13729_v36, %v3807_v59  ;;  %v17783_v36 = vld [vmem:[%s17924_s6 + $0x348] sm:$0xff]   ;;  %v3825_v28 = vsel %vm17938_vm5, %v3823_v38, %v3824_v35 }
 0x243   : > { %v3818_v63 = vsel %vm17938_vm5, %v3816_v18, %v3817_v11  ;;  %v13749_v59 = vcombine.low %v3808_v55, %v3811_v1  ;;  %v13715_v11 = vld [vmem:[%s17924_s6 + $0x44c] sm:$0xe]  ;;  %v13751_v55 = vcombine.low %v3822_v20, %v3825_v28  ;;  %v13774_v35 = vld [vmem:[%s17924_s6 + $0x2e8] sm:$0xf]  ;;  %v13780_v20 = vld [vmem:[%s17924_s6 + $0x390] sm:$0xf] }
 0x244   : > { %16097 = vmatmul.mubr.msk.bf16.gmra.mrb[12].mxu1 %vm724_vm6, %v13745_v39  ;;  %v17781_v39 = vld [vmem:[%s17924_s6 + $0x310] sm:$0xff]   ;;  %v13733_v15 = vrot.slane %v13715_v11, 9  ;;  %v13773_v38 = vld [vmem:[%s17924_s6 + $0x2cc] sm:$0xf]  ;;  %v13785_v28 = vld [vmem:[%s17924_s6 + $0x41c] sm:$0xf] }
 0x245   : > { %16100 = vmatprep.mubr.msk.bf16.mxu1 %vm724_vm6, %v13746_v24  ;;  %v20528_v24 = vld [vmem:[%s17924_s6 + $0x434] sm:$0xf]  ;;  %v13805_v11 = vcombine.low %v20524_v3, %v13785_v28 }
 0x247   : > { %16601 = vmatmul.mubr.msk.bf16.gmra.mrb[12].mxu0 %vm724_vm6, %v17776_v33  ;;  %v3815_v33 = vsel %vm17938_vm5, %v13730_v62, %v3814_v46  ;;  %v17782_v46 = vld [vmem:[%s17924_s6 + $0x32c] sm:$0xff]  }
 0x248   : > { %16604 = vmatprep.mubr.msk.bf16.mxu0 %vm724_vm6, %v17778_v32  ;;  %v3828_v32 = vrot.slane %v20528_v24, 5  ;;  %v13750_v22 = vcombine.low %v3815_v33, %v3818_v63 }
 0x24a   : > { %v3830_v4 = vrot.slane %v3828_v32, 4  ;;  %v3829_v62 = vsel %vm17938_vm5, %v13732_v25, %v3828_v32  ;;  %v13794_v25 = vcombine.low %v20349_v17, %v13774_v35 }
 0x24c   : > { %16101 = vmatmul.mubr.msk.bf16.gmra.mrb[16].mxu1 %vm724_vm6, %v13747_v8  ;;  %v3831_v8 = vrot.slane %v13714_v50, 5  ;;  %v13772_v50 = vld [vmem:[%s17924_s6 + $0x2b0] sm:$0xf] }
 0x24d   : > { %16104 = vmatprep.mubr.msk.bf16.mxu1 %vm724_vm6, %v13748_v19  ;;  %v20550_v19 = vld [vmem:[%s17924_s6 + $0x450] sm:$0xf] }
 0x24e   : > { %v3832_v18 = vsel %vm17938_vm5, %v3830_v4, %v3831_v8  ;;  %v17800_v4 = vld [vmem:[%s21839_s1 + $0x188] sm:$0xff]   ;;  %v13775_v8 = vld [vmem:[%s17924_s6 + $0x304] sm:$0xf] }
 0x24f   : > { %16605 = vmatmul.mubr.msk.bf16.gmra.mrb[16].mxu0 %vm724_vm6, %v17779_v14  ;;  %v3835_v14 = vrot.slane %v20550_v19, 5  ;;  %v13752_v1 = vcombine.low %v3829_v62, %v3832_v18  ;;  %v13795_v17 = vcombine.low %v20374_v21, %v13775_v8  ;;  %v13778_v21 = vld [vmem:[%s17924_s6 + $0x358] sm:$0xf] }
 0x250   : > { %16608 = vmatprep.mubr.msk.bf16.mxu0 %vm724_vm6, %v17781_v39  ;;  %v13717_v39 = vld [vmem:[%s17924_s6 + $0x454] sm:$0x1] }
 0x251   : > { %v3837_v33 = vrot.slane %v3835_v14, 4  ;;  %v3838_v63 = vrot.slane %v13717_v39, 5  ;;  %v3836_v32 = vsel %vm17938_vm5, %v13733_v15, %v3835_v14  ;;  %v13826_v14 = vld [vmem:[%s17924_s6 + $0xa8] sm:$0x8] }
 0x252   : > { %v13830_v39 = vld [vmem:[%s17924_s6 + $0xc8] sm:$0xf] }
 0x253   : > { %v3839_v47 = vsel %vm17938_vm5, %v3837_v33, %v3838_v63 }
 0x254   : > { %16105 = vmatmul.mubr.msk.bf16.gmra.mrb[20].mxu1 %vm724_vm6, %v13749_v59  ;;  %v13753_v59 = vcombine.low %v3836_v32, %v3839_v47  ;;  %v13831_v32 = vld [vmem:[%s17924_s6 + $0xcc] sm:$0x7]  ;;  %v4593_v47 = vrot.slane %v13830_v39, 7 }
 0x255   : > { %16108 = vmatprep.mubr.msk.bf16.mxu1 %vm724_vm6, %v13750_v22  ;;  %v13792_v22 = vcombine.low %v20315_v31, %v13772_v50  ;;  %v17798_v31 = vld [vmem:[%s21839_s1 + $0xa8] sm:$0xff]  }
 0x256   : > { %v14906_v50 = vld [vmem:[%s17924_s6 + $0x228] sm:$0xf] }
 0x257   : > { %16609 = vmatmul.mubr.msk.bf16.gmra.mrb[20].mxu0 %vm724_vm6, %v17782_v46  ;;  %v13793_v46 = vcombine.low %v20346_v26, %v13773_v38  ;;  %v20606_v26 = vld [vmem:[%s21839_s1 + $0xb0] sm:$0xff]   ;;  %v13834_v38 = vld [vmem:[%s17924_s6 + $0xe8] sm:$0x7] }
 0x258   : > { %16612 = vmatprep.mubr.msk.bf16.mxu0 %vm724_vm6, %v17783_v36  ;;  %v13779_v36 = vld [vmem:[%s17924_s6 + $0x374] sm:$0xf] }
 0x25c   : > { %16109 = vmatmul.mubr.msk.bf16.gmra.mrb[24].mxu1 %vm724_vm6, %v13751_v55 }
 0x25d   : > { %16112 = vmatprep.mubr.msk.bf16.mxu1 %vm724_vm6, %v13752_v1  ;;  %v13833_v1 = vld [vmem:[%s17924_s6 + $0xe4] sm:$0xf] }
 0x25e   : > { %v4600_v3 = vrot.slane %v13833_v1, 7  ;;  %v13838_v1 = vld [vmem:[%s17924_s6 + $0x118] sm:$0x8] }
 0x25f   : > { %16613 = vmatmul.mubr.msk.bf16.gmra.mrb[24].mxu0 %vm724_vm6, %v17784_v9 }
 0x260   : > { %16616 = vmatprep.mubr.msk.bf16.mxu0 %vm724_vm6, %v17785_v27 }
 0x264   : > { %16113 = vmatmul.mubr.msk.bf16.gmra.mrb[28].mxu1 %vm724_vm6, %v13753_v59  ;;  %v14909_v59 = vld [vmem:[%s17924_s6 + $0x244] sm:$0xf] }
 0x265   : > { %16120 = vmatprep.mubr.msk.bf16.mxu1 %vm724_vm6, %v13792_v22 }
 0x267   : > { %16617 = vmatmul.mubr.msk.bf16.gmra.mrb[28].mxu0 %vm724_vm6, %v17786_v61  ;;  %v13832_v61 = vld [vmem:[%s17924_s6 + $0xe0] sm:$0x8] }
 0x268   : > { %16624 = vmatprep.mubr.msk.bf16.mxu0 %vm724_vm6, %v21977_v48  ;;  %v13776_v48 = vld [vmem:[%s17924_s6 + $0x320] sm:$0xf] }
 0x26c   : > { %16121 = vmatmul.mubr.msk.bf16.vlgmr.msra.gmra.mrb[0].mxu1 %vm724_vm6, %v13793_v46 }
 0x26d   : > { %16153 = vmatpush3.bf16.msra.mxu1 %v20431_v58  ;;  %16124 = vmatprep.mubr.msk.bf16.mxu1 %vm724_vm6, %v13794_v25  ;;  %v13796_v58 = vcombine.low %v20378_v30, %v13776_v48  ;;  %v4596_v25 = vrot.slane %v13831_v32, 7  ;;  %v14916_v32 = vld [vmem:[%s17924_s6 + $0x280] sm:$0x3] }
 0x26e   : > { %16154 = vmatprep.subr.bf16.mxu1 %v17798_v31 }
 0x26f   : > { %16625 = vmatmul.mubr.msk.bf16.vlgmr.msra.gmra.mrb[0].mxu0 %vm724_vm6, %v21978_v41  ;;  %v20615_v41 = vld [vmem:[%s21839_s1 + $0x190] sm:$0xff]  }
 0x270   : > { %16657 = vmatpush3.bf16.msra.mxu0 %v20440_v2  ;;  %16628 = vmatprep.mubr.msk.bf16.mxu0 %vm724_vm6, %v21979_v57  ;;  %v13777_v57 = vld [vmem:[%s17924_s6 + $0x33c] sm:$0xf]  ;;  %v13798_v2 = vcombine.low %v20407_v0, %v13778_v21 }
 0x271   : > { %16658 = vmatprep.subr.bf16.mxu0 %v17800_v4  ;;  %16155 = vmatpush3.bf16.msra.mxu1 %v17798_v31  ;;  %v13797_v30 = vcombine.low %v20400_v12, %v13777_v57  ;;  %v13781_v12 = vld [vmem:[%s17924_s6 + $0x3ac] sm:$0xf]  ;;  %v14905_v31 = vld [vmem:[%s17924_s6 + $0x224] sm:$0xc]  ;;  %v10901_v57 = vrot.slane %v14909_v59, 6 }
 0x272   : > { %16188 = vmatprep.subr.bf16.mxu1 %v20606_v26 }
 0x274   : > { %16659 = vmatpush3.bf16.msra.mxu0 %v17800_v4  ;;  %16125 = vmatmul.mubr.msk.bf16.gmra.mrb[4].mxu1 %vm724_vm6, %v13795_v17  ;;  %v10894_v4 = vrot.slane %v14906_v50, 6  ;;  %v4595_v17 = vrot.slane %v4593_v47, 4 }
 0x275   : > { %16692 = vmatprep.subr.bf16.mxu0 %v20615_v41  ;;  %16128 = vmatprep.mubr.msk.bf16.mxu1 %vm724_vm6, %v13796_v58  ;;  %v14908_v58 = vld [vmem:[%s17924_s6 + $0x240] sm:$0xc] }
 0x277   : > { %16629 = vmatmul.mubr.msk.bf16.gmra.mrb[4].mxu0 %vm724_vm6, %v21980_v10  ;;  %v13799_v10 = vcombine.low %v20444_v43, %v13779_v36  ;;  %v13783_v43 = vld [vmem:[%s17924_s6 + $0x3e4] sm:$0xf]  ;;  %v4603_v36 = vrot.slane %v13834_v38, 7 }
 0x278   : > { %16632 = vmatprep.mubr.msk.bf16.mxu0 %vm724_vm6, %v21981_v44  ;;  %v13800_v44 = vcombine.low %v20449_v7, %v13780_v20  ;;  %v14910_v20 = vld [vmem:[%s17924_s6 + $0x248] sm:$0x3] }
 0x27c   : > { %16129 = vmatmul.mubr.msk.bf16.gmra.mrb[8].mxu1 %vm724_vm6, %v13797_v30  ;;  %v13876_v30 = vrot.slane %v13832_v61, 11  ;;  %v13878_v61 = vrot.slane %v13838_v1, 11 }
 0x27d   : > { %16132 = vmatprep.mubr.msk.bf16.mxu1 %vm724_vm6, %v13798_v2  ;;  %v4602_v2 = vrot.slane %v4600_v3, 4 }
 0x27e   : > { %v4601_v28 = vsel %vm18290_vm9, %v13876_v30, %v4600_v3 }
 0x27f   : > { %16633 = vmatmul.mubr.msk.bf16.gmra.mrb[8].mxu0 %vm724_vm6, %v21982_v5  ;;  %v13782_v5 = vld [vmem:[%s17924_s6 + $0x3c8] sm:$0xf] }
 0x280   : > { %16636 = vmatprep.mubr.msk.bf16.mxu0 %vm724_vm6, %v21983_v51  ;;  %v13801_v51 = vcombine.low %v20472_v37, %v13781_v12  ;;  %v13802_v0 = vcombine.low %v20476_v45, %v13782_v5  ;;  %v13827_v37 = vld [vmem:[%s17924_s6 + $0xac] sm:$0xf] }
 0x281   : > { %v14903_v45 = vld [vmem:[%s17924_s6 + $0x20c] sm:$0xf]  ;;  %v4586_v62 = vrot.slane %v13827_v37, 7  ;;  %v10904_v37 = vrot.slane %v14910_v20, 6  ;;  %v17810_v20 = vld [vmem:[%s21839_s1 + $0x198] sm:$0xff]  }
 0x282   : > { %v10887_v18 = vrot.slane %v14903_v45, 6  ;;  %v14915_v45 = vld [vmem:[%s17924_s6 + $0x27c] sm:$0xf] }
 0x283   : > { %v4588_v15 = vrot.slane %v4586_v62, 4 }
 0x284   : > { %16133 = vmatmul.mubr.msk.bf16.gmra.mrb[12].mxu1 %vm724_vm6, %v13799_v10  ;;  %v10889_v27 = vrot.slane %v10887_v18, 4  ;;  %v14951_v10 = vrot.slane %v14905_v31, 10 }
 0x285   : > { %16136 = vmatprep.mubr.msk.bf16.mxu1 %vm724_vm6, %v13800_v44  ;;  %v13836_v44 = vld [vmem:[%s17924_s6 + $0x100] sm:$0xf] }
 0x287   : > { %16637 = vmatmul.mubr.msk.bf16.gmra.mrb[12].mxu0 %vm724_vm6, %v21984_v60  ;;  %v13784_v60 = vld [vmem:[%s17924_s6 + $0x400] sm:$0xf] }
 0x288   : > { %16640 = vmatprep.mubr.msk.bf16.mxu0 %vm724_vm6, %v21985_v29  ;;  %v13803_v29 = vcombine.low %v20498_v34, %v13783_v43  ;;  %v13804_v7 = vcombine.low %v20502_v40, %v13784_v60  ;;  %v14902_v34 = vld [vmem:[%s17924_s6 + $0x208] sm:$0xc]  ;;  %v14904_v40 = vld [vmem:[%s17924_s6 + $0x210] sm:$0x3]  ;;  %v14912_v43 = vld [vmem:[%s17924_s6 + $0x260] sm:$0xf]  ;;  %v4597_v60 = vsel %vm18290_vm9, %v4595_v17, %v4596_v25 }
 0x289   : > { %v14950_v63 = vrot.slane %v14902_v34, 10  ;;  %v10890_v9 = vrot.slane %v14904_v40, 6  ;;  %v14911_v34 = vld [vmem:[%s17924_s6 + $0x25c] sm:$0xc]  ;;  %v14913_v40 = vld [vmem:[%s17924_s6 + $0x264] sm:$0x3] }
 0x28a   : > { %v14953_v3 = vrot.slane %v14911_v34, 10  ;;  %v10911_v59 = vrot.slane %v14913_v40, 6 }
 0x28b   : > { %v10888_v8 = vsel %vm17927_vm2, %v14950_v63, %v10887_v18  ;;  %v10891_v48 = vsel %vm17927_vm2, %v10889_v27, %v10890_v9  ;;  %v10908_v18 = vrot.slane %v14912_v43, 6  ;;  %v14914_v27 = vld [vmem:[%s17924_s6 + $0x278] sm:$0xc] }
 0x28c   : > { %16137 = vmatmul.mubr.msk.bf16.gmra.mrb[16].mxu1 %vm724_vm6, %v13801_v51  ;;  %v14970_v12 = vcombine.low %v10888_v8, %v10891_v48  ;;  %v10896_v51 = vrot.slane %v10894_v4, 4  ;;  %v14954_v25 = vrot.slane %v14914_v27, 10  ;;  %v13841_v8 = vld [vmem:[%s17924_s6 + $0x134] sm:$0x8]  ;;  %v17809_v48 = vld [vmem:[%s21839_s1 + $0xb8] sm:$0xff]  }
 0x28d   : > { %16140 = vmatprep.mubr.msk.bf16.mxu1 %vm724_vm6, %v13802_v0  ;;  %v13847_v27 = vld [vmem:[%s17924_s6 + $0x16c] sm:$0x8] }
 0x28f   : > { %16641 = vmatmul.mubr.msk.bf16.gmra.mrb[16].mxu0 %vm724_vm6, %v21986_v53  ;;  %v13786_v53 = vld [vmem:[%s17924_s6 + $0x438] sm:$0xf] }
 0x290   : > { %16644 = vmatprep.mubr.msk.bf16.mxu0 %vm724_vm6, %v21987_v23  ;;  %v13828_v23 = vld [vmem:[%s17924_s6 + $0xb0] sm:$0x7]  ;;  %v13806_v55 = vcombine.low %v20528_v24, %v13786_v53  ;;  %v13787_v24 = vld [vmem:[%s17924_s6 + $0x454] sm:$0xf]  ;;  %v4604_v53 = vsel %vm18290_vm9, %v4602_v2, %v4603_v36  ;;  %v10909_v2 = vsel %vm17927_vm2, %v14953_v3, %v10908_v18  ;;  %v14918_v36 = vld [vmem:[%s17924_s6 + $0x298] sm:$0xf] }
 0x291   : > { %v4589_v33 = vrot.slane %v13828_v23, 7  ;;  %v13807_v21 = vcombine.low %v20550_v19, %v13787_v24  ;;  %v13839_v19 = vld [vmem:[%s17924_s6 + $0x11c] sm:$0xf]  ;;  %v13837_v23 = vld [vmem:[%s17924_s6 + $0x104] sm:$0x7]  ;;  %v13896_v63 = vcombine.low %v4601_v28, %v4604_v53 }
 0x292   : > { %v4610_v50 = vrot.slane %v13837_v23, 7  ;;  %v20738_v24 = vld [vmem:[%s17924_s6 + $0x138] sm:$0xf]  ;;  %v13849_v3 = vld [vmem:[%s17924_s6 + $0x174] sm:$0x7] }
 0x293   : > { %v4590_v35 = vsel %vm18290_vm9, %v4588_v15, %v4589_v33  ;;  %v13840_v15 = vld [vmem:[%s17924_s6 + $0x120] sm:$0x7]  ;;  %v10915_v33 = vrot.slane %v14915_v45, 6  ;;  %v13844_v45 = vld [vmem:[%s17924_s6 + $0x150] sm:$0x8] }
 0x294   : > { %16141 = vmatmul.mubr.msk.bf16.gmra.mrb[20].mxu1 %vm724_vm6, %v13803_v29  ;;  %v14952_v29 = vrot.slane %v14908_v58, 10  ;;  %v4621_v58 = vrot.slane %v20738_v24, 7  ;;  %v13846_v28 = vld [vmem:[%s17924_s6 + $0x158] sm:$0x7] }
 0x295   : > { %16144 = vmatprep.mubr.msk.bf16.mxu1 %vm724_vm6, %v13804_v7  ;;  %v10903_v7 = vrot.slane %v10901_v57, 4  ;;  %v10917_v31 = vrot.slane %v10915_v33, 4 }
 0x296   : > { %v10902_v9 = vsel %vm17927_vm2, %v14952_v29, %v10901_v57  ;;  %v20747_v57 = vld [vmem:[%s17924_s6 + $0x154] sm:$0xf]  ;;  %v20780_v29 = vld [vmem:[%s21839_s1 + $0xc0] sm:$0xff]  }
 0x297   : > { %16645 = vmatmul.mubr.msk.bf16.gmra.mrb[20].mxu0 %vm724_vm6, %v21988_v56  ;;  %v13874_v56 = vrot.slane %v13826_v14, 11  ;;  %v13835_v14 = vld [vmem:[%s17924_s6 + $0xfc] sm:$0x8] }
 0x298   : > { %16648 = vmatprep.mubr.msk.bf16.mxu0 %vm724_vm6, %v21989_v54  ;;  %v13829_v54 = vld [vmem:[%s17924_s6 + $0xc4] sm:$0x8] }
 0x299   : > { %v4587_v22 = vsel %vm18290_vm9, %v13874_v56, %v4586_v62  ;;  %v13875_v46 = vrot.slane %v13829_v54, 11  ;;  %v4607_v62 = vrot.slane %v13836_v44, 7  ;;  %v13877_v54 = vrot.slane %v13835_v14, 11  ;;  %v14920_v14 = vld [vmem:[%s17924_s6 + $0x2b0] sm:$0xc] }
 0x29b   : > { %v4594_v5 = vsel %vm18290_vm9, %v13875_v46, %v4593_v47  ;;  %v4609_v47 = vrot.slane %v4607_v62, 4 }
 0x29c   : > { %16145 = vmatmul.mubr.msk.bf16.gmra.mrb[24].mxu1 %vm724_vm6, %v13805_v11  ;;  %v4614_v11 = vrot.slane %v13839_v19, 7  ;;  %v13895_v39 = vcombine.low %v4594_v5, %v4597_v60  ;;  %v14917_v5 = vld [vmem:[%s17924_s6 + $0x294] sm:$0xc]  ;;  %v14919_v19 = vld [vmem:[%s17924_s6 + $0x29c] sm:$0x3]  ;;  %v4628_v60 = vrot.slane %v20747_v57, 7 }
 0x29d   : > { %16148 = vmatprep.mubr.msk.bf16.mxu1 %vm724_vm6, %v13806_v55  ;;  %v10895_v55 = vsel %vm17927_vm2, %v14951_v10, %v10894_v4  ;;  %v10918_v4 = vrot.slane %v14916_v32, 6  ;;  %v4611_v30 = vsel %vm18290_vm9, %v4609_v47, %v4610_v50  ;;  %v13851_v32 = vld [vmem:[%s17924_s6 + $0x18c] sm:$0xf]  ;;  %v13852_v57 = vld [vmem:[%s17924_s6 + $0x190] sm:$0x7] }
 0x29e   : > { %v4616_v38 = vrot.slane %v4614_v11, 4  ;;  %v4615_v10 = vsel %vm18290_vm9, %v13878_v61, %v4614_v11  ;;  %v14922_v11 = vld [vmem:[%s17924_s6 + $0x2b8] sm:$0x3]  ;;  %v4630_v1 = vrot.slane %v4628_v60, 4 }
 0x29f   : > { %16649 = vmatmul.mubr.msk.bf16.gmra.mrb[24].mxu0 %vm724_vm6, %v21990_v13  ;;  %v14907_v13 = vld [vmem:[%s17924_s6 + $0x22c] sm:$0x3]  ;;  %v10932_v50 = vrot.slane %v14922_v11, 6  ;;  %v14933_v11 = vld [vmem:[%s17924_s6 + $0x324] sm:$0xf] }
 0x2a0   : > { %16652 = vmatprep.mubr.msk.bf16.mxu0 %vm724_vm6, %v21991_v49  ;;  %v13894_v49 = vcombine.low %v4587_v22, %v4590_v35  ;;  %v10897_v0 = vrot.slane %v14907_v13, 6  ;;  %v10910_v22 = vrot.slane %v10908_v18, 4  ;;  %v4617_v35 = vrot.slane %v13840_v15, 7  ;;  %v13843_v13 = vld [vmem:[%s17924_s6 + $0x13c] sm:$0x7] }
 0x2a1   : > { %v4624_v43 = vrot.slane %v13843_v13, 7  ;;  %v14955_v18 = vrot.slane %v14917_v5, 10  ;;  %v4631_v15 = vrot.slane %v13846_v28, 7  ;;  %v4638_v13 = vrot.slane %v13849_v3, 7  ;;  %v13854_v5 = vld [vmem:[%s17924_s6 + $0x1a8] sm:$0xf] }
 0x2a2   : > { %v10898_v56 = vsel %vm17927_vm2, %v10896_v51, %v10897_v0  ;;  %v4618_v44 = vsel %vm18290_vm9, %v4616_v38, %v4617_v35  ;;  %v14921_v51 = vld [vmem:[%s17924_s6 + $0x2b4] sm:$0xf]  ;;  %v10919_v0 = vsel %vm17927_vm2, %v10917_v31, %v10918_v4  ;;  %v14927_v38 = vld [vmem:[%s17924_s6 + $0x2ec] sm:$0xf]  ;;  %v4642_v4 = vrot.slane %v13851_v32, 7 }
 0x2a3   : > { %v14971_v46 = vcombine.low %v10895_v55, %v10898_v56  ;;  %v10929_v23 = vrot.slane %v14921_v51, 6  ;;  %v13898_v40 = vcombine.low %v4615_v10, %v4618_v44  ;;  %v10925_v55 = vrot.slane %v14919_v19, 6  ;;  %v14925_v31 = vld [vmem:[%s17924_s6 + $0x2d4] sm:$0x3]  ;;  %v14932_v3 = vld [vmem:[%s17924_s6 + $0x320] sm:$0xc] }
 0x2a4   : > { %16149 = vmatmul.mubr.msk.bf16.gmra.mrb[28].mxu1 %vm724_vm6, %v13807_v21  ;;  %v4608_v21 = vsel %vm18290_vm9, %v13877_v54, %v4607_v62  ;;  %v20790_v62 = vld [vmem:[%s21839_s1 + $0x1a0] sm:$0xff]   ;;  %v13880_v56 = vrot.slane %v13844_v45, 11  ;;  %v14956_v54 = vrot.slane %v14920_v14, 10  ;;  %v10939_v44 = vrot.slane %v14925_v31, 6 }
 0x2a5   : > { %16156 = vmatprep.mubr.msk.bf16.mxu1 %vm724_vm6, %v13894_v49  ;;  %v10912_v49 = vsel %vm17927_vm2, %v10910_v22, %v10911_v59  ;;  %v13897_v53 = vcombine.low %v4608_v21, %v4611_v30  ;;  %v10931_v47 = vrot.slane %v10929_v23, 4  ;;  %v14923_v22 = vld [vmem:[%s17924_s6 + $0x2cc] sm:$0xc]  ;;  %v13857_v45 = vld [vmem:[%s17924_s6 + $0x1c4] sm:$0xf] }
 0x2a6   : > { %v14973_v34 = vcombine.low %v10909_v2, %v10912_v49  ;;  %v14957_v2 = vrot.slane %v14923_v22, 10 }
 0x2a7   : > { %16653 = vmatmul.mubr.msk.bf16.gmra.mrb[28].mxu0 %vm724_vm6, %v21992_v42  ;;  %v10905_v42 = vsel %vm17927_vm2, %v10903_v7, %v10904_v37  ;;  %v4623_v7 = vrot.slane %v4621_v58, 4  ;;  %v10922_v37 = vrot.slane %v14918_v36, 6  ;;  %v10933_v21 = vsel %vm17927_vm2, %v10931_v47, %v10932_v50  ;;  %v14926_v36 = vld [vmem:[%s17924_s6 + $0x2e8] sm:$0xc] }
 0x2a8   : > { %16660 = vmatprep.mubr.msk.bf16.mxu0 %vm724_vm6, %v14970_v12  ;;  %v14972_v17 = vcombine.low %v10902_v9, %v10905_v42  ;;  %v13879_v12 = vrot.slane %v13841_v8, 11 }
 0x2a9   : > { %v4625_v9 = vsel %vm18290_vm9, %v4623_v7, %v4624_v43  ;;  %v10924_v42 = vrot.slane %v10922_v37, 4  ;;  %v10923_v24 = vsel %vm17927_vm2, %v14955_v18, %v10922_v37  ;;  %v4645_v43 = vrot.slane %v13852_v57, 7  ;;  %v14930_v37 = vld [vmem:[%s17924_s6 + $0x308] sm:$0xf]  ;;  %v13855_v18 = vld [vmem:[%s17924_s6 + $0x1ac] sm:$0x7] }
 0x2aa   : > { %v14958_v7 = vrot.slane %v14926_v36, 10  ;;  %v4652_v50 = vrot.slane %v13855_v18, 7  ;;  %v13863_v57 = vld [vmem:[%s17924_s6 + $0x1fc] sm:$0xf]  ;;  %v14938_v18 = vld [vmem:[%s17924_s6 + $0x358] sm:$0xc] }
 0x2ab   : > { %v10926_v8 = vsel %vm17927_vm2, %v10924_v42, %v10925_v55 }
 0x2ac   : > { %16157 = vmatmul.mubr.msk.bf16.vlgmr.msra.gmra.mrb[0].mxu1 %vm724_vm6, %v13895_v39  ;;  %v13848_v39 = vld [vmem:[%s17924_s6 + $0x170] sm:$0xf]  ;;  %v14975_v51 = vcombine.low %v10923_v24, %v10926_v8 }
 0x2ad   : > { %16189 = vmatpush3.bf16.msra.mxu1 %v20606_v26  ;;  %16160 = vmatprep.mubr.msk.bf16.mxu1 %vm724_vm6, %v13896_v63  ;;  %v10916_v26 = vsel %vm17927_vm2, %v14954_v25, %v10915_v33  ;;  %v14924_v33 = vld [vmem:[%s17924_s6 + $0x2d0] sm:$0xf]  ;;  %v4622_v63 = vsel %vm18290_vm9, %v13879_v12, %v4621_v58  ;;  %v4635_v59 = vrot.slane %v13848_v39, 7  ;;  %v4632_v25 = vsel %vm18290_vm9, %v4630_v1, %v4631_v15  ;;  %v13850_v58 = vld [vmem:[%s17924_s6 + $0x188] sm:$0x8] }
 0x2ae   : > { %16190 = vmatprep.subr.bf16.mxu1 %v17809_v48  ;;  %v10936_v61 = vrot.slane %v14924_v33, 6  ;;  %v13899_v35 = vcombine.low %v4622_v63, %v4625_v9  ;;  %v14928_v12 = vld [vmem:[%s17924_s6 + $0x2f0] sm:$0x3]  ;;  %v14931_v1 = vld [vmem:[%s17924_s6 + $0x30c] sm:$0x3]  ;;  %v10950_v15 = vrot.slane %v14930_v37, 6 }
 0x2af   : > { %16661 = vmatmul.mubr.msk.bf16.vlgmr.msra.gmra.mrb[0].mxu0 %vm724_vm6, %v14971_v46  ;;  %v4629_v46 = vsel %vm18290_vm9, %v13880_v56, %v4628_v60  ;;  %v4637_v30 = vrot.slane %v4635_v59, 4  ;;  %v10946_v14 = vrot.slane %v14928_v12, 6  ;;  %v14929_v56 = vld [vmem:[%s17924_s6 + $0x304] sm:$0xc]  ;;  %v4656_v33 = vrot.slane %v13857_v45, 7 }
 0x2b0   : > { %16693 = vmatpush3.bf16.msra.mxu0 %v20615_v41  ;;  %16664 = vmatprep.mubr.msk.bf16.mxu0 %vm724_vm6, %v14972_v17  ;;  %v14974_v41 = vcombine.low %v10916_v26, %v10919_v0  ;;  %v13881_v17 = vrot.slane %v13847_v27, 11  ;;  %v13900_v49 = vcombine.low %v4629_v46, %v4632_v25  ;;  %v10938_v10 = vrot.slane %v10936_v61, 4  ;;  %v13858_v27 = vld [vmem:[%s17924_s6 + $0x1c8] sm:$0x7]  ;;  %v13860_v46 = vld [vmem:[%s17924_s6 + $0x1e0] sm:$0xf] }
 0x2b1   : > { %16694 = vmatprep.subr.bf16.mxu0 %v17810_v20  ;;  %16191 = vmatpush3.bf16.msra.mxu1 %v17809_v48  ;;  %v10930_v48 = vsel %vm17927_vm2, %v14956_v54, %v10929_v23  ;;  %v13882_v26 = vrot.slane %v13850_v58, 11  ;;  %v4644_v0 = vrot.slane %v4642_v4, 4  ;;  %v4639_v28 = vsel %vm18290_vm9, %v4637_v30, %v4638_v13  ;;  %v13853_v23 = vld [vmem:[%s17924_s6 + $0x1a4] sm:$0x8]  ;;  %v13856_v54 = vld [vmem:[%s17924_s6 + $0x1c0] sm:$0x8] }
 0x2b2   : > { %16224 = vmatprep.subr.bf16.mxu1 %v20780_v29  ;;  %v14976_v19 = vcombine.low %v10930_v48, %v10933_v21  ;;  %v4636_v60 = vsel %vm18290_vm9, %v13881_v17, %v4635_v59  ;;  %v13883_v42 = vrot.slane %v13853_v23, 11  ;;  %v10957_v59 = vrot.slane %v14933_v11, 6  ;;  %v13859_v58 = vld [vmem:[%s17924_s6 + $0x1dc] sm:$0x8]  ;;  %v13862_v37 = vld [vmem:[%s17924_s6 + $0x1f8] sm:$0x8] }
 0x2b3   : > { %v4643_v39 = vsel %vm18290_vm9, %v13882_v26, %v4642_v4  ;;  %v4646_v55 = vsel %vm18290_vm9, %v4644_v0, %v4645_v43  ;;  %v13901_v63 = vcombine.low %v4636_v60, %v4639_v28  ;;  %v10952_v25 = vrot.slane %v10950_v15, 4  ;;  %v14935_v26 = vld [vmem:[%s17924_s6 + $0x33c] sm:$0xc]  ;;  %v13864_v45 = vld [vmem:[%s17924_s6 + $0x200] sm:$0x7] }
 0x2b4   : > { %16695 = vmatpush3.bf16.msra.mxu0 %v17810_v20  ;;  %16161 = vmatmul.mubr.msk.bf16.gmra.mrb[4].mxu1 %vm724_vm6, %v13897_v53  ;;  %v10943_v20 = vrot.slane %v14927_v38, 6  ;;  %v13902_v22 = vcombine.low %v4643_v39, %v4646_v55  ;;  %v10953_v38 = vrot.slane %v14931_v1, 6  ;;  %v13884_v31 = vrot.slane %v13856_v54, 11  ;;  %v14937_v23 = vld [vmem:[%s17924_s6 + $0x344] sm:$0x3] }
 0x2b5   : > { %16728 = vmatprep.subr.bf16.mxu0 %v20790_v62  ;;  %16164 = vmatprep.mubr.msk.bf16.mxu1 %vm724_vm6, %v13898_v40  ;;  %v10937_v40 = vsel %vm17927_vm2, %v14957_v2, %v10936_v61  ;;  %v14959_v61 = vrot.slane %v14929_v56, 10  ;;  %v4658_v4 = vrot.slane %v4656_v33, 4  ;;  %v4659_v8 = vrot.slane %v13858_v27, 7  ;;  %v14940_v11 = vld [vmem:[%s17924_s6 + $0x360] sm:$0x3] }
 0x2b6   : > { %v10945_v53 = vrot.slane %v10943_v20, 4  ;;  %v10944_v9 = vsel %vm17927_vm2, %v14958_v7, %v10943_v20  ;;  %v14960_v13 = vrot.slane %v14932_v3, 10  ;;  %v10959_v30 = vrot.slane %v10957_v59, 4  ;;  %v14936_v20 = vld [vmem:[%s17924_s6 + $0x340] sm:$0xf] }
 0x2b7   : > { %16665 = vmatmul.mubr.msk.bf16.gmra.mrb[4].mxu0 %vm724_vm6, %v14973_v34  ;;  %v4649_v34 = vrot.slane %v13854_v5, 7  ;;  %v4663_v36 = vrot.slane %v13860_v46, 7  ;;  %v10954_v12 = vsel %vm17927_vm2, %v10952_v25, %v10953_v38  ;;  %v4657_v5 = vsel %vm18290_vm9, %v13884_v31, %v4656_v33  ;;  %v13869_v54 = vld [vmem:[%s17924_s6 + $0x234] sm:$0xf]  ;;  %v14942_v3 = vld [vmem:[%s17924_s6 + $0x378] sm:$0xf] }
 0x2b8   : > { %16668 = vmatprep.mubr.msk.bf16.mxu0 %vm724_vm6, %v14974_v41  ;;  %v10940_v41 = vsel %vm17927_vm2, %v10938_v10, %v10939_v44  ;;  %v10947_v32 = vsel %vm17927_vm2, %v10945_v53, %v10946_v14  ;;  %v13861_v10 = vld [vmem:[%s17924_s6 + $0x1e4] sm:$0x7]  ;;  %v14939_v44 = vld [vmem:[%s17924_s6 + $0x35c] sm:$0xf]  ;;  %v4670_v0 = vrot.slane %v13863_v57, 7  ;;  %v13885_v60 = vrot.slane %v13859_v58, 11 }
 0x2b9   : > { %v4651_v47 = vrot.slane %v4649_v34, 4  ;;  %v14977_v24 = vcombine.low %v10937_v40, %v10940_v41  ;;  %v14978_v48 = vcombine.low %v10944_v9, %v10947_v32  ;;  %v4650_v17 = vsel %vm18290_vm9, %v13883_v42, %v4649_v34 }
 0x2ba   : > { %v10964_v7 = vrot.slane %v14936_v20, 6  ;;  %v4665_v53 = vrot.slane %v4663_v36, 4  ;;  %v4666_v14 = vrot.slane %v13861_v10, 7  ;;  %v10971_v34 = vrot.slane %v14939_v44, 6  ;;  %v14944_v10 = vld [vmem:[%s17924_s6 + $0x390] sm:$0xc] }
 0x2bb   : > { %v4653_v21 = vsel %vm18290_vm9, %v4651_v47, %v4652_v50  ;;  %v14961_v39 = vrot.slane %v14935_v26, 10  ;;  %v13886_v55 = vrot.slane %v13862_v37, 11  ;;  %v4672_v56 = vrot.slane %v4670_v0, 4  ;;  %v14946_v44 = vld [vmem:[%s17924_s6 + $0x398] sm:$0x3] }
 0x2bc   : > { %16165 = vmatmul.mubr.msk.bf16.gmra.mrb[8].mxu1 %vm724_vm6, %v13899_v35  ;;  %v14934_v35 = vld [vmem:[%s17924_s6 + $0x328] sm:$0x3]  ;;  %v13903_v43 = vcombine.low %v4650_v17, %v4653_v21  ;;  %v4673_v1 = vrot.slane %v13864_v45, 7  ;;  %v10966_v9 = vrot.slane %v10964_v7, 4  ;;  %v10967_v42 = vrot.slane %v14937_v23, 6 }
 0x2bd   : > { %16168 = vmatprep.mubr.msk.bf16.mxu1 %vm724_vm6, %v13900_v49  ;;  %v10960_v2 = vrot.slane %v14934_v35, 6  ;;  %v10951_v49 = vsel %vm17927_vm2, %v14959_v61, %v10950_v15  ;;  %v13866_v15 = vld [vmem:[%s17924_s6 + $0x218] sm:$0xf]  ;;  %v4667_v27 = vsel %vm18290_vm9, %v4665_v53, %v4666_v14  ;;  %v14962_v32 = vrot.slane %v14938_v18, 10  ;;  %v13867_v35 = vld [vmem:[%s17924_s6 + $0x21c] sm:$0x7] }
 0x2be   : > { %v14979_v40 = vcombine.low %v10951_v49, %v10954_v12  ;;  %v10973_v47 = vrot.slane %v10971_v34, 4  ;;  %v10974_v50 = vrot.slane %v14940_v11, 6  ;;  %v4671_v61 = vsel %vm18290_vm9, %v13886_v55, %v4670_v0  ;;  %v13870_v17 = vld [vmem:[%s17924_s6 + $0x238] sm:$0x7]  ;;  %v14941_v21 = vld [vmem:[%s17924_s6 + $0x374] sm:$0xc] }
 0x2bf   : > { %16669 = vmatmul.mubr.msk.bf16.gmra.mrb[8].mxu0 %vm724_vm6, %v14975_v51  ;;  %v4660_v51 = vsel %vm18290_vm9, %v4658_v4, %v4659_v8  ;;  %v10961_v28 = vsel %vm17927_vm2, %v10959_v30, %v10960_v2  ;;  %v4674_v38 = vsel %vm18290_vm9, %v4672_v56, %v4673_v1  ;;  %v4684_v46 = vrot.slane %v13869_v54, 7  ;;  %v14943_v30 = vld [vmem:[%s17924_s6 + $0x37c] sm:$0x3]  ;;  %v13872_v0 = vld [vmem:[%s17924_s6 + $0x250] sm:$0xf] }
 0x2c0   : > { %16672 = vmatprep.mubr.msk.bf16.mxu0 %vm724_vm6, %v14976_v19  ;;  %v10958_v19 = vsel %vm17927_vm2, %v14960_v13, %v10957_v59  ;;  %v13904_v41 = vcombine.low %v4657_v5, %v4660_v51  ;;  %v13865_v59 = vld [vmem:[%s17924_s6 + $0x214] sm:$0x8]  ;;  %v10965_v31 = vsel %vm17927_vm2, %v14961_v39, %v10964_v7  ;;  %v10968_v4 = vsel %vm17927_vm2, %v10966_v9, %v10967_v42  ;;  %v14948_v14 = vld [vmem:[%s17924_s6 + $0x3b0] sm:$0xf]  ;;  %v13871_v11 = vld [vmem:[%s17924_s6 + $0x24c] sm:$0x8] }
 0x2c1   : > { %v14980_v33 = vcombine.low %v10958_v19, %v10961_v28  ;;  %v10978_v8 = vrot.slane %v14942_v3, 6  ;;  %v10972_v13 = vsel %vm17927_vm2, %v14962_v32, %v10971_v34  ;;  %v10975_v58 = vsel %vm17927_vm2, %v10973_v47, %v10974_v50  ;;  %v13929_v37 = vld [vmem:[%s17924_s6 + $0xb4] sm:$0xf] }
 0x2c2   : > { %v13887_v57 = vrot.slane %v13865_v59, 11  ;;  %v4680_v49 = vrot.slane %v13867_v35, 7  ;;  %v14981_v12 = vcombine.low %v10965_v31, %v10968_v4  ;;  %v4686_v51 = vrot.slane %v4684_v46, 4  ;;  %v13873_v39 = vld [vmem:[%s17924_s6 + $0x254] sm:$0x7] }
 0x2c3   : > { %v4687_v26 = vrot.slane %v13870_v17, 7  ;;  %v14963_v19 = vrot.slane %v14941_v21, 10  ;;  %v10981_v7 = vrot.slane %v14943_v30, 6  ;;  %v14964_v45 = vrot.slane %v14944_v10, 10  ;;  %v14949_v32 = vld [vmem:[%s17924_s6 + $0x3b4] sm:$0x3] }
 0x2c4   : > { %16169 = vmatmul.mubr.msk.bf16.gmra.mrb[12].mxu1 %vm724_vm6, %v13901_v63  ;;  %v4664_v63 = vsel %vm18290_vm9, %v13885_v60, %v4663_v36  ;;  %v13906_v36 = vcombine.low %v4671_v61, %v4674_v38  ;;  %v10980_v60 = vrot.slane %v10978_v8, 4  ;;  %v10988_v53 = vrot.slane %v14946_v44, 6  ;;  %v13932_v35 = vld [vmem:[%s17924_s6 + $0xd0] sm:$0xf]  ;;  %v13931_v21 = vld [vmem:[%s17924_s6 + $0xcc] sm:$0xe] }
 0x2c5   : > { %16172 = vmatprep.mubr.msk.bf16.mxu1 %vm724_vm6, %v13902_v22  ;;  %v14945_v22 = vld [vmem:[%s17924_s6 + $0x394] sm:$0xf]  ;;  %v13905_v25 = vcombine.low %v4664_v63, %v4667_v27  ;;  %v4688_v18 = vsel %vm18290_vm9, %v4686_v51, %v4687_v26  ;;  %v5100_v55 = vrot.slane %v13929_v37, 5  ;;  %v10979_v56 = vsel %vm17927_vm2, %v14963_v19, %v10978_v8  ;;  %v13930_v63 = vld [vmem:[%s17924_s6 + $0xb8] sm:$0x1] }
 0x2c6   : > { %v10985_v2 = vrot.slane %v14945_v22, 6  ;;  %v10982_v1 = vsel %vm17927_vm2, %v10980_v60, %v10981_v7  ;;  %v14947_v27 = vld [vmem:[%s17924_s6 + $0x3ac] sm:$0xc]  ;;  %v13889_v50 = vrot.slane %v13871_v11, 11  ;;  %v4694_v59 = vrot.slane %v13873_v39, 7  ;;  %v17812_v37 = vld [vmem:[%s17924_s6 + $0x3f0] sm:$0xff]  }
 0x2c7   : > { %16673 = vmatmul.mubr.msk.bf16.gmra.mrb[12].mxu0 %vm724_vm6, %v14977_v24  ;;  %v4677_v24 = vrot.slane %v13866_v15, 7  ;;  %v10992_v15 = vrot.slane %v14948_v14, 6  ;;  %v5102_v61 = vrot.slane %v5100_v55, 4  ;;  %v5103_v38 = vrot.slane %v13930_v63, 5  ;;  %v13935_v8 = vld [vmem:[%s17924_s6 + $0xec] sm:$0xf] }
 0x2c8   : > { %16676 = vmatprep.mubr.msk.bf16.mxu0 %vm724_vm6, %v14978_v48  ;;  %v13868_v48 = vld [vmem:[%s17924_s6 + $0x230] sm:$0x8]  ;;  %v10987_v28 = vrot.slane %v10985_v2, 4  ;;  %v10986_v42 = vsel %vm17927_vm2, %v14964_v45, %v10985_v2  ;;  %v10995_v4 = vrot.slane %v14949_v32, 6  ;;  %v13933_v30 = vld [vmem:[%s17924_s6 + $0xd4] sm:$0x1] }
 0x2c9   : > { %v4679_v20 = vrot.slane %v4677_v24, 4  ;;  %v13888_v5 = vrot.slane %v13868_v48, 11  ;;  %v4678_v23 = vsel %vm18290_vm9, %v13887_v57, %v4677_v24  ;;  %v14983_v24 = vcombine.low %v10979_v56, %v10982_v1  ;;  %v13936_v10 = vld [vmem:[%s17924_s6 + $0xf0] sm:$0x1]  ;;  %v13938_v7 = vld [vmem:[%s17924_s6 + $0x108] sm:$0xf] }
 0x2ca   : > { %v10989_v54 = vsel %vm17927_vm2, %v10987_v28, %v10988_v53  ;;  %v10994_v31 = vrot.slane %v10992_v15, 4  ;;  %v5104_v57 = vsel %vm17938_vm5, %v5102_v61, %v5103_v38  ;;  %v5114_v2 = vrot.slane %v13935_v8, 5  ;;  %v13941_v45 = vld [vmem:[%s17924_s6 + $0x124] sm:$0xf]  ;;  %v13940_v11 = vld [vmem:[%s17924_s6 + $0x120] sm:$0xe] }
 0x2cb   : > { %v4681_v34 = vsel %vm18290_vm9, %v4679_v20, %v4680_v49  ;;  %v13934_v49 = vld [vmem:[%s17924_s6 + $0xe8] sm:$0xe]  ;;  %v5110_v26 = vrot.slane %v13933_v30, 5  ;;  %v5117_v60 = vrot.slane %v13936_v10, 5  ;;  %v5121_v14 = vrot.slane %v13938_v7, 5  ;;  %v17813_v56 = vld [vmem:[%s17924_s6 + $0x40c] sm:$0xff]  }
 0x2cc   : > { %16173 = vmatmul.mubr.msk.bf16.gmra.mrb[16].mxu1 %vm724_vm6, %v13903_v43  ;;  %v14982_v43 = vcombine.low %v10972_v13, %v10975_v58  ;;  %v13907_v9 = vcombine.low %v4678_v23, %v4681_v34  ;;  %v5107_v13 = vrot.slane %v13932_v35, 5  ;;  %v10996_v20 = vsel %vm17927_vm2, %v10994_v31, %v10995_v4  ;;  %v13942_v39 = vld [vmem:[%s17924_s6 + $0x128] sm:$0x1]  ;;  %v13943_v35 = vld [vmem:[%s17924_s6 + $0x13c] sm:$0xe] }
 0x2cd   : > { %16176 = vmatprep.mubr.msk.bf16.mxu1 %vm724_vm6, %v13904_v41  ;;  %v4685_v41 = vsel %vm18290_vm9, %v13888_v5, %v4684_v46  ;;  %v14984_v46 = vcombine.low %v10986_v42, %v10989_v54  ;;  %v13977_v5 = vrot.slane %v13931_v21, 9  ;;  %v5116_v19 = vrot.slane %v5114_v2, 4  ;;  %v17821_v32 = vld [vmem:[%s21839_s1 + $0xc8] sm:$0xff]   ;;  %v13946_v31 = vld [vmem:[%s17924_s6 + $0x158] sm:$0xe] }
 0x2ce   : > { %v13908_v47 = vcombine.low %v4685_v41, %v4688_v18  ;;  %v5109_v51 = vrot.slane %v5107_v13, 4  ;;  %v13939_v41 = vld [vmem:[%s17924_s6 + $0x10c] sm:$0x1]  ;;  %v5128_v18 = vrot.slane %v13941_v45, 5  ;;  %v5131_v54 = vrot.slane %v13942_v39, 5 }
 0x2cf   : > { %16677 = vmatmul.mubr.msk.bf16.gmra.mrb[16].mxu0 %vm724_vm6, %v14979_v40  ;;  %v4691_v40 = vrot.slane %v13872_v0, 7  ;;  %v5108_v28 = vsel %vm17938_vm5, %v13977_v5, %v5107_v13  ;;  %v5118_v34 = vsel %vm17938_vm5, %v5116_v19, %v5117_v60  ;;  %v5124_v63 = vrot.slane %v13939_v41, 5  ;;  %v13948_v4 = vld [vmem:[%s17924_s6 + $0x160] sm:$0x1]  ;;  %v13952_v19 = vld [vmem:[%s17924_s6 + $0x190] sm:$0xe] }
 0x2d0   : > { %16680 = vmatprep.mubr.msk.bf16.mxu0 %vm724_vm6, %v14980_v33  ;;  %v13928_v33 = vld [vmem:[%s17924_s6 + $0xb0] sm:$0xe]  ;;  %v5111_v53 = vsel %vm17938_vm5, %v5109_v51, %v5110_v26  ;;  %v5130_v42 = vrot.slane %v5128_v18, 4  ;;  %v13981_v13 = vrot.slane %v13943_v35, 9  ;;  %v13982_v21 = vrot.slane %v13946_v31, 9 }
 0x2d1   : > { %v4693_v3 = vrot.slane %v4691_v40, 4  ;;  %v13976_v22 = vrot.slane %v13928_v33, 9  ;;  %v4692_v48 = vsel %vm18290_vm9, %v13889_v50, %v4691_v40  ;;  %v13937_v40 = vld [vmem:[%s17924_s6 + $0x104] sm:$0xe]  ;;  %v5123_v33 = vrot.slane %v5121_v14, 4  ;;  %v17822_v35 = vld [vmem:[%s17924_s6 + $0x4d0] sm:$0xff]  }
 0x2d2   : > { %v13947_v50 = vld [vmem:[%s17924_s6 + $0x15c] sm:$0xf]  ;;  %v5132_v38 = vsel %vm17938_vm5, %v5130_v42, %v5131_v54  ;;  %v13949_v26 = vld [vmem:[%s17924_s6 + $0x174] sm:$0xe]  ;;  %v13954_v60 = vld [vmem:[%s17924_s6 + $0x198] sm:$0x1] }
 0x2d3   : > { %v4695_v17 = vsel %vm18290_vm9, %v4693_v3, %v4694_v59  ;;  %v5101_v58 = vsel %vm17938_vm5, %v13976_v22, %v5100_v55  ;;  %v13997_v55 = vcombine.low %v5108_v28, %v5111_v53  ;;  %v17824_v3 = vld [vmem:[%s21839_s1 + $0x1a8] sm:$0xff]   ;;  %v13983_v45 = vrot.slane %v13949_v26, 9  ;;  %v13956_v41 = vld [vmem:[%s17924_s6 + $0x1b0] sm:$0xf]  ;;  %v13971_v26 = vld [vmem:[%s17924_s6 + $0x23c] sm:$0xf] }
 0x2d4   : > { %16177 = vmatmul.mubr.msk.bf16.gmra.mrb[20].mxu1 %vm724_vm6, %v13905_v25  ;;  %v14965_v25 = vrot.slane %v14947_v27, 10  ;;  %v13909_v44 = vcombine.low %v4692_v48, %v4695_v17  ;;  %v13944_v27 = vld [vmem:[%s17924_s6 + $0x140] sm:$0xf]  ;;  %v21029_v48 = vld [vmem:[%s21839_s1 + $0x1b0] sm:$0xff]   ;;  %v13958_v42 = vld [vmem:[%s17924_s6 + $0x1c8] sm:$0xe] }
 0x2d5   : > { %16180 = vmatprep.mubr.msk.bf16.mxu1 %vm724_vm6, %v13906_v36  ;;  %v5135_v22 = vrot.slane %v13944_v27, 5  ;;  %v13960_v54 = vld [vmem:[%s17924_s6 + $0x1d0] sm:$0x1] }
 0x2d6   : > { %v10993_v36 = vsel %vm17927_vm2, %v14965_v25, %v10992_v15  ;;  %v13979_v15 = vrot.slane %v13937_v40, 9  ;;  %v21020_v25 = vld [vmem:[%s21839_s1 + $0xd0] sm:$0xff]   ;;  %v5159_v40 = vrot.slane %v13954_v60, 5 }
 0x2d7   : > { %16681 = vmatmul.mubr.msk.bf16.gmra.mrb[20].mxu0 %vm724_vm6, %v14981_v12  ;;  %v13996_v12 = vcombine.low %v5101_v58, %v5104_v57  ;;  %v14985_v0 = vcombine.low %v10993_v36, %v10996_v20  ;;  %v5137_v58 = vrot.slane %v5135_v22, 4  ;;  %v13950_v36 = vld [vmem:[%s17924_s6 + $0x178] sm:$0xf]  ;;  %v17817_v20 = vld [vmem:[%s17924_s6 + $0x460] sm:$0xff]   ;;  %v5136_v10 = vsel %vm17938_vm5, %v13981_v13, %v5135_v22 }
 0x2d8   : > { %16684 = vmatprep.mubr.msk.bf16.mxu0 %vm724_vm6, %v14982_v43  ;;  %v13978_v43 = vrot.slane %v13934_v49, 9  ;;  %v5122_v59 = vsel %vm17938_vm5, %v13979_v15, %v5121_v14  ;;  %v13953_v49 = vld [vmem:[%s17924_s6 + $0x194] sm:$0xf]  ;;  %v17818_v14 = vld [vmem:[%s17924_s6 + $0x47c] sm:$0xff]   ;;  %v13961_v13 = vld [vmem:[%s17924_s6 + $0x1e4] sm:$0xe] }
 0x2da   : > { %v5115_v23 = vsel %vm17938_vm5, %v13978_v43, %v5114_v2  ;;  %v5145_v2 = vrot.slane %v13948_v4, 5  ;;  %v5156_v43 = vrot.slane %v13953_v49, 5 }
 0x2db   : > { %v13998_v1 = vcombine.low %v5115_v23, %v5118_v34  ;;  %v13984_v23 = vrot.slane %v13952_v19, 9 }
 0x2dc   : > { %16181 = vmatmul.mubr.msk.bf16.gmra.mrb[24].mxu1 %vm724_vm6, %v13907_v9  ;;  %v13980_v9 = vrot.slane %v13940_v11, 9  ;;  %v5158_v34 = vrot.slane %v5156_v43, 4  ;;  %v13959_v11 = vld [vmem:[%s17924_s6 + $0x1cc] sm:$0xf] }
 0x2dd   : > { %16184 = vmatprep.mubr.msk.bf16.mxu1 %vm724_vm6, %v13908_v47  ;;  %v17815_v47 = vld [vmem:[%s17924_s6 + $0x428] sm:$0xff]  }
 0x2de   : > { %v5129_v61 = vsel %vm17938_vm5, %v13980_v9, %v5128_v18  ;;  %v17819_v18 = vld [vmem:[%s17924_s6 + $0x498] sm:$0xff]   ;;  %v5160_v15 = vsel %vm17938_vm5, %v5158_v34, %v5159_v40  ;;  %v5170_v9 = vrot.slane %v13959_v11, 5 }
 0x2df   : > { %16685 = vmatmul.mubr.msk.bf16.gmra.mrb[24].mxu0 %vm724_vm6, %v14983_v24  ;;  %v5125_v24 = vsel %vm17938_vm5, %v5123_v33, %v5124_v63  ;;  %v14000_v17 = vcombine.low %v5129_v61, %v5132_v38  ;;  %v13955_v33 = vld [vmem:[%s17924_s6 + $0x1ac] sm:$0xe]  ;;  %v13957_v63 = vld [vmem:[%s17924_s6 + $0x1b4] sm:$0x1]  ;;  %v5173_v61 = vrot.slane %v13960_v54, 5 }
 0x2e0   : > { %16688 = vmatprep.mubr.msk.bf16.mxu0 %vm724_vm6, %v14984_v46  ;;  %v5142_v46 = vrot.slane %v13947_v50, 5  ;;  %v13999_v8 = vcombine.low %v5122_v59, %v5125_v24  ;;  %v17820_v59 = vld [vmem:[%s17924_s6 + $0x4b4] sm:$0xff]   ;;  %v13986_v24 = vrot.slane %v13958_v42, 9  ;;  %v5172_v22 = vrot.slane %v5170_v9, 4  ;;  %v13962_v38 = vld [vmem:[%s17924_s6 + $0x1e8] sm:$0xf] }
 0x2e1   : > { %v5177_v4 = vrot.slane %v13962_v38, 5 }
 0x2e2   : > { %v5144_v30 = vrot.slane %v5142_v46, 4  ;;  %v5143_v5 = vsel %vm17938_vm5, %v13982_v21, %v5142_v46  ;;  %v13966_v21 = vld [vmem:[%s17924_s6 + $0x208] sm:$0x1] }
 0x2e4   : > { %16185 = vmatmul.mubr.msk.bf16.gmra.mrb[28].mxu1 %vm724_vm6, %v13909_v44  ;;  %v5146_v51 = vsel %vm17938_vm5, %v5144_v30, %v5145_v2 }
 0x2e5   : > { %16192 = vmatprep.mubr.msk.bf16.mxu1 %vm724_vm6, %v13996_v12  ;;  %v5149_v12 = vrot.slane %v13950_v36, 5  ;;  %v13987_v36 = vrot.slane %v13961_v13, 9  ;;  %v14037_v13 = vld [vmem:[%s17924_s6 + $0xf0] sm:$0xf] }
 0x2e7   : > { %16689 = vmatmul.mubr.msk.bf16.gmra.mrb[28].mxu0 %vm724_vm6, %v14985_v0  ;;  %v13951_v0 = vld [vmem:[%s17924_s6 + $0x17c] sm:$0x1]  ;;  %v5151_v28 = vrot.slane %v5149_v12, 4  ;;  %v5150_v39 = vsel %vm17938_vm5, %v13983_v45, %v5149_v12  ;;  %v5178_v19 = vsel %vm17938_vm5, %v13987_v36, %v5177_v4  ;;  %v5198_v45 = vrot.slane %v13971_v26, 5 }
 0x2e8   : > { %16696 = vmatprep.mubr.msk.bf16.mxu0 %vm724_vm6, %v17812_v37  ;;  %v14002_v37 = vcombine.low %v5143_v5, %v5146_v51  ;;  %v5152_v53 = vrot.slane %v13951_v0, 5  ;;  %v5187_v51 = vrot.slane %v13966_v21, 5  ;;  %v17825_v0 = vld [vmem:[%s17924_s6 + $0x508] sm:$0xff]  }
 0x2ec   : > { %16193 = vmatmul.mubr.msk.bf16.vlgmr.msra.gmra.mrb[0].mxu1 %vm724_vm6, %v13997_v55  ;;  %v5153_v55 = vsel %vm17938_vm5, %v5151_v28, %v5152_v53 }
 0x2ed   : > { %16225 = vmatpush3.bf16.msra.mxu1 %v20780_v29  ;;  %16196 = vmatprep.mubr.msk.bf16.mxu1 %vm724_vm6, %v13998_v1  ;;  %v13945_v29 = vld [vmem:[%s17924_s6 + $0x144] sm:$0x1]  ;;  %v5157_v1 = vsel %vm17938_vm5, %v13984_v23, %v5156_v43  ;;  %v14003_v27 = vcombine.low %v5150_v39, %v5153_v55  ;;  %v13972_v23 = vld [vmem:[%s17924_s6 + $0x240] sm:$0x1]  ;;  %v5200_v55 = vrot.slane %v5198_v45, 4 }
 0x2ee   : > { %16226 = vmatprep.subr.bf16.mxu1 %v17821_v32  ;;  %v5138_v57 = vrot.slane %v13945_v29, 5  ;;  %v13965_v29 = vld [vmem:[%s17924_s6 + $0x204] sm:$0xf] }
 0x2ef   : > { %16697 = vmatmul.mubr.msk.bf16.vlgmr.msra.gmra.mrb[0].mxu0 %vm724_vm6, %v17813_v56  ;;  %v5163_v56 = vrot.slane %v13956_v41, 5 }
 0x2f0   : > { %16729 = vmatpush3.bf16.msra.mxu0 %v20790_v62  ;;  %16700 = vmatprep.mubr.msk.bf16.mxu0 %vm724_vm6, %v17815_v47  ;;  %v17816_v62 = vld [vmem:[%s17924_s6 + $0x444] sm:$0xff]   ;;  %v5139_v44 = vsel %vm17938_vm5, %v5137_v58, %v5138_v57  ;;  %v13985_v47 = vrot.slane %v13955_v33, 9  ;;  %v13963_v58 = vld [vmem:[%s17924_s6 + $0x1ec] sm:$0x1]  ;;  %v5184_v57 = vrot.slane %v13965_v29, 5 }
 0x2f1   : > { %16730 = vmatprep.subr.bf16.mxu0 %v17824_v3  ;;  %16227 = vmatpush3.bf16.msra.mxu1 %v17821_v32  ;;  %v14001_v7 = vcombine.low %v5136_v10, %v5139_v44  ;;  %v14004_v32 = vcombine.low %v5157_v1, %v5160_v15  ;;  %v5165_v50 = vrot.slane %v5163_v56, 4  ;;  %v5180_v49 = vrot.slane %v13963_v58, 5  ;;  %v13968_v10 = vld [vmem:[%s17924_s6 + $0x220] sm:$0xf]  ;;  %v17823_v44 = vld [vmem:[%s17924_s6 + $0x4ec] sm:$0xff]   ;;  %v17826_v15 = vld [vmem:[%s17924_s6 + $0x524] sm:$0xff]  }
 0x2f2   : > { %16260 = vmatprep.subr.bf16.mxu1 %v21020_v25  ;;  %v5164_v46 = vsel %vm17938_vm5, %v13985_v47, %v5163_v56  ;;  %v5186_v5 = vrot.slane %v5184_v57, 4  ;;  %v5191_v43 = vrot.slane %v13968_v10, 5  ;;  %v5201_v56 = vrot.slane %v13972_v23, 5  ;;  %v13974_v1 = vld [vmem:[%s17924_s6 + $0x258] sm:$0xf] }
 0x2f3   : > { %v14031_v33 = vld [vmem:[%s17924_s6 + $0xb8] sm:$0xf]  ;;  %v15076_v29 = vld [vmem:[%s17924_s6 + $0x400] sm:$0x1] }
 0x2f4   : > { %16731 = vmatpush3.bf16.msra.mxu0 %v17824_v3  ;;  %16197 = vmatmul.mubr.msk.bf16.gmra.mrb[4].mxu1 %vm724_vm6, %v13999_v8  ;;  %v5166_v3 = vrot.slane %v13957_v63, 5  ;;  %v5171_v8 = vsel %vm17938_vm5, %v13986_v24, %v5170_v9  ;;  %v5188_v53 = vsel %vm17938_vm5, %v5186_v5, %v5187_v51  ;;  %v5193_v41 = vrot.slane %v5191_v43, 4  ;;  %v17827_v63 = vld [vmem:[%s17924_s6 + $0x540] sm:$0xff]   ;;  %v15075_v9 = vld [vmem:[%s17924_s6 + $0x3fc] sm:$0xf] }
 0x2f5   : > { %16764 = vmatprep.subr.bf16.mxu0 %v21029_v48  ;;  %16200 = vmatprep.mubr.msk.bf16.mxu1 %vm724_vm6, %v14000_v17  ;;  %v5174_v17 = vsel %vm17938_vm5, %v5172_v22, %v5173_v61  ;;  %v5614_v24 = vrot.slane %v14031_v33, 7  ;;  %v14032_v22 = vld [vmem:[%s17924_s6 + $0xbc] sm:$0x7]  ;;  %v15074_v61 = vld [vmem:[%s17924_s6 + $0x3f8] sm:$0xe]  ;;  %v11772_v38 = vrot.slane %v15075_v9, 5 }
 0x2f6   : > { %v5167_v31 = vsel %vm17938_vm5, %v5165_v50, %v5166_v3  ;;  %v14006_v2 = vcombine.low %v5171_v8, %v5174_v17  ;;  %v5202_v50 = vsel %vm17938_vm5, %v5200_v55, %v5201_v56  ;;  %v13975_v3 = vld [vmem:[%s17924_s6 + $0x25c] sm:$0x1]  ;;  %v15122_v21 = vrot.slane %v15074_v61, 9 }
 0x2f7   : > { %16701 = vmatmul.mubr.msk.bf16.gmra.mrb[4].mxu0 %vm724_vm6, %v17816_v62  ;;  %v13964_v62 = vld [vmem:[%s17924_s6 + $0x200] sm:$0xe]  ;;  %v14005_v30 = vcombine.low %v5164_v46, %v5167_v31  ;;  %v14034_v46 = vld [vmem:[%s17924_s6 + $0xd4] sm:$0xf]  ;;  %v5208_v17 = vrot.slane %v13975_v3, 5  ;;  %v11775_v36 = vrot.slane %v15076_v29, 5 }
 0x2f8   : > { %16704 = vmatprep.mubr.msk.bf16.mxu0 %vm724_vm6, %v17817_v20  ;;  %v5179_v20 = vrot.slane %v5177_v4, 4  ;;  %v13988_v12 = vrot.slane %v13964_v62, 9  ;;  %v5617_v62 = vrot.slane %v14032_v22, 7  ;;  %v17829_v10 = vld [vmem:[%s17924_s6 + $0x578] sm:$0xff]   ;;  %v5628_v5 = vrot.slane %v14037_v13, 7 }
 0x2f9   : > { %v14041_v29 = vld [vmem:[%s17924_s6 + $0x110] sm:$0x7] }
 0x2fa   : > { %v5181_v60 = vsel %vm17938_vm5, %v5179_v20, %v5180_v49  ;;  %v5185_v28 = vsel %vm17938_vm5, %v13988_v12, %v5184_v57  ;;  %v5616_v57 = vrot.slane %v5614_v24, 4  ;;  %v14033_v20 = vld [vmem:[%s17924_s6 + $0xd0] sm:$0x8]  ;;  %v5621_v49 = vrot.slane %v14034_v46, 7  ;;  %v15078_v12 = vld [vmem:[%s17924_s6 + $0x418] sm:$0xf] }
 0x2fb   : > { %v14007_v34 = vcombine.low %v5178_v19, %v5181_v60  ;;  %v14008_v11 = vcombine.low %v5185_v28, %v5188_v53  ;;  %v21151_v19 = vld [vmem:[%s17924_s6 + $0x434] sm:$0xf] }
 0x2fc   : > { %16201 = vmatmul.mubr.msk.bf16.gmra.mrb[8].mxu1 %vm724_vm6, %v14001_v7  ;;  %v13967_v7 = vld [vmem:[%s17924_s6 + $0x21c] sm:$0xe]  ;;  %v15077_v28 = vld [vmem:[%s17924_s6 + $0x414] sm:$0xe]  ;;  %v11786_v55 = vrot.slane %v21151_v19, 5 }
 0x2fd   : > { %16204 = vmatprep.mubr.msk.bf16.mxu1 %vm724_vm6, %v14002_v37  ;;  %v13969_v37 = vld [vmem:[%s17924_s6 + $0x224] sm:$0x1]  ;;  %v13989_v40 = vrot.slane %v13967_v7, 9  ;;  %v5618_v7 = vsel %vm18290_vm9, %v5616_v57, %v5617_v62  ;;  %v15123_v9 = vrot.slane %v15077_v28, 9 }
 0x2ff   : > { %16705 = vmatmul.mubr.msk.bf16.gmra.mrb[8].mxu0 %vm724_vm6, %v17818_v14  ;;  %v13970_v14 = vld [vmem:[%s17924_s6 + $0x238] sm:$0xe]  ;;  %v5192_v42 = vsel %vm17938_vm5, %v13989_v40, %v5191_v43  ;;  %v14038_v43 = vld [vmem:[%s17924_s6 + $0xf4] sm:$0x7]  ;;  %v11779_v40 = vrot.slane %v15078_v12, 5 }
 0x300   : > { %16708 = vmatprep.mubr.msk.bf16.mxu0 %vm724_vm6, %v17819_v18  ;;  %v5194_v18 = vrot.slane %v13969_v37, 5  ;;  %v13990_v39 = vrot.slane %v13970_v14, 9  ;;  %v11773_v37 = vsel %vm17938_vm5, %v15122_v21, %v11772_v38  ;;  %v5623_v14 = vrot.slane %v5621_v49, 4 }
 0x301   : > { %v11780_v13 = vsel %vm17938_vm5, %v15123_v9, %v11779_v40  ;;  %v15091_v9 = vld [vmem:[%s17924_s6 + $0x48c] sm:$0x1] }
 0x302   : > { %v5195_v54 = vsel %vm17938_vm5, %v5193_v41, %v5194_v18  ;;  %v5199_v47 = vsel %vm17938_vm5, %v13990_v39, %v5198_v45  ;;  %v14079_v45 = vrot.slane %v14033_v20, 11  ;;  %v5630_v18 = vrot.slane %v5628_v5, 4  ;;  %v15080_v39 = vld [vmem:[%s17924_s6 + $0x430] sm:$0xe]  ;;  %v14044_v20 = vld [vmem:[%s17924_s6 + $0x12c] sm:$0x7] }
 0x303   : > { %v14010_v31 = vcombine.low %v5199_v47, %v5202_v50  ;;  %v11781_v50 = vrot.slane %v11779_v40, 4  ;;  %v15124_v3 = vrot.slane %v15080_v39, 9  ;;  %v21217_v40 = vld [vmem:[%s17924_s6 + $0x160] sm:$0xf] }
 0x304   : > { %16205 = vmatmul.mubr.msk.bf16.gmra.mrb[12].mxu1 %vm724_vm6, %v14003_v27  ;;  %v13973_v27 = vld [vmem:[%s17924_s6 + $0x254] sm:$0xe] }
 0x305   : > { %16208 = vmatprep.mubr.msk.bf16.mxu1 %vm724_vm6, %v14004_v32  ;;  %v5205_v32 = vrot.slane %v13974_v1, 5  ;;  %v13991_v4 = vrot.slane %v13973_v27, 9  ;;  %v17830_v1 = vld [vmem:[%s17924_s6 + $0x594] sm:$0xff]   ;;  %v15084_v27 = vld [vmem:[%s17924_s6 + $0x450] sm:$0xf] }
 0x307   : > { %16709 = vmatmul.mubr.msk.bf16.gmra.mrb[12].mxu0 %vm724_vm6, %v17820_v59  ;;  %v14030_v59 = vld [vmem:[%s17924_s6 + $0xb4] sm:$0x8]  ;;  %v5207_v8 = vrot.slane %v5205_v32, 4  ;;  %v5206_v51 = vsel %vm17938_vm5, %v13991_v4, %v5205_v32  ;;  %v15083_v4 = vld [vmem:[%s17924_s6 + $0x44c] sm:$0xe] }
 0x308   : > { %16712 = vmatprep.mubr.msk.bf16.mxu0 %vm724_vm6, %v17822_v35  ;;  %v14009_v35 = vcombine.low %v5192_v42, %v5195_v54  ;;  %v14078_v58 = vrot.slane %v14030_v59, 11  ;;  %v15082_v54 = vld [vmem:[%s17924_s6 + $0x438] sm:$0x1]  ;;  %v21179_v59 = vld [vmem:[%s17924_s6 + $0x128] sm:$0xf]  ;;  %v15125_v12 = vrot.slane %v15083_v4, 9 }
 0x309   : > { %v5209_v26 = vsel %vm17938_vm5, %v5207_v8, %v5208_v17  ;;  %v15085_v8 = vld [vmem:[%s17924_s6 + $0x454] sm:$0x1]  ;;  %v11793_v17 = vrot.slane %v15084_v27, 5  ;;  %v5642_v57 = vrot.slane %v21179_v59, 7  ;;  %v5656_v59 = vrot.slane %v21217_v40, 7 }
 0x30a   : > { %v5615_v60 = vsel %vm18290_vm9, %v14078_v58, %v5614_v24  ;;  %v14011_v56 = vcombine.low %v5206_v51, %v5209_v26  ;;  %v21182_v24 = vld [vmem:[%s17924_s6 + $0x46c] sm:$0xf]  ;;  %v14042_v58 = vld [vmem:[%s17924_s6 + $0x124] sm:$0x8]  ;;  %v15088_v51 = vld [vmem:[%s17924_s6 + $0x470] sm:$0x1]  ;;  %v11787_v26 = vsel %vm17938_vm5, %v15124_v3, %v11786_v55 }
 0x30b   : > { %v14098_v33 = vcombine.low %v5615_v60, %v5618_v7  ;;  %v11800_v62 = vrot.slane %v21182_v24, 5  ;;  %v14082_v19 = vrot.slane %v14042_v58, 11  ;;  %v14046_v60 = vld [vmem:[%s17924_s6 + $0x144] sm:$0xf]  ;;  %v21213_v7 = vld [vmem:[%s17924_s6 + $0x488] sm:$0xf] }
 0x30c   : > { %16209 = vmatmul.mubr.msk.bf16.gmra.mrb[16].mxu1 %vm724_vm6, %v14005_v30  ;;  %v17828_v30 = vld [vmem:[%s17924_s6 + $0x55c] sm:$0xff]   ;;  %v5649_v39 = vrot.slane %v14046_v60, 7  ;;  %v14050_v3 = vld [vmem:[%s17924_s6 + $0x164] sm:$0x7] }
 0x30d   : > { %16212 = vmatprep.mubr.msk.bf16.mxu1 %vm724_vm6, %v14006_v2  ;;  %v11774_v2 = vrot.slane %v11772_v38, 4  ;;  %v11788_v38 = vrot.slane %v11786_v55, 4  ;;  %v15089_v55 = vld [vmem:[%s17924_s6 + $0x484] sm:$0xe]  ;;  %v5643_v27 = vsel %vm18290_vm9, %v14082_v19, %v5642_v57 }
 0x30f   : > { %16713 = vmatmul.mubr.msk.bf16.gmra.mrb[16].mxu0 %vm724_vm6, %v17823_v44  ;;  %v14035_v44 = vld [vmem:[%s17924_s6 + $0xd8] sm:$0x7]  ;;  %v11776_v53 = vsel %vm17938_vm5, %v11774_v2, %v11775_v36 }
 0x310   : > { %16716 = vmatprep.mubr.msk.bf16.mxu0 %vm724_vm6, %v17825_v0  ;;  %v14036_v0 = vld [vmem:[%s17924_s6 + $0xec] sm:$0x8]  ;;  %v5624_v23 = vrot.slane %v14035_v44, 7  ;;  %v15142_v32 = vcombine.low %v11773_v37, %v11776_v53  ;;  %v5638_v44 = vrot.slane %v14041_v29, 7  ;;  %v5644_v37 = vrot.slane %v5642_v57, 4 }
 0x311   : > { %v14080_v41 = vrot.slane %v14036_v0, 11  ;;  %v11802_v53 = vrot.slane %v11800_v62, 4  ;;  %v5658_v57 = vrot.slane %v5656_v59, 4 }
 0x312   : > { %v5625_v47 = vsel %vm18290_vm9, %v5623_v14, %v5624_v23  ;;  %v11803_v23 = vrot.slane %v15088_v51, 5 }
 0x313   : > { %v5629_v22 = vsel %vm18290_vm9, %v14080_v41, %v5628_v5  ;;  %v11796_v5 = vrot.slane %v15085_v8, 5  ;;  %v17833_v41 = vld [vmem:[%s21839_s1 + $0xd8] sm:$0xff]   ;;  %v5659_v8 = vrot.slane %v14050_v3, 7 }
 0x314   : > { %16213 = vmatmul.mubr.msk.bf16.gmra.mrb[20].mxu1 %vm724_vm6, %v14007_v34  ;;  %v15079_v34 = vld [vmem:[%s17924_s6 + $0x41c] sm:$0x1] }
 0x315   : > { %16216 = vmatprep.mubr.msk.bf16.mxu1 %vm724_vm6, %v14008_v11  ;;  %v5631_v11 = vrot.slane %v14038_v43, 7  ;;  %v11782_v42 = vrot.slane %v15079_v34, 5  ;;  %v11795_v43 = vrot.slane %v11793_v17, 4  ;;  %v14045_v34 = vld [vmem:[%s17924_s6 + $0x140] sm:$0x8] }
 0x317   : > { %16717 = vmatmul.mubr.msk.bf16.gmra.mrb[20].mxu0 %vm724_vm6, %v17826_v15  ;;  %v21170_v15 = vld [vmem:[%s17924_s6 + $0x10c] sm:$0xf]  ;;  %v5632_v61 = vsel %vm18290_vm9, %v5630_v18, %v5631_v11  ;;  %v14047_v11 = vld [vmem:[%s17924_s6 + $0x148] sm:$0x7] }
 0x318   : > { %16720 = vmatprep.mubr.msk.bf16.mxu0 %vm724_vm6, %v17827_v63  ;;  %v5622_v63 = vsel %vm18290_vm9, %v14079_v45, %v5621_v49  ;;  %v5635_v46 = vrot.slane %v21170_v15, 7  ;;  %v14100_v2 = vcombine.low %v5629_v22, %v5632_v61  ;;  %v15086_v49 = vld [vmem:[%s17924_s6 + $0x468] sm:$0xe]  ;;  %v5645_v45 = vrot.slane %v14044_v20, 7  ;;  %v14053_v20 = vld [vmem:[%s17924_s6 + $0x180] sm:$0x7] }
 0x319   : > { %v14099_v21 = vcombine.low %v5622_v63, %v5625_v47  ;;  %v15126_v28 = vrot.slane %v15086_v49, 9  ;;  %v11797_v63 = vsel %vm17938_vm5, %v11795_v43, %v11796_v5  ;;  %v14083_v47 = vrot.slane %v14045_v34, 11  ;;  %v15096_v49 = vld [vmem:[%s17924_s6 + $0x4c0] sm:$0xf]  ;;  %v14054_v34 = vld [vmem:[%s17924_s6 + $0x194] sm:$0x8] }
 0x31a   : > { %v5652_v22 = vrot.slane %v14047_v11, 7  ;;  %v15127_v61 = vrot.slane %v15089_v55, 9  ;;  %v14056_v11 = vld [vmem:[%s17924_s6 + $0x19c] sm:$0x7] }
 0x31b   : > { %v11801_v24 = vsel %vm17938_vm5, %v15126_v28, %v11800_v62  ;;  %v15094_v62 = vld [vmem:[%s17924_s6 + $0x4a8] sm:$0x1]  ;;  %v5666_v28 = vrot.slane %v14053_v20, 7 }
 0x31c   : > { %16217 = vmatmul.mubr.msk.bf16.gmra.mrb[24].mxu1 %vm724_vm6, %v14009_v35  ;;  %v14039_v35 = vld [vmem:[%s17924_s6 + $0x108] sm:$0x8]  ;;  %v11817_v19 = vrot.slane %v15094_v62, 5 }
 0x31d   : > { %16220 = vmatprep.mubr.msk.bf16.mxu1 %vm724_vm6, %v14010_v31  ;;  %v11789_v31 = vrot.slane %v15082_v54, 5  ;;  %v14081_v36 = vrot.slane %v14039_v35, 11  ;;  %v17834_v54 = vld [vmem:[%s21839_s1 + $0x1b8] sm:$0xff]   ;;  %v5651_v35 = vrot.slane %v5649_v39, 4 }
 0x31f   : > { %16721 = vmatmul.mubr.msk.bf16.gmra.mrb[24].mxu0 %vm724_vm6, %v17828_v30  ;;  %v11783_v30 = vsel %vm17938_vm5, %v11781_v50, %v11782_v42  ;;  %v11790_v0 = vsel %vm17938_vm5, %v11788_v38, %v11789_v31  ;;  %v21238_v42 = vld [vmem:[%s17924_s6 + $0x4a4] sm:$0xf]  ;;  %v14048_v50 = vld [vmem:[%s17924_s6 + $0x15c] sm:$0x8] }
 0x320   : > { %16724 = vmatprep.mubr.msk.bf16.mxu0 %vm724_vm6, %v17829_v10  ;;  %v5637_v10 = vrot.slane %v5635_v46, 4  ;;  %v15143_v14 = vcombine.low %v11780_v13, %v11783_v30  ;;  %v15144_v18 = vcombine.low %v11787_v26, %v11790_v0  ;;  %v14052_v38 = vld [vmem:[%s17924_s6 + $0x17c] sm:$0xf]  ;;  %v14084_v4 = vrot.slane %v14048_v50, 11  ;;  %v14055_v26 = vld [vmem:[%s17924_s6 + $0x198] sm:$0xf] }
 0x321   : > { %v11814_v13 = vrot.slane %v21238_v42, 5  ;;  %v5670_v40 = vrot.slane %v14055_v26, 7  ;;  %v14086_v50 = vrot.slane %v14054_v34, 11  ;;  %v15108_v34 = vld [vmem:[%s17924_s6 + $0x530] sm:$0xf] }
 0x322   : > { %v5639_v15 = vsel %vm18290_vm9, %v5637_v10, %v5638_v44  ;;  %v17861_v10 = vmov 0.0   ;;  %v5653_v44 = vsel %vm18290_vm9, %v5651_v35, %v5652_v22  ;;  %v5657_v0 = vsel %vm18290_vm9, %v14084_v4, %v5656_v59  ;;  %v14061_v35 = vld [vmem:[%s17924_s6 + $0x1d0] sm:$0xf] }
 0x323   : > { %v11816_v43 = vrot.slane %v11814_v13, 4  ;;  %v5672_v3 = vrot.slane %v5670_v40, 4  ;;  %v5673_v59 = vrot.slane %v14056_v11, 7  ;;  %v5671_v62 = vsel %vm18290_vm9, %v14086_v50, %v5670_v40  ;;  %v14065_v11 = vld [vmem:[%s17924_s6 + $0x1f0] sm:$0x7] }
 0x324   : > { %16221 = vmatmul.mubr.msk.bf16.gmra.mrb[28].mxu1 %vm724_vm6, %v14011_v56  ;;  %v11807_v56 = vrot.slane %v21213_v7, 5  ;;  %v15099_v7 = vld [vmem:[%s17924_s6 + $0x4dc] sm:$0xf]  ;;  %v5694_v50 = vrot.slane %v14065_v11, 7 }
 0x325   : > { %16228 = vmatprep.mubr.msk.bf16.mxu1 %vm724_vm6, %v14098_v33  ;;  %v21232_v33 = vsel %vm17938_vm5, %v15125_v12, %v11793_v17  ;;  %v15092_v17 = vld [vmem:[%s17924_s6 + $0x4a0] sm:$0xe]  ;;  %v11828_v55 = vrot.slane %v15099_v7, 5 }
 0x326   : > { %v11809_v29 = vrot.slane %v11807_v56, 4  ;;  %v15145_v30 = vcombine.low %v21232_v33, %v11797_v63  ;;  %v11808_v12 = vsel %vm17938_vm5, %v15127_v61, %v11807_v56  ;;  %v15128_v51 = vrot.slane %v15092_v17, 9  ;;  %v15100_v63 = vld [vmem:[%s17924_s6 + $0x4e0] sm:$0x1] }
 0x327   : > { %16725 = vmatmul.mubr.msk.bf16.gmra.mrb[28].mxu0 %vm724_vm6, %v17830_v1  ;;  %v5636_v1 = vsel %vm18290_vm9, %v14081_v36, %v5635_v46  ;;  %v11810_v46 = vrot.slane %v15091_v9, 5  ;;  %v5650_v36 = vsel %vm18290_vm9, %v14083_v47, %v5649_v39  ;;  %v15098_v39 = vld [vmem:[%s17924_s6 + $0x4d8] sm:$0xe]  ;;  %v11830_v22 = vrot.slane %v11828_v55, 4 }
 0x328   : > { %16732 = vmatprep.mubr.msk.bf16.mxu0 %vm724_vm6, %v15142_v32  ;;  %v5646_v32 = vsel %vm18290_vm9, %v5644_v37, %v5645_v45  ;;  %v14101_v31 = vcombine.low %v5636_v1, %v5639_v15  ;;  %v5660_v37 = vsel %vm18290_vm9, %v5658_v57, %v5659_v8  ;;  %v11815_v1 = vsel %vm17938_vm5, %v15128_v51, %v11814_v13  ;;  %v15102_v47 = vld [vmem:[%s17924_s6 + $0x4f8] sm:$0xf]  ;;  %v15105_v57 = vld [vmem:[%s17924_s6 + $0x514] sm:$0xf] }
 0x329   : > { %v14102_v58 = vcombine.low %v5643_v27, %v5646_v32  ;;  %v11811_v5 = vsel %vm17938_vm5, %v11809_v29, %v11810_v46  ;;  %v14104_v56 = vcombine.low %v5657_v0, %v5660_v37  ;;  %v11818_v15 = vsel %vm17938_vm5, %v11816_v43, %v11817_v19  ;;  %v14058_v32 = vld [vmem:[%s17924_s6 + $0x1b4] sm:$0xf]  ;;  %v14059_v29 = vld [vmem:[%s17924_s6 + $0x1b8] sm:$0x7]  ;;  %v15104_v37 = vld [vmem:[%s17924_s6 + $0x510] sm:$0xe] }
 0x32a   : > { %v11831_v61 = vrot.slane %v15100_v63, 5  ;;  %v5677_v46 = vrot.slane %v14058_v32, 7  ;;  %v11835_v4 = vrot.slane %v15102_v47, 5  ;;  %v11842_v43 = vrot.slane %v15105_v57, 5  ;;  %v14070_v57 = vld [vmem:[%s17924_s6 + $0x224] sm:$0xf] }
 0x32c   : > { %16229 = vmatmul.mubr.msk.bf16.vlgmr.msra.gmra.mrb[0].mxu1 %vm724_vm6, %v14099_v21  ;;  %v14051_v21 = vld [vmem:[%s17924_s6 + $0x178] sm:$0x8]  ;;  %v5679_v51 = vrot.slane %v5677_v46, 4  ;;  %v11837_v26 = vrot.slane %v11835_v4, 4 }
 0x32d   : > { %16261 = vmatpush3.bf16.msra.mxu1 %v21020_v25  ;;  %16232 = vmatprep.mubr.msk.bf16.mxu1 %vm724_vm6, %v14100_v2  ;;  %v11804_v25 = vsel %vm17938_vm5, %v11802_v53, %v11803_v23  ;;  %v14085_v60 = vrot.slane %v14051_v21, 11  ;;  %v15095_v53 = vld [vmem:[%s17924_s6 + $0x4bc] sm:$0xe]  ;;  %v15097_v23 = vld [vmem:[%s17924_s6 + $0x4c4] sm:$0x1]  ;;  %v5674_v21 = vsel %vm18290_vm9, %v5672_v3, %v5673_v59 }
 0x32e   : > { %16262 = vmatprep.subr.bf16.mxu1 %v17833_v41  ;;  %v15146_v2 = vcombine.low %v11801_v24, %v11804_v25  ;;  %v15129_v33 = vrot.slane %v15095_v53, 9  ;;  %v11824_v27 = vrot.slane %v15097_v23, 5  ;;  %v15130_v24 = vrot.slane %v15098_v39, 9  ;;  %v14067_v39 = vld [vmem:[%s17924_s6 + $0x208] sm:$0xf] }
 0x32f   : > { %16733 = vmatmul.mubr.msk.bf16.vlgmr.msra.gmra.mrb[0].mxu0 %vm724_vm6, %v15143_v14  ;;  %v11821_v14 = vrot.slane %v15096_v49, 5  ;;  %v15148_v25 = vcombine.low %v11815_v1, %v11818_v15  ;;  %v11832_v49 = vsel %vm17938_vm5, %v11830_v22, %v11831_v61  ;;  %v14106_v19 = vcombine.low %v5671_v62, %v5674_v21  ;;  %v15109_v3 = vld [vmem:[%s17924_s6 + $0x534] sm:$0x1]  ;;  %v14068_v22 = vld [vmem:[%s17924_s6 + $0x20c] sm:$0x7] }
 0x330   : > { %16765 = vmatpush3.bf16.msra.mxu0 %v21029_v48  ;;  %16736 = vmatprep.mubr.msk.bf16.mxu0 %vm724_vm6, %v15144_v18  ;;  %v5663_v48 = vrot.slane %v14052_v38, 7  ;;  %v15147_v18 = vcombine.low %v11808_v12, %v11811_v5  ;;  %v14057_v38 = vld [vmem:[%s17924_s6 + $0x1b0] sm:$0x8]  ;;  %v11829_v20 = vsel %vm17938_vm5, %v15130_v24, %v11828_v55  ;;  %v14064_v5 = vld [vmem:[%s17924_s6 + $0x1ec] sm:$0xf]  ;;  %v11844_v1 = vrot.slane %v11842_v43, 4 }
 0x331   : > { %16766 = vmatprep.subr.bf16.mxu0 %v17834_v54  ;;  %16263 = vmatpush3.bf16.msra.mxu1 %v17833_v41  ;;  %v14103_v41 = vcombine.low %v5650_v36, %v5653_v44  ;;  %v11822_v17 = vsel %vm17938_vm5, %v15129_v33, %v11821_v14  ;;  %v5684_v36 = vrot.slane %v14061_v35, 7  ;;  %v5680_v44 = vrot.slane %v14059_v29, 7  ;;  %v15111_v33 = vld [vmem:[%s17924_s6 + $0x54c] sm:$0xf]  ;;  %v15114_v62 = vld [vmem:[%s17924_s6 + $0x568] sm:$0xf] }
 0x332   : > { %16800 = vmatprep.subr.bf16.mxu1 %v17861_v10  ;;  %v5665_v45 = vrot.slane %v5663_v48, 4  ;;  %v5664_v9 = vsel %vm18290_vm9, %v14085_v60, %v5663_v48  ;;  %v14087_v48 = vrot.slane %v14057_v38, 11  ;;  %v5691_v23 = vrot.slane %v14064_v5, 7  ;;  %v14069_v5 = vld [vmem:[%s17924_s6 + $0x220] sm:$0x8] }
 0x333   : > { %v5686_v53 = vrot.slane %v5684_v36, 4  ;;  %v15150_v40 = vcombine.low %v11829_v20, %v11832_v49  ;;  %v5681_v55 = vsel %vm18290_vm9, %v5679_v51, %v5680_v44  ;;  %v5698_v59 = vrot.slane %v14067_v39, 7  ;;  %v14071_v51 = vld [vmem:[%s17924_s6 + $0x228] sm:$0x7] }
 0x334   : > { %16767 = vmatpush3.bf16.msra.mxu0 %v17834_v54  ;;  %16233 = vmatmul.mubr.msk.bf16.gmra.mrb[4].mxu1 %vm724_vm6, %v14101_v31  ;;  %v5667_v42 = vsel %vm18290_vm9, %v5665_v45, %v5666_v28  ;;  %v11823_v54 = vrot.slane %v11821_v14, 4  ;;  %v15101_v31 = vld [vmem:[%s17924_s6 + $0x4f4] sm:$0xe]  ;;  %v15106_v45 = vld [vmem:[%s17924_s6 + $0x518] sm:$0x1]  ;;  %v5693_v47 = vrot.slane %v5691_v23, 4 }
 0x335   : > { %16236 = vmatprep.mubr.msk.bf16.mxu1 %vm724_vm6, %v14102_v58  ;;  %v14105_v8 = vcombine.low %v5664_v9, %v5667_v42  ;;  %v15103_v58 = vld [vmem:[%s17924_s6 + $0x4fc] sm:$0x1]  ;;  %v15131_v12 = vrot.slane %v15101_v31, 9  ;;  %v14063_v14 = vld [vmem:[%s17924_s6 + $0x1e8] sm:$0x8]  ;;  %v11845_v15 = vrot.slane %v15106_v45, 5 }
 0x336   : > { %v11825_v13 = vsel %vm17938_vm5, %v11823_v54, %v11824_v27  ;;  %v11838_v0 = vrot.slane %v15103_v58, 5  ;;  %v14089_v42 = vrot.slane %v14063_v14, 11  ;;  %v15107_v54 = vld [vmem:[%s17924_s6 + $0x52c] sm:$0xe]  ;;  %v11849_v27 = vrot.slane %v15108_v34, 5 }
 0x337   : > { %16737 = vmatmul.mubr.msk.bf16.gmra.mrb[4].mxu0 %vm724_vm6, %v15145_v30  ;;  %v14060_v30 = vld [vmem:[%s17924_s6 + $0x1cc] sm:$0x8]  ;;  %v15149_v28 = vcombine.low %v11822_v17, %v11825_v13  ;;  %v11856_v61 = vrot.slane %v15111_v33, 5  ;;  %v11846_v29 = vsel %vm17938_vm5, %v11844_v1, %v11845_v15  ;;  %v15110_v31 = vld [vmem:[%s17924_s6 + $0x548] sm:$0xe]  ;;  %v11852_v58 = vrot.slane %v15109_v3, 5 }
 0x338   : > { %16740 = vmatprep.mubr.msk.bf16.mxu0 %vm724_vm6, %v15146_v2  ;;  %v14062_v2 = vld [vmem:[%s17924_s6 + $0x1d4] sm:$0x7]  ;;  %v14088_v60 = vrot.slane %v14060_v30, 11  ;;  %v11839_v63 = vsel %vm17938_vm5, %v11837_v26, %v11838_v0  ;;  %v5692_v17 = vsel %vm18290_vm9, %v14089_v42, %v5691_v23  ;;  %v11851_v13 = vrot.slane %v11849_v27, 4  ;;  %v15113_v0 = vld [vmem:[%s17924_s6 + $0x564] sm:$0xe] }
 0x339   : > { %v5687_v7 = vrot.slane %v14062_v2, 7  ;;  %v5695_v21 = vsel %vm18290_vm9, %v5693_v47, %v5694_v50  ;;  %v5700_v30 = vrot.slane %v5698_v59, 4  ;;  %v5701_v2 = vrot.slane %v14068_v22, 7  ;;  %v15117_v45 = vld [vmem:[%s17924_s6 + $0x584] sm:$0xf] }
 0x33a   : > { %v5685_v9 = vsel %vm18290_vm9, %v14088_v60, %v5684_v36  ;;  %v14073_v36 = vld [vmem:[%s17924_s6 + $0x240] sm:$0xf]  ;;  %v15134_v49 = vrot.slane %v15110_v31, 9  ;;  %v11858_v44 = vrot.slane %v11856_v61, 4  ;;  %v5705_v26 = vrot.slane %v14070_v57, 7 }
 0x33b   : > { %v5688_v32 = vsel %vm18290_vm9, %v5686_v53, %v5687_v7  ;;  %v15115_v7 = vld [vmem:[%s17924_s6 + $0x56c] sm:$0x1]  ;;  %v5702_v14 = vsel %vm18290_vm9, %v5700_v30, %v5701_v2  ;;  %v14091_v23 = vrot.slane %v14069_v5, 11  ;;  %v14072_v34 = vld [vmem:[%s17924_s6 + $0x23c] sm:$0x8]  ;;  %v5708_v11 = vrot.slane %v14071_v51, 7 }
 0x33c   : > { %16237 = vmatmul.mubr.msk.bf16.gmra.mrb[8].mxu1 %vm724_vm6, %v14103_v41  ;;  %v5678_v41 = vsel %vm18290_vm9, %v14087_v48, %v5677_v46  ;;  %v15133_v46 = vrot.slane %v15107_v54, 9  ;;  %v15135_v39 = vrot.slane %v15113_v0, 9  ;;  %v11866_v1 = vrot.slane %v15115_v7, 5  ;;  %v15116_v15 = vld [vmem:[%s17924_s6 + $0x580] sm:$0xe] }
 0x33d   : > { %16240 = vmatprep.mubr.msk.bf16.mxu1 %vm724_vm6, %v14104_v56  ;;  %v15132_v56 = vrot.slane %v15104_v37, 9  ;;  %v14107_v24 = vcombine.low %v5678_v41, %v5681_v55  ;;  %v5712_v37 = vrot.slane %v14073_v36, 7  ;;  %v11857_v41 = vsel %vm17938_vm5, %v15134_v49, %v11856_v61  ;;  %v14076_v47 = vld [vmem:[%s17924_s6 + $0x25c] sm:$0xf]  ;;  %v15120_v22 = vld [vmem:[%s17924_s6 + $0x5a0] sm:$0xf] }
 0x33e   : > { %v11850_v60 = vsel %vm17938_vm5, %v15133_v46, %v11849_v27  ;;  %v5707_v55 = vrot.slane %v5705_v26, 4  ;;  %v11870_v33 = vrot.slane %v15117_v45, 5  ;;  %v15118_v27 = vld [vmem:[%s17924_s6 + $0x588] sm:$0x1]  ;;  %v14133_v50 = vld [vmem:[%s17924_s6 + $0x1fc] sm:$0xf] }
 0x33f   : > { %16741 = vmatmul.mubr.msk.bf16.gmra.mrb[8].mxu0 %vm724_vm6, %v15147_v18  ;;  %v11836_v18 = vsel %vm17938_vm5, %v15131_v12, %v11835_v4  ;;  %v11843_v35 = vsel %vm17938_vm5, %v15132_v56, %v11842_v43  ;;  %v15112_v4 = vld [vmem:[%s17924_s6 + $0x550] sm:$0x1]  ;;  %v11863_v43 = vrot.slane %v15114_v62, 5  ;;  %v5714_v42 = vrot.slane %v5712_v37, 4  ;;  %v14075_v46 = vld [vmem:[%s17924_s6 + $0x258] sm:$0x8] }
 0x340   : > { %16744 = vmatprep.mubr.msk.bf16.mxu0 %vm724_vm6, %v15148_v25  ;;  %v14066_v25 = vld [vmem:[%s17924_s6 + $0x204] sm:$0x8]  ;;  %v15151_v38 = vcombine.low %v11836_v18, %v11839_v63  ;;  %v15152_v20 = vcombine.low %v11843_v35, %v11846_v29  ;;  %v11859_v12 = vrot.slane %v15112_v4, 5  ;;  %v5709_v61 = vsel %vm18290_vm9, %v5707_v55, %v5708_v11  ;;  %v15176_v49 = vld [vmem:[%s17924_s6 + $0x400] sm:$0xc] }
 0x341   : > { %v14090_v48 = vrot.slane %v14066_v25, 11  ;;  %v11865_v56 = vrot.slane %v11863_v43, 4  ;;  %v15136_v25 = vrot.slane %v15116_v15, 9  ;;  %v11872_v35 = vrot.slane %v11870_v33, 4  ;;  %v15177_v31 = vld [vmem:[%s17924_s6 + $0x404] sm:$0xf] }
 0x342   : > { %v11860_v18 = vsel %vm17938_vm5, %v11858_v44, %v11859_v12  ;;  %v11873_v29 = vrot.slane %v15118_v27, 5  ;;  %v6128_v57 = vrot.slane %v14133_v50, 7  ;;  %v11877_v62 = vrot.slane %v15120_v22, 5  ;;  %v15178_v0 = vld [vmem:[%s17924_s6 + $0x408] sm:$0x3] }
 0x343   : > { %v5699_v53 = vsel %vm18290_vm9, %v14090_v48, %v5698_v59  ;;  %v15154_v3 = vcombine.low %v11857_v41, %v11860_v18  ;;  %v5706_v59 = vsel %vm18290_vm9, %v14091_v23, %v5705_v26  ;;  %v14134_v48 = vld [vmem:[%s17924_s6 + $0x200] sm:$0x7]  ;;  %v14093_v36 = vrot.slane %v14075_v46, 11  ;;  %v14139_v23 = vld [vmem:[%s17924_s6 + $0x234] sm:$0xf] }
 0x344   : > { %16241 = vmatmul.mubr.msk.bf16.gmra.mrb[12].mxu1 %vm724_vm6, %v14105_v8  ;;  %v14108_v8 = vcombine.low %v5685_v9, %v5688_v32  ;;  %v14110_v63 = vcombine.low %v5699_v53, %v5702_v14  ;;  %v14092_v9 = vrot.slane %v14072_v34, 11  ;;  %v14111_v30 = vcombine.low %v5706_v59, %v5709_v61  ;;  %v15180_v11 = vld [vmem:[%s17924_s6 + $0x420] sm:$0xf]  ;;  %v14135_v55 = vld [vmem:[%s17924_s6 + $0x214] sm:$0x8] }
 0x345   : > { %16244 = vmatprep.mubr.msk.bf16.mxu1 %vm724_vm6, %v14106_v19  ;;  %v14109_v19 = vcombine.low %v5692_v17, %v5695_v21  ;;  %v14077_v17 = vld [vmem:[%s17924_s6 + $0x260] sm:$0x7]  ;;  %v14132_v21 = vld [vmem:[%s17924_s6 + $0x1f8] sm:$0x8]  ;;  %v12286_v44 = vrot.slane %v15177_v31, 6  ;;  %v11871_v5 = vsel %vm17938_vm5, %v15136_v25, %v11870_v33  ;;  %v11874_v51 = vsel %vm17938_vm5, %v11872_v35, %v11873_v29 }
 0x346   : > { %v5713_v4 = vsel %vm18290_vm9, %v14092_v9, %v5712_v37  ;;  %v5722_v26 = vrot.slane %v14077_v17, 7  ;;  %v6130_v7 = vrot.slane %v6128_v57, 4  ;;  %v6131_v37 = vrot.slane %v14134_v48, 7  ;;  %v14138_v50 = vld [vmem:[%s17924_s6 + $0x230] sm:$0x8] }
 0x347   : > { %16745 = vmatmul.mubr.msk.bf16.gmra.mrb[12].mxu0 %vm724_vm6, %v15149_v28  ;;  %v11853_v28 = vsel %vm17938_vm5, %v11851_v13, %v11852_v58  ;;  %v5719_v13 = vrot.slane %v14076_v47, 7  ;;  %v15119_v58 = vld [vmem:[%s17924_s6 + $0x59c] sm:$0xe]  ;;  %v15224_v14 = vrot.slane %v15176_v49, 10  ;;  %v15156_v34 = vcombine.low %v11871_v5, %v11874_v51  ;;  %v15181_v61 = vld [vmem:[%s17924_s6 + $0x424] sm:$0x3] }
 0x348   : > { %16748 = vmatprep.mubr.msk.bf16.mxu0 %vm724_vm6, %v15150_v40  ;;  %v14074_v40 = vld [vmem:[%s17924_s6 + $0x244] sm:$0x7]  ;;  %v15153_v32 = vcombine.low %v11850_v60, %v11853_v28  ;;  %v14180_v60 = vrot.slane %v14132_v21, 11  ;;  %v15137_v45 = vrot.slane %v15119_v58, 9  ;;  %v11879_v28 = vrot.slane %v11877_v62, 4 }
 0x349   : > { %v5715_v54 = vrot.slane %v14074_v40, 7  ;;  %v12288_v40 = vrot.slane %v12286_v44, 4  ;;  %v12289_v41 = vrot.slane %v15178_v0, 6  ;;  %v6132_v33 = vsel %vm18290_vm9, %v6130_v7, %v6131_v37  ;;  %v15182_v35 = vld [vmem:[%s17924_s6 + $0x438] sm:$0xc] }
 0x34a   : > { %v6129_v15 = vsel %vm18290_vm9, %v14180_v60, %v6128_v57  ;;  %v6142_v9 = vrot.slane %v14139_v23, 7  ;;  %v12293_v47 = vrot.slane %v15180_v11, 6  ;;  %v15184_v29 = vld [vmem:[%s17924_s6 + $0x440] sm:$0x3]  ;;  %v12296_v21 = vrot.slane %v15181_v61, 6 }
 0x34b   : > { %v12290_v59 = vsel %vm17927_vm2, %v12288_v40, %v12289_v41  ;;  %v15186_v48 = vld [vmem:[%s17924_s6 + $0x458] sm:$0xf]  ;;  %v12303_v49 = vrot.slane %v15184_v29, 6  ;;  %v14143_v51 = vld [vmem:[%s17924_s6 + $0x254] sm:$0x7] }
 0x34c   : > { %16245 = vmatmul.mubr.msk.bf16.gmra.mrb[16].mxu1 %vm724_vm6, %v14107_v24  ;;  %v11864_v24 = vsel %vm17938_vm5, %v15135_v39, %v11863_v43  ;;  %v14136_v43 = vld [vmem:[%s17924_s6 + $0x218] sm:$0xf]  ;;  %v5720_v39 = vsel %vm18290_vm9, %v14093_v36, %v5719_v13  ;;  %v15185_v0 = vld [vmem:[%s17924_s6 + $0x454] sm:$0xc]  ;;  %v15187_v60 = vld [vmem:[%s17924_s6 + $0x45c] sm:$0x3] }
 0x34d   : > { %16248 = vmatprep.mubr.msk.bf16.mxu1 %vm724_vm6, %v14108_v8  ;;  %v5716_v8 = vsel %vm18290_vm9, %v5714_v42, %v5715_v54  ;;  %v6135_v18 = vrot.slane %v14136_v43, 7  ;;  %v15183_v42 = vld [vmem:[%s17924_s6 + $0x43c] sm:$0xf]  ;;  %v11878_v54 = vsel %vm17938_vm5, %v15137_v45, %v11877_v62  ;;  %v12295_v62 = vrot.slane %v12293_v47, 4  ;;  %v14146_v23 = vld [vmem:[%s17924_s6 + $0x270] sm:$0x7] }
 0x34e   : > { %v14112_v12 = vcombine.low %v5713_v4, %v5716_v8  ;;  %v12300_v46 = vrot.slane %v15183_v42, 6  ;;  %v14182_v4 = vrot.slane %v14138_v50, 11  ;;  %v6144_v8 = vrot.slane %v6142_v9, 4 }
 0x34f   : > { %16749 = vmatmul.mubr.msk.bf16.gmra.mrb[16].mxu0 %vm724_vm6, %v15151_v38  ;;  %v11867_v38 = vsel %vm17938_vm5, %v11865_v56, %v11866_v1  ;;  %v14137_v56 = vld [vmem:[%s17924_s6 + $0x21c] sm:$0x7]  ;;  %v6137_v25 = vrot.slane %v6135_v18, 4  ;;  %v12307_v7 = vrot.slane %v15186_v48, 6  ;;  %v12297_v40 = vsel %vm17927_vm2, %v12295_v62, %v12296_v21  ;;  %v15191_v48 = vld [vmem:[%s17924_s6 + $0x48c] sm:$0xc] }
 0x350   : > { %16752 = vmatprep.mubr.msk.bf16.mxu0 %vm724_vm6, %v15152_v20  ;;  %v15155_v2 = vcombine.low %v11864_v24, %v11867_v38  ;;  %v15121_v20 = vld [vmem:[%s17924_s6 + $0x5a4] sm:$0x1]  ;;  %v14181_v24 = vrot.slane %v14135_v55, 11  ;;  %v6138_v22 = vrot.slane %v14137_v56, 7  ;;  %v14200_v38 = vcombine.low %v6129_v15, %v6132_v33  ;;  %v15190_v55 = vld [vmem:[%s17924_s6 + $0x478] sm:$0x3] }
 0x351   : > { %v11880_v53 = vrot.slane %v15121_v20, 5  ;;  %v15226_v20 = vrot.slane %v15182_v35, 10  ;;  %v12302_v5 = vrot.slane %v12300_v46, 4  ;;  %v6143_v43 = vsel %vm18290_vm9, %v14182_v4, %v6142_v9  ;;  %v17835_v9 = vld [vmem:[%s21840_s2] sm:$0xff]  }
 0x352   : > { %v6139_v36 = vsel %vm18290_vm9, %v6137_v25, %v6138_v22  ;;  %v15227_v11 = vrot.slane %v15185_v0, 10  ;;  %v12310_v33 = vrot.slane %v15187_v60, 6  ;;  %v12309_v42 = vrot.slane %v12307_v7, 4  ;;  %v14149_v22 = vld [vmem:[%s17924_s6 + $0x28c] sm:$0x7] }
 0x353   : > { %v11881_v27 = vsel %vm17938_vm5, %v11879_v28, %v11880_v53  ;;  %v12301_v41 = vsel %vm17927_vm2, %v15226_v20, %v12300_v46  ;;  %v15192_v46 = vld [vmem:[%s17924_s6 + $0x490] sm:$0xf]  ;;  %v6166_v21 = vrot.slane %v14149_v22, 7  ;;  %v14158_v22 = vld [vmem:[%s17924_s6 + $0x2e0] sm:$0x7] }
 0x354   : > { %16249 = vmatmul.mubr.msk.bf16.gmra.mrb[20].mxu1 %vm724_vm6, %v14109_v19  ;;  %v5721_v19 = vrot.slane %v5719_v13, 4  ;;  %v14142_v13 = vld [vmem:[%s17924_s6 + $0x250] sm:$0xf]  ;;  %v15157_v58 = vcombine.low %v11878_v54, %v11881_v27  ;;  %v12308_v29 = vsel %vm17927_vm2, %v15227_v11, %v12307_v7  ;;  %v12321_v20 = vrot.slane %v15192_v46, 6  ;;  %v14154_v7 = vld [vmem:[%s17924_s6 + $0x2c0] sm:$0xf] }
 0x355   : > { %16252 = vmatprep.mubr.msk.bf16.mxu1 %vm724_vm6, %v14110_v63  ;;  %v15179_v63 = vld [vmem:[%s17924_s6 + $0x41c] sm:$0xc]  ;;  %v15196_v60 = vld [vmem:[%s17924_s6 + $0x4b0] sm:$0x3] }
 0x356   : > { %v5723_v1 = vsel %vm18290_vm9, %v5721_v19, %v5722_v26  ;;  %v15225_v31 = vrot.slane %v15179_v63, 10  ;;  %v6149_v26 = vrot.slane %v14142_v13, 7  ;;  %v14148_v63 = vld [vmem:[%s17924_s6 + $0x288] sm:$0xf]  ;;  %v15195_v13 = vld [vmem:[%s17924_s6 + $0x4ac] sm:$0xf] }
 0x357   : > { %16753 = vmatmul.mubr.msk.bf16.gmra.mrb[20].mxu0 %vm724_vm6, %v15153_v32  ;;  %v12287_v32 = vsel %vm17927_vm2, %v15224_v14, %v12286_v44  ;;  %v14113_v16 = vcombine.low %v5720_v39, %v5723_v1  ;;  %v14141_v44 = vld [vmem:[%s17924_s6 + $0x24c] sm:$0x8]  ;;  %v14144_v14 = vld [vmem:[%s17924_s6 + $0x268] sm:$0x8]  ;;  %v15188_v39 = vld [vmem:[%s17924_s6 + $0x470] sm:$0xc]  ;;  %v12304_v1 = vsel %vm17927_vm2, %v12302_v5, %v12303_v49 }
 0x358   : > { %16756 = vmatprep.mubr.msk.bf16.mxu0 %vm724_vm6, %v15154_v3  ;;  %v14140_v3 = vld [vmem:[%s17924_s6 + $0x238] sm:$0x7]  ;;  %v15244_v57 = vcombine.low %v12287_v32, %v12290_v59  ;;  %v12294_v28 = vsel %vm17927_vm2, %v15225_v31, %v12293_v47  ;;  %v14183_v53 = vrot.slane %v14141_v44, 11  ;;  %v6151_v15 = vrot.slane %v6149_v26, 4  ;;  %v14150_v49 = vld [vmem:[%s17924_s6 + $0x2a0] sm:$0x8] }
 0x359   : > { %v6145_v17 = vrot.slane %v14140_v3, 7  ;;  %v14184_v54 = vrot.slane %v14144_v14, 11  ;;  %v6159_v32 = vrot.slane %v14146_v23, 7  ;;  %v15245_v47 = vcombine.low %v12294_v28, %v12297_v40  ;;  %v14152_v44 = vld [vmem:[%s17924_s6 + $0x2a8] sm:$0x7] }
 0x35a   : > { %v15228_v50 = vrot.slane %v15188_v39, 10  ;;  %v12317_v59 = vrot.slane %v15190_v55, 6  ;;  %v15246_v25 = vcombine.low %v12301_v41, %v12304_v1  ;;  %v6163_v61 = vrot.slane %v14148_v63, 7  ;;  %v15194_v5 = vld [vmem:[%s17924_s6 + $0x4a8] sm:$0xc] }
 0x35b   : > { %v6146_v19 = vsel %vm18290_vm9, %v6144_v8, %v6145_v17  ;;  %v12311_v31 = vsel %vm17927_vm2, %v12309_v42, %v12310_v33  ;;  %v15198_v14 = vld [vmem:[%s17924_s6 + $0x4c8] sm:$0xf]  ;;  %v12323_v40 = vrot.slane %v12321_v20, 4  ;;  %v15230_v41 = vrot.slane %v15194_v5, 10  ;;  %v14157_v11 = vld [vmem:[%s17924_s6 + $0x2dc] sm:$0xf] }
 0x35c   : > { %16253 = vmatmul.mubr.msk.bf16.gmra.mrb[24].mxu1 %vm724_vm6, %v14111_v30  ;;  %v14145_v30 = vld [vmem:[%s17924_s6 + $0x26c] sm:$0xf]  ;;  %v14202_v56 = vcombine.low %v6143_v43, %v6146_v19  ;;  %v15229_v19 = vrot.slane %v15191_v48, 10  ;;  %v12331_v55 = vrot.slane %v15196_v60, 6  ;;  %v6177_v1 = vrot.slane %v14154_v7, 7 }
 0x35d   : > { %16256 = vmatprep.mubr.msk.bf16.mxu1 %vm724_vm6, %v14112_v12  ;;  %v15189_v12 = vld [vmem:[%s17924_s6 + $0x474] sm:$0xf]  ;;  %v6156_v37 = vrot.slane %v14145_v30, 7  ;;  %v15197_v33 = vld [vmem:[%s17924_s6 + $0x4c4] sm:$0xc]  ;;  %v12335_v63 = vrot.slane %v15198_v14, 6 }
 0x35e   : > { %v15193_v30 = vld [vmem:[%s17924_s6 + $0x494] sm:$0x3]  ;;  %v15203_v7 = vld [vmem:[%s17924_s6 + $0x4fc] sm:$0xc] }
 0x35f   : > { %16757 = vmatmul.mubr.msk.bf16.gmra.mrb[24].mxu0 %vm724_vm6, %v15155_v2  ;;  %v6136_v2 = vsel %vm18290_vm9, %v14181_v24, %v6135_v18  ;;  %v6152_v18 = vrot.slane %v14143_v51, 7  ;;  %v6158_v27 = vrot.slane %v6156_v37, 4  ;;  %v14147_v24 = vld [vmem:[%s17924_s6 + $0x284] sm:$0x8]  ;;  %v6157_v4 = vsel %vm18290_vm9, %v14184_v54, %v6156_v37 }
 0x360   : > { %16760 = vmatprep.mubr.msk.bf16.mxu0 %vm724_vm6, %v15156_v34  ;;  %v14201_v45 = vcombine.low %v6136_v2, %v6139_v36  ;;  %v12314_v34 = vrot.slane %v15189_v12, 6  ;;  %v14185_v17 = vrot.slane %v14147_v24, 11  ;;  %v6165_v36 = vrot.slane %v6163_v61, 4 }
 0x361   : > { %v6153_v35 = vsel %vm18290_vm9, %v6151_v15, %v6152_v18  ;;  %v6160_v8 = vsel %vm18290_vm9, %v6158_v27, %v6159_v32  ;;  %v12328_v51 = vrot.slane %v15195_v13, 6  ;;  %v12324_v37 = vrot.slane %v15193_v30, 6  ;;  %v14153_v18 = vld [vmem:[%s17924_s6 + $0x2bc] sm:$0x8]  ;;  %v15199_v32 = vld [vmem:[%s17924_s6 + $0x4cc] sm:$0x3] }
 0x362   : > { %v12316_v3 = vrot.slane %v12314_v34, 4  ;;  %v14204_v0 = vcombine.low %v6157_v4, %v6160_v8  ;;  %v6164_v23 = vsel %vm18290_vm9, %v14185_v17, %v6163_v61  ;;  %v12322_v15 = vsel %vm17927_vm2, %v15229_v19, %v12321_v20  ;;  %v15202_v8 = vld [vmem:[%s17924_s6 + $0x4e8] sm:$0x3]  ;;  %v14160_v17 = vld [vmem:[%s17924_s6 + $0x2f8] sm:$0xf] }
 0x363   : > { %v12330_v39 = vrot.slane %v12328_v51, 4  ;;  %v12338_v4 = vrot.slane %v15199_v32, 6  ;;  %v6191_v5 = vrot.slane %v14160_v17, 7  ;;  %v15209_v17 = vld [vmem:[%s17924_s6 + $0x534] sm:$0xc] }
 0x364   : > { %16257 = vmatmul.mubr.msk.bf16.gmra.mrb[28].mxu1 %vm724_vm6, %v14113_v16  ;;  %v14151_v16 = vld [vmem:[%s17924_s6 + $0x2a4] sm:$0xf]  ;;  %v12318_v62 = vsel %vm17927_vm2, %v12316_v3, %v12317_v59  ;;  %v12329_v3 = vsel %vm17927_vm2, %v15230_v41, %v12328_v51  ;;  %v14187_v59 = vrot.slane %v14153_v18, 11 }
 0x365   : > { %16264 = vmatprep.mubr.msk.bf16.mxu1 %vm724_vm6, %v14200_v38  ;;  %v6150_v38 = vsel %vm18290_vm9, %v14183_v53, %v6149_v26  ;;  %v6170_v2 = vrot.slane %v14151_v16, 7  ;;  %v15247_v26 = vcombine.low %v12308_v29, %v12311_v31  ;;  %v6173_v53 = vrot.slane %v14152_v44, 7 }
 0x366   : > { %v14203_v12 = vcombine.low %v6150_v38, %v6153_v35  ;;  %v12332_v61 = vsel %vm17927_vm2, %v12330_v39, %v12331_v55  ;;  %v6179_v16 = vrot.slane %v6177_v1, 4  ;;  %v15231_v38 = vrot.slane %v15197_v33, 10  ;;  %v15200_v35 = vld [vmem:[%s17924_s6 + $0x4e0] sm:$0xc]  ;;  %v15206_v39 = vld [vmem:[%s17924_s6 + $0x518] sm:$0xc] }
 0x367   : > { %16761 = vmatmul.mubr.msk.bf16.gmra.mrb[28].mxu0 %vm724_vm6, %v15157_v58  ;;  %v17836_v58 = vld [vmem:[%s21840_s2 + $0x8] sm:$0xff]   ;;  %v6172_v28 = vrot.slane %v6170_v2, 4  ;;  %v12337_v31 = vrot.slane %v12335_v63, 4  ;;  %v6178_v48 = vsel %vm18290_vm9, %v14187_v59, %v6177_v1  ;;  %v15232_v30 = vrot.slane %v15200_v35, 10 }
 0x368   : > { %16768 = vmatprep.mubr.msk.bf16.mxu0 %vm724_vm6, %v15244_v57  ;;  %v12315_v57 = vsel %vm17927_vm2, %v15228_v50, %v12314_v34  ;;  %v6167_v34 = vsel %vm18290_vm9, %v6165_v36, %v6166_v21  ;;  %v12325_v50 = vsel %vm17927_vm2, %v12323_v40, %v12324_v37  ;;  %v15250_v21 = vcombine.low %v12329_v3, %v12332_v61  ;;  %v14163_v36 = vld [vmem:[%s17924_s6 + $0x314] sm:$0xf]  ;;  %v15205_v37 = vld [vmem:[%s17924_s6 + $0x504] sm:$0x3]  ;;  %v14164_v40 = vld [vmem:[%s17924_s6 + $0x318] sm:$0x7] }
 0x369   : > { %v15248_v43 = vcombine.low %v12315_v57, %v12318_v62  ;;  %v14205_v42 = vcombine.low %v6164_v23, %v6167_v34  ;;  %v6174_v27 = vsel %vm18290_vm9, %v6172_v28, %v6173_v53  ;;  %v15249_v13 = vcombine.low %v12322_v15, %v12325_v50  ;;  %v14162_v34 = vld [vmem:[%s17924_s6 + $0x310] sm:$0x8]  ;;  %v14165_v59 = vld [vmem:[%s17924_s6 + $0x32c] sm:$0x8] }
 0x36a   : > { %v6187_v62 = vrot.slane %v14158_v22, 7  ;;  %v12345_v44 = vrot.slane %v15202_v8, 6  ;;  %v12336_v51 = vsel %vm17927_vm2, %v15231_v38, %v12335_v63  ;;  %v6198_v28 = vrot.slane %v14163_v36, 7  ;;  %v15208_v63 = vld [vmem:[%s17924_s6 + $0x520] sm:$0x3] }
 0x36b   : > { %v6193_v18 = vrot.slane %v6191_v5, 4  ;;  %v15233_v15 = vrot.slane %v15203_v7, 10  ;;  %v12352_v33 = vrot.slane %v15205_v37, 6  ;;  %v6201_v32 = vrot.slane %v14164_v40, 7  ;;  %v15210_v38 = vld [vmem:[%s17924_s6 + $0x538] sm:$0xf] }
 0x36c   : > { %16265 = vmatmul.mubr.msk.bf16.vlgmr.msra.gmra.mrb[0].mxu1 %vm724_vm6, %v14201_v45  ;;  %v14186_v45 = vrot.slane %v14150_v49, 11  ;;  %v15234_v3 = vrot.slane %v15206_v39, 10  ;;  %v12359_v61 = vrot.slane %v15208_v63, 6  ;;  %v15216_v39 = vld [vmem:[%s17924_s6 + $0x570] sm:$0xf] }
 0x36d   : > { %16801 = vmatpush3.bf16.msra.mxu1 %v17835_v9  ;;  %16268 = vmatprep.mubr.msk.bf16.mxu1 %vm724_vm6, %v14202_v56  ;;  %v14155_v56 = vld [vmem:[%s17924_s6 + $0x2c4] sm:$0x7] }
 0x36e   : > { %16802 = vmatprep.subr.bf16.mxu1 %v17861_v10  ;;  %v15201_v9 = vld [vmem:[%s17924_s6 + $0x4e4] sm:$0xf]  ;;  %v6171_v54 = vsel %vm18290_vm9, %v14186_v45, %v6170_v2  ;;  %v6180_v24 = vrot.slane %v14155_v56, 7  ;;  %v15204_v2 = vld [vmem:[%s17924_s6 + $0x500] sm:$0xf] }
 0x36f   : > { %16769 = vmatmul.mubr.msk.bf16.vlgmr.msra.gmra.mrb[0].mxu0 %vm724_vm6, %v15245_v47  ;;  %v6184_v47 = vrot.slane %v14157_v11, 7  ;;  %v12342_v29 = vrot.slane %v15201_v9, 6  ;;  %v14206_v46 = vcombine.low %v6171_v54, %v6174_v27  ;;  %v12349_v45 = vrot.slane %v15204_v2, 6  ;;  %v14166_v9 = vld [vmem:[%s17924_s6 + $0x330] sm:$0xf] }
 0x370   : > { %16772 = vmatprep.mubr.msk.bf16.mxu0 %vm724_vm6, %v15246_v25  ;;  %v14156_v25 = vld [vmem:[%s17924_s6 + $0x2d8] sm:$0x8]  ;;  %v6181_v20 = vsel %vm18290_vm9, %v6179_v16, %v6180_v24  ;;  %v14190_v54 = vrot.slane %v14162_v34, 11  ;;  %v6200_v27 = vrot.slane %v6198_v28, 4  ;;  %v14169_v24 = vld [vmem:[%s17924_s6 + $0x34c] sm:$0xf] }
 0x371   : > { %16803 = vmatpush3.bf16.msra.mxu1 %v17836_v58  ;;  %v14188_v58 = vrot.slane %v14156_v25, 11  ;;  %v6186_v57 = vrot.slane %v6184_v47, 4  ;;  %v12344_v49 = vrot.slane %v12342_v29, 4  ;;  %v14207_v53 = vcombine.low %v6178_v48, %v6181_v20  ;;  %v14168_v48 = vld [vmem:[%s17924_s6 + $0x348] sm:$0x8] }
 0x372   : > { %v12343_v14 = vsel %vm17927_vm2, %v15232_v30, %v12342_v29  ;;  %v6205_v16 = vrot.slane %v14166_v9, 7  ;;  %v12350_v35 = vsel %vm17927_vm2, %v15233_v15, %v12349_v45  ;;  %v14167_v29 = vld [vmem:[%s17924_s6 + $0x334] sm:$0x7]  ;;  %v6202_v8 = vsel %vm18290_vm9, %v6200_v27, %v6201_v32  ;;  %v14170_v30 = vld [vmem:[%s17924_s6 + $0x350] sm:$0x7] }
 0x373   : > { %v6185_v19 = vsel %vm18290_vm9, %v14188_v58, %v6184_v47  ;;  %v6188_v60 = vsel %vm18290_vm9, %v6186_v57, %v6187_v62  ;;  %v12346_v41 = vsel %vm17927_vm2, %v12344_v49, %v12345_v44  ;;  %v14191_v62 = vrot.slane %v14165_v59, 11  ;;  %v15211_v49 = vld [vmem:[%s17924_s6 + $0x53c] sm:$0x3]  ;;  %v14175_v34 = vld [vmem:[%s17924_s6 + $0x384] sm:$0xf] }
 0x374   : > { %16269 = vmatmul.mubr.msk.bf16.gmra.mrb[4].mxu1 %vm724_vm6, %v14203_v12  ;;  %v14159_v12 = vld [vmem:[%s17924_s6 + $0x2f4] sm:$0x8]  ;;  %v14208_v1 = vcombine.low %v6185_v19, %v6188_v60  ;;  %v15252_v47 = vcombine.low %v12343_v14, %v12346_v41  ;;  %v6207_v36 = vrot.slane %v6205_v16, 4  ;;  %v6208_v20 = vrot.slane %v14167_v29, 7  ;;  %v14173_v9 = vld [vmem:[%s17924_s6 + $0x36c] sm:$0x7] }
 0x375   : > { %16272 = vmatprep.mubr.msk.bf16.mxu1 %vm724_vm6, %v14204_v0  ;;  %v14161_v0 = vld [vmem:[%s17924_s6 + $0x2fc] sm:$0x7]  ;;  %v14189_v23 = vrot.slane %v14159_v12, 11  ;;  %v21993_v12 = vld [vmem:[#allocation18_spill] sm:$0xff]  ;;  %v15235_v19 = vrot.slane %v15209_v17, 10  ;;  %v14192_v60 = vrot.slane %v14168_v48, 11 }
 0x376   : > { %v6194_v11 = vrot.slane %v14161_v0, 7  ;;  %v15212_v0 = vld [vmem:[%s17924_s6 + $0x550] sm:$0xc]  ;;  %v6215_v37 = vrot.slane %v14170_v30, 7  ;;  %v6209_v40 = vsel %vm18290_vm9, %v6207_v36, %v6208_v20  ;;  %v6222_v29 = vrot.slane %v14173_v9, 7 }
 0x377   : > { %16773 = vmatmul.mubr.msk.bf16.gmra.mrb[4].mxu0 %vm724_vm6, %v15247_v26  ;;  %v12339_v26 = vsel %vm17927_vm2, %v12337_v31, %v12338_v4  ;;  %v6192_v50 = vsel %vm18290_vm9, %v14189_v23, %v6191_v5  ;;  %v6199_v4 = vsel %vm18290_vm9, %v14190_v54, %v6198_v28  ;;  %v12797_v5 = vrot.slane %v21993_v12, 4 }
 0x378   : > { %16776 = vmatprep.mubr.msk.bf16.mxu0 %vm724_vm6, %v15248_v43  ;;  %v15207_v43 = vld [vmem:[%s17924_s6 + $0x51c] sm:$0xf]  ;;  %v15251_v56 = vcombine.low %v12336_v51, %v12339_v26  ;;  %v6195_v25 = vsel %vm18290_vm9, %v6193_v18, %v6194_v11  ;;  %v14210_v26 = vcombine.low %v6199_v4, %v6202_v8  ;;  %v12366_v23 = vrot.slane %v15211_v49, 6  ;;  %v15222_v49 = vld [vmem:[%s17924_s6 + $0x5a8] sm:$0xf] }
 0x379   : > { %v12356_v55 = vrot.slane %v15207_v43, 6  ;;  %v14209_v58 = vcombine.low %v6192_v50, %v6195_v25  ;;  %v15214_v43 = vld [vmem:[%s17924_s6 + $0x558] sm:$0x3]  ;;  %v15236_v41 = vrot.slane %v15212_v0, 10  ;;  %v12798_v15 = vadd.f32 %v12797_v5, %v21993_v12  ;;  %v14174_v50 = vld [vmem:[%s17924_s6 + $0x380] sm:$0x8] }
 0x37a   : > { %v12373_v11 = vrot.slane %v15214_v43, 6  ;;  %v14194_v8 = vrot.slane %v14174_v50, 11  ;;  %v14177_v0 = vld [vmem:[%s17924_s6 + $0x39c] sm:$0x8]  ;;  %v14179_v43 = vld [vmem:[%s17924_s6 + $0x3a4] sm:$0x7] }
 0x37b   : > { %v12358_v22 = vrot.slane %v12356_v55, 4  ;;  %v12357_v57 = vsel %vm17927_vm2, %v15234_v3, %v12356_v55  ;;  %v14171_v55 = vld [vmem:[%s17924_s6 + $0x364] sm:$0x8]  ;;  %v14176_v3 = vld [vmem:[%s17924_s6 + $0x388] sm:$0x7]  ;;  %v12799_v30 = vrot.slane %v12798_v15, 2 }
 0x37c   : > { %16273 = vmatmul.mubr.msk.bf16.gmra.mrb[8].mxu1 %vm724_vm6, %v14205_v42  ;;  %v12351_v42 = vrot.slane %v12349_v45, 4  ;;  %v14172_v45 = vld [vmem:[%s17924_s6 + $0x368] sm:$0xf]  ;;  %v14193_v25 = vrot.slane %v14171_v55, 11 }
 0x37d   : > { %16276 = vmatprep.mubr.msk.bf16.mxu1 %vm724_vm6, %v14206_v46  ;;  %v15213_v46 = vld [vmem:[%s17924_s6 + $0x554] sm:$0xf]  ;;  %v12360_v2 = vsel %vm17927_vm2, %v12358_v22, %v12359_v61  ;;  %v15215_v22 = vld [vmem:[%s17924_s6 + $0x56c] sm:$0xc] }
 0x37e   : > { %v12353_v31 = vsel %vm17927_vm2, %v12351_v42, %v12352_v33  ;;  %v12370_v44 = vrot.slane %v15213_v46, 6  ;;  %v15254_v28 = vcombine.low %v12357_v57, %v12360_v2  ;;  %v6226_v42 = vrot.slane %v14175_v34, 7  ;;  %v15217_v61 = vld [vmem:[%s17924_s6 + $0x574] sm:$0x3]  ;;  %v15218_v46 = vld [vmem:[%s17924_s6 + $0x588] sm:$0xc] }
 0x37f   : > { %16777 = vmatmul.mubr.msk.bf16.gmra.mrb[8].mxu0 %vm724_vm6, %v15249_v13  ;;  %v6212_v13 = vrot.slane %v14169_v24, 7  ;;  %v15253_v51 = vcombine.low %v12350_v35, %v12353_v31  ;;  %v15220_v31 = vld [vmem:[%s17924_s6 + $0x590] sm:$0x3]  ;;  %v12380_v48 = vrot.slane %v15217_v61, 6  ;;  %v15238_v2 = vrot.slane %v15218_v46, 10 }
 0x380   : > { %16780 = vmatprep.mubr.msk.bf16.mxu0 %vm724_vm6, %v15250_v21  ;;  %v12363_v21 = vrot.slane %v15210_v38, 6  ;;  %v12372_v18 = vrot.slane %v12370_v44, 4  ;;  %v12371_v59 = vsel %vm17927_vm2, %v15236_v41, %v12370_v44  ;;  %v6228_v17 = vrot.slane %v6226_v42, 4 }
 0x381   : > { %v6214_v7 = vrot.slane %v6212_v13, 4  ;;  %v6213_v33 = vsel %vm18290_vm9, %v14192_v60, %v6212_v13  ;;  %v6229_v13 = vrot.slane %v14176_v3, 7  ;;  %v12387_v20 = vrot.slane %v15220_v31, 6 }
 0x382   : > { %v12365_v14 = vrot.slane %v12363_v21, 4  ;;  %v12364_v27 = vsel %vm17927_vm2, %v15235_v19, %v12363_v21  ;;  %v12374_v24 = vsel %vm17927_vm2, %v12372_v18, %v12373_v11  ;;  %v6236_v18 = vrot.slane %v14179_v43, 7 }
 0x383   : > { %v6216_v63 = vsel %vm18290_vm9, %v6214_v7, %v6215_v37  ;;  %v15256_v57 = vcombine.low %v12371_v59, %v12374_v24  ;;  %v12391_v7 = vrot.slane %v15222_v49, 6  ;;  %v12800_v37 = vadd.f32 %v12799_v30, %v12798_v15 }
 0x384   : > { %16277 = vmatmul.mubr.msk.bf16.gmra.mrb[12].mxu1 %vm724_vm6, %v14207_v53  ;;  %v6206_v53 = vsel %vm18290_vm9, %v14191_v62, %v6205_v16  ;;  %v12367_v32 = vsel %vm17927_vm2, %v12365_v14, %v12366_v23  ;;  %v14212_v38 = vcombine.low %v6213_v33, %v6216_v63  ;;  %v15237_v62 = vrot.slane %v15215_v22, 10  ;;  %v15221_v14 = vld [vmem:[%s17924_s6 + $0x5a4] sm:$0xc]  ;;  %v15223_v23 = vld [vmem:[%s17924_s6 + $0x5ac] sm:$0x3] }
 0x385   : > { %16280 = vmatprep.mubr.msk.bf16.mxu1 %vm724_vm6, %v14208_v1  ;;  %v15219_v1 = vld [vmem:[%s17924_s6 + $0x58c] sm:$0xf]  ;;  %v14211_v54 = vcombine.low %v6206_v53, %v6209_v40  ;;  %v15255_v4 = vcombine.low %v12364_v27, %v12367_v32  ;;  %v14195_v40 = vrot.slane %v14177_v0, 11  ;;  %v15239_v55 = vrot.slane %v15221_v14, 10 }
 0x386   : > { %v12384_v16 = vrot.slane %v15219_v1, 6  ;;  %v12394_v1 = vrot.slane %v15223_v23, 6  ;;  %v12801_v33 = vrot.slane %v12800_v37, 1 }
 0x387   : > { %16781 = vmatmul.mubr.msk.bf16.gmra.mrb[12].mxu0 %vm724_vm6, %v15251_v56  ;;  %v6219_v56 = vrot.slane %v14172_v45, 7  ;;  %v12392_v9 = vsel %vm17927_vm2, %v15239_v55, %v12391_v7 }
 0x388   : > { %16784 = vmatprep.mubr.msk.bf16.mxu0 %vm724_vm6, %v15252_v47  ;;  %v12377_v47 = vrot.slane %v15216_v39, 6  ;;  %v12386_v36 = vrot.slane %v12384_v16, 4  ;;  %v12802_v27 = vadd.f32 %v12801_v33, %v12800_v37 }
 0x389   : > { %v6221_v35 = vrot.slane %v6219_v56, 4  ;;  %v6220_v44 = vsel %vm18290_vm9, %v14193_v25, %v6219_v56  ;;  %v12393_v56 = vrot.slane %v12391_v7, 4 }
 0x38a   : > { %v12379_v21 = vrot.slane %v12377_v47, 4  ;;  %v12378_v19 = vsel %vm17927_vm2, %v15237_v62, %v12377_v47  ;;  %v12388_v53 = vsel %vm17927_vm2, %v12386_v36, %v12387_v20  ;;  %v12803_v47 = vmul.f32 0.00390625, %v12802_v27 }
 0x38b   : > { %v6223_v12 = vsel %vm18290_vm9, %v6221_v35, %v6222_v29 }
 0x38c   : > { %16281 = vmatmul.mubr.msk.bf16.gmra.mrb[16].mxu1 %vm724_vm6, %v14209_v58  ;;  %v14178_v58 = vld [vmem:[%s17924_s6 + $0x3a0] sm:$0xf]  ;;  %v12381_v60 = vsel %vm17927_vm2, %v12379_v21, %v12380_v48  ;;  %v14213_v45 = vcombine.low %v6220_v44, %v6223_v12  ;;  %v12804_v52 = vpack.c.bf16 %v12803_v47, %v12803_v47  ;;  %s15284_s6 = sshll.u32 %s21995_s16, 8 }
 0x38d   : > { %16284 = vmatprep.mubr.msk.bf16.mxu1 %vm724_vm6, %v14210_v26  ;;  %v6233_v5 = vrot.slane %v14178_v58, 7  ;;  %v6230_v26 = vsel %vm18290_vm9, %v6228_v17, %v6229_v13  ;;  %v15257_v11 = vcombine.low %v12378_v19, %v12381_v60  ;;  %s21769_s24 = scalar_lea.vmem %s21842_s4, %s15284_s6 }
 0x38f   : > { %16785 = vmatmul.mubr.msk.bf16.gmra.mrb[16].mxu0 %vm724_vm6, %v15253_v51  ;;  %v6227_v51 = vsel %vm18290_vm9, %v14194_v8, %v6226_v42  ;;  %v6235_v41 = vrot.slane %v6233_v5, 4  ;;  %v6234_v15 = vsel %vm18290_vm9, %v14195_v40, %v6233_v5  ;;  %v12395_v42 = vsel %vm17927_vm2, %v12393_v56, %v12394_v1 }
 0x390   : > { %16788 = vmatprep.mubr.msk.bf16.mxu0 %vm724_vm6, %v15254_v28  ;;  %v12385_v28 = vsel %vm17927_vm2, %v15238_v2, %v12384_v16  ;;  %v14214_v34 = vcombine.low %v6227_v51, %v6230_v26  ;;  %v15259_v32 = vcombine.low %v12392_v9, %v12395_v42 }
 0x391   : > { %v15258_v39 = vcombine.low %v12385_v28, %v12388_v53  ;;  %v6237_v63 = vsel %vm18290_vm9, %v6235_v41, %v6236_v18 }
 0x394   : > { %16285 = vmatmul.mubr.msk.bf16.gmra.mrb[20].mxu1 %vm724_vm6, %v14211_v54  ;;  %v14215_v54 = vcombine.low %v6234_v15, %v6237_v63 }
 0x395   : > { %16288 = vmatprep.mubr.msk.bf16.mxu1 %vm724_vm6, %v14212_v38 }
 0x397   : > { %16789 = vmatmul.mubr.msk.bf16.gmra.mrb[20].mxu0 %vm724_vm6, %v15255_v4 }
 0x398   : > { %16792 = vmatprep.mubr.msk.bf16.mxu0 %vm724_vm6, %v15256_v57 }
 0x39c   : > { %16289 = vmatmul.mubr.msk.bf16.gmra.mrb[24].mxu1 %vm724_vm6, %v14213_v45 }
 0x39d   : > { %16292 = vmatprep.mubr.msk.bf16.mxu1 %vm724_vm6, %v14214_v34 }
 0x39f   : > { %16793 = vmatmul.mubr.msk.bf16.gmra.mrb[24].mxu0 %vm724_vm6, %v15257_v11 }
 0x3a0   : > { %16796 = vmatprep.mubr.msk.bf16.mxu0 %vm724_vm6, %v15258_v39 }
 0x3a4   : > { %16293 = vmatmul.mubr.msk.bf16.gmra.mrb[28].mxu1 %vm724_vm6, %v14215_v54 }
 0x3a5   : > { %16804 = vmatprep.mubr.msk.bf16.mxu1 %vm17862_vm10, %v17861_v10 }
 0x3a7   : > { %16797 = vmatmul.mubr.msk.bf16.gmra.mrb[28].mxu0 %vm724_vm6, %v15259_v32 }
 0x3ac   : > { %16805 = vmatmul.mubr.msk.bf16.vlgmr.msra.gmra.mrb[32].mxu1 %vm724_vm6, %v12804_v52 }
 0x43f   : > { %v16266_v50 = vpop.f32.mrb[0].mxu1 }
 0x440   : > { %v6385_v3 = vpop.f32.mrb[1].mxu1 }
 0x441   : > { %v16267_v24 = vpop.f32.mrb[2].mxu1 }
 0x442   : > { %v16770_v59 = vpop.f32.mrb[0].mxu0  ;;  %v6388_v22 = vpop.f32.mrb[3].mxu1 }
 0x443   : > { %v21699_v6 = vadd.f32 %v16770_v59, %v16266_v50  ;;  %v12543_v25 = vpop.f32.mrb[1].mxu0 }
 0x444   : > { %v21701_v61 = vadd.f32 %v12543_v25, %v6385_v3  ;;  %v16771_v16 = vpop.f32.mrb[2].mxu0 }
 0x445   : > { %v21703_v38 = vadd.f32 %v16771_v16, %v16267_v24  ;;  %v12546_v35 = vpop.f32.mrb[3].mxu0 }
 0x446   : > { %v21705_v10 = vadd.f32 %v12546_v35, %v6388_v22 }
 0x447   : > { %v16270_v29 = vpop.f32.mrb[4].mxu1 }
 0x448   : > { %v6401_v46 = vpop.f32.mrb[5].mxu1 }
 0x449   : > { %v16271_v4 = vpop.f32.mrb[6].mxu1 }
 0x44a   : > { %v16774_v31 = vpop.f32.mrb[4].mxu0  ;;  %v6404_v13 = vpop.f32.mrb[7].mxu1 }
 0x44b   : > { %v21707_v8 = vadd.f32 %v16774_v31, %v16270_v29  ;;  %v12559_v17 = vpop.f32.mrb[5].mxu0 }
 0x44c   : > { %v21709_v58 = vadd.f32 %v12559_v17, %v6401_v46  ;;  %v16775_v57 = vpop.f32.mrb[6].mxu0 }
 0x44d   : > { %v21711_v62 = vadd.f32 %v16775_v57, %v16271_v4  ;;  %v12562_v21 = vpop.f32.mrb[7].mxu0 }
 0x44e   : > { %v21713_v48 = vadd.f32 %v12562_v21, %v6404_v13 }
 0x44f   : > { %v16274_v30 = vpop.f32.mrb[8].mxu1 }
 0x450   : > { %v6417_v2 = vpop.f32.mrb[9].mxu1 }
 0x451   : > { %v16275_v20 = vpop.f32.mrb[10].mxu1 }
 0x452   : > { %v16778_v36 = vpop.f32.mrb[8].mxu0  ;;  %v6420_v12 = vpop.f32.mrb[11].mxu1 }
 0x453   : > { %v21715_v49 = vadd.f32 %v16778_v36, %v16274_v30  ;;  %v12575_v44 = vpop.f32.mrb[9].mxu0 }
 0x454   : > { %v21717_v5 = vadd.f32 %v12575_v44, %v6417_v2  ;;  %v16779_v51 = vpop.f32.mrb[10].mxu0 }
 0x455   : > { %v21719_v26 = vadd.f32 %v16779_v51, %v16275_v20  ;;  %v12578_v0 = vpop.f32.mrb[11].mxu0  ;;  %v12864_v20 = vlaneseq }
 0x456   : > { %v21721_v43 = vadd.f32 %v12578_v0, %v6420_v12 }
 0x457   : > { %v16278_v19 = vpop.f32.mrb[12].mxu1  ;;  %v12865_v0 = vshrl.u32 %v12864_v20, 7 }
 0x458   : > { %v6433_v60 = vpop.f32.mrb[13].mxu1 }
 0x459   : > { %v16279_v37 = vpop.f32.mrb[14].mxu1 }
 0x45a   : > { %v16782_v7 = vpop.f32.mrb[12].mxu0  ;;  %v6436_v53 = vpop.f32.mrb[15].mxu1 }
 0x45b   : > { %v21723_v45 = vadd.f32 %v16782_v7, %v16278_v19  ;;  %v12591_v28 = vpop.f32.mrb[13].mxu0 }
 0x45c   : > { %v21725_v14 = vadd.f32 %v12591_v28, %v6433_v60  ;;  %v16783_v23 = vpop.f32.mrb[14].mxu0 }
 0x45d   : > { %v21727_v34 = vadd.f32 %v16783_v23, %v16279_v37  ;;  %v12594_v40 = vpop.f32.mrb[15].mxu0 }
 0x45e   : > { %v21729_v41 = vadd.f32 %v12594_v40, %v6436_v53 }
 0x45f   : > { %v16282_v18 = vpop.f32.mrb[16].mxu1 }
 0x460   : > { %v6449_v11 = vpop.f32.mrb[17].mxu1 }
 0x461   : > { %v16283_v55 = vpop.f32.mrb[18].mxu1 }
 0x462   : > { %v16786_v39 = vpop.f32.mrb[16].mxu0  ;;  %v6452_v33 = vpop.f32.mrb[19].mxu1 }
 0x463   : > { %v21731_v56 = vadd.f32 %v16786_v39, %v16282_v18  ;;  %v12607_v1 = vpop.f32.mrb[17].mxu0 }
 0x464   : > { %v21733_v15 = vadd.f32 %v12607_v1, %v6449_v11  ;;  %v16787_v63 = vpop.f32.mrb[18].mxu0  ;;  %v12866_v11 = vsub.s32 0, %v12865_v0 }
 0x465   : > { %v21735_v9 = vadd.f32 %v16787_v63, %v16283_v55  ;;  %v12610_v42 = vpop.f32.mrb[19].mxu0 }
 0x466   : > { %v21737_v54 = vadd.f32 %v12610_v42, %v6452_v33 }
 0x467   : > { %v16286_v27 = vpop.f32.mrb[20].mxu1 }
 0x468   : > { %v6465_v32 = vpop.f32.mrb[21].mxu1 }
 0x469   : > { %v16287_v52 = vpop.f32.mrb[22].mxu1 }
 0x46a   : > { %v16790_v47 = vpop.f32.mrb[20].mxu0  ;;  %v6468_v59 = vpop.f32.mrb[23].mxu1 }
 0x46b   : > { %v21739_v50 = vadd.f32 %v16790_v47, %v16286_v27  ;;  %v12623_v3 = vpop.f32.mrb[21].mxu0 }
 0x46c   : > { %v16829_v24 = vadd.f32 %v12623_v3, %v6465_v32  ;;  %v16791_v25 = vpop.f32.mrb[22].mxu0 }
 0x46d   : > { %v16830_v22 = vadd.f32 %v16791_v25, %v16287_v52  ;;  %v12626_v16 = vpop.f32.mrb[23].mxu0 }
 0x46e   : > { %v16831_v35 = vadd.f32 %v12626_v16, %v6468_v59 }
 0x46f   : > { %v16290_v29 = vpop.f32.mrb[24].mxu1 }
 0x470   : > { %v6481_v46 = vpop.f32.mrb[25].mxu1 }
 0x471   : > { %v16291_v4 = vpop.f32.mrb[26].mxu1 }
 0x472   : > { %v16794_v31 = vpop.f32.mrb[24].mxu0  ;;  %v6484_v57 = vpop.f32.mrb[27].mxu1 }
 0x473   : > { %v16832_v17 = vadd.f32 %v16794_v31, %v16290_v29  ;;  %v12639_v13 = vpop.f32.mrb[25].mxu0 }
 0x474   : > { %v16833_v21 = vadd.f32 %v12639_v13, %v6481_v46  ;;  %v16795_v30 = vpop.f32.mrb[26].mxu0 }
 0x475   : > { %v16834_v2 = vadd.f32 %v16795_v30, %v16291_v4  ;;  %v12642_v36 = vpop.f32.mrb[27].mxu0 }
 0x476   : > { %v16835_v44 = vadd.f32 %v12642_v36, %v6484_v57 }
 0x477   : > { %v16294_v12 = vpop.f32.mrb[28].mxu1 }
 0x478   : > { %v6497_v51 = vpop.f32.mrb[29].mxu1 }
 0x479   : > { %v16295_v60 = vpop.f32.mrb[30].mxu1 }
 0x47a   : > { %v16798_v19 = vpop.f32.mrb[28].mxu0  ;;  %v6500_v28 = vpop.f32.mrb[31].mxu1 }
 0x47b   : > { %v16836_v7 = vadd.f32 %v16798_v19, %v16294_v12  ;;  %v12655_v37 = vpop.f32.mrb[29].mxu0 }
 0x47c   : > { %v16837_v53 = vadd.f32 %v12655_v37, %v6497_v51  ;;  %v16799_v23 = vpop.f32.mrb[30].mxu0 }
 0x47d   : > { %v16838_v40 = vadd.f32 %v16799_v23, %v16295_v60  ;;  %v12658_v18 = vpop.f32.mrb[31].mxu0 }
 0x47e   : > { %v16839_v39 = vadd.f32 %v12658_v18, %v6500_v28 }
 0x47f   : > { %v12858_v55 = vpop.f32.mrb[32].mxu1 }
 0x480   : > { %v12867_v1 = vrot.slane %v12858_v55, %v12866_v11  ;;  %v16806_v33 = vpop.f32.mrb[33].mxu1 }
 0x481   : > { %v12861_v63 = vpop.f32.mrb[34].mxu1 }
 0x482   : > { %v12868_v42 = vadd.f32 %v21701_v61, %v12867_v1  ;;  %v12869_v27 = vadd.f32 %v21705_v10, %v12867_v1  ;;  %v12870_v32 = vadd.f32 %v21699_v6, %v12867_v1  ;;  %v12871_v47 = vadd.f32 %v21703_v38, %v12867_v1  ;;  %v16807_v52 = vpop.f32.mrb[35].mxu1 }
 0x483   : > { %v12872_v3 = vadd.f32 %v21709_v58, %v12867_v1  ;;  %v12873_v59 = vadd.f32 %v21713_v48, %v12867_v1  ;;  %v12874_v25 = vadd.f32 %v21707_v8, %v12867_v1  ;;  %v12875_v16 = vadd.f32 %v21711_v62, %v12867_v1 }
 0x484   : > { %v12876_v29 = vadd.f32 %v21717_v5, %v12867_v1  ;;  %v12877_v61 = vadd.f32 %v21721_v43, %v12867_v1  ;;  %v12878_v10 = vadd.f32 %v21715_v49, %v12867_v1  ;;  %v12879_v46 = vadd.f32 %v21719_v26, %v12867_v1 }
 0x485   : > { %v12880_v6 = vadd.f32 %v21725_v14, %v12867_v1  ;;  %v12881_v38 = vadd.f32 %v21729_v41, %v12867_v1  ;;  %v12882_v58 = vadd.f32 %v21723_v45, %v12867_v1  ;;  %v12883_v48 = vadd.f32 %v21727_v34, %v12867_v1  ;;  %v15281_v45 = vld [vmem:[%s21841_s3] ss:$0 sm:$0xff] }
 0x486   : > { %v12884_v8 = vadd.f32 %v21733_v15, %v12867_v1  ;;  %v12885_v62 = vadd.f32 %v21737_v54, %v12867_v1  ;;  %v12886_v5 = vadd.f32 %v21731_v56, %v12867_v1  ;;  %v12887_v43 = vadd.f32 %v21735_v9, %v12867_v1 }
 0x487   : > { %v12888_v49 = vadd.f32 %v16829_v24, %v12867_v1  ;;  %v12889_v31 = vadd.f32 %v16831_v35, %v12867_v1  ;;  %v12890_v26 = vadd.f32 %v21739_v50, %v12867_v1  ;;  %v12891_v14 = vadd.f32 %v16830_v22, %v12867_v1 }
 0x488   : > { %v12892_v41 = vadd.f32 %v16833_v21, %v12867_v1  ;;  %v12893_v34 = vadd.f32 %v16835_v44, %v12867_v1  ;;  %v12894_v4 = vadd.f32 %v16832_v17, %v12867_v1  ;;  %v12895_v13 = vadd.f32 %v16834_v2, %v12867_v1 }
 0x489   : > { %v12896_v56 = vadd.f32 %v16837_v53, %v12867_v1  ;;  %v12897_v15 = vadd.f32 %v16839_v39, %v12867_v1  ;;  %v12898_v9 = vadd.f32 %v16836_v7, %v12867_v1  ;;  %v12899_v54 = vadd.f32 %v16838_v40, %v12867_v1 }
 0x48a   : > { %v12907_v50 = vadd.f32 %v15281_v45, %v12868_v42  ;;  %v12908_v24 = vadd.f32 %v15281_v45, %v12869_v27  ;;  %v12909_v22 = vadd.f32 %v15281_v45, %v12870_v32  ;;  %v12910_v35 = vadd.f32 %v15281_v45, %v12871_v47 }
 0x48b   : > { %v12911_v57 = vadd.f32 %v15281_v45, %v12872_v3  ;;  %v12912_v17 = vadd.f32 %v15281_v45, %v12873_v59  ;;  %v12913_v21 = vadd.f32 %v15281_v45, %v12874_v25  ;;  %v12914_v30 = vadd.f32 %v15281_v45, %v12875_v16 }
 0x48c   : > { %v12915_v2 = vadd.f32 %v15281_v45, %v12876_v29  ;;  %v12916_v36 = vadd.f32 %v15281_v45, %v12877_v61  ;;  %v12917_v20 = vadd.f32 %v15281_v45, %v12878_v10  ;;  %v12918_v44 = vadd.f32 %v15281_v45, %v12879_v46  ;;  %12939 = vst.msk [vmem:[%s21769_s24] sm:$0xff] %vm724_vm6, %v12907_v50 }
 0x48d   : > { %12940 = vst.msk [vmem:[%s21769_s24 + $0x8] sm:$0xff] %vm724_vm6, %v12908_v24  ;;  %12941 = vst.msk [vmem:[%s21769_s24 + $0x10] sm:$0xff] %vm724_vm6, %v12909_v22  ;;  %v12919_v12 = vadd.f32 %v15281_v45, %v12880_v6  ;;  %v12920_v51 = vadd.f32 %v15281_v45, %v12881_v38  ;;  %v12921_v0 = vadd.f32 %v15281_v45, %v12882_v58 }
 0x48e   : > { %12942 = vst.msk [vmem:[%s21769_s24 + $0x18] sm:$0xff] %vm724_vm6, %v12910_v35  ;;  %v12922_v19 = vadd.f32 %v15281_v45, %v12883_v48  ;;  %12943 = vst.msk [vmem:[%s21769_s24 + $0x20] sm:$0xff] %vm724_vm6, %v12911_v57  ;;  %v12923_v60 = vadd.f32 %v15281_v45, %v12884_v8  ;;  %v12924_v7 = vadd.f32 %v15281_v45, %v12885_v62 }
 0x48f   : > { %12944 = vst.msk [vmem:[%s21769_s24 + $0x28] sm:$0xff] %vm724_vm6, %v12912_v17  ;;  %12945 = vst.msk [vmem:[%s21769_s24 + $0x30] sm:$0xff] %vm724_vm6, %v12913_v21  ;;  %v12925_v37 = vadd.f32 %v15281_v45, %v12886_v5  ;;  %v12926_v28 = vadd.f32 %v15281_v45, %v12887_v43  ;;  %v12927_v53 = vadd.f32 %v15281_v45, %v12888_v49 }
 0x490   : > { %12946 = vst.msk [vmem:[%s21769_s24 + $0x38] sm:$0xff] %vm724_vm6, %v12914_v30  ;;  %12947 = vst.msk [vmem:[%s21769_s24 + $0x40] sm:$0xff] %vm724_vm6, %v12915_v2  ;;  %v12928_v23 = vadd.f32 %v15281_v45, %v12889_v31  ;;  %v12929_v40 = vadd.f32 %v15281_v45, %v12890_v26  ;;  %v12930_v18 = vadd.f32 %v15281_v45, %v12891_v14 }
 0x491   : > { %12948 = vst.msk [vmem:[%s21769_s24 + $0x48] sm:$0xff] %vm724_vm6, %v12916_v36  ;;  %12949 = vst.msk [vmem:[%s21769_s24 + $0x50] sm:$0xff] %vm724_vm6, %v12917_v20  ;;  %v12931_v11 = vadd.f32 %v15281_v45, %v12892_v41  ;;  %v12932_v39 = vadd.f32 %v15281_v45, %v12893_v34  ;;  %v12933_v55 = vadd.f32 %v15281_v45, %v12894_v4 }
 0x492   : > { %12950 = vst.msk [vmem:[%s21769_s24 + $0x58] sm:$0xff] %vm724_vm6, %v12918_v44  ;;  %12951 = vst.msk [vmem:[%s21769_s24 + $0x60] sm:$0xff] %vm724_vm6, %v12919_v12  ;;  %v12934_v1 = vadd.f32 %v15281_v45, %v12895_v13  ;;  %v12935_v33 = vadd.f32 %v15281_v45, %v12896_v56  ;;  %v12936_v63 = vadd.f32 %v15281_v45, %v12897_v15 }
 0x493   : > { %12952 = vst.msk [vmem:[%s21769_s24 + $0x68] sm:$0xff] %vm724_vm6, %v12920_v51  ;;  %12953 = vst.msk [vmem:[%s21769_s24 + $0x70] sm:$0xff] %vm724_vm6, %v12921_v0  ;;  %v12937_v42 = vadd.f32 %v15281_v45, %v12898_v9  ;;  %v12938_v27 = vadd.f32 %v15281_v45, %v12899_v54 }
 0x494   : > { %12954 = vst.msk [vmem:[%s21769_s24 + $0x78] sm:$0xff] %vm724_vm6, %v12922_v19  ;;  %12955 = vst.msk [vmem:[%s21769_s24 + $0x80] sm:$0xff] %vm724_vm6, %v12923_v60 }
 0x495   : > { %12956 = vst.msk [vmem:[%s21769_s24 + $0x88] sm:$0xff] %vm724_vm6, %v12924_v7  ;;  %12957 = vst.msk [vmem:[%s21769_s24 + $0x90] sm:$0xff] %vm724_vm6, %v12925_v37 }
 0x496   : > { %12958 = vst.msk [vmem:[%s21769_s24 + $0x98] sm:$0xff] %vm724_vm6, %v12926_v28  ;;  %12959 = vst.msk [vmem:[%s21769_s24 + $0xa0] sm:$0xff] %vm724_vm6, %v12927_v53 }
 0x497   : > { %12960 = vst.msk [vmem:[%s21769_s24 + $0xa8] sm:$0xff] %vm724_vm6, %v12928_v23  ;;  %12961 = vst.msk [vmem:[%s21769_s24 + $0xb0] sm:$0xff] %vm724_vm6, %v12929_v40 }
 0x498   : > { %12962 = vst.msk [vmem:[%s21769_s24 + $0xb8] sm:$0xff] %vm724_vm6, %v12930_v18  ;;  %12963 = vst.msk [vmem:[%s21769_s24 + $0xc0] sm:$0xff] %vm724_vm6, %v12931_v11 }
 0x499   : > { %12964 = vst.msk [vmem:[%s21769_s24 + $0xc8] sm:$0xff] %vm724_vm6, %v12932_v39  ;;  %12965 = vst.msk [vmem:[%s21769_s24 + $0xd0] sm:$0xff] %vm724_vm6, %v12933_v55 }
 0x49a   : > { %12966 = vst.msk [vmem:[%s21769_s24 + $0xd8] sm:$0xff] %vm724_vm6, %v12934_v1  ;;  %12967 = vst.msk [vmem:[%s21769_s24 + $0xe0] sm:$0xff] %vm724_vm6, %v12935_v33 }
 0x49b   : > { %12968 = vst.msk [vmem:[%s21769_s24 + $0xe8] sm:$0xff] %vm724_vm6, %v12936_v63  ;;  %12969 = vst.msk [vmem:[%s21769_s24 + $0xf0] sm:$0xff] %vm724_vm6, %v12937_v42 }
 0x49c   : > { %12970 = vst.msk [vmem:[%s21769_s24 + $0xf8] sm:$0xff] %vm724_vm6, %v12938_v27 }
 0x49d PF: > { %s14_s15 = sadd.s32 1, %s17859_s15  }
 0x49e   : > { %p11_p4 = scmp.ge.s32.totalorder %s14_s15, 4  }
 0x4a0   :  { %13 = sbr.rel (!%p11_p4) target bundleno = 1 (0x1), region = 99 }

</bundles_post_ra>
